<compile_context>
chip_gen: v6e
topology: v6e:2x2x1
jax: 0.10.0
libtpu: 0.0.40
codegen_flags: <defaults>
</compile_context>

<pallas_src>
import jax
import jax.numpy as jnp
from jax.experimental import pallas as pl
from jax.experimental.pallas import tpu as pltpu

_BN_EPS = 1e-5


def _ds(start, size, stride):
    """Static slice helper; only emit a strided slice when it matters."""
    if stride == 1 or size == 1:
        return pl.ds(start, size)
    return pl.ds(start, size, stride=stride)


def _conv_out(x, k, s, p):
    return (x + 2 * p - k) // s + 1


def _vmem_spec():
    return pl.BlockSpec(memory_space=pltpu.MemorySpace.VMEM)


# ----------------------------------------------------------------------------
# Static network description (mirrors PlainCNN.__init__)
# ----------------------------------------------------------------------------
def _block_defs(config):
    return [
        dict(in_ch=3, out_ch=64, k=7, n=config[0], stride=2, pad=3),
        dict(in_ch=64, out_ch=64, k=3, n=config[1], stride=1, pad=1),
        dict(in_ch=64, out_ch=128, k=3, n=config[2], stride=2, pad=1),
        dict(in_ch=128, out_ch=256, k=3, n=config[3], stride=2, pad=1),
        dict(in_ch=256, out_ch=512, k=3, n=config[4], stride=2, pad=1),
    ]


def build_layer_metas(config, h, w):
    """Per-conv-layer static metadata, tracking spatial sizes through the net."""
    assert all(n >= 1 for n in config), "each PlainBlock needs >= 1 layer"
    metas, pool_src = [], None
    for bi, bd in enumerate(_block_defs(config)):
        for li in range(bd["n"]):
            cin = bd["in_ch"] if li == 0 else bd["out_ch"]
            stride = bd["stride"] if li == 0 else 1
            ho = _conv_out(h, bd["k"], stride, bd["pad"])
            wo = _conv_out(w, bd["k"], stride, bd["pad"])
            metas.append(dict(cin=cin, cout=bd["out_ch"], k=bd["k"], stride=stride,
                              pad=bd["pad"], hin=h, win=w, ho=ho, wo=wo,
                              pool_before=False))
            h, w = ho, wo
        if bi == 0:                      # nn.MaxPool2d(2, 2) right after block1
            pool_src = (h, w, bd["out_ch"])
            h, w = h // 2, w // 2
    metas[config[0]]["pool_before"] = True
    return metas, pool_src


# ----------------------------------------------------------------------------
# Parameters (random init mirroring PlainBlock / PlainCNN structure)
# ----------------------------------------------------------------------------
def make_plain_cnn_params(key, metas, n_classes):
    layers = []
    for m in metas:
        key, kw_, kg_, kb_ = jax.random.split(key, 4)
        layers.append(dict(
            w=0.05 * jax.random.normal(
                kw_, (m["k"], m["k"], m["cin"], m["cout"]), jnp.float32),
            gamma=1.0 + 0.1 * jax.random.normal(kg_, (1, m["cout"]), jnp.float32),
            beta=0.1 * jax.random.normal(kb_, (1, m["cout"]), jnp.float32),
        ))
    key, kfw, kfb = jax.random.split(key, 3)
    return dict(
        layers=layers,
        fc_w=0.05 * jax.random.normal(kfw, (metas[-1]["cout"], n_classes), jnp.float32),
        fc_b=0.05 * jax.random.normal(kfb, (1, n_classes), jnp.float32),
    )


# ----------------------------------------------------------------------------
# The single fused forward kernel
# ----------------------------------------------------------------------------
def _make_fused_kernel(metas, n_batch):
    n_layers = len(metas)

    def bn_relu(acc, g_ref, b_ref):
        # BatchNorm2d training-mode forward (batch mean, biased variance) + ReLU,
        # applied as one per-channel FMA over the (M, C) activation.
        mean = jnp.mean(acc, axis=0, keepdims=True)
        var = jnp.mean(jnp.square(acc - mean), axis=0, keepdims=True)
        scale = g_ref[...] * jax.lax.rsqrt(var + _BN_EPS)
        bias = b_ref[...] - mean * scale
        return jnp.maximum(acc * scale + bias, 0.0)

    def kernel(*refs):
        patches_ref = refs[0]
        wgb = [(refs[1 + 3 * l], refs[2 + 3 * l], refs[3 + 3 * l])
               for l in range(n_layers)]
        fc_w_ref = refs[3 * n_layers + 1]
        fc_b_ref = refs[3 * n_layers + 2]
        out_ref = refs[3 * n_layers + 3]
        pool_ref = refs[3 * n_layers + 4]
        pad_refs = refs[3 * n_layers + 5:]

        # -- layer 0: one deep im2col matmul on the MXU (K padded to 128-multiple) --
        m0 = metas[0]
        w0_ref, g0_ref, b0_ref = wgb[0]
        acc = jnp.dot(patches_ref[...], w0_ref[...],
                      preferred_element_type=jnp.float32)      # (M0, Cout0)
        cur = bn_relu(acc, g0_ref, b0_ref)                     # rows ordered (h, w, n)
        cur_hw, cur_c = (m0["ho"], m0["wo"]), m0["cout"]

        for l in range(1, n_layers):
            m = metas[l]

            if m["pool_before"]:
                # Fused MaxPool2d(2, 2): stage block-1 output in VMEM scratch and take
                # strided reads along the untiled H/W axes (3 VPU max ops, no HBM).
                h, w = cur_hw
                pool_ref[...] = cur.reshape(h, w, n_batch, cur_c)
                hp, wp = h // 2, w // 2
                v00 = pool_ref[_ds(0, hp, 2), _ds(0, wp, 2), :, :]
                v01 = pool_ref[_ds(0, hp, 2), _ds(1, wp, 2), :, :]
                v10 = pool_ref[_ds(1, hp, 2), _ds(0, wp, 2), :, :]
                v11 = pool_ref[_ds(1, hp, 2), _ds(1, wp, 2), :, :]
                cur = jnp.maximum(jnp.maximum(v00, v01),
                                  jnp.maximum(v10, v11)).reshape(hp * wp * n_batch, cur_c)
                cur_hw = (hp, wp)

            h, w = cur_hw
            assert (h, w) == (m["hin"], m["win"]) and cur_c == m["cin"]
            w_ref, g_ref, b_ref = wgb[l]
            pad_ref = pad_refs[l - 1]
            p, k, s = m["pad"], m["k"], m["stride"]
            ho, wo, cout = m["ho"], m["wo"], m["cout"]

            # Zero-pad in VMEM scratch; halo offsets land on untiled (major) dims, the
            # (N, C) minor tile is always stored full-width (lane-dense stores).
            pad_ref[...] = jnp.zeros(pad_ref.shape, jnp.float32)
            pad_ref[p:p + h, p:p + w, :, :] = cur.reshape(h, w, n_batch, cur_c)

            # Conv as per-tap MXU matmuls accumulated in f32.
            mm = ho * wo * n_batch
            acc = jnp.zeros((mm, cout), jnp.float32)
            for i in range(k):
                for j in range(k):
                    xs = pad_ref[_ds(i, ho, s), _ds(j, wo, s), :, :]
                    acc = acc + jnp.dot(xs.reshape(mm, cur_c), w_ref[i, j],
                                        preferred_element_type=jnp.float32)
            cur = bn_relu(acc, g_ref, b_ref)
            cur_hw, cur_c = (ho, wo), cout

        # -- AdaptiveAvgPool2d((1,1)) + flatten + Linear --
        h, w = cur_hw
        if h * w == 1:
            pooled = cur                                        # already (N, C)
        else:
            pooled = jnp.mean(cur.reshape(h * w, n_batch, cur_c), axis=0)
        out_ref[...] = (jnp.dot(pooled, fc_w_ref[...],
                                preferred_element_type=jnp.float32) + fc_b_ref[...])

    return kernel


# ----------------------------------------------------------------------------
# Wrapper: input layout prep + single fused pallas_call
# ----------------------------------------------------------------------------
def make_forward(config, n_batch, height, width, n_classes):
    metas, pool_src = build_layer_metas(config, height, width)
    n_layers = len(metas)
    m0 = metas[0]
    k0_raw = m0["k"] * m0["k"] * m0["cin"]
    k0_pad = ((k0_raw + 127) // 128) * 128
    kernel = _make_fused_kernel(metas, n_batch)

    def forward(x_nchw, params):
        # NCHW (PyTorch) -> NHWC so channels ride the 128-wide lane axis.
        x = jnp.transpose(x_nchw, (0, 2, 3, 1)).astype(jnp.float32)

        # Layer-0 im2col built once in XLA on the tiny network input (input layout prep,
        # like the NCHW->NHWC transpose); gives the kernel a lane-dense (M0, 128-multiple)
        # patch matrix so the first conv is one deep MXU matmul instead of 49 K=3 matmuls.
        p0, k0, s0 = m0["pad"], m0["k"], m0["stride"]
        ho0, wo0, cin0 = m0["ho"], m0["wo"], m0["cin"]
        xp = jnp.pad(x, ((0, 0), (p0, p0), (p0, p0), (0, 0)))
        xp = jnp.transpose(xp, (1, 2, 0, 3))                  # (Hp, Wp, N, Cin)
        taps = []
        for i in range(k0):
            for j in range(k0):
                taps.append(jax.lax.slice(
                    xp, (i, j, 0, 0),
                    (i + s0 * (ho0 - 1) + 1, j + s0 * (wo0 - 1) + 1, n_batch, cin0),
                    (s0, s0, 1, 1)))
        patches = jnp.concatenate(taps, axis=-1)               # (Ho, Wo, N, k*k*Cin)
        patches = patches.reshape(ho0 * wo0 * n_batch, k0_raw)
        patches = jnp.pad(patches, ((0, 0), (0, k0_pad - k0_raw)))
        w0 = params["layers"][0]["w"].reshape(k0_raw, m0["cout"])
        w0 = jnp.pad(w0, ((0, k0_pad - k0_raw), (0, 0)))

        inputs = [patches, w0,
                  params["layers"][0]["gamma"], params["layers"][0]["beta"]]
        for l in range(1, n_layers):
            lay = params["layers"][l]
            inputs += [lay["w"], lay["gamma"], lay["beta"]]
        inputs += [params["fc_w"], params["fc_b"]]

        ph, pw, pc = pool_src
        scratch = [pltpu.VMEM((ph, pw, n_batch, pc), jnp.float32)]
        for l in range(1, n_layers):
            m = metas[l]
            scratch.append(pltpu.VMEM(
                (m["hin"] + 2 * m["pad"], m["win"] + 2 * m["pad"], n_batch, m["cin"]),
                jnp.float32))

        return pl.pallas_call(
            kernel,
            out_shape=jax.ShapeDtypeStruct((n_batch, n_classes), jnp.float32),
            in_specs=[_vmem_spec()] * len(inputs),
            out_specs=_vmem_spec(),
            scratch_shapes=scratch,
            compiler_params=pltpu.CompilerParams(vmem_limit_bytes=48 * 1024 * 1024),
        )(*inputs)

    return forward


if __name__ == "__main__":
    config = (1, 2, 1, 1, 1)       # conv layers per PlainBlock
    n_classes = 10
    n_batch, height, width = 2, 16, 16

    key = jax.random.PRNGKey(0)
    key, kx, kp = jax.random.split(key, 3)
    x = jax.random.normal(kx, (n_batch, 3, height, width), jnp.float32)  # NCHW input

    metas, _ = build_layer_metas(config, height, width)
    params = make_plain_cnn_params(kp, metas, n_classes)

    forward = jax.jit(make_forward(config, n_batch, height, width, n_classes))
    out = jax.block_until_ready(forward(x, params))

    assert out.shape == (n_batch, n_classes), out.shape
    assert bool(jnp.all(jnp.isfinite(out))), "non-finite output"
    print("KERNEL_OK")
</pallas_src>

<mosaic_0001>
module attributes {stable_mosaic.version = 11 : i64} {
  func.func @kernel(%arg0: memref<128x256xf32, #tpu.memory_space<vmem>>, %arg1: memref<256x64xf32, #tpu.memory_space<vmem>>, %arg2: memref<1x64xf32, #tpu.memory_space<vmem>>, %arg3: memref<1x64xf32, #tpu.memory_space<vmem>>, %arg4: memref<3x3x64x64xf32, #tpu.memory_space<vmem>>, %arg5: memref<1x64xf32, #tpu.memory_space<vmem>>, %arg6: memref<1x64xf32, #tpu.memory_space<vmem>>, %arg7: memref<3x3x64x64xf32, #tpu.memory_space<vmem>>, %arg8: memref<1x64xf32, #tpu.memory_space<vmem>>, %arg9: memref<1x64xf32, #tpu.memory_space<vmem>>, %arg10: memref<3x3x64x128xf32, #tpu.memory_space<vmem>>, %arg11: memref<1x128xf32, #tpu.memory_space<vmem>>, %arg12: memref<1x128xf32, #tpu.memory_space<vmem>>, %arg13: memref<3x3x128x256xf32, #tpu.memory_space<vmem>>, %arg14: memref<1x256xf32, #tpu.memory_space<vmem>>, %arg15: memref<1x256xf32, #tpu.memory_space<vmem>>, %arg16: memref<3x3x256x512xf32, #tpu.memory_space<vmem>>, %arg17: memref<1x512xf32, #tpu.memory_space<vmem>>, %arg18: memref<1x512xf32, #tpu.memory_space<vmem>>, %arg19: memref<512x10xf32, #tpu.memory_space<vmem>>, %arg20: memref<1x10xf32, #tpu.memory_space<vmem>>, %arg21: memref<2x10xf32, #tpu.memory_space<vmem>>, %arg22: memref<8x8x2x64xf32, #tpu.memory_space<vmem>>, %arg23: memref<6x6x2x64xf32, #tpu.memory_space<vmem>>, %arg24: memref<6x6x2x64xf32, #tpu.memory_space<vmem>>, %arg25: memref<6x6x2x64xf32, #tpu.memory_space<vmem>>, %arg26: memref<4x4x2x128xf32, #tpu.memory_space<vmem>>, %arg27: memref<3x3x2x256xf32, #tpu.memory_space<vmem>>) attributes {dimension_semantics = [], scalar_prefetch = 0 : i64, scratch_operands = 6 : i64, tpu.core_type = #tpu.core_type<tc>} {
    %c0 = arith.constant 0 : index
    %c0_0 = arith.constant 0 : index
    %0 = vector.load %arg0[%c0, %c0_0] : memref<128x256xf32, #tpu.memory_space<vmem>>, vector<128x256xf32>
    %c0_1 = arith.constant 0 : index
    %c0_2 = arith.constant 0 : index
    %1 = vector.load %arg1[%c0_1, %c0_2] : memref<256x64xf32, #tpu.memory_space<vmem>>, vector<256x64xf32>
    %cst = arith.constant dense<0.000000e+00> : vector<128x64xf32>
    %2 = tpu.matmul %0, %1, %cst {dimension_numbers = #tpu.dot_dimension_numbers<[1], [0], [0], [1], [0, 0, 1, 1], [], []>} : vector<128x256xf32>, vector<256x64xf32>, vector<128x64xf32> -> vector<128x64xf32>
    %cst_3 = arith.constant dense<0.000000e+00> : vector<64xf32>
    %3 = vector.multi_reduction <add>, %2, %cst_3 [0] : vector<128x64xf32> to vector<64xf32>
    %4 = vector.shape_cast %3 : vector<64xf32> to vector<1x64xf32>
    %cst_4 = arith.constant 1.280000e+02 : f32
    %5 = vector.broadcast %cst_4 : f32 to vector<1x64xf32>
    %6 = arith.divf %4, %5 : vector<1x64xf32>
    %7 = vector.broadcast %6 : vector<1x64xf32> to vector<128x64xf32>
    %8 = arith.subf %2, %7 : vector<128x64xf32>
    %9 = arith.mulf %8, %8 : vector<128x64xf32>
    %cst_5 = arith.constant dense<0.000000e+00> : vector<64xf32>
    %10 = vector.multi_reduction <add>, %9, %cst_5 [0] : vector<128x64xf32> to vector<64xf32>
    %11 = vector.shape_cast %10 : vector<64xf32> to vector<1x64xf32>
    %cst_6 = arith.constant 1.280000e+02 : f32
    %12 = vector.broadcast %cst_6 : f32 to vector<1x64xf32>
    %13 = arith.divf %11, %12 : vector<1x64xf32>
    %c0_7 = arith.constant 0 : index
    %c0_8 = arith.constant 0 : index
    %14 = vector.load %arg2[%c0_7, %c0_8] : memref<1x64xf32, #tpu.memory_space<vmem>>, vector<1x64xf32>
    %cst_9 = arith.constant 9.99999974E-6 : f32
    %15 = vector.broadcast %cst_9 : f32 to vector<1x64xf32>
    %16 = arith.addf %13, %15 : vector<1x64xf32>
    %17 = math.rsqrt %16 : vector<1x64xf32>
    %18 = arith.mulf %14, %17 : vector<1x64xf32>
    %c0_10 = arith.constant 0 : index
    %c0_11 = arith.constant 0 : index
    %19 = vector.load %arg3[%c0_10, %c0_11] : memref<1x64xf32, #tpu.memory_space<vmem>>, vector<1x64xf32>
    %20 = arith.mulf %6, %18 : vector<1x64xf32>
    %21 = arith.subf %19, %20 : vector<1x64xf32>
    %22 = vector.broadcast %18 : vector<1x64xf32> to vector<128x64xf32>
    %23 = arith.mulf %2, %22 : vector<128x64xf32>
    %24 = vector.broadcast %21 : vector<1x64xf32> to vector<128x64xf32>
    %25 = arith.addf %23, %24 : vector<128x64xf32>
    %cst_12 = arith.constant 0.000000e+00 : f32
    %26 = vector.broadcast %cst_12 : f32 to vector<128x64xf32>
    %27 = arith.maximumf %25, %26 : vector<128x64xf32>
    %28 = vector.shape_cast %27 : vector<128x64xf32> to vector<8x8x2x64xf32>
    %c0_13 = arith.constant 0 : index
    %c0_14 = arith.constant 0 : index
    %c0_15 = arith.constant 0 : index
    %c0_16 = arith.constant 0 : index
    %29 = vector.load %arg22[%c0_13, %c0_14, %c0_15, %c0_16] : memref<8x8x2x64xf32, #tpu.memory_space<vmem>>, vector<8x8x2x64xf32>
    tpu.vector_store %arg22[%c0_13, %c0_14, %c0_15, %c0_16], %28 {strides = array<i32>} : memref<8x8x2x64xf32, #tpu.memory_space<vmem>>, vector<8x8x2x64xf32>,
    %c0_17 = arith.constant 0 : index
    %c0_18 = arith.constant 0 : index
    %c0_19 = arith.constant 0 : index
    %c0_20 = arith.constant 0 : index
    %30 = tpu.strided_load %arg22[%c0_17, %c0_18, %c0_19, %c0_20] {strides = array<i32: 2, 2, 1, 1>} : memref<8x8x2x64xf32, #tpu.memory_space<vmem>>, vector<4x4x2x64xf32>
    %c0_21 = arith.constant 0 : index
    %c1 = arith.constant 1 : index
    %c0_22 = arith.constant 0 : index
    %c0_23 = arith.constant 0 : index
    %31 = tpu.strided_load %arg22[%c0_21, %c1, %c0_22, %c0_23] {strides = array<i32: 2, 2, 1, 1>} : memref<8x8x2x64xf32, #tpu.memory_space<vmem>>, vector<4x4x2x64xf32>
    %c1_24 = arith.constant 1 : index
    %c0_25 = arith.constant 0 : index
    %c0_26 = arith.constant 0 : index
    %c0_27 = arith.constant 0 : index
    %32 = tpu.strided_load %arg22[%c1_24, %c0_25, %c0_26, %c0_27] {strides = array<i32: 2, 2, 1, 1>} : memref<8x8x2x64xf32, #tpu.memory_space<vmem>>, vector<4x4x2x64xf32>
    %c1_28 = arith.constant 1 : index
    %c1_29 = arith.constant 1 : index
    %c0_30 = arith.constant 0 : index
    %c0_31 = arith.constant 0 : index
    %33 = tpu.strided_load %arg22[%c1_28, %c1_29, %c0_30, %c0_31] {strides = array<i32: 2, 2, 1, 1>} : memref<8x8x2x64xf32, #tpu.memory_space<vmem>>, vector<4x4x2x64xf32>
    %34 = arith.maximumf %30, %31 : vector<4x4x2x64xf32>
    %35 = arith.maximumf %32, %33 : vector<4x4x2x64xf32>
    %36 = arith.maximumf %34, %35 : vector<4x4x2x64xf32>
    %37 = vector.shape_cast %36 : vector<4x4x2x64xf32> to vector<32x64xf32>
    %cst_32 = arith.constant 0.000000e+00 : f32
    %38 = vector.broadcast %cst_32 : f32 to vector<6x6x2x64xf32>
    %c0_33 = arith.constant 0 : index
    %c0_34 = arith.constant 0 : index
    %c0_35 = arith.constant 0 : index
    %c0_36 = arith.constant 0 : index
    %39 = vector.load %arg23[%c0_33, %c0_34, %c0_35, %c0_36] : memref<6x6x2x64xf32, #tpu.memory_space<vmem>>, vector<6x6x2x64xf32>
    tpu.vector_store %arg23[%c0_33, %c0_34, %c0_35, %c0_36], %38 {strides = array<i32>} : memref<6x6x2x64xf32, #tpu.memory_space<vmem>>, vector<6x6x2x64xf32>,
    %40 = vector.shape_cast %37 : vector<32x64xf32> to vector<4x4x2x64xf32>
    %c1_37 = arith.constant 1 : index
    %c1_38 = arith.constant 1 : index
    %c0_39 = arith.constant 0 : index
    %c0_40 = arith.constant 0 : index
    %41 = vector.load %arg23[%c1_37, %c1_38, %c0_39, %c0_40] : memref<6x6x2x64xf32, #tpu.memory_space<vmem>>, vector<4x4x2x64xf32>
    tpu.vector_store %arg23[%c1_37, %c1_38, %c0_39, %c0_40], %40 {strides = array<i32>} : memref<6x6x2x64xf32, #tpu.memory_space<vmem>>, vector<4x4x2x64xf32>,
    %cst_41 = arith.constant 0.000000e+00 : f32
    %42 = vector.broadcast %cst_41 : f32 to vector<32x64xf32>
    %c0_42 = arith.constant 0 : index
    %c0_43 = arith.constant 0 : index
    %c0_44 = arith.constant 0 : index
    %c0_45 = arith.constant 0 : index
    %43 = vector.load %arg23[%c0_42, %c0_43, %c0_44, %c0_45] : memref<6x6x2x64xf32, #tpu.memory_space<vmem>>, vector<4x4x2x64xf32>
    %44 = vector.shape_cast %43 : vector<4x4x2x64xf32> to vector<32x64xf32>
    %c0_46 = arith.constant 0 : index
    %c0_47 = arith.constant 0 : index
    %c0_48 = arith.constant 0 : index
    %c0_49 = arith.constant 0 : index
    %45 = vector.load %arg4[%c0_46, %c0_47, %c0_48, %c0_49] : memref<3x3x64x64xf32, #tpu.memory_space<vmem>>, vector<1x1x64x64xf32>
    %46 = vector.shape_cast %45 : vector<1x1x64x64xf32> to vector<64x64xf32>
    %cst_50 = arith.constant dense<0.000000e+00> : vector<32x64xf32>
    %47 = tpu.matmul %44, %46, %cst_50 {dimension_numbers = #tpu.dot_dimension_numbers<[1], [0], [0], [1], [0, 0, 1, 1], [], []>} : vector<32x64xf32>, vector<64x64xf32>, vector<32x64xf32> -> vector<32x64xf32>
    %48 = arith.addf %42, %47 : vector<32x64xf32>
    %c0_51 = arith.constant 0 : index
    %c1_52 = arith.constant 1 : index
    %c0_53 = arith.constant 0 : index
    %c0_54 = arith.constant 0 : index
    %49 = vector.load %arg23[%c0_51, %c1_52, %c0_53, %c0_54] : memref<6x6x2x64xf32, #tpu.memory_space<vmem>>, vector<4x4x2x64xf32>
    %50 = vector.shape_cast %49 : vector<4x4x2x64xf32> to vector<32x64xf32>
    %c0_55 = arith.constant 0 : index
    %c1_56 = arith.constant 1 : index
    %c0_57 = arith.constant 0 : index
    %c0_58 = arith.constant 0 : index
    %51 = vector.load %arg4[%c0_55, %c1_56, %c0_57, %c0_58] : memref<3x3x64x64xf32, #tpu.memory_space<vmem>>, vector<1x1x64x64xf32>
    %52 = vector.shape_cast %51 : vector<1x1x64x64xf32> to vector<64x64xf32>
    %cst_59 = arith.constant dense<0.000000e+00> : vector<32x64xf32>
    %53 = tpu.matmul %50, %52, %cst_59 {dimension_numbers = #tpu.dot_dimension_numbers<[1], [0], [0], [1], [0, 0, 1, 1], [], []>} : vector<32x64xf32>, vector<64x64xf32>, vector<32x64xf32> -> vector<32x64xf32>
    %54 = arith.addf %48, %53 : vector<32x64xf32>
    %c0_60 = arith.constant 0 : index
    %c2 = arith.constant 2 : index
    %c0_61 = arith.constant 0 : index
    %c0_62 = arith.constant 0 : index
    %55 = vector.load %arg23[%c0_60, %c2, %c0_61, %c0_62] : memref<6x6x2x64xf32, #tpu.memory_space<vmem>>, vector<4x4x2x64xf32>
    %56 = vector.shape_cast %55 : vector<4x4x2x64xf32> to vector<32x64xf32>
    %c0_63 = arith.constant 0 : index
    %c2_64 = arith.constant 2 : index
    %c0_65 = arith.constant 0 : index
    %c0_66 = arith.constant 0 : index
    %57 = vector.load %arg4[%c0_63, %c2_64, %c0_65, %c0_66] : memref<3x3x64x64xf32, #tpu.memory_space<vmem>>, vector<1x1x64x64xf32>
    %58 = vector.shape_cast %57 : vector<1x1x64x64xf32> to vector<64x64xf32>
    %cst_67 = arith.constant dense<0.000000e+00> : vector<32x64xf32>
    %59 = tpu.matmul %56, %58, %cst_67 {dimension_numbers = #tpu.dot_dimension_numbers<[1], [0], [0], [1], [0, 0, 1, 1], [], []>} : vector<32x64xf32>, vector<64x64xf32>, vector<32x64xf32> -> vector<32x64xf32>
    %60 = arith.addf %54, %59 : vector<32x64xf32>
    %c1_68 = arith.constant 1 : index
    %c0_69 = arith.constant 0 : index
    %c0_70 = arith.constant 0 : index
    %c0_71 = arith.constant 0 : index
    %61 = vector.load %arg23[%c1_68, %c0_69, %c0_70, %c0_71] : memref<6x6x2x64xf32, #tpu.memory_space<vmem>>, vector<4x4x2x64xf32>
    %62 = vector.shape_cast %61 : vector<4x4x2x64xf32> to vector<32x64xf32>
    %c1_72 = arith.constant 1 : index
    %c0_73 = arith.constant 0 : index
    %c0_74 = arith.constant 0 : index
    %c0_75 = arith.constant 0 : index
    %63 = vector.load %arg4[%c1_72, %c0_73, %c0_74, %c0_75] : memref<3x3x64x64xf32, #tpu.memory_space<vmem>>, vector<1x1x64x64xf32>
    %64 = vector.shape_cast %63 : vector<1x1x64x64xf32> to vector<64x64xf32>
    %cst_76 = arith.constant dense<0.000000e+00> : vector<32x64xf32>
    %65 = tpu.matmul %62, %64, %cst_76 {dimension_numbers = #tpu.dot_dimension_numbers<[1], [0], [0], [1], [0, 0, 1, 1], [], []>} : vector<32x64xf32>, vector<64x64xf32>, vector<32x64xf32> -> vector<32x64xf32>
    %66 = arith.addf %60, %65 : vector<32x64xf32>
    %c1_77 = arith.constant 1 : index
    %c1_78 = arith.constant 1 : index
    %c0_79 = arith.constant 0 : index
    %c0_80 = arith.constant 0 : index
    %67 = vector.load %arg23[%c1_77, %c1_78, %c0_79, %c0_80] : memref<6x6x2x64xf32, #tpu.memory_space<vmem>>, vector<4x4x2x64xf32>
    %68 = vector.shape_cast %67 : vector<4x4x2x64xf32> to vector<32x64xf32>
    %c1_81 = arith.constant 1 : index
    %c1_82 = arith.constant 1 : index
    %c0_83 = arith.constant 0 : index
    %c0_84 = arith.constant 0 : index
    %69 = vector.load %arg4[%c1_81, %c1_82, %c0_83, %c0_84] : memref<3x3x64x64xf32, #tpu.memory_space<vmem>>, vector<1x1x64x64xf32>
    %70 = vector.shape_cast %69 : vector<1x1x64x64xf32> to vector<64x64xf32>
    %cst_85 = arith.constant dense<0.000000e+00> : vector<32x64xf32>
    %71 = tpu.matmul %68, %70, %cst_85 {dimension_numbers = #tpu.dot_dimension_numbers<[1], [0], [0], [1], [0, 0, 1, 1], [], []>} : vector<32x64xf32>, vector<64x64xf32>, vector<32x64xf32> -> vector<32x64xf32>
    %72 = arith.addf %66, %71 : vector<32x64xf32>
    %c1_86 = arith.constant 1 : index
    %c2_87 = arith.constant 2 : index
    %c0_88 = arith.constant 0 : index
    %c0_89 = arith.constant 0 : index
    %73 = vector.load %arg23[%c1_86, %c2_87, %c0_88, %c0_89] : memref<6x6x2x64xf32, #tpu.memory_space<vmem>>, vector<4x4x2x64xf32>
    %74 = vector.shape_cast %73 : vector<4x4x2x64xf32> to vector<32x64xf32>
    %c1_90 = arith.constant 1 : index
    %c2_91 = arith.constant 2 : index
    %c0_92 = arith.constant 0 : index
    %c0_93 = arith.constant 0 : index
    %75 = vector.load %arg4[%c1_90, %c2_91, %c0_92, %c0_93] : memref<3x3x64x64xf32, #tpu.memory_space<vmem>>, vector<1x1x64x64xf32>
    %76 = vector.shape_cast %75 : vector<1x1x64x64xf32> to vector<64x64xf32>
    %cst_94 = arith.constant dense<0.000000e+00> : vector<32x64xf32>
    %77 = tpu.matmul %74, %76, %cst_94 {dimension_numbers = #tpu.dot_dimension_numbers<[1], [0], [0], [1], [0, 0, 1, 1], [], []>} : vector<32x64xf32>, vector<64x64xf32>, vector<32x64xf32> -> vector<32x64xf32>
    %78 = arith.addf %72, %77 : vector<32x64xf32>
    %c2_95 = arith.constant 2 : index
    %c0_96 = arith.constant 0 : index
    %c0_97 = arith.constant 0 : index
    %c0_98 = arith.constant 0 : index
    %79 = vector.load %arg23[%c2_95, %c0_96, %c0_97, %c0_98] : memref<6x6x2x64xf32, #tpu.memory_space<vmem>>, vector<4x4x2x64xf32>
    %80 = vector.shape_cast %79 : vector<4x4x2x64xf32> to vector<32x64xf32>
    %c2_99 = arith.constant 2 : index
    %c0_100 = arith.constant 0 : index
    %c0_101 = arith.constant 0 : index
    %c0_102 = arith.constant 0 : index
    %81 = vector.load %arg4[%c2_99, %c0_100, %c0_101, %c0_102] : memref<3x3x64x64xf32, #tpu.memory_space<vmem>>, vector<1x1x64x64xf32>
    %82 = vector.shape_cast %81 : vector<1x1x64x64xf32> to vector<64x64xf32>
    %cst_103 = arith.constant dense<0.000000e+00> : vector<32x64xf32>
    %83 = tpu.matmul %80, %82, %cst_103 {dimension_numbers = #tpu.dot_dimension_numbers<[1], [0], [0], [1], [0, 0, 1, 1], [], []>} : vector<32x64xf32>, vector<64x64xf32>, vector<32x64xf32> -> vector<32x64xf32>
    %84 = arith.addf %78, %83 : vector<32x64xf32>
    %c2_104 = arith.constant 2 : index
    %c1_105 = arith.constant 1 : index
    %c0_106 = arith.constant 0 : index
    %c0_107 = arith.constant 0 : index
    %85 = vector.load %arg23[%c2_104, %c1_105, %c0_106, %c0_107] : memref<6x6x2x64xf32, #tpu.memory_space<vmem>>, vector<4x4x2x64xf32>
    %86 = vector.shape_cast %85 : vector<4x4x2x64xf32> to vector<32x64xf32>
    %c2_108 = arith.constant 2 : index
    %c1_109 = arith.constant 1 : index
    %c0_110 = arith.constant 0 : index
    %c0_111 = arith.constant 0 : index
    %87 = vector.load %arg4[%c2_108, %c1_109, %c0_110, %c0_111] : memref<3x3x64x64xf32, #tpu.memory_space<vmem>>, vector<1x1x64x64xf32>
    %88 = vector.shape_cast %87 : vector<1x1x64x64xf32> to vector<64x64xf32>
    %cst_112 = arith.constant dense<0.000000e+00> : vector<32x64xf32>
    %89 = tpu.matmul %86, %88, %cst_112 {dimension_numbers = #tpu.dot_dimension_numbers<[1], [0], [0], [1], [0, 0, 1, 1], [], []>} : vector<32x64xf32>, vector<64x64xf32>, vector<32x64xf32> -> vector<32x64xf32>
    %90 = arith.addf %84, %89 : vector<32x64xf32>
    %c2_113 = arith.constant 2 : index
    %c2_114 = arith.constant 2 : index
    %c0_115 = arith.constant 0 : index
    %c0_116 = arith.constant 0 : index
    %91 = vector.load %arg23[%c2_113, %c2_114, %c0_115, %c0_116] : memref<6x6x2x64xf32, #tpu.memory_space<vmem>>, vector<4x4x2x64xf32>
    %92 = vector.shape_cast %91 : vector<4x4x2x64xf32> to vector<32x64xf32>
    %c2_117 = arith.constant 2 : index
    %c2_118 = arith.constant 2 : index
    %c0_119 = arith.constant 0 : index
    %c0_120 = arith.constant 0 : index
    %93 = vector.load %arg4[%c2_117, %c2_118, %c0_119, %c0_120] : memref<3x3x64x64xf32, #tpu.memory_space<vmem>>, vector<1x1x64x64xf32>
    %94 = vector.shape_cast %93 : vector<1x1x64x64xf32> to vector<64x64xf32>
    %cst_121 = arith.constant dense<0.000000e+00> : vector<32x64xf32>
    %95 = tpu.matmul %92, %94, %cst_121 {dimension_numbers = #tpu.dot_dimension_numbers<[1], [0], [0], [1], [0, 0, 1, 1], [], []>} : vector<32x64xf32>, vector<64x64xf32>, vector<32x64xf32> -> vector<32x64xf32>
    %96 = arith.addf %90, %95 : vector<32x64xf32>
    %cst_122 = arith.constant dense<0.000000e+00> : vector<64xf32>
    %97 = vector.multi_reduction <add>, %96, %cst_122 [0] : vector<32x64xf32> to vector<64xf32>
    %98 = vector.shape_cast %97 : vector<64xf32> to vector<1x64xf32>
    %cst_123 = arith.constant 3.200000e+01 : f32
    %99 = vector.broadcast %cst_123 : f32 to vector<1x64xf32>
    %100 = arith.divf %98, %99 : vector<1x64xf32>
    %101 = vector.broadcast %100 : vector<1x64xf32> to vector<32x64xf32>
    %102 = arith.subf %96, %101 : vector<32x64xf32>
    %103 = arith.mulf %102, %102 : vector<32x64xf32>
    %cst_124 = arith.constant dense<0.000000e+00> : vector<64xf32>
    %104 = vector.multi_reduction <add>, %103, %cst_124 [0] : vector<32x64xf32> to vector<64xf32>
    %105 = vector.shape_cast %104 : vector<64xf32> to vector<1x64xf32>
    %cst_125 = arith.constant 3.200000e+01 : f32
    %106 = vector.broadcast %cst_125 : f32 to vector<1x64xf32>
    %107 = arith.divf %105, %106 : vector<1x64xf32>
    %c0_126 = arith.constant 0 : index
    %c0_127 = arith.constant 0 : index
    %108 = vector.load %arg5[%c0_126, %c0_127] : memref<1x64xf32, #tpu.memory_space<vmem>>, vector<1x64xf32>
    %cst_128 = arith.constant 9.99999974E-6 : f32
    %109 = vector.broadcast %cst_128 : f32 to vector<1x64xf32>
    %110 = arith.addf %107, %109 : vector<1x64xf32>
    %111 = math.rsqrt %110 : vector<1x64xf32>
    %112 = arith.mulf %108, %111 : vector<1x64xf32>
    %c0_129 = arith.constant 0 : index
    %c0_130 = arith.constant 0 : index
    %113 = vector.load %arg6[%c0_129, %c0_130] : memref<1x64xf32, #tpu.memory_space<vmem>>, vector<1x64xf32>
    %114 = arith.mulf %100, %112 : vector<1x64xf32>
    %115 = arith.subf %113, %114 : vector<1x64xf32>
    %116 = vector.broadcast %112 : vector<1x64xf32> to vector<32x64xf32>
    %117 = arith.mulf %96, %116 : vector<32x64xf32>
    %118 = vector.broadcast %115 : vector<1x64xf32> to vector<32x64xf32>
    %119 = arith.addf %117, %118 : vector<32x64xf32>
    %cst_131 = arith.constant 0.000000e+00 : f32
    %120 = vector.broadcast %cst_131 : f32 to vector<32x64xf32>
    %121 = arith.maximumf %119, %120 : vector<32x64xf32>
    %cst_132 = arith.constant 0.000000e+00 : f32
    %122 = vector.broadcast %cst_132 : f32 to vector<6x6x2x64xf32>
    %c0_133 = arith.constant 0 : index
    %c0_134 = arith.constant 0 : index
    %c0_135 = arith.constant 0 : index
    %c0_136 = arith.constant 0 : index
    %123 = vector.load %arg24[%c0_133, %c0_134, %c0_135, %c0_136] : memref<6x6x2x64xf32, #tpu.memory_space<vmem>>, vector<6x6x2x64xf32>
    tpu.vector_store %arg24[%c0_133, %c0_134, %c0_135, %c0_136], %122 {strides = array<i32>} : memref<6x6x2x64xf32, #tpu.memory_space<vmem>>, vector<6x6x2x64xf32>,
    %124 = vector.shape_cast %121 : vector<32x64xf32> to vector<4x4x2x64xf32>
    %c1_137 = arith.constant 1 : index
    %c1_138 = arith.constant 1 : index
    %c0_139 = arith.constant 0 : index
    %c0_140 = arith.constant 0 : index
    %125 = vector.load %arg24[%c1_137, %c1_138, %c0_139, %c0_140] : memref<6x6x2x64xf32, #tpu.memory_space<vmem>>, vector<4x4x2x64xf32>
    tpu.vector_store %arg24[%c1_137, %c1_138, %c0_139, %c0_140], %124 {strides = array<i32>} : memref<6x6x2x64xf32, #tpu.memory_space<vmem>>, vector<4x4x2x64xf32>,
    %cst_141 = arith.constant 0.000000e+00 : f32
    %126 = vector.broadcast %cst_141 : f32 to vector<32x64xf32>
    %c0_142 = arith.constant 0 : index
    %c0_143 = arith.constant 0 : index
    %c0_144 = arith.constant 0 : index
    %c0_145 = arith.constant 0 : index
    %127 = vector.load %arg24[%c0_142, %c0_143, %c0_144, %c0_145] : memref<6x6x2x64xf32, #tpu.memory_space<vmem>>, vector<4x4x2x64xf32>
    %128 = vector.shape_cast %127 : vector<4x4x2x64xf32> to vector<32x64xf32>
    %c0_146 = arith.constant 0 : index
    %c0_147 = arith.constant 0 : index
    %c0_148 = arith.constant 0 : index
    %c0_149 = arith.constant 0 : index
    %129 = vector.load %arg7[%c0_146, %c0_147, %c0_148, %c0_149] : memref<3x3x64x64xf32, #tpu.memory_space<vmem>>, vector<1x1x64x64xf32>
    %130 = vector.shape_cast %129 : vector<1x1x64x64xf32> to vector<64x64xf32>
    %cst_150 = arith.constant dense<0.000000e+00> : vector<32x64xf32>
    %131 = tpu.matmul %128, %130, %cst_150 {dimension_numbers = #tpu.dot_dimension_numbers<[1], [0], [0], [1], [0, 0, 1, 1], [], []>} : vector<32x64xf32>, vector<64x64xf32>, vector<32x64xf32> -> vector<32x64xf32>
    %132 = arith.addf %126, %131 : vector<32x64xf32>
    %c0_151 = arith.constant 0 : index
    %c1_152 = arith.constant 1 : index
    %c0_153 = arith.constant 0 : index
    %c0_154 = arith.constant 0 : index
    %133 = vector.load %arg24[%c0_151, %c1_152, %c0_153, %c0_154] : memref<6x6x2x64xf32, #tpu.memory_space<vmem>>, vector<4x4x2x64xf32>
    %134 = vector.shape_cast %133 : vector<4x4x2x64xf32> to vector<32x64xf32>
    %c0_155 = arith.constant 0 : index
    %c1_156 = arith.constant 1 : index
    %c0_157 = arith.constant 0 : index
    %c0_158 = arith.constant 0 : index
    %135 = vector.load %arg7[%c0_155, %c1_156, %c0_157, %c0_158] : memref<3x3x64x64xf32, #tpu.memory_space<vmem>>, vector<1x1x64x64xf32>
    %136 = vector.shape_cast %135 : vector<1x1x64x64xf32> to vector<64x64xf32>
    %cst_159 = arith.constant dense<0.000000e+00> : vector<32x64xf32>
    %137 = tpu.matmul %134, %136, %cst_159 {dimension_numbers = #tpu.dot_dimension_numbers<[1], [0], [0], [1], [0, 0, 1, 1], [], []>} : vector<32x64xf32>, vector<64x64xf32>, vector<32x64xf32> -> vector<32x64xf32>
    %138 = arith.addf %132, %137 : vector<32x64xf32>
    %c0_160 = arith.constant 0 : index
    %c2_161 = arith.constant 2 : index
    %c0_162 = arith.constant 0 : index
    %c0_163 = arith.constant 0 : index
    %139 = vector.load %arg24[%c0_160, %c2_161, %c0_162, %c0_163] : memref<6x6x2x64xf32, #tpu.memory_space<vmem>>, vector<4x4x2x64xf32>
    %140 = vector.shape_cast %139 : vector<4x4x2x64xf32> to vector<32x64xf32>
    %c0_164 = arith.constant 0 : index
    %c2_165 = arith.constant 2 : index
    %c0_166 = arith.constant 0 : index
    %c0_167 = arith.constant 0 : index
    %141 = vector.load %arg7[%c0_164, %c2_165, %c0_166, %c0_167] : memref<3x3x64x64xf32, #tpu.memory_space<vmem>>, vector<1x1x64x64xf32>
    %142 = vector.shape_cast %141 : vector<1x1x64x64xf32> to vector<64x64xf32>
    %cst_168 = arith.constant dense<0.000000e+00> : vector<32x64xf32>
    %143 = tpu.matmul %140, %142, %cst_168 {dimension_numbers = #tpu.dot_dimension_numbers<[1], [0], [0], [1], [0, 0, 1, 1], [], []>} : vector<32x64xf32>, vector<64x64xf32>, vector<32x64xf32> -> vector<32x64xf32>
    %144 = arith.addf %138, %143 : vector<32x64xf32>
    %c1_169 = arith.constant 1 : index
    %c0_170 = arith.constant 0 : index
    %c0_171 = arith.constant 0 : index
    %c0_172 = arith.constant 0 : index
    %145 = vector.load %arg24[%c1_169, %c0_170, %c0_171, %c0_172] : memref<6x6x2x64xf32, #tpu.memory_space<vmem>>, vector<4x4x2x64xf32>
    %146 = vector.shape_cast %145 : vector<4x4x2x64xf32> to vector<32x64xf32>
    %c1_173 = arith.constant 1 : index
    %c0_174 = arith.constant 0 : index
    %c0_175 = arith.constant 0 : index
    %c0_176 = arith.constant 0 : index
    %147 = vector.load %arg7[%c1_173, %c0_174, %c0_175, %c0_176] : memref<3x3x64x64xf32, #tpu.memory_space<vmem>>, vector<1x1x64x64xf32>
    %148 = vector.shape_cast %147 : vector<1x1x64x64xf32> to vector<64x64xf32>
    %cst_177 = arith.constant dense<0.000000e+00> : vector<32x64xf32>
    %149 = tpu.matmul %146, %148, %cst_177 {dimension_numbers = #tpu.dot_dimension_numbers<[1], [0], [0], [1], [0, 0, 1, 1], [], []>} : vector<32x64xf32>, vector<64x64xf32>, vector<32x64xf32> -> vector<32x64xf32>
    %150 = arith.addf %144, %149 : vector<32x64xf32>
    %c1_178 = arith.constant 1 : index
    %c1_179 = arith.constant 1 : index
    %c0_180 = arith.constant 0 : index
    %c0_181 = arith.constant 0 : index
    %151 = vector.load %arg24[%c1_178, %c1_179, %c0_180, %c0_181] : memref<6x6x2x64xf32, #tpu.memory_space<vmem>>, vector<4x4x2x64xf32>
    %152 = vector.shape_cast %151 : vector<4x4x2x64xf32> to vector<32x64xf32>
    %c1_182 = arith.constant 1 : index
    %c1_183 = arith.constant 1 : index
    %c0_184 = arith.constant 0 : index
    %c0_185 = arith.constant 0 : index
    %153 = vector.load %arg7[%c1_182, %c1_183, %c0_184, %c0_185] : memref<3x3x64x64xf32, #tpu.memory_space<vmem>>, vector<1x1x64x64xf32>
    %154 = vector.shape_cast %153 : vector<1x1x64x64xf32> to vector<64x64xf32>
    %cst_186 = arith.constant dense<0.000000e+00> : vector<32x64xf32>
    %155 = tpu.matmul %152, %154, %cst_186 {dimension_numbers = #tpu.dot_dimension_numbers<[1], [0], [0], [1], [0, 0, 1, 1], [], []>} : vector<32x64xf32>, vector<64x64xf32>, vector<32x64xf32> -> vector<32x64xf32>
    %156 = arith.addf %150, %155 : vector<32x64xf32>
    %c1_187 = arith.constant 1 : index
    %c2_188 = arith.constant 2 : index
    %c0_189 = arith.constant 0 : index
    %c0_190 = arith.constant 0 : index
    %157 = vector.load %arg24[%c1_187, %c2_188, %c0_189, %c0_190] : memref<6x6x2x64xf32, #tpu.memory_space<vmem>>, vector<4x4x2x64xf32>
    %158 = vector.shape_cast %157 : vector<4x4x2x64xf32> to vector<32x64xf32>
    %c1_191 = arith.constant 1 : index
    %c2_192 = arith.constant 2 : index
    %c0_193 = arith.constant 0 : index
    %c0_194 = arith.constant 0 : index
    %159 = vector.load %arg7[%c1_191, %c2_192, %c0_193, %c0_194] : memref<3x3x64x64xf32, #tpu.memory_space<vmem>>, vector<1x1x64x64xf32>
    %160 = vector.shape_cast %159 : vector<1x1x64x64xf32> to vector<64x64xf32>
    %cst_195 = arith.constant dense<0.000000e+00> : vector<32x64xf32>
    %161 = tpu.matmul %158, %160, %cst_195 {dimension_numbers = #tpu.dot_dimension_numbers<[1], [0], [0], [1], [0, 0, 1, 1], [], []>} : vector<32x64xf32>, vector<64x64xf32>, vector<32x64xf32> -> vector<32x64xf32>
    %162 = arith.addf %156, %161 : vector<32x64xf32>
    %c2_196 = arith.constant 2 : index
    %c0_197 = arith.constant 0 : index
    %c0_198 = arith.constant 0 : index
    %c0_199 = arith.constant 0 : index
    %163 = vector.load %arg24[%c2_196, %c0_197, %c0_198, %c0_199] : memref<6x6x2x64xf32, #tpu.memory_space<vmem>>, vector<4x4x2x64xf32>
    %164 = vector.shape_cast %163 : vector<4x4x2x64xf32> to vector<32x64xf32>
    %c2_200 = arith.constant 2 : index
    %c0_201 = arith.constant 0 : index
    %c0_202 = arith.constant 0 : index
    %c0_203 = arith.constant 0 : index
    %165 = vector.load %arg7[%c2_200, %c0_201, %c0_202, %c0_203] : memref<3x3x64x64xf32, #tpu.memory_space<vmem>>, vector<1x1x64x64xf32>
    %166 = vector.shape_cast %165 : vector<1x1x64x64xf32> to vector<64x64xf32>
    %cst_204 = arith.constant dense<0.000000e+00> : vector<32x64xf32>
    %167 = tpu.matmul %164, %166, %cst_204 {dimension_numbers = #tpu.dot_dimension_numbers<[1], [0], [0], [1], [0, 0, 1, 1], [], []>} : vector<32x64xf32>, vector<64x64xf32>, vector<32x64xf32> -> vector<32x64xf32>
    %168 = arith.addf %162, %167 : vector<32x64xf32>
    %c2_205 = arith.constant 2 : index
    %c1_206 = arith.constant 1 : index
    %c0_207 = arith.constant 0 : index
    %c0_208 = arith.constant 0 : index
    %169 = vector.load %arg24[%c2_205, %c1_206, %c0_207, %c0_208] : memref<6x6x2x64xf32, #tpu.memory_space<vmem>>, vector<4x4x2x64xf32>
    %170 = vector.shape_cast %169 : vector<4x4x2x64xf32> to vector<32x64xf32>
    %c2_209 = arith.constant 2 : index
    %c1_210 = arith.constant 1 : index
    %c0_211 = arith.constant 0 : index
    %c0_212 = arith.constant 0 : index
    %171 = vector.load %arg7[%c2_209, %c1_210, %c0_211, %c0_212] : memref<3x3x64x64xf32, #tpu.memory_space<vmem>>, vector<1x1x64x64xf32>
    %172 = vector.shape_cast %171 : vector<1x1x64x64xf32> to vector<64x64xf32>
    %cst_213 = arith.constant dense<0.000000e+00> : vector<32x64xf32>
    %173 = tpu.matmul %170, %172, %cst_213 {dimension_numbers = #tpu.dot_dimension_numbers<[1], [0], [0], [1], [0, 0, 1, 1], [], []>} : vector<32x64xf32>, vector<64x64xf32>, vector<32x64xf32> -> vector<32x64xf32>
    %174 = arith.addf %168, %173 : vector<32x64xf32>
    %c2_214 = arith.constant 2 : index
    %c2_215 = arith.constant 2 : index
    %c0_216 = arith.constant 0 : index
    %c0_217 = arith.constant 0 : index
    %175 = vector.load %arg24[%c2_214, %c2_215, %c0_216, %c0_217] : memref<6x6x2x64xf32, #tpu.memory_space<vmem>>, vector<4x4x2x64xf32>
    %176 = vector.shape_cast %175 : vector<4x4x2x64xf32> to vector<32x64xf32>
    %c2_218 = arith.constant 2 : index
    %c2_219 = arith.constant 2 : index
    %c0_220 = arith.constant 0 : index
    %c0_221 = arith.constant 0 : index
    %177 = vector.load %arg7[%c2_218, %c2_219, %c0_220, %c0_221] : memref<3x3x64x64xf32, #tpu.memory_space<vmem>>, vector<1x1x64x64xf32>
    %178 = vector.shape_cast %177 : vector<1x1x64x64xf32> to vector<64x64xf32>
    %cst_222 = arith.constant dense<0.000000e+00> : vector<32x64xf32>
    %179 = tpu.matmul %176, %178, %cst_222 {dimension_numbers = #tpu.dot_dimension_numbers<[1], [0], [0], [1], [0, 0, 1, 1], [], []>} : vector<32x64xf32>, vector<64x64xf32>, vector<32x64xf32> -> vector<32x64xf32>
    %180 = arith.addf %174, %179 : vector<32x64xf32>
    %cst_223 = arith.constant dense<0.000000e+00> : vector<64xf32>
    %181 = vector.multi_reduction <add>, %180, %cst_223 [0] : vector<32x64xf32> to vector<64xf32>
    %182 = vector.shape_cast %181 : vector<64xf32> to vector<1x64xf32>
    %cst_224 = arith.constant 3.200000e+01 : f32
    %183 = vector.broadcast %cst_224 : f32 to vector<1x64xf32>
    %184 = arith.divf %182, %183 : vector<1x64xf32>
    %185 = vector.broadcast %184 : vector<1x64xf32> to vector<32x64xf32>
    %186 = arith.subf %180, %185 : vector<32x64xf32>
    %187 = arith.mulf %186, %186 : vector<32x64xf32>
    %cst_225 = arith.constant dense<0.000000e+00> : vector<64xf32>
    %188 = vector.multi_reduction <add>, %187, %cst_225 [0] : vector<32x64xf32> to vector<64xf32>
    %189 = vector.shape_cast %188 : vector<64xf32> to vector<1x64xf32>
    %cst_226 = arith.constant 3.200000e+01 : f32
    %190 = vector.broadcast %cst_226 : f32 to vector<1x64xf32>
    %191 = arith.divf %189, %190 : vector<1x64xf32>
    %c0_227 = arith.constant 0 : index
    %c0_228 = arith.constant 0 : index
    %192 = vector.load %arg8[%c0_227, %c0_228] : memref<1x64xf32, #tpu.memory_space<vmem>>, vector<1x64xf32>
    %cst_229 = arith.constant 9.99999974E-6 : f32
    %193 = vector.broadcast %cst_229 : f32 to vector<1x64xf32>
    %194 = arith.addf %191, %193 : vector<1x64xf32>
    %195 = math.rsqrt %194 : vector<1x64xf32>
    %196 = arith.mulf %192, %195 : vector<1x64xf32>
    %c0_230 = arith.constant 0 : index
    %c0_231 = arith.constant 0 : index
    %197 = vector.load %arg9[%c0_230, %c0_231] : memref<1x64xf32, #tpu.memory_space<vmem>>, vector<1x64xf32>
    %198 = arith.mulf %184, %196 : vector<1x64xf32>
    %199 = arith.subf %197, %198 : vector<1x64xf32>
    %200 = vector.broadcast %196 : vector<1x64xf32> to vector<32x64xf32>
    %201 = arith.mulf %180, %200 : vector<32x64xf32>
    %202 = vector.broadcast %199 : vector<1x64xf32> to vector<32x64xf32>
    %203 = arith.addf %201, %202 : vector<32x64xf32>
    %cst_232 = arith.constant 0.000000e+00 : f32
    %204 = vector.broadcast %cst_232 : f32 to vector<32x64xf32>
    %205 = arith.maximumf %203, %204 : vector<32x64xf32>
    %cst_233 = arith.constant 0.000000e+00 : f32
    %206 = vector.broadcast %cst_233 : f32 to vector<6x6x2x64xf32>
    %c0_234 = arith.constant 0 : index
    %c0_235 = arith.constant 0 : index
    %c0_236 = arith.constant 0 : index
    %c0_237 = arith.constant 0 : index
    %207 = vector.load %arg25[%c0_234, %c0_235, %c0_236, %c0_237] : memref<6x6x2x64xf32, #tpu.memory_space<vmem>>, vector<6x6x2x64xf32>
    tpu.vector_store %arg25[%c0_234, %c0_235, %c0_236, %c0_237], %206 {strides = array<i32>} : memref<6x6x2x64xf32, #tpu.memory_space<vmem>>, vector<6x6x2x64xf32>,
    %208 = vector.shape_cast %205 : vector<32x64xf32> to vector<4x4x2x64xf32>
    %c1_238 = arith.constant 1 : index
    %c1_239 = arith.constant 1 : index
    %c0_240 = arith.constant 0 : index
    %c0_241 = arith.constant 0 : index
    %209 = vector.load %arg25[%c1_238, %c1_239, %c0_240, %c0_241] : memref<6x6x2x64xf32, #tpu.memory_space<vmem>>, vector<4x4x2x64xf32>
    tpu.vector_store %arg25[%c1_238, %c1_239, %c0_240, %c0_241], %208 {strides = array<i32>} : memref<6x6x2x64xf32, #tpu.memory_space<vmem>>, vector<4x4x2x64xf32>,
    %cst_242 = arith.constant 0.000000e+00 : f32
    %210 = vector.broadcast %cst_242 : f32 to vector<8x128xf32>
    %c0_243 = arith.constant 0 : index
    %c0_244 = arith.constant 0 : index
    %c0_245 = arith.constant 0 : index
    %c0_246 = arith.constant 0 : index
    %211 = tpu.strided_load %arg25[%c0_243, %c0_244, %c0_245, %c0_246] {strides = array<i32: 2, 2, 1, 1>} : memref<6x6x2x64xf32, #tpu.memory_space<vmem>>, vector<2x2x2x64xf32>
    %212 = vector.shape_cast %211 : vector<2x2x2x64xf32> to vector<8x64xf32>
    %c0_247 = arith.constant 0 : index
    %c0_248 = arith.constant 0 : index
    %c0_249 = arith.constant 0 : index
    %c0_250 = arith.constant 0 : index
    %213 = vector.load %arg10[%c0_247, %c0_248, %c0_249, %c0_250] : memref<3x3x64x128xf32, #tpu.memory_space<vmem>>, vector<1x1x64x128xf32>
    %214 = vector.shape_cast %213 : vector<1x1x64x128xf32> to vector<64x128xf32>
    %cst_251 = arith.constant dense<0.000000e+00> : vector<8x128xf32>
    %215 = tpu.matmul %212, %214, %cst_251 {dimension_numbers = #tpu.dot_dimension_numbers<[1], [0], [0], [1], [0, 0, 1, 1], [], []>} : vector<8x64xf32>, vector<64x128xf32>, vector<8x128xf32> -> vector<8x128xf32>
    %216 = arith.addf %210, %215 : vector<8x128xf32>
    %c0_252 = arith.constant 0 : index
    %c1_253 = arith.constant 1 : index
    %c0_254 = arith.constant 0 : index
    %c0_255 = arith.constant 0 : index
    %217 = tpu.strided_load %arg25[%c0_252, %c1_253, %c0_254, %c0_255] {strides = array<i32: 2, 2, 1, 1>} : memref<6x6x2x64xf32, #tpu.memory_space<vmem>>, vector<2x2x2x64xf32>
    %218 = vector.shape_cast %217 : vector<2x2x2x64xf32> to vector<8x64xf32>
    %c0_256 = arith.constant 0 : index
    %c1_257 = arith.constant 1 : index
    %c0_258 = arith.constant 0 : index
    %c0_259 = arith.constant 0 : index
    %219 = vector.load %arg10[%c0_256, %c1_257, %c0_258, %c0_259] : memref<3x3x64x128xf32, #tpu.memory_space<vmem>>, vector<1x1x64x128xf32>
    %220 = vector.shape_cast %219 : vector<1x1x64x128xf32> to vector<64x128xf32>
    %cst_260 = arith.constant dense<0.000000e+00> : vector<8x128xf32>
    %221 = tpu.matmul %218, %220, %cst_260 {dimension_numbers = #tpu.dot_dimension_numbers<[1], [0], [0], [1], [0, 0, 1, 1], [], []>} : vector<8x64xf32>, vector<64x128xf32>, vector<8x128xf32> -> vector<8x128xf32>
    %222 = arith.addf %216, %221 : vector<8x128xf32>
    %c0_261 = arith.constant 0 : index
    %c2_262 = arith.constant 2 : index
    %c0_263 = arith.constant 0 : index
    %c0_264 = arith.constant 0 : index
    %223 = tpu.strided_load %arg25[%c0_261, %c2_262, %c0_263, %c0_264] {strides = array<i32: 2, 2, 1, 1>} : memref<6x6x2x64xf32, #tpu.memory_space<vmem>>, vector<2x2x2x64xf32>
    %224 = vector.shape_cast %223 : vector<2x2x2x64xf32> to vector<8x64xf32>
    %c0_265 = arith.constant 0 : index
    %c2_266 = arith.constant 2 : index
    %c0_267 = arith.constant 0 : index
    %c0_268 = arith.constant 0 : index
    %225 = vector.load %arg10[%c0_265, %c2_266, %c0_267, %c0_268] : memref<3x3x64x128xf32, #tpu.memory_space<vmem>>, vector<1x1x64x128xf32>
    %226 = vector.shape_cast %225 : vector<1x1x64x128xf32> to vector<64x128xf32>
    %cst_269 = arith.constant dense<0.000000e+00> : vector<8x128xf32>
    %227 = tpu.matmul %224, %226, %cst_269 {dimension_numbers = #tpu.dot_dimension_numbers<[1], [0], [0], [1], [0, 0, 1, 1], [], []>} : vector<8x64xf32>, vector<64x128xf32>, vector<8x128xf32> -> vector<8x128xf32>
    %228 = arith.addf %222, %227 : vector<8x128xf32>
    %c1_270 = arith.constant 1 : index
    %c0_271 = arith.constant 0 : index
    %c0_272 = arith.constant 0 : index
    %c0_273 = arith.constant 0 : index
    %229 = tpu.strided_load %arg25[%c1_270, %c0_271, %c0_272, %c0_273] {strides = array<i32: 2, 2, 1, 1>} : memref<6x6x2x64xf32, #tpu.memory_space<vmem>>, vector<2x2x2x64xf32>
    %230 = vector.shape_cast %229 : vector<2x2x2x64xf32> to vector<8x64xf32>
    %c1_274 = arith.constant 1 : index
    %c0_275 = arith.constant 0 : index
    %c0_276 = arith.constant 0 : index
    %c0_277 = arith.constant 0 : index
    %231 = vector.load %arg10[%c1_274, %c0_275, %c0_276, %c0_277] : memref<3x3x64x128xf32, #tpu.memory_space<vmem>>, vector<1x1x64x128xf32>
    %232 = vector.shape_cast %231 : vector<1x1x64x128xf32> to vector<64x128xf32>
    %cst_278 = arith.constant dense<0.000000e+00> : vector<8x128xf32>
    %233 = tpu.matmul %230, %232, %cst_278 {dimension_numbers = #tpu.dot_dimension_numbers<[1], [0], [0], [1], [0, 0, 1, 1], [], []>} : vector<8x64xf32>, vector<64x128xf32>, vector<8x128xf32> -> vector<8x128xf32>
    %234 = arith.addf %228, %233 : vector<8x128xf32>
    %c1_279 = arith.constant 1 : index
    %c1_280 = arith.constant 1 : index
    %c0_281 = arith.constant 0 : index
    %c0_282 = arith.constant 0 : index
    %235 = tpu.strided_load %arg25[%c1_279, %c1_280, %c0_281, %c0_282] {strides = array<i32: 2, 2, 1, 1>} : memref<6x6x2x64xf32, #tpu.memory_space<vmem>>, vector<2x2x2x64xf32>
    %236 = vector.shape_cast %235 : vector<2x2x2x64xf32> to vector<8x64xf32>
    %c1_283 = arith.constant 1 : index
    %c1_284 = arith.constant 1 : index
    %c0_285 = arith.constant 0 : index
    %c0_286 = arith.constant 0 : index
    %237 = vector.load %arg10[%c1_283, %c1_284, %c0_285, %c0_286] : memref<3x3x64x128xf32, #tpu.memory_space<vmem>>, vector<1x1x64x128xf32>
    %238 = vector.shape_cast %237 : vector<1x1x64x128xf32> to vector<64x128xf32>
    %cst_287 = arith.constant dense<0.000000e+00> : vector<8x128xf32>
    %239 = tpu.matmul %236, %238, %cst_287 {dimension_numbers = #tpu.dot_dimension_numbers<[1], [0], [0], [1], [0, 0, 1, 1], [], []>} : vector<8x64xf32>, vector<64x128xf32>, vector<8x128xf32> -> vector<8x128xf32>
    %240 = arith.addf %234, %239 : vector<8x128xf32>
    %c1_288 = arith.constant 1 : index
    %c2_289 = arith.constant 2 : index
    %c0_290 = arith.constant 0 : index
    %c0_291 = arith.constant 0 : index
    %241 = tpu.strided_load %arg25[%c1_288, %c2_289, %c0_290, %c0_291] {strides = array<i32: 2, 2, 1, 1>} : memref<6x6x2x64xf32, #tpu.memory_space<vmem>>, vector<2x2x2x64xf32>
    %242 = vector.shape_cast %241 : vector<2x2x2x64xf32> to vector<8x64xf32>
    %c1_292 = arith.constant 1 : index
    %c2_293 = arith.constant 2 : index
    %c0_294 = arith.constant 0 : index
    %c0_295 = arith.constant 0 : index
    %243 = vector.load %arg10[%c1_292, %c2_293, %c0_294, %c0_295] : memref<3x3x64x128xf32, #tpu.memory_space<vmem>>, vector<1x1x64x128xf32>
    %244 = vector.shape_cast %243 : vector<1x1x64x128xf32> to vector<64x128xf32>
    %cst_296 = arith.constant dense<0.000000e+00> : vector<8x128xf32>
    %245 = tpu.matmul %242, %244, %cst_296 {dimension_numbers = #tpu.dot_dimension_numbers<[1], [0], [0], [1], [0, 0, 1, 1], [], []>} : vector<8x64xf32>, vector<64x128xf32>, vector<8x128xf32> -> vector<8x128xf32>
    %246 = arith.addf %240, %245 : vector<8x128xf32>
    %c2_297 = arith.constant 2 : index
    %c0_298 = arith.constant 0 : index
    %c0_299 = arith.constant 0 : index
    %c0_300 = arith.constant 0 : index
    %247 = tpu.strided_load %arg25[%c2_297, %c0_298, %c0_299, %c0_300] {strides = array<i32: 2, 2, 1, 1>} : memref<6x6x2x64xf32, #tpu.memory_space<vmem>>, vector<2x2x2x64xf32>
    %248 = vector.shape_cast %247 : vector<2x2x2x64xf32> to vector<8x64xf32>
    %c2_301 = arith.constant 2 : index
    %c0_302 = arith.constant 0 : index
    %c0_303 = arith.constant 0 : index
    %c0_304 = arith.constant 0 : index
    %249 = vector.load %arg10[%c2_301, %c0_302, %c0_303, %c0_304] : memref<3x3x64x128xf32, #tpu.memory_space<vmem>>, vector<1x1x64x128xf32>
    %250 = vector.shape_cast %249 : vector<1x1x64x128xf32> to vector<64x128xf32>
    %cst_305 = arith.constant dense<0.000000e+00> : vector<8x128xf32>
    %251 = tpu.matmul %248, %250, %cst_305 {dimension_numbers = #tpu.dot_dimension_numbers<[1], [0], [0], [1], [0, 0, 1, 1], [], []>} : vector<8x64xf32>, vector<64x128xf32>, vector<8x128xf32> -> vector<8x128xf32>
    %252 = arith.addf %246, %251 : vector<8x128xf32>
    %c2_306 = arith.constant 2 : index
    %c1_307 = arith.constant 1 : index
    %c0_308 = arith.constant 0 : index
    %c0_309 = arith.constant 0 : index
    %253 = tpu.strided_load %arg25[%c2_306, %c1_307, %c0_308, %c0_309] {strides = array<i32: 2, 2, 1, 1>} : memref<6x6x2x64xf32, #tpu.memory_space<vmem>>, vector<2x2x2x64xf32>
    %254 = vector.shape_cast %253 : vector<2x2x2x64xf32> to vector<8x64xf32>
    %c2_310 = arith.constant 2 : index
    %c1_311 = arith.constant 1 : index
    %c0_312 = arith.constant 0 : index
    %c0_313 = arith.constant 0 : index
    %255 = vector.load %arg10[%c2_310, %c1_311, %c0_312, %c0_313] : memref<3x3x64x128xf32, #tpu.memory_space<vmem>>, vector<1x1x64x128xf32>
    %256 = vector.shape_cast %255 : vector<1x1x64x128xf32> to vector<64x128xf32>
    %cst_314 = arith.constant dense<0.000000e+00> : vector<8x128xf32>
    %257 = tpu.matmul %254, %256, %cst_314 {dimension_numbers = #tpu.dot_dimension_numbers<[1], [0], [0], [1], [0, 0, 1, 1], [], []>} : vector<8x64xf32>, vector<64x128xf32>, vector<8x128xf32> -> vector<8x128xf32>
    %258 = arith.addf %252, %257 : vector<8x128xf32>
    %c2_315 = arith.constant 2 : index
    %c2_316 = arith.constant 2 : index
    %c0_317 = arith.constant 0 : index
    %c0_318 = arith.constant 0 : index
    %259 = tpu.strided_load %arg25[%c2_315, %c2_316, %c0_317, %c0_318] {strides = array<i32: 2, 2, 1, 1>} : memref<6x6x2x64xf32, #tpu.memory_space<vmem>>, vector<2x2x2x64xf32>
    %260 = vector.shape_cast %259 : vector<2x2x2x64xf32> to vector<8x64xf32>
    %c2_319 = arith.constant 2 : index
    %c2_320 = arith.constant 2 : index
    %c0_321 = arith.constant 0 : index
    %c0_322 = arith.constant 0 : index
    %261 = vector.load %arg10[%c2_319, %c2_320, %c0_321, %c0_322] : memref<3x3x64x128xf32, #tpu.memory_space<vmem>>, vector<1x1x64x128xf32>
    %262 = vector.shape_cast %261 : vector<1x1x64x128xf32> to vector<64x128xf32>
    %cst_323 = arith.constant dense<0.000000e+00> : vector<8x128xf32>
    %263 = tpu.matmul %260, %262, %cst_323 {dimension_numbers = #tpu.dot_dimension_numbers<[1], [0], [0], [1], [0, 0, 1, 1], [], []>} : vector<8x64xf32>, vector<64x128xf32>, vector<8x128xf32> -> vector<8x128xf32>
    %264 = arith.addf %258, %263 : vector<8x128xf32>
    %cst_324 = arith.constant dense<0.000000e+00> : vector<128xf32>
    %265 = vector.multi_reduction <add>, %264, %cst_324 [0] : vector<8x128xf32> to vector<128xf32>
    %266 = vector.shape_cast %265 : vector<128xf32> to vector<1x128xf32>
    %cst_325 = arith.constant 8.000000e+00 : f32
    %267 = vector.broadcast %cst_325 : f32 to vector<1x128xf32>
    %268 = arith.divf %266, %267 : vector<1x128xf32>
    %269 = vector.broadcast %268 : vector<1x128xf32> to vector<8x128xf32>
    %270 = arith.subf %264, %269 : vector<8x128xf32>
    %271 = arith.mulf %270, %270 : vector<8x128xf32>
    %cst_326 = arith.constant dense<0.000000e+00> : vector<128xf32>
    %272 = vector.multi_reduction <add>, %271, %cst_326 [0] : vector<8x128xf32> to vector<128xf32>
    %273 = vector.shape_cast %272 : vector<128xf32> to vector<1x128xf32>
    %cst_327 = arith.constant 8.000000e+00 : f32
    %274 = vector.broadcast %cst_327 : f32 to vector<1x128xf32>
    %275 = arith.divf %273, %274 : vector<1x128xf32>
    %c0_328 = arith.constant 0 : index
    %c0_329 = arith.constant 0 : index
    %276 = vector.load %arg11[%c0_328, %c0_329] : memref<1x128xf32, #tpu.memory_space<vmem>>, vector<1x128xf32>
    %cst_330 = arith.constant 9.99999974E-6 : f32
    %277 = vector.broadcast %cst_330 : f32 to vector<1x128xf32>
    %278 = arith.addf %275, %277 : vector<1x128xf32>
    %279 = math.rsqrt %278 : vector<1x128xf32>
    %280 = arith.mulf %276, %279 : vector<1x128xf32>
    %c0_331 = arith.constant 0 : index
    %c0_332 = arith.constant 0 : index
    %281 = vector.load %arg12[%c0_331, %c0_332] : memref<1x128xf32, #tpu.memory_space<vmem>>, vector<1x128xf32>
    %282 = arith.mulf %268, %280 : vector<1x128xf32>
    %283 = arith.subf %281, %282 : vector<1x128xf32>
    %284 = vector.broadcast %280 : vector<1x128xf32> to vector<8x128xf32>
    %285 = arith.mulf %264, %284 : vector<8x128xf32>
    %286 = vector.broadcast %283 : vector<1x128xf32> to vector<8x128xf32>
    %287 = arith.addf %285, %286 : vector<8x128xf32>
    %cst_333 = arith.constant 0.000000e+00 : f32
    %288 = vector.broadcast %cst_333 : f32 to vector<8x128xf32>
    %289 = arith.maximumf %287, %288 : vector<8x128xf32>
    %cst_334 = arith.constant 0.000000e+00 : f32
    %290 = vector.broadcast %cst_334 : f32 to vector<4x4x2x128xf32>
    %c0_335 = arith.constant 0 : index
    %c0_336 = arith.constant 0 : index
    %c0_337 = arith.constant 0 : index
    %c0_338 = arith.constant 0 : index
    %291 = vector.load %arg26[%c0_335, %c0_336, %c0_337, %c0_338] : memref<4x4x2x128xf32, #tpu.memory_space<vmem>>, vector<4x4x2x128xf32>
    tpu.vector_store %arg26[%c0_335, %c0_336, %c0_337, %c0_338], %290 {strides = array<i32>} : memref<4x4x2x128xf32, #tpu.memory_space<vmem>>, vector<4x4x2x128xf32>,
    %292 = vector.shape_cast %289 : vector<8x128xf32> to vector<2x2x2x128xf32>
    %c1_339 = arith.constant 1 : index
    %c1_340 = arith.constant 1 : index
    %c0_341 = arith.constant 0 : index
    %c0_342 = arith.constant 0 : index
    %293 = vector.load %arg26[%c1_339, %c1_340, %c0_341, %c0_342] : memref<4x4x2x128xf32, #tpu.memory_space<vmem>>, vector<2x2x2x128xf32>
    tpu.vector_store %arg26[%c1_339, %c1_340, %c0_341, %c0_342], %292 {strides = array<i32>} : memref<4x4x2x128xf32, #tpu.memory_space<vmem>>, vector<2x2x2x128xf32>,
    %cst_343 = arith.constant 0.000000e+00 : f32
    %294 = vector.broadcast %cst_343 : f32 to vector<2x256xf32>
    %c0_344 = arith.constant 0 : index
    %c0_345 = arith.constant 0 : index
    %c0_346 = arith.constant 0 : index
    %c0_347 = arith.constant 0 : index
    %295 = vector.load %arg26[%c0_344, %c0_345, %c0_346, %c0_347] : memref<4x4x2x128xf32, #tpu.memory_space<vmem>>, vector<1x1x2x128xf32>
    %296 = vector.shape_cast %295 : vector<1x1x2x128xf32> to vector<2x128xf32>
    %c0_348 = arith.constant 0 : index
    %c0_349 = arith.constant 0 : index
    %c0_350 = arith.constant 0 : index
    %c0_351 = arith.constant 0 : index
    %297 = vector.load %arg13[%c0_348, %c0_349, %c0_350, %c0_351] : memref<3x3x128x256xf32, #tpu.memory_space<vmem>>, vector<1x1x128x256xf32>
    %298 = vector.shape_cast %297 : vector<1x1x128x256xf32> to vector<128x256xf32>
    %cst_352 = arith.constant dense<0.000000e+00> : vector<2x256xf32>
    %299 = tpu.matmul %296, %298, %cst_352 {dimension_numbers = #tpu.dot_dimension_numbers<[1], [0], [0], [1], [0, 0, 1, 1], [], []>} : vector<2x128xf32>, vector<128x256xf32>, vector<2x256xf32> -> vector<2x256xf32>
    %300 = arith.addf %294, %299 : vector<2x256xf32>
    %c0_353 = arith.constant 0 : index
    %c1_354 = arith.constant 1 : index
    %c0_355 = arith.constant 0 : index
    %c0_356 = arith.constant 0 : index
    %301 = vector.load %arg26[%c0_353, %c1_354, %c0_355, %c0_356] : memref<4x4x2x128xf32, #tpu.memory_space<vmem>>, vector<1x1x2x128xf32>
    %302 = vector.shape_cast %301 : vector<1x1x2x128xf32> to vector<2x128xf32>
    %c0_357 = arith.constant 0 : index
    %c1_358 = arith.constant 1 : index
    %c0_359 = arith.constant 0 : index
    %c0_360 = arith.constant 0 : index
    %303 = vector.load %arg13[%c0_357, %c1_358, %c0_359, %c0_360] : memref<3x3x128x256xf32, #tpu.memory_space<vmem>>, vector<1x1x128x256xf32>
    %304 = vector.shape_cast %303 : vector<1x1x128x256xf32> to vector<128x256xf32>
    %cst_361 = arith.constant dense<0.000000e+00> : vector<2x256xf32>
    %305 = tpu.matmul %302, %304, %cst_361 {dimension_numbers = #tpu.dot_dimension_numbers<[1], [0], [0], [1], [0, 0, 1, 1], [], []>} : vector<2x128xf32>, vector<128x256xf32>, vector<2x256xf32> -> vector<2x256xf32>
    %306 = arith.addf %300, %305 : vector<2x256xf32>
    %c0_362 = arith.constant 0 : index
    %c2_363 = arith.constant 2 : index
    %c0_364 = arith.constant 0 : index
    %c0_365 = arith.constant 0 : index
    %307 = vector.load %arg26[%c0_362, %c2_363, %c0_364, %c0_365] : memref<4x4x2x128xf32, #tpu.memory_space<vmem>>, vector<1x1x2x128xf32>
    %308 = vector.shape_cast %307 : vector<1x1x2x128xf32> to vector<2x128xf32>
    %c0_366 = arith.constant 0 : index
    %c2_367 = arith.constant 2 : index
    %c0_368 = arith.constant 0 : index
    %c0_369 = arith.constant 0 : index
    %309 = vector.load %arg13[%c0_366, %c2_367, %c0_368, %c0_369] : memref<3x3x128x256xf32, #tpu.memory_space<vmem>>, vector<1x1x128x256xf32>
    %310 = vector.shape_cast %309 : vector<1x1x128x256xf32> to vector<128x256xf32>
    %cst_370 = arith.constant dense<0.000000e+00> : vector<2x256xf32>
    %311 = tpu.matmul %308, %310, %cst_370 {dimension_numbers = #tpu.dot_dimension_numbers<[1], [0], [0], [1], [0, 0, 1, 1], [], []>} : vector<2x128xf32>, vector<128x256xf32>, vector<2x256xf32> -> vector<2x256xf32>
    %312 = arith.addf %306, %311 : vector<2x256xf32>
    %c1_371 = arith.constant 1 : index
    %c0_372 = arith.constant 0 : index
    %c0_373 = arith.constant 0 : index
    %c0_374 = arith.constant 0 : index
    %313 = vector.load %arg26[%c1_371, %c0_372, %c0_373, %c0_374] : memref<4x4x2x128xf32, #tpu.memory_space<vmem>>, vector<1x1x2x128xf32>
    %314 = vector.shape_cast %313 : vector<1x1x2x128xf32> to vector<2x128xf32>
    %c1_375 = arith.constant 1 : index
    %c0_376 = arith.constant 0 : index
    %c0_377 = arith.constant 0 : index
    %c0_378 = arith.constant 0 : index
    %315 = vector.load %arg13[%c1_375, %c0_376, %c0_377, %c0_378] : memref<3x3x128x256xf32, #tpu.memory_space<vmem>>, vector<1x1x128x256xf32>
    %316 = vector.shape_cast %315 : vector<1x1x128x256xf32> to vector<128x256xf32>
    %cst_379 = arith.constant dense<0.000000e+00> : vector<2x256xf32>
    %317 = tpu.matmul %314, %316, %cst_379 {dimension_numbers = #tpu.dot_dimension_numbers<[1], [0], [0], [1], [0, 0, 1, 1], [], []>} : vector<2x128xf32>, vector<128x256xf32>, vector<2x256xf32> -> vector<2x256xf32>
    %318 = arith.addf %312, %317 : vector<2x256xf32>
    %c1_380 = arith.constant 1 : index
    %c1_381 = arith.constant 1 : index
    %c0_382 = arith.constant 0 : index
    %c0_383 = arith.constant 0 : index
    %319 = vector.load %arg26[%c1_380, %c1_381, %c0_382, %c0_383] : memref<4x4x2x128xf32, #tpu.memory_space<vmem>>, vector<1x1x2x128xf32>
    %320 = vector.shape_cast %319 : vector<1x1x2x128xf32> to vector<2x128xf32>
    %c1_384 = arith.constant 1 : index
    %c1_385 = arith.constant 1 : index
    %c0_386 = arith.constant 0 : index
    %c0_387 = arith.constant 0 : index
    %321 = vector.load %arg13[%c1_384, %c1_385, %c0_386, %c0_387] : memref<3x3x128x256xf32, #tpu.memory_space<vmem>>, vector<1x1x128x256xf32>
    %322 = vector.shape_cast %321 : vector<1x1x128x256xf32> to vector<128x256xf32>
    %cst_388 = arith.constant dense<0.000000e+00> : vector<2x256xf32>
    %323 = tpu.matmul %320, %322, %cst_388 {dimension_numbers = #tpu.dot_dimension_numbers<[1], [0], [0], [1], [0, 0, 1, 1], [], []>} : vector<2x128xf32>, vector<128x256xf32>, vector<2x256xf32> -> vector<2x256xf32>
    %324 = arith.addf %318, %323 : vector<2x256xf32>
    %c1_389 = arith.constant 1 : index
    %c2_390 = arith.constant 2 : index
    %c0_391 = arith.constant 0 : index
    %c0_392 = arith.constant 0 : index
    %325 = vector.load %arg26[%c1_389, %c2_390, %c0_391, %c0_392] : memref<4x4x2x128xf32, #tpu.memory_space<vmem>>, vector<1x1x2x128xf32>
    %326 = vector.shape_cast %325 : vector<1x1x2x128xf32> to vector<2x128xf32>
    %c1_393 = arith.constant 1 : index
    %c2_394 = arith.constant 2 : index
    %c0_395 = arith.constant 0 : index
    %c0_396 = arith.constant 0 : index
    %327 = vector.load %arg13[%c1_393, %c2_394, %c0_395, %c0_396] : memref<3x3x128x256xf32, #tpu.memory_space<vmem>>, vector<1x1x128x256xf32>
    %328 = vector.shape_cast %327 : vector<1x1x128x256xf32> to vector<128x256xf32>
    %cst_397 = arith.constant dense<0.000000e+00> : vector<2x256xf32>
    %329 = tpu.matmul %326, %328, %cst_397 {dimension_numbers = #tpu.dot_dimension_numbers<[1], [0], [0], [1], [0, 0, 1, 1], [], []>} : vector<2x128xf32>, vector<128x256xf32>, vector<2x256xf32> -> vector<2x256xf32>
    %330 = arith.addf %324, %329 : vector<2x256xf32>
    %c2_398 = arith.constant 2 : index
    %c0_399 = arith.constant 0 : index
    %c0_400 = arith.constant 0 : index
    %c0_401 = arith.constant 0 : index
    %331 = vector.load %arg26[%c2_398, %c0_399, %c0_400, %c0_401] : memref<4x4x2x128xf32, #tpu.memory_space<vmem>>, vector<1x1x2x128xf32>
    %332 = vector.shape_cast %331 : vector<1x1x2x128xf32> to vector<2x128xf32>
    %c2_402 = arith.constant 2 : index
    %c0_403 = arith.constant 0 : index
    %c0_404 = arith.constant 0 : index
    %c0_405 = arith.constant 0 : index
    %333 = vector.load %arg13[%c2_402, %c0_403, %c0_404, %c0_405] : memref<3x3x128x256xf32, #tpu.memory_space<vmem>>, vector<1x1x128x256xf32>
    %334 = vector.shape_cast %333 : vector<1x1x128x256xf32> to vector<128x256xf32>
    %cst_406 = arith.constant dense<0.000000e+00> : vector<2x256xf32>
    %335 = tpu.matmul %332, %334, %cst_406 {dimension_numbers = #tpu.dot_dimension_numbers<[1], [0], [0], [1], [0, 0, 1, 1], [], []>} : vector<2x128xf32>, vector<128x256xf32>, vector<2x256xf32> -> vector<2x256xf32>
    %336 = arith.addf %330, %335 : vector<2x256xf32>
    %c2_407 = arith.constant 2 : index
    %c1_408 = arith.constant 1 : index
    %c0_409 = arith.constant 0 : index
    %c0_410 = arith.constant 0 : index
    %337 = vector.load %arg26[%c2_407, %c1_408, %c0_409, %c0_410] : memref<4x4x2x128xf32, #tpu.memory_space<vmem>>, vector<1x1x2x128xf32>
    %338 = vector.shape_cast %337 : vector<1x1x2x128xf32> to vector<2x128xf32>
    %c2_411 = arith.constant 2 : index
    %c1_412 = arith.constant 1 : index
    %c0_413 = arith.constant 0 : index
    %c0_414 = arith.constant 0 : index
    %339 = vector.load %arg13[%c2_411, %c1_412, %c0_413, %c0_414] : memref<3x3x128x256xf32, #tpu.memory_space<vmem>>, vector<1x1x128x256xf32>
    %340 = vector.shape_cast %339 : vector<1x1x128x256xf32> to vector<128x256xf32>
    %cst_415 = arith.constant dense<0.000000e+00> : vector<2x256xf32>
    %341 = tpu.matmul %338, %340, %cst_415 {dimension_numbers = #tpu.dot_dimension_numbers<[1], [0], [0], [1], [0, 0, 1, 1], [], []>} : vector<2x128xf32>, vector<128x256xf32>, vector<2x256xf32> -> vector<2x256xf32>
    %342 = arith.addf %336, %341 : vector<2x256xf32>
    %c2_416 = arith.constant 2 : index
    %c2_417 = arith.constant 2 : index
    %c0_418 = arith.constant 0 : index
    %c0_419 = arith.constant 0 : index
    %343 = vector.load %arg26[%c2_416, %c2_417, %c0_418, %c0_419] : memref<4x4x2x128xf32, #tpu.memory_space<vmem>>, vector<1x1x2x128xf32>
    %344 = vector.shape_cast %343 : vector<1x1x2x128xf32> to vector<2x128xf32>
    %c2_420 = arith.constant 2 : index
    %c2_421 = arith.constant 2 : index
    %c0_422 = arith.constant 0 : index
    %c0_423 = arith.constant 0 : index
    %345 = vector.load %arg13[%c2_420, %c2_421, %c0_422, %c0_423] : memref<3x3x128x256xf32, #tpu.memory_space<vmem>>, vector<1x1x128x256xf32>
    %346 = vector.shape_cast %345 : vector<1x1x128x256xf32> to vector<128x256xf32>
    %cst_424 = arith.constant dense<0.000000e+00> : vector<2x256xf32>
    %347 = tpu.matmul %344, %346, %cst_424 {dimension_numbers = #tpu.dot_dimension_numbers<[1], [0], [0], [1], [0, 0, 1, 1], [], []>} : vector<2x128xf32>, vector<128x256xf32>, vector<2x256xf32> -> vector<2x256xf32>
    %348 = arith.addf %342, %347 : vector<2x256xf32>
    %cst_425 = arith.constant dense<0.000000e+00> : vector<256xf32>
    %349 = vector.multi_reduction <add>, %348, %cst_425 [0] : vector<2x256xf32> to vector<256xf32>
    %350 = vector.shape_cast %349 : vector<256xf32> to vector<1x256xf32>
    %cst_426 = arith.constant 2.000000e+00 : f32
    %351 = vector.broadcast %cst_426 : f32 to vector<1x256xf32>
    %352 = arith.divf %350, %351 : vector<1x256xf32>
    %353 = vector.broadcast %352 : vector<1x256xf32> to vector<2x256xf32>
    %354 = arith.subf %348, %353 : vector<2x256xf32>
    %355 = arith.mulf %354, %354 : vector<2x256xf32>
    %cst_427 = arith.constant dense<0.000000e+00> : vector<256xf32>
    %356 = vector.multi_reduction <add>, %355, %cst_427 [0] : vector<2x256xf32> to vector<256xf32>
    %357 = vector.shape_cast %356 : vector<256xf32> to vector<1x256xf32>
    %cst_428 = arith.constant 2.000000e+00 : f32
    %358 = vector.broadcast %cst_428 : f32 to vector<1x256xf32>
    %359 = arith.divf %357, %358 : vector<1x256xf32>
    %c0_429 = arith.constant 0 : index
    %c0_430 = arith.constant 0 : index
    %360 = vector.load %arg14[%c0_429, %c0_430] : memref<1x256xf32, #tpu.memory_space<vmem>>, vector<1x256xf32>
    %cst_431 = arith.constant 9.99999974E-6 : f32
    %361 = vector.broadcast %cst_431 : f32 to vector<1x256xf32>
    %362 = arith.addf %359, %361 : vector<1x256xf32>
    %363 = math.rsqrt %362 : vector<1x256xf32>
    %364 = arith.mulf %360, %363 : vector<1x256xf32>
    %c0_432 = arith.constant 0 : index
    %c0_433 = arith.constant 0 : index
    %365 = vector.load %arg15[%c0_432, %c0_433] : memref<1x256xf32, #tpu.memory_space<vmem>>, vector<1x256xf32>
    %366 = arith.mulf %352, %364 : vector<1x256xf32>
    %367 = arith.subf %365, %366 : vector<1x256xf32>
    %368 = vector.broadcast %364 : vector<1x256xf32> to vector<2x256xf32>
    %369 = arith.mulf %348, %368 : vector<2x256xf32>
    %370 = vector.broadcast %367 : vector<1x256xf32> to vector<2x256xf32>
    %371 = arith.addf %369, %370 : vector<2x256xf32>
    %cst_434 = arith.constant 0.000000e+00 : f32
    %372 = vector.broadcast %cst_434 : f32 to vector<2x256xf32>
    %373 = arith.maximumf %371, %372 : vector<2x256xf32>
    %cst_435 = arith.constant 0.000000e+00 : f32
    %374 = vector.broadcast %cst_435 : f32 to vector<3x3x2x256xf32>
    %c0_436 = arith.constant 0 : index
    %c0_437 = arith.constant 0 : index
    %c0_438 = arith.constant 0 : index
    %c0_439 = arith.constant 0 : index
    %375 = vector.load %arg27[%c0_436, %c0_437, %c0_438, %c0_439] : memref<3x3x2x256xf32, #tpu.memory_space<vmem>>, vector<3x3x2x256xf32>
    tpu.vector_store %arg27[%c0_436, %c0_437, %c0_438, %c0_439], %374 {strides = array<i32>} : memref<3x3x2x256xf32, #tpu.memory_space<vmem>>, vector<3x3x2x256xf32>,
    %376 = vector.shape_cast %373 : vector<2x256xf32> to vector<1x1x2x256xf32>
    %c1_440 = arith.constant 1 : index
    %c1_441 = arith.constant 1 : index
    %c0_442 = arith.constant 0 : index
    %c0_443 = arith.constant 0 : index
    %377 = vector.load %arg27[%c1_440, %c1_441, %c0_442, %c0_443] : memref<3x3x2x256xf32, #tpu.memory_space<vmem>>, vector<1x1x2x256xf32>
    tpu.vector_store %arg27[%c1_440, %c1_441, %c0_442, %c0_443], %376 {strides = array<i32>} : memref<3x3x2x256xf32, #tpu.memory_space<vmem>>, vector<1x1x2x256xf32>,
    %cst_444 = arith.constant 0.000000e+00 : f32
    %378 = vector.broadcast %cst_444 : f32 to vector<2x512xf32>
    %c0_445 = arith.constant 0 : index
    %c0_446 = arith.constant 0 : index
    %c0_447 = arith.constant 0 : index
    %c0_448 = arith.constant 0 : index
    %379 = vector.load %arg27[%c0_445, %c0_446, %c0_447, %c0_448] : memref<3x3x2x256xf32, #tpu.memory_space<vmem>>, vector<1x1x2x256xf32>
    %380 = vector.shape_cast %379 : vector<1x1x2x256xf32> to vector<2x256xf32>
    %c0_449 = arith.constant 0 : index
    %c0_450 = arith.constant 0 : index
    %c0_451 = arith.constant 0 : index
    %c0_452 = arith.constant 0 : index
    %381 = vector.load %arg16[%c0_449, %c0_450, %c0_451, %c0_452] : memref<3x3x256x512xf32, #tpu.memory_space<vmem>>, vector<1x1x256x512xf32>
    %382 = vector.shape_cast %381 : vector<1x1x256x512xf32> to vector<256x512xf32>
    %cst_453 = arith.constant dense<0.000000e+00> : vector<2x512xf32>
    %383 = tpu.matmul %380, %382, %cst_453 {dimension_numbers = #tpu.dot_dimension_numbers<[1], [0], [0], [1], [0, 0, 1, 1], [], []>} : vector<2x256xf32>, vector<256x512xf32>, vector<2x512xf32> -> vector<2x512xf32>
    %384 = arith.addf %378, %383 : vector<2x512xf32>
    %c0_454 = arith.constant 0 : index
    %c1_455 = arith.constant 1 : index
    %c0_456 = arith.constant 0 : index
    %c0_457 = arith.constant 0 : index
    %385 = vector.load %arg27[%c0_454, %c1_455, %c0_456, %c0_457] : memref<3x3x2x256xf32, #tpu.memory_space<vmem>>, vector<1x1x2x256xf32>
    %386 = vector.shape_cast %385 : vector<1x1x2x256xf32> to vector<2x256xf32>
    %c0_458 = arith.constant 0 : index
    %c1_459 = arith.constant 1 : index
    %c0_460 = arith.constant 0 : index
    %c0_461 = arith.constant 0 : index
    %387 = vector.load %arg16[%c0_458, %c1_459, %c0_460, %c0_461] : memref<3x3x256x512xf32, #tpu.memory_space<vmem>>, vector<1x1x256x512xf32>
    %388 = vector.shape_cast %387 : vector<1x1x256x512xf32> to vector<256x512xf32>
    %cst_462 = arith.constant dense<0.000000e+00> : vector<2x512xf32>
    %389 = tpu.matmul %386, %388, %cst_462 {dimension_numbers = #tpu.dot_dimension_numbers<[1], [0], [0], [1], [0, 0, 1, 1], [], []>} : vector<2x256xf32>, vector<256x512xf32>, vector<2x512xf32> -> vector<2x512xf32>
    %390 = arith.addf %384, %389 : vector<2x512xf32>
    %c0_463 = arith.constant 0 : index
    %c2_464 = arith.constant 2 : index
    %c0_465 = arith.constant 0 : index
    %c0_466 = arith.constant 0 : index
    %391 = vector.load %arg27[%c0_463, %c2_464, %c0_465, %c0_466] : memref<3x3x2x256xf32, #tpu.memory_space<vmem>>, vector<1x1x2x256xf32>
    %392 = vector.shape_cast %391 : vector<1x1x2x256xf32> to vector<2x256xf32>
    %c0_467 = arith.constant 0 : index
    %c2_468 = arith.constant 2 : index
    %c0_469 = arith.constant 0 : index
    %c0_470 = arith.constant 0 : index
    %393 = vector.load %arg16[%c0_467, %c2_468, %c0_469, %c0_470] : memref<3x3x256x512xf32, #tpu.memory_space<vmem>>, vector<1x1x256x512xf32>
    %394 = vector.shape_cast %393 : vector<1x1x256x512xf32> to vector<256x512xf32>
    %cst_471 = arith.constant dense<0.000000e+00> : vector<2x512xf32>
    %395 = tpu.matmul %392, %394, %cst_471 {dimension_numbers = #tpu.dot_dimension_numbers<[1], [0], [0], [1], [0, 0, 1, 1], [], []>} : vector<2x256xf32>, vector<256x512xf32>, vector<2x512xf32> -> vector<2x512xf32>
    %396 = arith.addf %390, %395 : vector<2x512xf32>
    %c1_472 = arith.constant 1 : index
    %c0_473 = arith.constant 0 : index
    %c0_474 = arith.constant 0 : index
    %c0_475 = arith.constant 0 : index
    %397 = vector.load %arg27[%c1_472, %c0_473, %c0_474, %c0_475] : memref<3x3x2x256xf32, #tpu.memory_space<vmem>>, vector<1x1x2x256xf32>
    %398 = vector.shape_cast %397 : vector<1x1x2x256xf32> to vector<2x256xf32>
    %c1_476 = arith.constant 1 : index
    %c0_477 = arith.constant 0 : index
    %c0_478 = arith.constant 0 : index
    %c0_479 = arith.constant 0 : index
    %399 = vector.load %arg16[%c1_476, %c0_477, %c0_478, %c0_479] : memref<3x3x256x512xf32, #tpu.memory_space<vmem>>, vector<1x1x256x512xf32>
    %400 = vector.shape_cast %399 : vector<1x1x256x512xf32> to vector<256x512xf32>
    %cst_480 = arith.constant dense<0.000000e+00> : vector<2x512xf32>
    %401 = tpu.matmul %398, %400, %cst_480 {dimension_numbers = #tpu.dot_dimension_numbers<[1], [0], [0], [1], [0, 0, 1, 1], [], []>} : vector<2x256xf32>, vector<256x512xf32>, vector<2x512xf32> -> vector<2x512xf32>
    %402 = arith.addf %396, %401 : vector<2x512xf32>
    %c1_481 = arith.constant 1 : index
    %c1_482 = arith.constant 1 : index
    %c0_483 = arith.constant 0 : index
    %c0_484 = arith.constant 0 : index
    %403 = vector.load %arg27[%c1_481, %c1_482, %c0_483, %c0_484] : memref<3x3x2x256xf32, #tpu.memory_space<vmem>>, vector<1x1x2x256xf32>
    %404 = vector.shape_cast %403 : vector<1x1x2x256xf32> to vector<2x256xf32>
    %c1_485 = arith.constant 1 : index
    %c1_486 = arith.constant 1 : index
    %c0_487 = arith.constant 0 : index
    %c0_488 = arith.constant 0 : index
    %405 = vector.load %arg16[%c1_485, %c1_486, %c0_487, %c0_488] : memref<3x3x256x512xf32, #tpu.memory_space<vmem>>, vector<1x1x256x512xf32>
    %406 = vector.shape_cast %405 : vector<1x1x256x512xf32> to vector<256x512xf32>
    %cst_489 = arith.constant dense<0.000000e+00> : vector<2x512xf32>
    %407 = tpu.matmul %404, %406, %cst_489 {dimension_numbers = #tpu.dot_dimension_numbers<[1], [0], [0], [1], [0, 0, 1, 1], [], []>} : vector<2x256xf32>, vector<256x512xf32>, vector<2x512xf32> -> vector<2x512xf32>
    %408 = arith.addf %402, %407 : vector<2x512xf32>
    %c1_490 = arith.constant 1 : index
    %c2_491 = arith.constant 2 : index
    %c0_492 = arith.constant 0 : index
    %c0_493 = arith.constant 0 : index
    %409 = vector.load %arg27[%c1_490, %c2_491, %c0_492, %c0_493] : memref<3x3x2x256xf32, #tpu.memory_space<vmem>>, vector<1x1x2x256xf32>
    %410 = vector.shape_cast %409 : vector<1x1x2x256xf32> to vector<2x256xf32>
    %c1_494 = arith.constant 1 : index
    %c2_495 = arith.constant 2 : index
    %c0_496 = arith.constant 0 : index
    %c0_497 = arith.constant 0 : index
    %411 = vector.load %arg16[%c1_494, %c2_495, %c0_496, %c0_497] : memref<3x3x256x512xf32, #tpu.memory_space<vmem>>, vector<1x1x256x512xf32>
    %412 = vector.shape_cast %411 : vector<1x1x256x512xf32> to vector<256x512xf32>
    %cst_498 = arith.constant dense<0.000000e+00> : vector<2x512xf32>
    %413 = tpu.matmul %410, %412, %cst_498 {dimension_numbers = #tpu.dot_dimension_numbers<[1], [0], [0], [1], [0, 0, 1, 1], [], []>} : vector<2x256xf32>, vector<256x512xf32>, vector<2x512xf32> -> vector<2x512xf32>
    %414 = arith.addf %408, %413 : vector<2x512xf32>
    %c2_499 = arith.constant 2 : index
    %c0_500 = arith.constant 0 : index
    %c0_501 = arith.constant 0 : index
    %c0_502 = arith.constant 0 : index
    %415 = vector.load %arg27[%c2_499, %c0_500, %c0_501, %c0_502] : memref<3x3x2x256xf32, #tpu.memory_space<vmem>>, vector<1x1x2x256xf32>
    %416 = vector.shape_cast %415 : vector<1x1x2x256xf32> to vector<2x256xf32>
    %c2_503 = arith.constant 2 : index
    %c0_504 = arith.constant 0 : index
    %c0_505 = arith.constant 0 : index
    %c0_506 = arith.constant 0 : index
    %417 = vector.load %arg16[%c2_503, %c0_504, %c0_505, %c0_506] : memref<3x3x256x512xf32, #tpu.memory_space<vmem>>, vector<1x1x256x512xf32>
    %418 = vector.shape_cast %417 : vector<1x1x256x512xf32> to vector<256x512xf32>
    %cst_507 = arith.constant dense<0.000000e+00> : vector<2x512xf32>
    %419 = tpu.matmul %416, %418, %cst_507 {dimension_numbers = #tpu.dot_dimension_numbers<[1], [0], [0], [1], [0, 0, 1, 1], [], []>} : vector<2x256xf32>, vector<256x512xf32>, vector<2x512xf32> -> vector<2x512xf32>
    %420 = arith.addf %414, %419 : vector<2x512xf32>
    %c2_508 = arith.constant 2 : index
    %c1_509 = arith.constant 1 : index
    %c0_510 = arith.constant 0 : index
    %c0_511 = arith.constant 0 : index
    %421 = vector.load %arg27[%c2_508, %c1_509, %c0_510, %c0_511] : memref<3x3x2x256xf32, #tpu.memory_space<vmem>>, vector<1x1x2x256xf32>
    %422 = vector.shape_cast %421 : vector<1x1x2x256xf32> to vector<2x256xf32>
    %c2_512 = arith.constant 2 : index
    %c1_513 = arith.constant 1 : index
    %c0_514 = arith.constant 0 : index
    %c0_515 = arith.constant 0 : index
    %423 = vector.load %arg16[%c2_512, %c1_513, %c0_514, %c0_515] : memref<3x3x256x512xf32, #tpu.memory_space<vmem>>, vector<1x1x256x512xf32>
    %424 = vector.shape_cast %423 : vector<1x1x256x512xf32> to vector<256x512xf32>
    %cst_516 = arith.constant dense<0.000000e+00> : vector<2x512xf32>
    %425 = tpu.matmul %422, %424, %cst_516 {dimension_numbers = #tpu.dot_dimension_numbers<[1], [0], [0], [1], [0, 0, 1, 1], [], []>} : vector<2x256xf32>, vector<256x512xf32>, vector<2x512xf32> -> vector<2x512xf32>
    %426 = arith.addf %420, %425 : vector<2x512xf32>
    %c2_517 = arith.constant 2 : index
    %c2_518 = arith.constant 2 : index
    %c0_519 = arith.constant 0 : index
    %c0_520 = arith.constant 0 : index
    %427 = vector.load %arg27[%c2_517, %c2_518, %c0_519, %c0_520] : memref<3x3x2x256xf32, #tpu.memory_space<vmem>>, vector<1x1x2x256xf32>
    %428 = vector.shape_cast %427 : vector<1x1x2x256xf32> to vector<2x256xf32>
    %c2_521 = arith.constant 2 : index
    %c2_522 = arith.constant 2 : index
    %c0_523 = arith.constant 0 : index
    %c0_524 = arith.constant 0 : index
    %429 = vector.load %arg16[%c2_521, %c2_522, %c0_523, %c0_524] : memref<3x3x256x512xf32, #tpu.memory_space<vmem>>, vector<1x1x256x512xf32>
    %430 = vector.shape_cast %429 : vector<1x1x256x512xf32> to vector<256x512xf32>
    %cst_525 = arith.constant dense<0.000000e+00> : vector<2x512xf32>
    %431 = tpu.matmul %428, %430, %cst_525 {dimension_numbers = #tpu.dot_dimension_numbers<[1], [0], [0], [1], [0, 0, 1, 1], [], []>} : vector<2x256xf32>, vector<256x512xf32>, vector<2x512xf32> -> vector<2x512xf32>
    %432 = arith.addf %426, %431 : vector<2x512xf32>
    %cst_526 = arith.constant dense<0.000000e+00> : vector<512xf32>
    %433 = vector.multi_reduction <add>, %432, %cst_526 [0] : vector<2x512xf32> to vector<512xf32>
    %434 = vector.shape_cast %433 : vector<512xf32> to vector<1x512xf32>
    %cst_527 = arith.constant 2.000000e+00 : f32
    %435 = vector.broadcast %cst_527 : f32 to vector<1x512xf32>
    %436 = arith.divf %434, %435 : vector<1x512xf32>
    %437 = vector.broadcast %436 : vector<1x512xf32> to vector<2x512xf32>
    %438 = arith.subf %432, %437 : vector<2x512xf32>
    %439 = arith.mulf %438, %438 : vector<2x512xf32>
    %cst_528 = arith.constant dense<0.000000e+00> : vector<512xf32>
    %440 = vector.multi_reduction <add>, %439, %cst_528 [0] : vector<2x512xf32> to vector<512xf32>
    %441 = vector.shape_cast %440 : vector<512xf32> to vector<1x512xf32>
    %cst_529 = arith.constant 2.000000e+00 : f32
    %442 = vector.broadcast %cst_529 : f32 to vector<1x512xf32>
    %443 = arith.divf %441, %442 : vector<1x512xf32>
    %c0_530 = arith.constant 0 : index
    %c0_531 = arith.constant 0 : index
    %444 = vector.load %arg17[%c0_530, %c0_531] : memref<1x512xf32, #tpu.memory_space<vmem>>, vector<1x512xf32>
    %cst_532 = arith.constant 9.99999974E-6 : f32
    %445 = vector.broadcast %cst_532 : f32 to vector<1x512xf32>
    %446 = arith.addf %443, %445 : vector<1x512xf32>
    %447 = math.rsqrt %446 : vector<1x512xf32>
    %448 = arith.mulf %444, %447 : vector<1x512xf32>
    %c0_533 = arith.constant 0 : index
    %c0_534 = arith.constant 0 : index
    %449 = vector.load %arg18[%c0_533, %c0_534] : memref<1x512xf32, #tpu.memory_space<vmem>>, vector<1x512xf32>
    %450 = arith.mulf %436, %448 : vector<1x512xf32>
    %451 = arith.subf %449, %450 : vector<1x512xf32>
    %452 = vector.broadcast %448 : vector<1x512xf32> to vector<2x512xf32>
    %453 = arith.mulf %432, %452 : vector<2x512xf32>
    %454 = vector.broadcast %451 : vector<1x512xf32> to vector<2x512xf32>
    %455 = arith.addf %453, %454 : vector<2x512xf32>
    %cst_535 = arith.constant 0.000000e+00 : f32
    %456 = vector.broadcast %cst_535 : f32 to vector<2x512xf32>
    %457 = arith.maximumf %455, %456 : vector<2x512xf32>
    %c0_536 = arith.constant 0 : index
    %c0_537 = arith.constant 0 : index
    %458 = vector.load %arg19[%c0_536, %c0_537] : memref<512x10xf32, #tpu.memory_space<vmem>>, vector<512x10xf32>
    %cst_538 = arith.constant dense<0.000000e+00> : vector<2x10xf32>
    %459 = tpu.matmul %457, %458, %cst_538 {dimension_numbers = #tpu.dot_dimension_numbers<[1], [0], [0], [1], [0, 0, 1, 1], [], []>} : vector<2x512xf32>, vector<512x10xf32>, vector<2x10xf32> -> vector<2x10xf32>
    %c0_539 = arith.constant 0 : index
    %c0_540 = arith.constant 0 : index
    %460 = vector.load %arg20[%c0_539, %c0_540] : memref<1x10xf32, #tpu.memory_space<vmem>>, vector<1x10xf32>
    %461 = vector.broadcast %460 : vector<1x10xf32> to vector<2x10xf32>
    %462 = arith.addf %459, %461 : vector<2x10xf32>
    %c0_541 = arith.constant 0 : index
    %c0_542 = arith.constant 0 : index
    %463 = vector.load %arg21[%c0_541, %c0_542] : memref<2x10xf32, #tpu.memory_space<vmem>>, vector<2x10xf32>
    tpu.vector_store %arg21[%c0_541, %c0_542], %462 {strides = array<i32>} : memref<2x10xf32, #tpu.memory_space<vmem>>, vector<2x10xf32>,
    return
  }
}

</mosaic_0001>

<bundles_post_ra>
// kernel: forward.1
= control target key start
LH: loop header
LB: loop body
LE: loop exit
PB: predicated region body
PF: predicated region fallthrough
CT: control target
= control target key end

     0   :  { %s19782_s0 = inlined_call_operand.vmem [shape: f32[128,256], index: 0, kind: input, shape index: {}]   ;;  %s19783_s1 = inlined_call_operand.vmem [shape: f32[256,64], index: 1, kind: input, shape index: {}]   ;;  %s19784_s2 = inlined_call_operand.vmem [shape: f32[1,64], index: 2, kind: input, shape index: {}]   ;;  %s19785_s3 = inlined_call_operand.vmem [shape: f32[1,64], index: 3, kind: input, shape index: {}]   ;;  %s19786_s4 = inlined_call_operand.vmem [shape: f32[3,3,64,64], index: 4, kind: input, shape index: {}]   ;;  %s19787_s5 = inlined_call_operand.vmem [shape: f32[1,64], index: 5, kind: input, shape index: {}]   ;;  %s19788_s6 = inlined_call_operand.vmem [shape: f32[1,64], index: 6, kind: input, shape index: {}]   ;;  %s19789_s7 = inlined_call_operand.vmem [shape: f32[3,3,64,64], index: 7, kind: input, shape index: {}]   ;;  %s19790_s8 = inlined_call_operand.vmem [shape: f32[1,64], index: 8, kind: input, shape index: {}]   ;;  %s19791_s9 = inlined_call_operand.vmem [shape: f32[1,64], index: 9, kind: input, shape index: {}]   ;;  %s19792_s10 = inlined_call_operand.vmem [shape: f32[3,3,64,128], index: 10, kind: input, shape index: {}]   ;;  %s19793_s11 = inlined_call_operand.vmem [shape: f32[1,128], index: 11, kind: input, shape index: {}]   ;;  %s19794_s12 = inlined_call_operand.vmem [shape: f32[1,128], index: 12, kind: input, shape index: {}]   ;;  %s19795_s13 = inlined_call_operand.vmem [shape: f32[3,3,128,256], index: 13, kind: input, shape index: {}]   ;;  %s19796_s14 = inlined_call_operand.vmem [shape: f32[1,256], index: 14, kind: input, shape index: {}]   ;;  %s19797_s15 = inlined_call_operand.vmem [shape: f32[1,256], index: 15, kind: input, shape index: {}]   ;;  %s19798_s16 = inlined_call_operand.vmem [shape: f32[3,3,256,512], index: 16, kind: input, shape index: {}]   ;;  %s19799_s17 = inlined_call_operand.vmem [shape: f32[1,512], index: 17, kind: input, shape index: {}]   ;;  %s19800_s18 = inlined_call_operand.vmem [shape: f32[1,512], index: 18, kind: input, shape index: {}]   ;;  %s19801_s19 = inlined_call_operand.vmem [shape: f32[512,10], index: 19, kind: input, shape index: {}]   ;;  %s19802_s20 = inlined_call_operand.vmem [shape: f32[1,10], index: 20, kind: input, shape index: {}]   ;;  %s19803_s21 = inlined_call_operand.hbm [shape: f32[2,10], index: 21, kind: output, shape index: {}]  }
   0x1   :  { %19807 = sst [smem:[#allocation11_spill]] %s19782_s0 }
   0x2   :  { %19808 = sst [smem:[#allocation12_spill]] %s19783_s1 }
   0x3   :  { %19809 = sst [smem:[#allocation13_spill]] %s19784_s2 }
   0x4   :  { %19810 = sst [smem:[#allocation14_spill]] %s19785_s3 }
   0x5   :  { %19811 = sst [smem:[#allocation15_spill]] %s19786_s4 }
   0x6   :  { %19812 = sst [smem:[#allocation16_spill]] %s19787_s5 }
   0x7   :  { %s19813_s26 = sld [smem:[#allocation12_spill]] }
   0x8   :  { %s19814_s2 = sld [smem:[#allocation11_spill]] }
   0xd   :  { %v132_v0 = vld [vmem:[%s19813_s26 + $0xf8] sm:$0xff]  ;;  %v131_v2 = vld [vmem:[%s19813_s26 + $0xf0] sm:$0xff]  ;;  %v130_v4 = vld [vmem:[%s19813_s26 + $0xe8] sm:$0xff] }
   0xe   :  { %v116_v1 = vld [vmem:[%s19813_s26 + $0x78] sm:$0xff]  ;;  %11883 = vmatprep.subr.mxu0 %v132_v0  ;;  %v115_v3 = vld [vmem:[%s19813_s26 + $0x70] sm:$0xff]  ;;  %v114_v5 = vld [vmem:[%s19813_s26 + $0x68] sm:$0xff] }
   0xf   :  { %11884 = vmatpush3.msra.mxu0 %v116_v1  ;;  %v129_v6 = vld [vmem:[%s19813_s26 + $0xe0] sm:$0xff]  ;;  %v128_v8 = vld [vmem:[%s19813_s26 + $0xd8] sm:$0xff]  ;;  %v127_v10 = vld [vmem:[%s19813_s26 + $0xd0] sm:$0xff] }
  0x10   :  { %11885 = vmatprep.subr.mxu0 %v131_v2  ;;  %v113_v7 = vld [vmem:[%s19813_s26 + $0x60] sm:$0xff]  ;;  %v112_v9 = vld [vmem:[%s19813_s26 + $0x58] sm:$0xff]  ;;  %v111_v11 = vld [vmem:[%s19813_s26 + $0x50] sm:$0xff] }
  0x11   :  { %11886 = vmatpush3.msra.mxu0 %v115_v3  ;;  %v126_v12 = vld [vmem:[%s19813_s26 + $0xc8] sm:$0xff]  ;;  %v125_v15 = vld [vmem:[%s19813_s26 + $0xc0] sm:$0xff]  ;;  %v124_v17 = vld [vmem:[%s19813_s26 + $0xb8] sm:$0xff] }
  0x12   :  { %11887 = vmatprep.subr.mxu0 %v130_v4  ;;  %v70_v13 = vld [vmem:[%s19814_s2 + $0x8] sm:$0xff]  ;;  %v109_v16 = vld [vmem:[%s19813_s26 + $0x40] sm:$0xff]  ;;  %v108_v18 = vld [vmem:[%s19813_s26 + $0x38] sm:$0xff] }
  0x13   :  { %11888 = vmatpush3.msra.mxu0 %v114_v5  ;;  %v110_v14 = vld [vmem:[%s19813_s26 + $0x48] sm:$0xff]  ;;  %197 = vmatprep.mubr.f32.mxu0 %v70_v13  ;;  %v123_v19 = vld [vmem:[%s19813_s26 + $0xb0] sm:$0xff]  ;;  %v121_v23 = vld [vmem:[%s19813_s26 + $0xa0] sm:$0xff] }
  0x14   :  { %11889 = vmatprep.subr.mxu0 %v129_v6  ;;  %v107_v20 = vld [vmem:[%s19813_s26 + $0x30] sm:$0xff]  ;;  %v122_v21 = vld [vmem:[%s19813_s26 + $0xa8] sm:$0xff]  ;;  %v105_v24 = vld [vmem:[%s19813_s26 + $0x20] sm:$0xff] }
  0x15   :  { %11890 = vmatpush3.msra.mxu0 %v113_v7  ;;  %v106_v22 = vld [vmem:[%s19813_s26 + $0x28] sm:$0xff] }
  0x16   :  { %11891 = vmatprep.subr.mxu0 %v128_v8 }
  0x17   :  { %11892 = vmatpush3.msra.mxu0 %v112_v9 }
  0x18   :  { %11893 = vmatprep.subr.mxu0 %v127_v10 }
  0x19   :  { %11894 = vmatpush3.msra.mxu0 %v111_v11 }
  0x1a   :  { %11895 = vmatprep.subr.mxu0 %v126_v12 }
  0x1b   :  { %11896 = vmatpush3.msra.mxu0 %v110_v14 }
  0x1c   :  { %11897 = vmatprep.subr.mxu0 %v125_v15 }
  0x1d   :  { %11898 = vmatpush3.msra.mxu0 %v109_v16 }
  0x1e   :  { %11899 = vmatprep.subr.mxu0 %v124_v17 }
  0x1f   :  { %11900 = vmatpush3.msra.mxu0 %v108_v18 }
  0x20   :  { %11901 = vmatprep.subr.mxu0 %v123_v19 }
  0x21   :  { %11902 = vmatpush3.msra.mxu0 %v107_v20 }
  0x22   :  { %11903 = vmatprep.subr.mxu0 %v122_v21 }
  0x23   :  { %26 = vsyncpa [#allocation9], 0  ;;  %11904 = vmatpush3.msra.mxu0 %v106_v22  ;;  %v120_v25 = vld [vmem:[%s19813_s26 + $0x98] sm:$0xff]  ;;  %v119_v27 = vld [vmem:[%s19813_s26 + $0x90] sm:$0xff]  ;;  %vm278_vm0 = vcmask 523264   ;;  %vm807_vm1 = vcmask 517120  }
  0x24   :  { %11905 = vmatprep.subr.mxu0 %v121_v23  ;;  %v104_v26 = vld [vmem:[%s19813_s26 + $0x18] sm:$0xff]  ;;  %v103_v28 = vld [vmem:[%s19813_s26 + $0x10] sm:$0xff]  ;;  %v118_v29 = vld [vmem:[%s19813_s26 + $0x88] sm:$0xff]  ;;  %s19815_s4 = sld [smem:[#allocation15_spill]]  ;;  %vm12982_vm2 = vmmov 0   ;;  %vm7175_vm3 = vcmask 1041408  }
  0x25   :  { %11906 = vmatpush3.msra.mxu0 %v105_v24  ;;  %v102_v30 = vld [vmem:[%s19813_s26 + $0x8] sm:$0xff]  ;;  %v117_v31 = vld [vmem:[%s19813_s26 + $0x80] sm:$0xff]  ;;  %v72_v34 = vld [vmem:[%s19814_s2 + $0x18] sm:$0xff]  ;;  %s19816_s24 = sld [smem:[#allocation13_spill]]  ;;  %s12984_s5 = smov [#allocation8]   ;;  %vm10301_vm4 = vcmask 74752  }
  0x26   :  { %11907 = vmatprep.subr.mxu0 %v120_v25  ;;  %v101_v32 = vld [vmem:[%s19813_s26] sm:$0xff]  ;;  %v71_v35 = vld [vmem:[%s19814_s2 + $0x10] sm:$0xff]  ;;  %v74_v36 = vld [vmem:[%s19814_s2 + $0x28] sm:$0xff]  ;;  %s19817_s3 = sld [smem:[#allocation14_spill]]  ;;  %s10309_s22 = sshll.u32 %s12984_s5, 4  ;;  %s10310_s22 = int_to_ptr.vmem [resolvable:$true] %s10309_s22 }
  0x27   :  { %11908 = vmatpush3.msra.mxu0 %v104_v26  ;;  %v69_v33 = vld [vmem:[%s19814_s2] sm:$0xff]  ;;  %v76_v38 = vld [vmem:[%s19814_s2 + $0x38] sm:$0xff]  ;;  %v75_v39 = vld [vmem:[%s19814_s2 + $0x30] sm:$0xff]  ;;  %s19818_s30 = sld [smem:[#allocation16_spill]]  ;;  %p12963_p1 = scmp.lt.s32.totalorder %s10310_s22, %s10310_s22 }
  0x28   :  { %11909 = vmatprep.subr.mxu0 %v119_v27  ;;  %v73_v37 = vld [vmem:[%s19814_s2 + $0x20] sm:$0xff]  ;;  %v78_v40 = vld [vmem:[%s19814_s2 + $0x48] sm:$0xff]  ;;  %v80_v42 = vld [vmem:[%s19814_s2 + $0x58] sm:$0xff] }
  0x29   :  { %11910 = vmatpush3.msra.mxu0 %v103_v28  ;;  %v77_v41 = vld [vmem:[%s19814_s2 + $0x40] sm:$0xff]  ;;  %v79_v43 = vld [vmem:[%s19814_s2 + $0x50] sm:$0xff]  ;;  %v82_v44 = vld [vmem:[%s19814_s2 + $0x68] sm:$0xff] }
  0x2a   :  { %11911 = vmatprep.subr.mxu0 %v118_v29  ;;  %v81_v45 = vld [vmem:[%s19814_s2 + $0x60] sm:$0xff]  ;;  %v84_v46 = vld [vmem:[%s19814_s2 + $0x78] sm:$0xff]  ;;  %v83_v47 = vld [vmem:[%s19814_s2 + $0x70] sm:$0xff] }
  0x2b   :  { %11912 = vmatpush3.msra.mxu0 %v102_v30  ;;  %v86_v48 = vld [vmem:[%s19814_s2 + $0x88] sm:$0xff]  ;;  %v85_v49 = vld [vmem:[%s19814_s2 + $0x80] sm:$0xff]  ;;  %v88_v50 = vld [vmem:[%s19814_s2 + $0x98] sm:$0xff] }
  0x2c   :  { %11913 = vmatprep.subr.mxu0 %v117_v31  ;;  %v87_v51 = vld [vmem:[%s19814_s2 + $0x90] sm:$0xff]  ;;  %v90_v52 = vld [vmem:[%s19814_s2 + $0xa8] sm:$0xff]  ;;  %v89_v53 = vld [vmem:[%s19814_s2 + $0xa0] sm:$0xff] }
  0x2d   :  { %11914 = vmatpush3.msra.mxu0 %v101_v32  ;;  %v92_v54 = vld [vmem:[%s19814_s2 + $0xb8] sm:$0xff]  ;;  %v91_v55 = vld [vmem:[%s19814_s2 + $0xb0] sm:$0xff]  ;;  %v94_v56 = vld [vmem:[%s19814_s2 + $0xc8] sm:$0xff] }
  0x2e   :  { %198 = vmatmul.mubr.f32.vlgmr.msra.gmra.mxu0 %v69_v33  ;;  %v93_v57 = vld [vmem:[%s19814_s2 + $0xc0] sm:$0xff]  ;;  %v96_v58 = vld [vmem:[%s19814_s2 + $0xd8] sm:$0xff]  ;;  %v95_v59 = vld [vmem:[%s19814_s2 + $0xd0] sm:$0xff] }
  0x2f   :  { %202 = vmatprep.mubr.f32.mxu0 %v72_v34  ;;  %v98_v60 = vld [vmem:[%s19814_s2 + $0xe8] sm:$0xff]  ;;  %v97_v61 = vld [vmem:[%s19814_s2 + $0xe0] sm:$0xff]  ;;  %v100_v62 = vld [vmem:[%s19814_s2 + $0xf8] sm:$0xff] }
  0x30   :  { %v99_v63 = vld [vmem:[%s19814_s2 + $0xf0] sm:$0xff] }
  0x32   :  { %203 = vmatmul.mubr.f32.gmra.mxu0 %v71_v35 }
  0x33   :  { %207 = vmatprep.mubr.f32.mxu0 %v74_v36 }
  0x36   :  { %208 = vmatmul.mubr.f32.gmra.mxu0 %v73_v37 }
  0x37   :  { %212 = vmatprep.mubr.f32.mxu0 %v76_v38 }
  0x3a   :  { %213 = vmatmul.mubr.f32.gmra.mxu0 %v75_v39 }
  0x3b   :  { %217 = vmatprep.mubr.f32.mxu0 %v78_v40 }
  0x3e   :  { %218 = vmatmul.mubr.f32.gmra.mxu0 %v77_v41 }
  0x3f   :  { %222 = vmatprep.mubr.f32.mxu0 %v80_v42 }
  0x42   :  { %223 = vmatmul.mubr.f32.gmra.mxu0 %v79_v43 }
  0x43   :  { %227 = vmatprep.mubr.f32.mxu0 %v82_v44 }
  0x46   :  { %228 = vmatmul.mubr.f32.gmra.mxu0 %v81_v45 }
  0x47   :  { %232 = vmatprep.mubr.f32.mxu0 %v84_v46 }
  0x4a   :  { %233 = vmatmul.mubr.f32.gmra.mxu0 %v83_v47 }
  0x4b   :  { %237 = vmatprep.mubr.f32.mxu0 %v86_v48 }
  0x4e   :  { %238 = vmatmul.mubr.f32.gmra.mxu0 %v85_v49 }
  0x4f   :  { %242 = vmatprep.mubr.f32.mxu0 %v88_v50 }
  0x52   :  { %243 = vmatmul.mubr.f32.gmra.mxu0 %v87_v51 }
  0x53   :  { %247 = vmatprep.mubr.f32.mxu0 %v90_v52 }
  0x56   :  { %248 = vmatmul.mubr.f32.gmra.mxu0 %v89_v53 }
  0x57   :  { %252 = vmatprep.mubr.f32.mxu0 %v92_v54 }
  0x5a   :  { %253 = vmatmul.mubr.f32.gmra.mxu0 %v91_v55  ;;  %v13340_v55 = vld [vmem:[%s19815_s4 + $0x78] sm:$0xff] }
  0x5b   :  { %257 = vmatprep.mubr.f32.mxu0 %v94_v56  ;;  %v13345_v56 = vld [vmem:[%s19815_s4 + $0x70] sm:$0xff]  ;;  %12330 = vmatprep.subr.mxu1 %v13340_v55 }
  0x5c   :  { %12331 = vmatpush3.msra.mxu1 %v13340_v55 }
  0x5d   :  { %12332 = vmatprep.subr.mxu1 %v13345_v56 }
  0x5e   :  { %258 = vmatmul.mubr.f32.gmra.mxu0 %v93_v57  ;;  %v13350_v57 = vld [vmem:[%s19815_s4 + $0x1f8] sm:$0xff]  ;;  %12333 = vmatpush3.msra.mxu1 %v13345_v56 }
  0x5f   :  { %262 = vmatprep.mubr.f32.mxu0 %v96_v58  ;;  %12484 = vmatprep.subr.mxu0 %v13350_v57 }
  0x60   :  { %12485 = vmatpush3.msra.mxu0 %v13350_v57 }
  0x62   :  { %263 = vmatmul.mubr.f32.gmra.mxu0 %v95_v59 }
  0x63   :  { %267 = vmatprep.mubr.f32.mxu0 %v98_v60  ;;  %v12980_v60 = vmov 1983009808  }
  0x66   :  { %268 = vmatmul.mubr.f32.gmra.mxu0 %v97_v61  ;;  %v13356_v61 = vunpack.c.l.s4 %v12980_v60 }
  0x67   :  { %272 = vmatprep.mubr.f32.mxu0 %v100_v62  ;;  %v13363_v62 = vld [vmem:[%s19815_s4 + $0x1f0] sm:$0xff] }
  0x68   :  { %12486 = vmatprep.subr.mxu0 %v13363_v62 }
  0x69   :  { %12487 = vmatpush3.msra.mxu0 %v13363_v62 }
  0x6a   :  { %273 = vmatmul.mubr.f32.gmra.mxu0 %v99_v63  ;;  %v12981_v63 = vmov 0.0  }
  0x6b   :  { %988 = vst.msk [vmem:[#allocation3 + $0x2] sm:$0x3] %vm807_vm1, %v12981_v63  ;;  %989 = vst.msk [vmem:[#allocation3 + $0x4] sm:$0x3] %vm807_vm1, %v12981_v63 }
  0x6c   :  { %990 = vst.msk [vmem:[#allocation3 + $0x6] sm:$0x3] %vm807_vm1, %v12981_v63  ;;  %991 = vst.msk [vmem:[#allocation3 + $0x8] sm:$0x3] %vm807_vm1, %v12981_v63 }
  0x6d   :  { %987 = vst.msk [vmem:[#allocation3] sm:$0x3] %vm807_vm1, %v12981_v63  ;;  %992 = vst.msk [vmem:[#allocation3 + $0xa] sm:$0x3] %vm807_vm1, %v12981_v63 }
  0x6e   :  { %993 = vst.msk [vmem:[#allocation3 + $0xc] sm:$0x3] %vm807_vm1, %v12981_v63  ;;  %994 = vst.msk [vmem:[#allocation3 + $0xe] sm:$0x3] %vm807_vm1, %v12981_v63 }
  0x6f   :  { %995 = vst.msk [vmem:[#allocation3 + $0x10] sm:$0x3] %vm807_vm1, %v12981_v63  ;;  %996 = vst.msk [vmem:[#allocation3 + $0x12] sm:$0x3] %vm807_vm1, %v12981_v63 }
  0x70   :  { %997 = vst.msk [vmem:[#allocation3 + $0x14] sm:$0x3] %vm807_vm1, %v12981_v63  ;;  %998 = vst.msk [vmem:[#allocation3 + $0x16] sm:$0x3] %vm807_vm1, %v12981_v63 }
  0x71   :  { %999 = vst.msk [vmem:[#allocation3 + $0x18] sm:$0x3] %vm807_vm1, %v12981_v63  ;;  %1000 = vst.msk [vmem:[#allocation3 + $0x1a] sm:$0x3] %vm807_vm1, %v12981_v63 }
  0x72   :  { %1001 = vst.msk [vmem:[#allocation3 + $0x1c] sm:$0x3] %vm807_vm1, %v12981_v63  ;;  %1002 = vst.msk [vmem:[#allocation3 + $0x1e] sm:$0x3] %vm807_vm1, %v12981_v63 }
  0x73   :  { %1003 = vst.msk [vmem:[#allocation3 + $0x20] sm:$0x3] %vm807_vm1, %v12981_v63  ;;  %1004 = vst.msk [vmem:[#allocation3 + $0x22] sm:$0x3] %vm807_vm1, %v12981_v63 }
  0x74   :  { %1005 = vst.msk [vmem:[#allocation3 + $0x24] sm:$0x3] %vm807_vm1, %v12981_v63  ;;  %1006 = vst.msk [vmem:[#allocation3 + $0x26] sm:$0x3] %vm807_vm1, %v12981_v63 }
  0x75   :  { %1007 = vst.msk [vmem:[#allocation3 + $0x28] sm:$0x3] %vm807_vm1, %v12981_v63  ;;  %1008 = vst.msk [vmem:[#allocation3 + $0x2a] sm:$0x3] %vm807_vm1, %v12981_v63 }
  0x76   :  { %1009 = vst.msk [vmem:[#allocation3 + $0x2c] sm:$0x3] %vm807_vm1, %v12981_v63  ;;  %1010 = vst.msk [vmem:[#allocation3 + $0x2e] sm:$0x3] %vm807_vm1, %v12981_v63 }
  0x77   :  { %1011 = vst.msk [vmem:[#allocation3 + $0x30] sm:$0x3] %vm807_vm1, %v12981_v63  ;;  %1012 = vst.msk [vmem:[#allocation3 + $0x32] sm:$0x3] %vm807_vm1, %v12981_v63 }
  0x78   :  { %1013 = vst.msk [vmem:[#allocation3 + $0x34] sm:$0x3] %vm807_vm1, %v12981_v63  ;;  %1014 = vst.msk [vmem:[#allocation3 + $0x36] sm:$0x3] %vm807_vm1, %v12981_v63 }
  0x79   :  { %1015 = vst.msk [vmem:[#allocation3 + $0x38] sm:$0x3] %vm807_vm1, %v12981_v63  ;;  %1016 = vst.msk [vmem:[#allocation3 + $0x3a] sm:$0x3] %vm807_vm1, %v12981_v63 }
  0x7a   :  { %1017 = vst.msk [vmem:[#allocation3 + $0x3c] sm:$0x3] %vm807_vm1, %v12981_v63  ;;  %1018 = vst.msk [vmem:[#allocation3 + $0x3e] sm:$0x3] %vm807_vm1, %v12981_v63 }
  0x7b   :  { %1019 = vst.msk [vmem:[#allocation3 + $0x40] sm:$0x3] %vm807_vm1, %v12981_v63  ;;  %1020 = vst.msk [vmem:[#allocation3 + $0x42] sm:$0x3] %vm807_vm1, %v12981_v63 }
  0x7c   :  { %1021 = vst.msk [vmem:[#allocation3 + $0x44] sm:$0x3] %vm807_vm1, %v12981_v63  ;;  %1022 = vst.msk [vmem:[#allocation3 + $0x46] sm:$0x3] %vm807_vm1, %v12981_v63 }
  0x7d   :  { %2960 = vst.msk [vmem:[#allocation4] sm:$0x3] %vm807_vm1, %v12981_v63  ;;  %2961 = vst.msk [vmem:[#allocation4 + $0x2] sm:$0x3] %vm807_vm1, %v12981_v63 }
  0x7e   :  { %2962 = vst.msk [vmem:[#allocation4 + $0x4] sm:$0x3] %vm807_vm1, %v12981_v63  ;;  %2963 = vst.msk [vmem:[#allocation4 + $0x6] sm:$0x3] %vm807_vm1, %v12981_v63 }
  0x7f   :  { %2964 = vst.msk [vmem:[#allocation4 + $0x8] sm:$0x3] %vm807_vm1, %v12981_v63  ;;  %2965 = vst.msk [vmem:[#allocation4 + $0xa] sm:$0x3] %vm807_vm1, %v12981_v63 }
  0x80   :  { %2966 = vst.msk [vmem:[#allocation4 + $0xc] sm:$0x3] %vm807_vm1, %v12981_v63  ;;  %2967 = vst.msk [vmem:[#allocation4 + $0xe] sm:$0x3] %vm807_vm1, %v12981_v63 }
  0x81   :  { %2968 = vst.msk [vmem:[#allocation4 + $0x10] sm:$0x3] %vm807_vm1, %v12981_v63  ;;  %2969 = vst.msk [vmem:[#allocation4 + $0x12] sm:$0x3] %vm807_vm1, %v12981_v63 }
  0x82   :  { %2970 = vst.msk [vmem:[#allocation4 + $0x14] sm:$0x3] %vm807_vm1, %v12981_v63  ;;  %2971 = vst.msk [vmem:[#allocation4 + $0x16] sm:$0x3] %vm807_vm1, %v12981_v63 }
  0x83   :  { %2972 = vst.msk [vmem:[#allocation4 + $0x18] sm:$0x3] %vm807_vm1, %v12981_v63  ;;  %2973 = vst.msk [vmem:[#allocation4 + $0x1a] sm:$0x3] %vm807_vm1, %v12981_v63 }
  0x84   :  { %2974 = vst.msk [vmem:[#allocation4 + $0x1c] sm:$0x3] %vm807_vm1, %v12981_v63  ;;  %2975 = vst.msk [vmem:[#allocation4 + $0x1e] sm:$0x3] %vm807_vm1, %v12981_v63 }
  0x85   :  { %2976 = vst.msk [vmem:[#allocation4 + $0x20] sm:$0x3] %vm807_vm1, %v12981_v63  ;;  %2977 = vst.msk [vmem:[#allocation4 + $0x22] sm:$0x3] %vm807_vm1, %v12981_v63 }
  0x86   :  { %2978 = vst.msk [vmem:[#allocation4 + $0x24] sm:$0x3] %vm807_vm1, %v12981_v63  ;;  %2979 = vst.msk [vmem:[#allocation4 + $0x26] sm:$0x3] %vm807_vm1, %v12981_v63 }
  0x87   :  { %2980 = vst.msk [vmem:[#allocation4 + $0x28] sm:$0x3] %vm807_vm1, %v12981_v63  ;;  %2981 = vst.msk [vmem:[#allocation4 + $0x2a] sm:$0x3] %vm807_vm1, %v12981_v63 }
  0x88   :  { %2982 = vst.msk [vmem:[#allocation4 + $0x2c] sm:$0x3] %vm807_vm1, %v12981_v63  ;;  %2983 = vst.msk [vmem:[#allocation4 + $0x2e] sm:$0x3] %vm807_vm1, %v12981_v63 }
  0x89   :  { %2984 = vst.msk [vmem:[#allocation4 + $0x30] sm:$0x3] %vm807_vm1, %v12981_v63  ;;  %2985 = vst.msk [vmem:[#allocation4 + $0x32] sm:$0x3] %vm807_vm1, %v12981_v63 }
  0x8a   :  { %2986 = vst.msk [vmem:[#allocation4 + $0x34] sm:$0x3] %vm807_vm1, %v12981_v63  ;;  %2987 = vst.msk [vmem:[#allocation4 + $0x36] sm:$0x3] %vm807_vm1, %v12981_v63 }
  0x8b   :  { %2988 = vst.msk [vmem:[#allocation4 + $0x38] sm:$0x3] %vm807_vm1, %v12981_v63  ;;  %2989 = vst.msk [vmem:[#allocation4 + $0x3a] sm:$0x3] %vm807_vm1, %v12981_v63 }
  0x8c   :  { %2990 = vst.msk [vmem:[#allocation4 + $0x3c] sm:$0x3] %vm807_vm1, %v12981_v63  ;;  %2991 = vst.msk [vmem:[#allocation4 + $0x3e] sm:$0x3] %vm807_vm1, %v12981_v63 }
  0x8d   :  { %2992 = vst.msk [vmem:[#allocation4 + $0x40] sm:$0x3] %vm807_vm1, %v12981_v63  ;;  %2993 = vst.msk [vmem:[#allocation4 + $0x42] sm:$0x3] %vm807_vm1, %v12981_v63 }
  0x8e   :  { %2994 = vst.msk [vmem:[#allocation4 + $0x44] sm:$0x3] %vm807_vm1, %v12981_v63  ;;  %2995 = vst.msk [vmem:[#allocation4 + $0x46] sm:$0x3] %vm807_vm1, %v12981_v63 }
  0x8f   :  { %5020 = vst.msk [vmem:[#allocation5] sm:$0x3] %vm807_vm1, %v12981_v63  ;;  %5021 = vst.msk [vmem:[#allocation5 + $0x2] sm:$0x3] %vm807_vm1, %v12981_v63 }
  0x90   :  { %5022 = vst.msk [vmem:[#allocation5 + $0x4] sm:$0x3] %vm807_vm1, %v12981_v63  ;;  %5023 = vst.msk [vmem:[#allocation5 + $0x6] sm:$0x3] %vm807_vm1, %v12981_v63 }
  0x91   :  { %5024 = vst.msk [vmem:[#allocation5 + $0x8] sm:$0x3] %vm807_vm1, %v12981_v63  ;;  %5026 = vst.msk [vmem:[#allocation5 + $0xc] sm:$0x3] %vm807_vm1, %v12981_v63 }
  0x92   :  { %5027 = vst.msk [vmem:[#allocation5 + $0xe] sm:$0x3] %vm807_vm1, %v12981_v63  ;;  %5028 = vst.msk [vmem:[#allocation5 + $0x10] sm:$0x3] %vm807_vm1, %v12981_v63 }
  0x93   :  { %5029 = vst.msk [vmem:[#allocation5 + $0x12] sm:$0x3] %vm807_vm1, %v12981_v63  ;;  %5030 = vst.msk [vmem:[#allocation5 + $0x14] sm:$0x3] %vm807_vm1, %v12981_v63 }
  0x94   :  { %5032 = vst.msk [vmem:[#allocation5 + $0x18] sm:$0x3] %vm807_vm1, %v12981_v63  ;;  %5033 = vst.msk [vmem:[#allocation5 + $0x1a] sm:$0x3] %vm807_vm1, %v12981_v63 }
  0x95   :  { %5034 = vst.msk [vmem:[#allocation5 + $0x1c] sm:$0x3] %vm807_vm1, %v12981_v63  ;;  %5035 = vst.msk [vmem:[#allocation5 + $0x1e] sm:$0x3] %vm807_vm1, %v12981_v63 }
  0x96   :  { %5036 = vst.msk [vmem:[#allocation5 + $0x20] sm:$0x3] %vm807_vm1, %v12981_v63  ;;  %5038 = vst.msk [vmem:[#allocation5 + $0x24] sm:$0x3] %vm807_vm1, %v12981_v63 }
  0x97   :  { %5039 = vst.msk [vmem:[#allocation5 + $0x26] sm:$0x3] %vm807_vm1, %v12981_v63  ;;  %5040 = vst.msk [vmem:[#allocation5 + $0x28] sm:$0x3] %vm807_vm1, %v12981_v63 }
  0x98   :  { %5041 = vst.msk [vmem:[#allocation5 + $0x2a] sm:$0x3] %vm807_vm1, %v12981_v63  ;;  %5042 = vst.msk [vmem:[#allocation5 + $0x2c] sm:$0x3] %vm807_vm1, %v12981_v63 }
  0x99   :  { %5044 = vst.msk [vmem:[#allocation5 + $0x30] sm:$0x3] %vm807_vm1, %v12981_v63  ;;  %5045 = vst.msk [vmem:[#allocation5 + $0x32] sm:$0x3] %vm807_vm1, %v12981_v63 }
  0x9a   :  { %5046 = vst.msk [vmem:[#allocation5 + $0x34] sm:$0x3] %vm807_vm1, %v12981_v63  ;;  %5047 = vst.msk [vmem:[#allocation5 + $0x36] sm:$0x3] %vm807_vm1, %v12981_v63 }
  0x9b   :  { %5048 = vst.msk [vmem:[#allocation5 + $0x38] sm:$0x3] %vm807_vm1, %v12981_v63  ;;  %6167 = vst [vmem:[#allocation6] sm:$0x3] %v12981_v63 }
  0x9c   :  { %6168 = vst [vmem:[#allocation6 + $0x2] sm:$0x3] %v12981_v63  ;;  %6169 = vst [vmem:[#allocation6 + $0x4] sm:$0x3] %v12981_v63 }
  0x9d   :  { %6171 = vst [vmem:[#allocation6 + $0x8] sm:$0x3] %v12981_v63  ;;  %6172 = vst [vmem:[#allocation6 + $0xa] sm:$0x3] %v12981_v63 }
  0x9e   :  { %6173 = vst [vmem:[#allocation6 + $0xc] sm:$0x3] %v12981_v63  ;;  %6175 = vst [vmem:[#allocation6 + $0x10] sm:$0x3] %v12981_v63 }
  0x9f   :  { %6176 = vst [vmem:[#allocation6 + $0x12] sm:$0x3] %v12981_v63  ;;  %6177 = vst [vmem:[#allocation6 + $0x14] sm:$0x3] %v12981_v63 }
  0xa0   :  { %7287 = vst [vmem:[#allocation7] sm:$0xf] %v12981_v63  ;;  %7288 = vst [vmem:[#allocation7 + $0x4] sm:$0xf] %v12981_v63 }
  0xa1   :  { %7289 = vst [vmem:[#allocation7 + $0x8] sm:$0xf] %v12981_v63  ;;  %7290 = vst [vmem:[#allocation7 + $0xc] sm:$0xf] %v12981_v63 }
  0xa2   :  { %7291 = vst [vmem:[#allocation7 + $0x10] sm:$0xf] %v12981_v63  ;;  %7292 = vst [vmem:[#allocation7 + $0x14] sm:$0xf] %v12981_v63 }
  0xa3   :  { %7293 = vst [vmem:[#allocation7 + $0x18] sm:$0xf] %v12981_v63  ;;  %7294 = vst [vmem:[#allocation7 + $0x1c] sm:$0xf] %v12981_v63 }
  0xa4   :  { %7295 = vst [vmem:[#allocation7 + $0x20] sm:$0xf] %v12981_v63 }
  0xee   :  { %v11915_v0 = vpop.f32.mrf.mxu0 }
  0xf0   :  { %v11916_v1 = vpop.f32.mrf.mxu0 }
  0xf1   :  { %v13289_v18 = vadd.f32 %v11916_v1, %v11915_v0 }
  0xf2   :  { %v11918_v2 = vpop.f32.mrf.mxu0 }
  0xf3   :  { %v279_v24 = vsel %vm278_vm0, %v13289_v18, 0.0 }
  0xf4   :  { %v11919_v3 = vpop.f32.mrf.mxu0 }
  0xf5   :  { %v13287_v16 = vadd.f32 %v11919_v3, %v11918_v2  ;;  %v10322_v2 = vld [vmem:[%s19815_s4 + $0x68] sm:$0xff] }
  0xf6   :  { %v11921_v4 = vpop.f32.mrf.mxu0  ;;  %v10398_v3 = vld [vmem:[%s19815_s4 + $0x1e8] sm:$0xff]  ;;  %12334 = vmatprep.subr.mxu1 %v10322_v2 }
  0xf7   :  { %v280_v21 = vsel %vm278_vm0, %v13287_v16, 0.0  ;;  %12488 = vmatprep.subr.mxu0 %v10398_v3  ;;  %12335 = vmatpush3.msra.mxu1 %v10322_v2 }
  0xf8   :  { %v11922_v5 = vpop.f32.mrf.mxu0  ;;  %v281_v27 = vadd.f32 %v280_v21, %v279_v24  ;;  %12489 = vmatpush3.msra.mxu0 %v10398_v3 }
  0xf9   :  { %v13291_v19 = vadd.f32 %v11922_v5, %v11921_v4 }
  0xfa   :  { %v11924_v6 = vpop.f32.mrf.mxu0 }
  0xfb   :  { %v282_v25 = vsel %vm278_vm0, %v13291_v19, 0.0 }
  0xfc   :  { %v11925_v7 = vpop.f32.mrf.mxu0  ;;  %v283_v31 = vadd.f32 %v282_v25, %v281_v27  ;;  %v10319_v25 = vld [vmem:[%s19815_s4 + $0x50] sm:$0xff] }
  0xfd   :  { %v13295_v22 = vadd.f32 %v11925_v7, %v11924_v6  ;;  %v396_v6 = vlaneseq  ;;  %v10395_v27 = vld [vmem:[%s19815_s4 + $0x1d0] sm:$0xff] }
  0xfe   :  { %v11927_v8 = vpop.f32.mrf.mxu0 }
  0xff   :  { %v284_v29 = vsel %vm278_vm0, %v13295_v22, 0.0  ;;  %v13619_v24 = vshrl.u32 %v396_v6, 7 }
 0x100   :  { %v11928_v9 = vpop.f32.mrf.mxu0  ;;  %v285_v35 = vadd.f32 %v284_v29, %v283_v31  ;;  %v10318_v29 = vld [vmem:[%s19815_s4 + $0x48] sm:$0xff] }
 0x101   :  { %v13301_v26 = vadd.f32 %v11928_v9, %v11927_v8  ;;  %v10321_v9 = vld [vmem:[%s19815_s4 + $0x60] sm:$0xff]  ;;  %v10394_v31 = vld [vmem:[%s19815_s4 + $0x1c8] sm:$0xff] }
 0x102   :  { %v11930_v10 = vpop.f32.mrf.mxu0  ;;  %12336 = vmatprep.subr.mxu1 %v10321_v9 }
 0x103   :  { %v286_v33 = vsel %vm278_vm0, %v13301_v26, 0.0  ;;  %12337 = vmatpush3.msra.mxu1 %v10321_v9 }
 0x104   :  { %v11931_v11 = vpop.f32.mrf.mxu0  ;;  %v287_v39 = vadd.f32 %v286_v33, %v285_v35  ;;  %v1066_v33 = vld [vmem:[#allocation3 + $0x4] sm:$0x3]  ;;  %v1067_v35 = vld [vmem:[#allocation3 + $0x6] sm:$0x3] }
 0x105   :  { %v13305_v30 = vadd.f32 %v11931_v11, %v11930_v10  ;;  %v10397_v10 = vld [vmem:[%s19815_s4 + $0x1e0] sm:$0xff] }
 0x106   :  { %v11933_v12 = vpop.f32.mrf.mxu0  ;;  %12490 = vmatprep.subr.mxu0 %v10397_v10 }
 0x107   :  { %v288_v37 = vsel %vm278_vm0, %v13305_v30, 0.0  ;;  %12491 = vmatpush3.msra.mxu0 %v10397_v10 }
 0x108   :  { %v11934_v13 = vpop.f32.mrf.mxu0  ;;  %v289_v43 = vadd.f32 %v288_v37, %v287_v39 }
 0x109   :  { %v13309_v34 = vadd.f32 %v11934_v13, %v11933_v12  ;;  %v474_v13 = vunpack.c.0.s8 %v13356_v61 }
 0x10a   :  { %v11936_v14 = vpop.f32.mrf.mxu0 }
 0x10b   :  { %v290_v41 = vsel %vm278_vm0, %v13309_v34, 0.0  ;;  %v13636_v39 = vsub.s32 %v474_v13, %v13619_v24 }
 0x10c   :  { %v11937_v15 = vpop.f32.mrf.mxu0  ;;  %v291_v47 = vadd.f32 %v290_v41, %v289_v43 }
 0x10d   :  { %v13313_v38 = vadd.f32 %v11937_v15, %v11936_v14  ;;  %v10320_v15 = vld [vmem:[%s19815_s4 + $0x58] sm:$0xff] }
 0x10e   :  { %v11939_v17 = vpop.f32.mrf.mxu0  ;;  %12338 = vmatprep.subr.mxu1 %v10320_v15 }
 0x10f   :  { %v292_v45 = vsel %vm278_vm0, %v13313_v38, 0.0  ;;  %12339 = vmatpush3.msra.mxu1 %v10320_v15 }
 0x110   :  { %v11940_v20 = vpop.f32.mrf.mxu0  ;;  %v293_v51 = vadd.f32 %v292_v45, %v291_v47  ;;  %v10393_v47 = vld [vmem:[%s19815_s4 + $0x1c0] sm:$0xff]  ;;  %12340 = vmatprep.subr.mxu1 %v10319_v25 }
 0x111   :  { %v13317_v42 = vadd.f32 %v11940_v20, %v11939_v17  ;;  %v10396_v17 = vld [vmem:[%s19815_s4 + $0x1d8] sm:$0xff]  ;;  %12341 = vmatpush3.msra.mxu1 %v10319_v25 }
 0x112   :  { %v11942_v23 = vpop.f32.mrf.mxu0  ;;  %12492 = vmatprep.subr.mxu0 %v10396_v17  ;;  %12342 = vmatprep.subr.mxu1 %v10318_v29 }
 0x113   :  { %v294_v49 = vsel %vm278_vm0, %v13317_v42, 0.0  ;;  %12493 = vmatpush3.msra.mxu0 %v10396_v17  ;;  %12343 = vmatpush3.msra.mxu1 %v10318_v29 }
 0x114   :  { %v11943_v28 = vpop.f32.mrf.mxu0  ;;  %v13352_v58 = vadd.f32 %v294_v49, %v293_v51  ;;  %12494 = vmatprep.subr.mxu0 %v10395_v27 }
 0x115   :  { %v13321_v46 = vadd.f32 %v11943_v28, %v11942_v23  ;;  %12495 = vmatpush3.msra.mxu0 %v10395_v27 }
 0x116   :  { %v11945_v32 = vpop.f32.mrf.mxu0  ;;  %12496 = vmatprep.subr.mxu0 %v10394_v31 }
 0x117   :  { %v13333_v53 = vsel %vm278_vm0, %v13321_v46, 0.0  ;;  %12497 = vmatpush3.msra.mxu0 %v10394_v31 }
 0x118   :  { %v11946_v36 = vpop.f32.mrf.mxu0  ;;  %v297_v4 = vadd.f32 %v13333_v53, %v13352_v58  ;;  %v13655_v58 = vld [vmem:[%s19815_s4 + $0x38] sm:$0xff]  ;;  %12498 = vmatprep.subr.mxu0 %v10393_v47 }
 0x119   :  { %v13327_v50 = vadd.f32 %v11946_v36, %v11945_v32  ;;  %v1065_v32 = vld [vmem:[#allocation3 + $0x2] sm:$0x3]  ;;  %12499 = vmatpush3.msra.mxu0 %v10393_v47 }
 0x11a   :  { %v11948_v40 = vpop.f32.mrf.mxu0  ;;  %v1106_v41 = vcombine.low %v1065_v32, %v1066_v33 }
 0x11b   :  { %v298_v0 = vsel %vm278_vm0, %v13327_v50, 0.0 }
 0x11c   :  { %v11949_v44 = vpop.f32.mrf.mxu0  ;;  %v299_v11 = vadd.f32 %v298_v0, %v297_v4  ;;  %v1114_v51 = vrot.slane %v1106_v41, %v13636_v39 }
 0x11d   :  { %v13335_v54 = vadd.f32 %v11949_v44, %v11948_v40  ;;  %v1068_v40 = vld [vmem:[#allocation3 + $0x8] sm:$0x3]  ;;  %v10317_v44 = vld [vmem:[%s19815_s4 + $0x40] sm:$0xff] }
 0x11e   :  { %v13323_v48 = vpop.f32.mrf.mxu0  ;;  %v1107_v45 = vcombine.low %v1067_v35, %v1068_v40  ;;  %12344 = vmatprep.subr.mxu1 %v10317_v44 }
 0x11f   :  { %v300_v7 = vsel %vm278_vm0, %v13335_v54, 0.0  ;;  %12345 = vmatpush3.msra.mxu1 %v10317_v44 }
 0x120   :  { %v13329_v52 = vpop.f32.mrf.mxu0  ;;  %v301_v20 = vadd.f32 %v300_v7, %v299_v11  ;;  %v1121_v53 = vrot.slane %v1107_v45, %v13636_v39  ;;  %12352 = vmatprep.subr.mxu1 %v13655_v58 }
 0x121   :  { %v13581_v1 = vadd.f32 %v13329_v52, %v13323_v48 }
 0x122   :  { %v13354_v59 = vpop.f32.mrf.mxu0  ;;  %v1122_v57 = vcombine.low %v1114_v51, %v1121_v53 }
 0x123   :  { %v302_v14 = vsel %vm278_vm0, %v13581_v1, 0.0 }
 0x124   :  { %v11955_v5 = vpop.f32.mrf.mxu0  ;;  %v303_v36 = vadd.f32 %v302_v14, %v301_v20  ;;  %12346 = vmatprep.mubr.msk.f32.mxu1 %vm278_vm0, %v1122_v57 }
 0x125   :  { %v13598_v8 = vadd.f32 %v11955_v5, %v13354_v59 }
 0x126   :  { %v11957_v12 = vpop.f32.mrf.mxu0 }
 0x127   :  { %v304_v21 = vsel %vm278_vm0, %v13598_v8, 0.0 }
 0x128   :  { %v11958_v23 = vpop.f32.mrf.mxu0  ;;  %v305_v48 = vadd.f32 %v304_v21, %v303_v36 }
 0x129   :  { %v13627_v28 = vadd.f32 %v11958_v23, %v11957_v12 }
 0x12a   :  { %v11960_v37 = vpop.f32.mrf.mxu0 }
 0x12b   :  { %v306_v43 = vsel %vm278_vm0, %v13627_v28, 0.0 }
 0x12c   :  { %v11961_v49 = vpop.f32.mrf.mxu0  ;;  %v307_v55 = vadd.f32 %v306_v43, %v305_v48 }
 0x12d   :  { %v13647_v52 = vadd.f32 %v11961_v49, %v11960_v37 }
 0x12f   :  { %v308_v56 = vsel %vm278_vm0, %v13647_v52, 0.0 }
 0x130   :  { %v309_v59 = vadd.f32 %v308_v56, %v307_v55 }
 0x132   :  { %v310_v60 = vrot.slane %v309_v59, 4 }
 0x134   :  { %v311_v61 = vadd.f32 %v310_v60, %v309_v59 }
 0x136   :  { %v312_v62 = vrot.slane %v311_v61, 2 }
 0x138   :  { %v313_v0 = vadd.f32 %v312_v62, %v311_v61 }
 0x13a   :  { %v314_v2 = vrot.slane %v313_v0, 1 }
 0x13c   :  { %v315_v3 = vadd.f32 %v314_v2, %v313_v0 }
 0x13e   :  { %v13659_v4 = vmul.f32 0.0078125, %v315_v3 }
 0x140   :  { %v318_v5 = vsub.f32 %v13289_v18, %v13659_v4  ;;  %v319_v6 = vsub.f32 %v13287_v16, %v13659_v4  ;;  %v320_v7 = vsub.f32 %v13291_v19, %v13659_v4  ;;  %v321_v9 = vsub.f32 %v13295_v22, %v13659_v4 }
 0x141   :  { %v322_v12 = vsub.f32 %v13301_v26, %v13659_v4  ;;  %v323_v14 = vsub.f32 %v13305_v30, %v13659_v4  ;;  %v324_v23 = vsub.f32 %v13309_v34, %v13659_v4  ;;  %v325_v31 = vsub.f32 %v13313_v38, %v13659_v4 }
 0x142   :  { %v334_v10 = vmul.f32 %v318_v5, %v318_v5  ;;  %v335_v11 = vmul.f32 %v319_v6, %v319_v6  ;;  %v336_v13 = vmul.f32 %v320_v7, %v320_v7  ;;  %v337_v15 = vmul.f32 %v321_v9, %v321_v9 }
 0x143   :  { %v338_v25 = vmul.f32 %v322_v12, %v322_v12  ;;  %v339_v32 = vmul.f32 %v323_v14, %v323_v14  ;;  %v326_v36 = vsub.f32 %v13317_v42, %v13659_v4  ;;  %v340_v37 = vmul.f32 %v324_v23, %v324_v23 }
 0x144   :  { %v350_v17 = vsel %vm278_vm0, %v334_v10, 0.0  ;;  %v351_v20 = vsel %vm278_vm0, %v335_v11, 0.0  ;;  %v353_v27 = vsel %vm278_vm0, %v336_v13, 0.0  ;;  %v355_v33 = vsel %vm278_vm0, %v337_v15, 0.0 }
 0x145   :  { %v352_v21 = vadd.f32 %v351_v20, %v350_v17  ;;  %v357_v40 = vsel %vm278_vm0, %v338_v25, 0.0  ;;  %v327_v43 = vsub.f32 %v13321_v46, %v13659_v4  ;;  %v341_v44 = vmul.f32 %v325_v31, %v325_v31 }
 0x146   :  { %v359_v45 = vsel %vm278_vm0, %v339_v32, 0.0  ;;  %v328_v48 = vsub.f32 %v13327_v50, %v13659_v4  ;;  %v342_v49 = vmul.f32 %v326_v36, %v326_v36  ;;  %v361_v51 = vsel %vm278_vm0, %v340_v37, 0.0 }
 0x147   :  { %v354_v29 = vadd.f32 %v353_v27, %v352_v21  ;;  %v329_v55 = vsub.f32 %v13335_v54, %v13659_v4  ;;  %v343_v56 = vmul.f32 %v327_v43, %v327_v43  ;;  %v363_v57 = vsel %vm278_vm0, %v341_v44, 0.0 }
 0x148   :  { %v330_v60 = vsub.f32 %v13581_v1, %v13659_v4  ;;  %v344_v61 = vmul.f32 %v328_v48, %v328_v48  ;;  %v365_v62 = vsel %vm278_vm0, %v342_v49, 0.0  ;;  %v331_v2 = vsub.f32 %v13598_v8, %v13659_v4 }
 0x149   :  { %v356_v35 = vadd.f32 %v355_v33, %v354_v29  ;;  %v345_v3 = vmul.f32 %v329_v55, %v329_v55  ;;  %v367_v5 = vsel %vm278_vm0, %v343_v56, 0.0  ;;  %v332_v7 = vsub.f32 %v13627_v28, %v13659_v4 }
 0x14a   :  { %v346_v9 = vmul.f32 %v330_v60, %v330_v60  ;;  %v369_v10 = vsel %vm278_vm0, %v344_v61, 0.0  ;;  %v333_v12 = vsub.f32 %v13647_v52, %v13659_v4  ;;  %v347_v13 = vmul.f32 %v331_v2, %v331_v2 }
 0x14b   :  { %v358_v41 = vadd.f32 %v357_v40, %v356_v35  ;;  %v371_v14 = vsel %vm278_vm0, %v345_v3, 0.0  ;;  %v348_v17 = vmul.f32 %v332_v7, %v332_v7  ;;  %v13713_v48 = vsub.s32 0, %v13619_v24 }
 0x14c   :  { %v373_v20 = vsel %vm278_vm0, %v346_v9, 0.0  ;;  %v349_v23 = vmul.f32 %v333_v12, %v333_v12  ;;  %v375_v25 = vsel %vm278_vm0, %v347_v13, 0.0 }
 0x14d   :  { %v360_v47 = vadd.f32 %v359_v45, %v358_v41  ;;  %v377_v29 = vsel %vm278_vm0, %v348_v17, 0.0 }
 0x14e   :  { %v379_v32 = vsel %vm278_vm0, %v349_v23, 0.0 }
 0x14f   :  { %v362_v53 = vadd.f32 %v361_v51, %v360_v47  ;;  %v388_v47 = vld [vmem:[%s19816_s24] sm:$0x1] }
 0x151   :  { %v364_v59 = vadd.f32 %v363_v57, %v362_v53  ;;  %v392_v53 = vld [vmem:[%s19817_s3] sm:$0x1] }
 0x153   :  { %v366_v0 = vadd.f32 %v365_v62, %v364_v59 }
 0x155   :  { %v368_v6 = vadd.f32 %v367_v5, %v366_v0 }
 0x157   :  { %v370_v11 = vadd.f32 %v369_v10, %v368_v6 }
 0x159   :  { %v372_v15 = vadd.f32 %v371_v14, %v370_v11 }
 0x15b   :  { %v374_v21 = vadd.f32 %v373_v20, %v372_v15 }
 0x15d   :  { %v376_v27 = vadd.f32 %v375_v25, %v374_v21 }
 0x15f   :  { %v378_v31 = vadd.f32 %v377_v29, %v376_v27 }
 0x161   :  { %v380_v33 = vadd.f32 %v379_v32, %v378_v31 }
 0x163   :  { %v381_v35 = vrot.slane %v380_v33, 4 }
 0x165   :  { %v382_v36 = vadd.f32 %v381_v35, %v380_v33 }
 0x167   :  { %v383_v37 = vrot.slane %v382_v36, 2 }
 0x169   :  { %v384_v40 = vadd.f32 %v383_v37, %v382_v36 }
 0x16b   :  { %v385_v41 = vrot.slane %v384_v40, 1 }
 0x16d   :  { %v386_v43 = vadd.f32 %v385_v41, %v384_v40 }
 0x16f   :  { %v387_v44 = vmul.f32 0.0078125, %v386_v43 }
 0x171   :  { %v389_v45 = vadd.f32 1e-05, %v387_v44 }
 0x173   :  { %12920 = vrsqrt.f32 %v389_v45 }
 0x180   :  { %v12921_v49 = vpop.eup %12920 }
 0x181   :  { %v391_v51 = vmul.f32 %v12921_v49, %v388_v47 }
 0x183   :  { %v393_v55 = vmul.f32 %v391_v51, %v13659_v4  ;;  %v13720_v56 = vrot.slane %v391_v51, %v13713_v48 }
 0x185   :  { %v394_v57 = vsub.f32 %v392_v53, %v393_v55  ;;  %v414_v59 = vmul.f32 %v13598_v8, %v13720_v56  ;;  %v416_v60 = vmul.f32 %v13647_v52, %v13720_v56  ;;  %v401_v61 = vmul.f32 %v13289_v18, %v13720_v56 }
 0x186   :  { %v402_v62 = vmul.f32 %v13287_v16, %v13720_v56  ;;  %v403_v4 = vmul.f32 %v13291_v19, %v13720_v56  ;;  %v404_v2 = vmul.f32 %v13295_v22, %v13720_v56  ;;  %v405_v8 = vmul.f32 %v13301_v26, %v13720_v56 }
 0x187   :  { %v13731_v0 = vrot.slane %v394_v57, %v13713_v48  ;;  %v406_v52 = vmul.f32 %v13305_v30, %v13720_v56  ;;  %v407_v18 = vmul.f32 %v13309_v34, %v13720_v56  ;;  %v408_v16 = vmul.f32 %v13313_v38, %v13720_v56 }
 0x188   :  { %v13747_v3 = vmul.f32 %v13317_v42, %v13720_v56 }
 0x189   :  { %v436_v19 = vadd.f32 %v13731_v0, %v414_v59  ;;  %v438_v22 = vadd.f32 %v13731_v0, %v416_v60  ;;  %v423_v5 = vadd.f32 %v13731_v0, %v401_v61  ;;  %v424_v26 = vadd.f32 %v13731_v0, %v402_v62 }
 0x18a   :  { %v425_v30 = vadd.f32 %v13731_v0, %v403_v4  ;;  %v426_v6 = vadd.f32 %v13731_v0, %v404_v2  ;;  %v427_v34 = vadd.f32 %v13731_v0, %v405_v8  ;;  %v428_v38 = vadd.f32 %v13731_v0, %v406_v52 }
 0x18b   :  { %v452_v7 = vmax.f32 %v436_v19, 0.0  ;;  %v454_v9 = vmax.f32 %v438_v22, 0.0  ;;  %v439_v42 = vmax.f32 %v423_v5, 0.0  ;;  %v440_v10 = vmax.f32 %v424_v26, 0.0 }
 0x18c   :  { %v441_v11 = vmax.f32 %v425_v30, 0.0  ;;  %v442_v12 = vmax.f32 %v426_v6, 0.0  ;;  %v429_v13 = vadd.f32 %v13731_v0, %v407_v18  ;;  %v430_v14 = vadd.f32 %v13731_v0, %v408_v16 }
 0x18d   :  { %v692_v15 = vcombine.high %v452_v7, %v452_v7  ;;  %v699_v17 = vrot.slane %v452_v7, %v13636_v39  ;;  %v726_v20 = vcombine.high %v454_v9, %v454_v9  ;;  %v733_v21 = vrot.slane %v454_v9, %v13636_v39 }
 0x18e   :  { %v471_v23 = vcombine.high %v439_v42, %v439_v42  ;;  %v478_v25 = vrot.slane %v439_v42, %v13636_v39  ;;  %v488_v27 = vcombine.high %v440_v10, %v440_v10  ;;  %v495_v29 = vrot.slane %v440_v10, %v13636_v39 }
 0x18f   :  { %v706_v31 = vrot.slane %v692_v15, %v13636_v39  ;;  %v707_v32 = vcombine.high %v699_v17, %v699_v17  ;;  %v740_v33 = vrot.slane %v726_v20, %v13636_v39  ;;  %v741_v35 = vcombine.high %v733_v21, %v733_v21  ;;  %860 = vst.msk [vmem:[#allocation2 + $0x68] sm:$0x3] %vm807_vm1, %v699_v17 }
 0x190   :  { %868 = vst.msk [vmem:[#allocation2 + $0x78] sm:$0x3] %vm807_vm1, %v733_v21  ;;  %v485_v36 = vrot.slane %v471_v23, %v13636_v39  ;;  %v486_v37 = vcombine.high %v478_v25, %v478_v25  ;;  %v502_v40 = vrot.slane %v488_v27, %v13636_v39  ;;  %v503_v41 = vcombine.high %v495_v29, %v495_v29 }
 0x191   :  { %808 = vst.msk [vmem:[#allocation2] sm:$0x3] %vm807_vm1, %v478_v25  ;;  %812 = vst.msk [vmem:[#allocation2 + $0x8] sm:$0x3] %vm807_vm1, %v495_v29  ;;  %v708_v43 = vcombine.high %v706_v31, %v706_v31  ;;  %v742_v44 = vcombine.high %v740_v33, %v740_v33  ;;  %v505_v45 = vcombine.high %v441_v11, %v441_v11  ;;  %v443_v60 = vmax.f32 %v427_v34, 0.0 }
 0x192   :  { %861 = vst.msk [vmem:[#allocation2 + $0x6a] sm:$0x3] %vm807_vm1, %v707_v32  ;;  %862 = vst.msk [vmem:[#allocation2 + $0x6c] sm:$0x3] %vm807_vm1, %v706_v31  ;;  %v512_v47 = vrot.slane %v441_v11, %v13636_v39  ;;  %v487_v49 = vcombine.high %v485_v36, %v485_v36  ;;  %v504_v51 = vcombine.high %v502_v40, %v502_v40  ;;  %v444_v61 = vmax.f32 %v428_v38, 0.0 }
 0x193   :  { %869 = vst.msk [vmem:[#allocation2 + $0x7a] sm:$0x3] %vm807_vm1, %v741_v35  ;;  %870 = vst.msk [vmem:[#allocation2 + $0x7c] sm:$0x3] %vm807_vm1, %v740_v33  ;;  %v522_v53 = vcombine.high %v442_v12, %v442_v12  ;;  %v529_v55 = vrot.slane %v442_v12, %v13636_v39  ;;  %v519_v57 = vrot.slane %v505_v45, %v13636_v39  ;;  %v445_v2 = vmax.f32 %v429_v13, 0.0 }
 0x194   :  { %809 = vst.msk [vmem:[#allocation2 + $0x2] sm:$0x3] %vm807_vm1, %v486_v37  ;;  %810 = vst.msk [vmem:[#allocation2 + $0x4] sm:$0x3] %vm807_vm1, %v485_v36  ;;  %v520_v59 = vcombine.high %v512_v47, %v512_v47  ;;  %v446_v8 = vmax.f32 %v430_v14, 0.0  ;;  %v539_v18 = vcombine.high %v443_v60, %v443_v60  ;;  %v546_v16 = vrot.slane %v443_v60, %v13636_v39 }
 0x195   :  { %813 = vst.msk [vmem:[#allocation2 + $0xa] sm:$0x3] %vm807_vm1, %v503_v41  ;;  %814 = vst.msk [vmem:[#allocation2 + $0xc] sm:$0x3] %vm807_vm1, %v502_v40  ;;  %v536_v62 = vrot.slane %v522_v53, %v13636_v39  ;;  %v537_v4 = vcombine.high %v529_v55, %v529_v55  ;;  %v521_v52 = vcombine.high %v519_v57, %v519_v57 }
 0x196   :  { %863 = vst.msk [vmem:[#allocation2 + $0x6e] sm:$0x3] %vm807_vm1, %v708_v43  ;;  %871 = vst.msk [vmem:[#allocation2 + $0x7e] sm:$0x3] %vm807_vm1, %v742_v44  ;;  %v556_v19 = vcombine.high %v444_v61, %v444_v61  ;;  %v563_v5 = vrot.slane %v444_v61, %v13636_v39  ;;  %v573_v26 = vcombine.high %v445_v2, %v445_v2  ;;  %v886_v9 = vld [vmem:[#allocation2 + $0x68] sm:$0x3] }
 0x197   :  { %816 = vst.msk [vmem:[#allocation2 + $0x10] sm:$0x3] %vm807_vm1, %v512_v47  ;;  %811 = vst.msk [vmem:[#allocation2 + $0x6] sm:$0x3] %vm807_vm1, %v487_v49  ;;  %v538_v22 = vcombine.high %v536_v62, %v536_v62  ;;  %v580_v30 = vrot.slane %v445_v2, %v13636_v39  ;;  %v553_v6 = vrot.slane %v539_v18, %v13636_v39  ;;  %v920_v10 = vld [vmem:[#allocation2 + $0x78] sm:$0x3] }
 0x198   :  { %815 = vst.msk [vmem:[#allocation2 + $0xe] sm:$0x3] %vm807_vm1, %v504_v51  ;;  %820 = vst.msk [vmem:[#allocation2 + $0x18] sm:$0x3] %vm807_vm1, %v529_v55  ;;  %v554_v34 = vcombine.high %v546_v16, %v546_v16  ;;  %v570_v38 = vrot.slane %v556_v19, %v13636_v39  ;;  %v590_v7 = vcombine.high %v446_v8, %v446_v8  ;;  %v13805_v23 = vld [vmem:[#allocation2] sm:$0x3] }
 0x199   :  { %817 = vst.msk [vmem:[#allocation2 + $0x12] sm:$0x3] %vm807_vm1, %v520_v59  ;;  %818 = vst.msk [vmem:[#allocation2 + $0x14] sm:$0x3] %vm807_vm1, %v519_v57  ;;  %v903_v42 = vld [vmem:[#allocation2 + $0x6a] sm:$0x3]  ;;  %v571_v11 = vcombine.high %v563_v5, %v563_v5  ;;  %v587_v12 = vrot.slane %v573_v26, %v13636_v39  ;;  %v588_v13 = vcombine.high %v580_v30, %v580_v30 }
 0x19a   :  { %821 = vst.msk [vmem:[#allocation2 + $0x1a] sm:$0x3] %vm807_vm1, %v537_v4  ;;  %822 = vst.msk [vmem:[#allocation2 + $0x1c] sm:$0x3] %vm807_vm1, %v536_v62  ;;  %v597_v14 = vrot.slane %v446_v8, %v13636_v39  ;;  %v887_v15 = vld [vmem:[#allocation2 + $0x6c] sm:$0x3]  ;;  %v953_v21 = vmax.f32 %v886_v9, %v903_v42  ;;  %v555_v27 = vcombine.high %v553_v6, %v553_v6 }
 0x19b   :  { %819 = vst.msk [vmem:[#allocation2 + $0x16] sm:$0x3] %vm807_vm1, %v521_v52  ;;  %824 = vst.msk [vmem:[#allocation2 + $0x20] sm:$0x3] %vm807_vm1, %v546_v16  ;;  %v921_v17 = vld [vmem:[#allocation2 + $0x7c] sm:$0x3]  ;;  %v572_v29 = vcombine.high %v570_v38, %v570_v38  ;;  %v604_v31 = vrot.slane %v590_v7, %v13636_v39  ;;  %v589_v37 = vcombine.high %v587_v12, %v587_v12 }
 0x19c   :  { %823 = vst.msk [vmem:[#allocation2 + $0x1e] sm:$0x3] %vm807_vm1, %v538_v22  ;;  %828 = vst.msk [vmem:[#allocation2 + $0x28] sm:$0x3] %vm807_vm1, %v563_v5  ;;  %v937_v20 = vld [vmem:[#allocation2 + $0x7a] sm:$0x3]  ;;  %v605_v40 = vcombine.high %v597_v14, %v597_v14  ;;  %v431_v41 = vadd.f32 %v13731_v0, %v13747_v3  ;;  %v410_v53 = vmul.f32 %v13321_v46, %v13720_v56 }
 0x19d   :  { %832 = vst.msk [vmem:[#allocation2 + $0x30] sm:$0x3] %vm807_vm1, %v580_v30  ;;  %v13807_v25 = vld [vmem:[#allocation2 + $0x8] sm:$0x3]  ;;  %825 = vst.msk [vmem:[#allocation2 + $0x22] sm:$0x3] %vm807_vm1, %v554_v34  ;;  %v969_v35 = vmax.f32 %v920_v10, %v937_v20  ;;  %v606_v51 = vcombine.high %v604_v31, %v604_v31  ;;  %v411_v62 = vmul.f32 %v13327_v50, %v13720_v56 }
 0x19e   :  { %826 = vst.msk [vmem:[#allocation2 + $0x24] sm:$0x3] %vm807_vm1, %v553_v6  ;;  %830 = vst.msk [vmem:[#allocation2 + $0x2c] sm:$0x3] %vm807_vm1, %v570_v38  ;;  %v904_v32 = vld [vmem:[#allocation2 + $0x6e] sm:$0x3]  ;;  %v412_v16 = vmul.f32 %v13335_v54, %v13720_v56  ;;  %v432_v30 = vadd.f32 %v13731_v0, %v410_v53  ;;  %v413_v54 = vmul.f32 %v13581_v1, %v13720_v56 }
 0x19f   :  { %v938_v33 = vld [vmem:[#allocation2 + $0x7e] sm:$0x3]  ;;  %v889_v36 = vld [vmem:[#allocation2 + $0x2] sm:$0x3]  ;;  %829 = vst.msk [vmem:[#allocation2 + $0x2a] sm:$0x3] %vm807_vm1, %v571_v11  ;;  %v954_v43 = vmax.f32 %v887_v15, %v904_v32  ;;  %v985_v55 = vmax.f32 %v953_v21, %v969_v35  ;;  %v433_v9 = vadd.f32 %v13731_v0, %v411_v62  ;;  %v415_v32 = vmul.f32 %v13627_v28, %v13720_v56 }
 0x1a0   :  { %833 = vst.msk [vmem:[#allocation2 + $0x32] sm:$0x3] %vm807_vm1, %v588_v13  ;;  %834 = vst.msk [vmem:[#allocation2 + $0x34] sm:$0x3] %vm807_vm1, %v587_v12  ;;  %v970_v44 = vmax.f32 %v921_v17, %v938_v33  ;;  %v890_v45 = vld [vmem:[#allocation2 + $0x6] sm:$0x3]  ;;  %v939_v3 = vmax.f32 %v13805_v23, %v889_v36  ;;  %v434_v42 = vadd.f32 %v13731_v0, %v412_v16 }
 0x1a1   :  { %836 = vst.msk [vmem:[#allocation2 + $0x38] sm:$0x3] %vm807_vm1, %v597_v14  ;;  %v891_v47 = vld [vmem:[#allocation2 + $0xa] sm:$0x3]  ;;  %v892_v49 = vld [vmem:[#allocation2 + $0xe] sm:$0x3] }
 0x1a2   :  { %827 = vst.msk [vmem:[#allocation2 + $0x26] sm:$0x3] %vm807_vm1, %v555_v27  ;;  %831 = vst.msk [vmem:[#allocation2 + $0x2e] sm:$0x3] %vm807_vm1, %v572_v29  ;;  %v873_v57 = vld [vmem:[#allocation2 + $0x4] sm:$0x3]  ;;  %v941_v61 = vmax.f32 %v13807_v25, %v891_v47  ;;  %v986_v4 = vmax.f32 %v954_v43, %v970_v44 }
 0x1a3   :  { %838 = vst.msk [vmem:[#allocation2 + $0x3c] sm:$0x3] %vm807_vm1, %v604_v31  ;;  %v875_v59 = vld [vmem:[#allocation2 + $0xc] sm:$0x3]  ;;  %v906_v60 = vld [vmem:[#allocation2 + $0x10] sm:$0x3]  ;;  %v940_v46 = vmax.f32 %v873_v57, %v890_v45 }
 0x1a4   :  { %835 = vst.msk [vmem:[#allocation2 + $0x36] sm:$0x3] %vm807_vm1, %v589_v37  ;;  %837 = vst.msk [vmem:[#allocation2 + $0x3a] sm:$0x3] %vm807_vm1, %v605_v40  ;;  %v908_v2 = vld [vmem:[#allocation2 + $0x18] sm:$0x3]  ;;  %v942_v18 = vmax.f32 %v875_v59, %v892_v49  ;;  %v437_v49 = vadd.f32 %v13731_v0, %v415_v32 }
 0x1a5   :  { %v923_v8 = vld [vmem:[#allocation2 + $0x12] sm:$0x3]  ;;  %v925_v52 = vld [vmem:[#allocation2 + $0x1a] sm:$0x3]  ;;  %839 = vst.msk [vmem:[#allocation2 + $0x3e] sm:$0x3] %vm807_vm1, %v606_v51 }
 0x1a6   :  { %1038 = vst.msk [vmem:[#allocation3 + $0x36] sm:$0x3] %vm807_vm1, %v985_v55  ;;  %v907_v19 = vld [vmem:[#allocation2 + $0x14] sm:$0x3]  ;;  %v924_v22 = vld [vmem:[#allocation2 + $0x16] sm:$0x3]  ;;  %v955_v5 = vmax.f32 %v906_v60, %v923_v8  ;;  %v957_v26 = vmax.f32 %v908_v2, %v925_v52 }
 0x1a7   :  { %v447_v50 = vmax.f32 %v431_v41, 0.0  ;;  %1039 = vst.msk [vmem:[#allocation3 + $0x38] sm:$0x3] %vm807_vm1, %v986_v4  ;;  %v909_v6 = vld [vmem:[#allocation2 + $0x1c] sm:$0x3]  ;;  %v956_v38 = vmax.f32 %v907_v19, %v924_v22  ;;  %v435_v41 = vadd.f32 %v13731_v0, %v413_v54  ;;  %v448_v60 = vmax.f32 %v432_v30, 0.0 }
 0x1a8   :  { %v926_v34 = vld [vmem:[#allocation2 + $0x1e] sm:$0x3]  ;;  %v876_v7 = vld [vmem:[#allocation2 + $0x20] sm:$0x3]  ;;  %v971_v11 = vmax.f32 %v939_v3, %v955_v5  ;;  %v973_v12 = vmax.f32 %v941_v61, %v957_v26  ;;  %v877_v13 = vld [vmem:[#allocation2 + $0x24] sm:$0x3] }
 0x1a9   :  { %v958_v10 = vmax.f32 %v909_v6, %v926_v34  ;;  %v878_v14 = vld [vmem:[#allocation2 + $0x28] sm:$0x3]  ;;  %v893_v15 = vld [vmem:[#allocation2 + $0x22] sm:$0x3]  ;;  %v607_v17 = vcombine.high %v447_v50, %v447_v50  ;;  %v972_v20 = vmax.f32 %v940_v46, %v956_v38  ;;  %v879_v21 = vld [vmem:[#allocation2 + $0x2c] sm:$0x3]  ;;  %v614_v31 = vrot.slane %v447_v50, %v13636_v39 }
 0x1aa   :  { %v895_v23 = vld [vmem:[#allocation2 + $0x2a] sm:$0x3]  ;;  %v910_v25 = vld [vmem:[#allocation2 + $0x30] sm:$0x3]  ;;  %v911_v27 = vld [vmem:[#allocation2 + $0x34] sm:$0x3]  ;;  %v943_v29 = vmax.f32 %v876_v7, %v893_v15  ;;  %v624_v0 = vcombine.high %v448_v60, %v448_v60 }
 0x1ab   :  { %v974_v33 = vmax.f32 %v942_v18, %v958_v10  ;;  %1024 = vst.msk [vmem:[#allocation3 + $0xe] sm:$0x3] %vm807_vm1, %v971_v11  ;;  %1026 = vst.msk [vmem:[#allocation3 + $0x12] sm:$0x3] %vm807_vm1, %v973_v12  ;;  %v894_v1 = vld [vmem:[#allocation2 + $0x26] sm:$0x3]  ;;  %v945_v37 = vmax.f32 %v878_v14, %v895_v23  ;;  %v621_v40 = vrot.slane %v607_v17, %v13636_v39 }
 0x1ac   :  { %v896_v35 = vld [vmem:[#allocation2 + $0x2e] sm:$0x3]  ;;  %v912_v36 = vld [vmem:[#allocation2 + $0x38] sm:$0x3]  ;;  %1025 = vst.msk [vmem:[#allocation3 + $0x10] sm:$0x3] %vm807_vm1, %v972_v20  ;;  %v944_v47 = vmax.f32 %v877_v13, %v894_v1  ;;  %v622_v56 = vcombine.high %v614_v31, %v614_v31  ;;  %v631_v18 = vrot.slane %v448_v60, %v13636_v39  ;;  %v638_v22 = vrot.slane %v624_v0, %v13636_v39 }
 0x1ad   :  { %v927_v43 = vld [vmem:[#allocation2 + $0x32] sm:$0x3]  ;;  %v928_v44 = vld [vmem:[#allocation2 + $0x36] sm:$0x3]  ;;  %v929_v45 = vld [vmem:[#allocation2 + $0x3a] sm:$0x3]  ;;  %v946_v28 = vmax.f32 %v879_v21, %v896_v35  ;;  %v623_v4 = vcombine.high %v621_v40, %v621_v40 }
 0x1ae   :  { %840 = vst.msk [vmem:[#allocation2 + $0x40] sm:$0x3] %vm807_vm1, %v614_v31  ;;  %1027 = vst.msk [vmem:[#allocation3 + $0x14] sm:$0x3] %vm807_vm1, %v974_v33  ;;  %v913_v51 = vld [vmem:[#allocation2 + $0x3c] sm:$0x3]  ;;  %v959_v55 = vmax.f32 %v910_v25, %v927_v43  ;;  %v960_v57 = vmax.f32 %v911_v27, %v928_v44  ;;  %v961_v59 = vmax.f32 %v912_v36, %v929_v45 }
 0x1af   :  { %v930_v53 = vld [vmem:[#allocation2 + $0x3e] sm:$0x3]  ;;  %842 = vst.msk [vmem:[#allocation2 + $0x44] sm:$0x3] %vm807_vm1, %v621_v40  ;;  %v449_v61 = vmax.f32 %v433_v9, 0.0  ;;  %v450_v62 = vmax.f32 %v434_v42, 0.0  ;;  %v639_v50 = vcombine.high %v631_v18, %v631_v18  ;;  %v640_v42 = vcombine.high %v638_v22, %v638_v22 }
 0x1b0   :  { %v962_v3 = vmax.f32 %v913_v51, %v930_v53  ;;  %841 = vst.msk [vmem:[#allocation2 + $0x42] sm:$0x3] %vm807_vm1, %v622_v56  ;;  %v975_v2 = vmax.f32 %v943_v29, %v959_v55  ;;  %v976_v8 = vmax.f32 %v944_v47, %v960_v57  ;;  %v977_v52 = vmax.f32 %v945_v37, %v961_v59  ;;  %v1062_v44 = vld [vmem:[%s19815_s4 + $0x30] sm:$0xff] }
 0x1b1   :  { %v641_v16 = vcombine.high %v449_v61, %v449_v61  ;;  %v648_v19 = vrot.slane %v449_v61, %v13636_v39  ;;  %843 = vst.msk [vmem:[#allocation2 + $0x46] sm:$0x3] %vm807_vm1, %v623_v4  ;;  %v658_v5 = vcombine.high %v450_v62, %v450_v62  ;;  %v665_v26 = vrot.slane %v450_v62, %v13636_v39  ;;  %v1061_v61 = vld [vmem:[%s19815_s4 + $0x28] sm:$0xff] }
 0x1b2   :  { %v978_v46 = vmax.f32 %v946_v28, %v962_v3  ;;  %1028 = vst.msk [vmem:[#allocation3 + $0x1a] sm:$0x3] %vm807_vm1, %v975_v2  ;;  %1029 = vst.msk [vmem:[#allocation3 + $0x1c] sm:$0x3] %vm807_vm1, %v976_v8  ;;  %v451_v30 = vmax.f32 %v435_v41, 0.0  ;;  %v453_v38 = vmax.f32 %v437_v49, 0.0 }
 0x1b3   :  { %1030 = vst.msk [vmem:[#allocation3 + $0x1e] sm:$0x3] %vm807_vm1, %v977_v52  ;;  %v655_v6 = vrot.slane %v641_v16, %v13636_v39  ;;  %v656_v34 = vcombine.high %v648_v19, %v648_v19  ;;  %844 = vst.msk [vmem:[#allocation2 + $0x48] sm:$0x3] %vm807_vm1, %v631_v18  ;;  %v1069_v7 = vld [vmem:[#allocation3 + $0xe] sm:$0x3]  ;;  %v672_v54 = vrot.slane %v658_v5, %v13636_v39 }
 0x1b4   :  { %1031 = vst.msk [vmem:[#allocation3 + $0x20] sm:$0x3] %vm807_vm1, %v978_v46  ;;  %848 = vst.msk [vmem:[#allocation2 + $0x50] sm:$0x3] %vm807_vm1, %v648_v19  ;;  %v1070_v9 = vld [vmem:[#allocation3 + $0x10] sm:$0x3]  ;;  %v673_v10 = vcombine.high %v665_v26, %v665_v26  ;;  %v675_v11 = vcombine.high %v451_v30, %v451_v30  ;;  %v682_v17 = vrot.slane %v451_v30, %v13636_v39 }
 0x1b5   :  { %846 = vst.msk [vmem:[#allocation2 + $0x4c] sm:$0x3] %vm807_vm1, %v638_v22  ;;  %852 = vst.msk [vmem:[#allocation2 + $0x58] sm:$0x3] %vm807_vm1, %v665_v26  ;;  %v1071_v12 = vld [vmem:[#allocation3 + $0x12] sm:$0x3]  ;;  %v1123_v14 = vcombine.low %v1069_v7, %v1070_v9  ;;  %v657_v15 = vcombine.high %v655_v6, %v655_v6  ;;  %v709_v20 = vcombine.high %v453_v38, %v453_v38 }
 0x1b6   :  { %v1072_v13 = vld [vmem:[#allocation3 + $0x14] sm:$0x3]  ;;  %845 = vst.msk [vmem:[#allocation2 + $0x4a] sm:$0x3] %vm807_vm1, %v639_v50  ;;  %849 = vst.msk [vmem:[#allocation2 + $0x52] sm:$0x3] %vm807_vm1, %v656_v34  ;;  %v674_v23 = vcombine.high %v672_v54, %v672_v54  ;;  %v689_v25 = vrot.slane %v675_v11, %v13636_v39  ;;  %v716_v27 = vrot.slane %v453_v38, %v13636_v39 }
 0x1b7   :  { %850 = vst.msk [vmem:[#allocation2 + $0x54] sm:$0x3] %vm807_vm1, %v655_v6  ;;  %v1124_v21 = vcombine.low %v1071_v12, %v1072_v13  ;;  %847 = vst.msk [vmem:[#allocation2 + $0x4e] sm:$0x3] %vm807_vm1, %v640_v42  ;;  %v1131_v29 = vrot.slane %v1123_v14, %v13636_v39  ;;  %v690_v31 = vcombine.high %v682_v17, %v682_v17  ;;  %v13883_v1 = vld [vmem:[#allocation2 + $0x42] sm:$0x3] }
 0x1b8   :  { %853 = vst.msk [vmem:[#allocation2 + $0x5a] sm:$0x3] %vm807_vm1, %v673_v10  ;;  %854 = vst.msk [vmem:[#allocation2 + $0x5c] sm:$0x3] %vm807_vm1, %v672_v54  ;;  %v723_v32 = vrot.slane %v709_v20, %v13636_v39  ;;  %v13885_v35 = vld [vmem:[#allocation2 + $0x46] sm:$0x3]  ;;  %v691_v36 = vcombine.high %v689_v25, %v689_v25  ;;  %v724_v37 = vcombine.high %v716_v27, %v716_v27 }
 0x1b9   :  { %851 = vst.msk [vmem:[#allocation2 + $0x56] sm:$0x3] %vm807_vm1, %v657_v15  ;;  %856 = vst.msk [vmem:[#allocation2 + $0x60] sm:$0x3] %vm807_vm1, %v682_v17  ;;  %v1138_v33 = vrot.slane %v1124_v21, %v13636_v39  ;;  %v2479_v40 = vld [vmem:[#allocation3 + $0x1a] sm:$0x3] }
 0x1ba   :  { %855 = vst.msk [vmem:[#allocation2 + $0x5e] sm:$0x3] %vm807_vm1, %v674_v23  ;;  %858 = vst.msk [vmem:[#allocation2 + $0x64] sm:$0x3] %vm807_vm1, %v689_v25  ;;  %v2480_v41 = vld [vmem:[#allocation3 + $0x1c] sm:$0x3]  ;;  %v725_v45 = vcombine.high %v723_v32, %v723_v32 }
 0x1bb   :  { %864 = vst.msk [vmem:[#allocation2 + $0x70] sm:$0x3] %vm807_vm1, %v716_v27  ;;  %v2481_v43 = vld [vmem:[#allocation3 + $0x1e] sm:$0x3]  ;;  %857 = vst.msk [vmem:[#allocation2 + $0x62] sm:$0x3] %vm807_vm1, %v690_v31  ;;  %v1139_v47 = vcombine.low %v1131_v29, %v1138_v33  ;;  %v2520_v56 = vcombine.low %v2479_v40, %v2480_v41 }
 0x1bc   :  { %866 = vst.msk [vmem:[#allocation2 + $0x74] sm:$0x3] %vm807_vm1, %v723_v32  ;;  %v2482_v28 = vld [vmem:[#allocation3 + $0x20] sm:$0x3]  ;;  %v1073_v49 = vld [vmem:[#allocation3 + $0x1a] sm:$0x3] }
 0x1bd   :  { %v1074_v51 = vld [vmem:[#allocation3 + $0x1c] sm:$0x3]  ;;  %v880_v53 = vld [vmem:[#allocation2 + $0x40] sm:$0x3]  ;;  %859 = vst.msk [vmem:[#allocation2 + $0x66] sm:$0x3] %vm807_vm1, %v691_v36  ;;  %v2521_v55 = vcombine.low %v2481_v43, %v2482_v28  ;;  %12347 = vmatmul.mubr.msk.f32.vlgmr.msra.gmra.mxu1 %vm278_vm0, %v1139_v47  ;;  %v2528_v62 = vrot.slane %v2520_v56, %v13636_v39 }
 0x1be   :  { %865 = vst.msk [vmem:[#allocation2 + $0x72] sm:$0x3] %vm807_vm1, %v724_v37  ;;  %v1075_v57 = vld [vmem:[#allocation3 + $0x1e] sm:$0x3]  ;;  %v1076_v59 = vld [vmem:[#allocation3 + $0x20] sm:$0x3]  ;;  %v1140_v60 = vcombine.low %v1073_v49, %v1074_v51  ;;  %12353 = vmatpush3.msra.mxu1 %v13655_v58  ;;  %v947_v22 = vmax.f32 %v880_v53, %v13883_v1 }
 0x1bf   :  { %v881_v3 = vld [vmem:[#allocation2 + $0x44] sm:$0x3]  ;;  %867 = vst.msk [vmem:[#allocation2 + $0x76] sm:$0x3] %vm807_vm1, %v725_v45  ;;  %v1141_v4 = vcombine.low %v1075_v57, %v1076_v59  ;;  %v882_v2 = vld [vmem:[#allocation2 + $0x48] sm:$0x3]  ;;  %v2535_v0 = vrot.slane %v2521_v55, %v13636_v39  ;;  %12354 = vmatprep.subr.mxu1 %v1062_v44 }
 0x1c0   :  { %v883_v8 = vld [vmem:[#allocation2 + $0x4c] sm:$0x3]  ;;  %v899_v52 = vld [vmem:[#allocation2 + $0x4a] sm:$0x3]  ;;  %v1148_v46 = vrot.slane %v1140_v60, %v13636_v39  ;;  %v900_v18 = vld [vmem:[#allocation2 + $0x4e] sm:$0x3]  ;;  %v948_v5 = vmax.f32 %v881_v3, %v13885_v35  ;;  %12355 = vmatpush3.msra.mxu1 %v1062_v44 }
 0x1c1   :  { %v914_v16 = vld [vmem:[#allocation2 + $0x50] sm:$0x3]  ;;  %v915_v19 = vld [vmem:[#allocation2 + $0x54] sm:$0x3]  ;;  %v1155_v26 = vrot.slane %v1141_v4, %v13636_v39  ;;  %v916_v30 = vld [vmem:[#allocation2 + $0x58] sm:$0x3]  ;;  %v949_v34 = vmax.f32 %v882_v2, %v899_v52  ;;  %v950_v38 = vmax.f32 %v883_v8, %v900_v18  ;;  %v2536_v7 = vcombine.low %v2528_v62, %v2535_v0  ;;  %12356 = vmatprep.subr.mxu1 %v1061_v61 }
 0x1c2   :  { %v931_v50 = vld [vmem:[#allocation2 + $0x52] sm:$0x3]  ;;  %v932_v6 = vld [vmem:[#allocation2 + $0x56] sm:$0x3]  ;;  %v1060_v58 = vld [vmem:[%s19815_s4 + $0x20] sm:$0xff]  ;;  %12357 = vmatpush3.msra.mxu1 %v1061_v61 }
 0x1c3   :  { %v917_v9 = vld [vmem:[#allocation2 + $0x5c] sm:$0x3]  ;;  %v933_v42 = vld [vmem:[#allocation2 + $0x5a] sm:$0x3]  ;;  %v934_v54 = vld [vmem:[#allocation2 + $0x5e] sm:$0x3]  ;;  %v963_v10 = vmax.f32 %v914_v16, %v931_v50  ;;  %v964_v11 = vmax.f32 %v915_v19, %v932_v6  ;;  %v1156_v12 = vcombine.low %v1148_v46, %v1155_v26  ;;  %12500 = vmatprep.mubr.msk.f32.mxu0 %vm278_vm0, %v2536_v7  ;;  %12358 = vmatprep.subr.mxu1 %v1060_v58 }
 0x1c4   :  { %v965_v13 = vmax.f32 %v916_v30, %v933_v42  ;;  %v966_v14 = vmax.f32 %v917_v9, %v934_v54  ;;  %v884_v15 = vld [vmem:[#allocation2 + $0x60] sm:$0x3]  ;;  %v885_v17 = vld [vmem:[#allocation2 + $0x64] sm:$0x3]  ;;  %v901_v20 = vld [vmem:[#allocation2 + $0x62] sm:$0x3]  ;;  %12359 = vmatpush3.msra.mxu1 %v1060_v58 }
 0x1c5   :  { %v1059_v21 = vld [vmem:[%s19815_s4 + $0x18] sm:$0xff]  ;;  %v979_v23 = vmax.f32 %v947_v22, %v963_v10  ;;  %v980_v25 = vmax.f32 %v948_v5, %v964_v11  ;;  %v902_v27 = vld [vmem:[#allocation2 + $0x66] sm:$0x3]  ;;  %v918_v29 = vld [vmem:[#allocation2 + $0x70] sm:$0x3]  ;;  %v951_v32 = vmax.f32 %v884_v15, %v901_v20  ;;  %12349 = vmatprep.mubr.msk.f32.mxu1 %vm278_vm0, %v1156_v12 }
 0x1c6   :  { %v935_v31 = vld [vmem:[#allocation2 + $0x72] sm:$0x3]  ;;  %v981_v33 = vmax.f32 %v949_v34, %v965_v13  ;;  %v982_v1 = vmax.f32 %v950_v38, %v966_v14  ;;  %v919_v35 = vld [vmem:[#allocation2 + $0x74] sm:$0x3]  ;;  %v936_v36 = vld [vmem:[#allocation2 + $0x76] sm:$0x3]  ;;  %v952_v37 = vmax.f32 %v885_v17, %v902_v27  ;;  %12360 = vmatprep.subr.mxu1 %v1059_v21 }
 0x1c7   :  { %v967_v40 = vmax.f32 %v918_v29, %v935_v31  ;;  %v1040_v41 = vld [vmem:[#allocation3] sm:$0x3]  ;;  %1032 = vst.msk [vmem:[#allocation3 + $0x26] sm:$0x3] %vm807_vm1, %v979_v23  ;;  %1033 = vst.msk [vmem:[#allocation3 + $0x28] sm:$0x3] %vm807_vm1, %v980_v25  ;;  %v968_v43 = vmax.f32 %v919_v35, %v936_v36  ;;  %12361 = vmatpush3.msra.mxu1 %v1059_v21 }
 0x1c8   :  { %v1041_v44 = vld [vmem:[#allocation3 + $0x2] sm:$0x3]  ;;  %v1042_v45 = vld [vmem:[#allocation3 + $0x4] sm:$0x3]  ;;  %v1043_v47 = vld [vmem:[#allocation3 + $0x6] sm:$0x3] }
 0x1c9   :  { %1034 = vst.msk [vmem:[#allocation3 + $0x2a] sm:$0x3] %vm807_vm1, %v981_v33  ;;  %1035 = vst.msk [vmem:[#allocation3 + $0x2c] sm:$0x3] %vm807_vm1, %v982_v1  ;;  %v983_v28 = vmax.f32 %v951_v32, %v967_v40  ;;  %v1058_v56 = vld [vmem:[%s19815_s4 + $0x10] sm:$0xff]  ;;  %v984_v49 = vmax.f32 %v952_v37, %v968_v43  ;;  %v1057_v51 = vld [vmem:[%s19815_s4 + $0x8] sm:$0xff]  ;;  %v1283_v53 = vcombine.low %v1040_v41, %v1041_v44 }
 0x1ca   :  { %v1284_v55 = vcombine.low %v1042_v45, %v1043_v47  ;;  %12362 = vmatprep.subr.mxu1 %v1058_v56  ;;  %v2490_v57 = vld [vmem:[#allocation3 + $0x38] sm:$0x3]  ;;  %v1056_v59 = vld [vmem:[%s19815_s4] sm:$0xff]  ;;  %v2489_v3 = vld [vmem:[#allocation3 + $0x36] sm:$0x3] }
 0x1cb   :  { %1036 = vst.msk [vmem:[#allocation3 + $0x32] sm:$0x3] %vm807_vm1, %v983_v28  ;;  %1037 = vst.msk [vmem:[#allocation3 + $0x34] sm:$0x3] %vm807_vm1, %v984_v49  ;;  %12363 = vmatpush3.msra.mxu1 %v1058_v56  ;;  %v13934_v60 = vld [vmem:[%s19815_s4 + $0xb8] sm:$0xff]  ;;  %v1291_v52 = vrot.slane %v1283_v53, %v13636_v39  ;;  %v2555_v5 = vcombine.low %v2489_v3, %v2490_v57 }
 0x1cc   :  { %12364 = vmatprep.subr.mxu1 %v1057_v51  ;;  %v1046_v61 = vld [vmem:[#allocation3 + $0x10] sm:$0x3]  ;;  %v1050_v62 = vld [vmem:[#allocation3 + $0x1c] sm:$0x3]  ;;  %v1298_v0 = vrot.slane %v1284_v55, %v13636_v39  ;;  %v1044_v46 = vld [vmem:[#allocation3 + $0xc] sm:$0x3] }
 0x1cd   :  { %12365 = vmatpush3.msra.mxu1 %v1057_v51  ;;  %v1045_v18 = vld [vmem:[#allocation3 + $0xe] sm:$0x3]  ;;  %v1048_v30 = vld [vmem:[#allocation3 + $0x18] sm:$0x3]  ;;  %v1445_v50 = vld [vmem:[#allocation3 + $0x4] sm:$0x3]  ;;  %v2569_v31 = vrot.slane %v2555_v5, %v13636_v39 }
 0x1ce   :  { %v2483_v4 = vld [vmem:[#allocation3 + $0x26] sm:$0x3]  ;;  %v2484_v2 = vld [vmem:[#allocation3 + $0x28] sm:$0x3]  ;;  %12366 = vmatprep.subr.mxu1 %v1056_v59  ;;  %v1047_v42 = vld [vmem:[#allocation3 + $0x12] sm:$0x3]  ;;  %v1299_v23 = vcombine.low %v1291_v52, %v1298_v0  ;;  %v1300_v33 = vcombine.low %v1044_v46, %v1045_v18 }
 0x1cf   :  { %v1077_v8 = vld [vmem:[#allocation3 + $0x26] sm:$0x3]  ;;  %v2537_v22 = vcombine.low %v2483_v4, %v2484_v2  ;;  %v1078_v26 = vld [vmem:[#allocation3 + $0x28] sm:$0x3]  ;;  %12367 = vmatpush3.msra.mxu1 %v1056_v59  ;;  %v1301_v11 = vcombine.low %v1046_v61, %v1047_v42  ;;  %v1049_v12 = vld [vmem:[#allocation3 + $0x1a] sm:$0x3] }
 0x1d0   :  { %v2485_v16 = vld [vmem:[#allocation3 + $0x2a] sm:$0x3]  ;;  %v2486_v19 = vld [vmem:[#allocation3 + $0x2c] sm:$0x3]  ;;  %v1446_v6 = vld [vmem:[#allocation3 + $0x6] sm:$0x3]  ;;  %v1157_v9 = vcombine.low %v1077_v8, %v1078_v26  ;;  %12374 = vmatprep.subr.mxu1 %v13934_v60  ;;  %v1317_v35 = vcombine.low %v1048_v30, %v1049_v12  ;;  %v1308_v51 = vrot.slane %v1300_v33, %v13636_v39 }
 0x1d1   :  { %v1447_v34 = vld [vmem:[#allocation3 + $0x8] sm:$0x3]  ;;  %v2538_v38 = vcombine.low %v2485_v16, %v2486_v19  ;;  %v1079_v58 = vld [vmem:[#allocation3 + $0x2a] sm:$0x3]  ;;  %v1080_v7 = vld [vmem:[#allocation3 + $0x2c] sm:$0x3]  ;;  %v2545_v54 = vrot.slane %v2537_v22, %v13636_v39  ;;  %v1486_v41 = vcombine.low %v1445_v50, %v1446_v6  ;;  %v1315_v47 = vrot.slane %v1301_v11, %v13636_v39 }
 0x1d2   :  { %v1158_v10 = vcombine.low %v1079_v58, %v1080_v7  ;;  %v1051_v13 = vld [vmem:[#allocation3 + $0x1e] sm:$0x3]  ;;  %v1448_v14 = vld [vmem:[#allocation3 + $0xa] sm:$0x3]  ;;  %v2487_v17 = vld [vmem:[#allocation3 + $0x32] sm:$0x3]  ;;  %v1165_v21 = vrot.slane %v1157_v9, %v13636_v39  ;;  %v1325_v55 = vrot.slane %v1317_v35, %v13636_v39 }
 0x1d3   :  { %v2552_v15 = vrot.slane %v2538_v38, %v13636_v39  ;;  %v2488_v20 = vld [vmem:[#allocation3 + $0x34] sm:$0x3]  ;;  %v1318_v25 = vcombine.low %v1050_v62, %v1051_v13  ;;  %v1054_v27 = vld [vmem:[#allocation3 + $0x28] sm:$0x3]  ;;  %v1052_v36 = vld [vmem:[#allocation3 + $0x24] sm:$0x3]  ;;  %v1487_v43 = vcombine.low %v1447_v34, %v1448_v14  ;;  %v1494_v57 = vrot.slane %v1486_v41, %v13636_v39 }
 0x1d4   :  { %v2554_v29 = vcombine.low %v2487_v17, %v2488_v20  ;;  %v1172_v32 = vrot.slane %v1158_v10, %v13636_v39  ;;  %v1053_v37 = vld [vmem:[#allocation3 + $0x26] sm:$0x3]  ;;  %v1055_v40 = vld [vmem:[#allocation3 + $0x2a] sm:$0x3]  ;;  %v1316_v3 = vcombine.low %v1308_v51, %v1315_v47  ;;  %v10339_v4 = vld [vmem:[%s19815_s4 + $0xb0] sm:$0xff] }
 0x1d5   :  { %v2553_v1 = vcombine.low %v2545_v54, %v2552_v15  ;;  %v1335_v28 = vcombine.low %v1054_v27, %v1055_v40  ;;  %v1332_v56 = vrot.slane %v1318_v25, %v13636_v39  ;;  %v1334_v53 = vcombine.low %v1052_v36, %v1053_v37  ;;  %v10338_v8 = vld [vmem:[%s19815_s4 + $0xa8] sm:$0xff]  ;;  %v1449_v46 = vld [vmem:[#allocation3 + $0x10] sm:$0x3]  ;;  %v1452_v18 = vld [vmem:[#allocation3 + $0x16] sm:$0x3] }
 0x1d6   :  { %v2562_v44 = vrot.slane %v2554_v29, %v13636_v39  ;;  %v1173_v45 = vcombine.low %v1165_v21, %v1172_v32  ;;  %v1501_v59 = vrot.slane %v1487_v43, %v13636_v39  ;;  %v10337_v16 = vld [vmem:[%s19815_s4 + $0xa0] sm:$0xff]  ;;  %v1451_v19 = vld [vmem:[#allocation3 + $0x14] sm:$0x3]  ;;  %v1453_v5 = vld [vmem:[#allocation3 + $0x1c] sm:$0x3] }
 0x1d7   :  { %12501 = vmatmul.mubr.msk.f32.vlgmr.msra.gmra.mxu0 %vm278_vm0, %v2553_v1  ;;  %v1349_v61 = vrot.slane %v1335_v28, %v13636_v39  ;;  %v1333_v62 = vcombine.low %v1325_v55, %v1332_v56  ;;  %v1342_v2 = vrot.slane %v1334_v53, %v13636_v39  ;;  %v1456_v22 = vld [vmem:[#allocation3 + $0x22] sm:$0x3]  ;;  %v1455_v26 = vld [vmem:[#allocation3 + $0x20] sm:$0x3]  ;;  %v10336_v30 = vld [vmem:[%s19815_s4 + $0x98] sm:$0xff]  ;;  %v1504_v58 = vcombine.low %v1451_v19, %v1452_v18 }
 0x1d8   :  { %v2570_v49 = vcombine.low %v2562_v44, %v2569_v31  ;;  %12350 = vmatmul.mubr.msk.f32.gmra.mxu1 %vm278_vm0, %v1173_v45  ;;  %v1502_v52 = vcombine.low %v1494_v57, %v1501_v59  ;;  %v1460_v6 = vld [vmem:[#allocation3 + $0x2e] sm:$0x3]  ;;  %v2491_v34 = vld [vmem:[#allocation3 + $0x3e] sm:$0x3]  ;;  %v2492_v38 = vld [vmem:[#allocation3 + $0x40] sm:$0x3]  ;;  %v1521_v11 = vcombine.low %v1455_v26, %v1456_v22 }
 0x1d9   :  { %12368 = vmatprep.mubr.msk.f32.mxu1 %vm278_vm0, %v1299_v23  ;;  %v1350_v0 = vcombine.low %v1342_v2, %v1349_v61  ;;  %v1454_v7 = vld [vmem:[#allocation3 + $0x1e] sm:$0x3]  ;;  %v2493_v9 = vld [vmem:[#allocation3 + $0x42] sm:$0x3]  ;;  %v2494_v42 = vld [vmem:[#allocation3 + $0x44] sm:$0x3]  ;;  %v2571_v15 = vcombine.low %v2491_v34, %v2492_v38  ;;  %v1518_v25 = vrot.slane %v1504_v58, %v13636_v39 }
 0x1da   :  { %12503 = vmatprep.mubr.msk.f32.mxu0 %vm278_vm0, %v2570_v49  ;;  %v10335_v54 = vld [vmem:[%s19815_s4 + $0x90] sm:$0xff]  ;;  %v1520_v10 = vcombine.low %v1453_v5, %v1454_v7  ;;  %v1457_v12 = vld [vmem:[#allocation3 + $0x28] sm:$0x3]  ;;  %v1459_v13 = vld [vmem:[#allocation3 + $0x2c] sm:$0x3]  ;;  %v2572_v23 = vcombine.low %v2493_v9, %v2494_v42  ;;  %v1535_v37 = vrot.slane %v1521_v11, %v13636_v39 }
 0x1db   :  { %v1654_v14 = vld [vmem:[#allocation3 + $0x10] sm:$0x3]  ;;  %v10334_v17 = vld [vmem:[%s19815_s4 + $0x88] sm:$0xff]  ;;  %v1538_v29 = vcombine.low %v1459_v13, %v1460_v6  ;;  %v1655_v33 = vld [vmem:[#allocation3 + $0x12] sm:$0x3]  ;;  %v2579_v1 = vrot.slane %v2571_v15, %v13636_v39 }
 0x1dc   :  { %12369 = vmatmul.mubr.msk.f32.vlgmr.msra.gmra.mxu1 %vm278_vm0, %v1316_v3  ;;  %v1458_v21 = vld [vmem:[#allocation3 + $0x2a] sm:$0x3]  ;;  %v1652_v31 = vld [vmem:[#allocation3 + $0xc] sm:$0x3]  ;;  %v1653_v32 = vld [vmem:[#allocation3 + $0xe] sm:$0x3]  ;;  %v1528_v36 = vrot.slane %v1520_v10, %v13636_v39  ;;  %v1694_v40 = vcombine.low %v1654_v14, %v1655_v33  ;;  %v2586_v41 = vrot.slane %v2572_v23, %v13636_v39 }
 0x1dd   :  { %12371 = vmatprep.mubr.msk.f32.mxu1 %vm278_vm0, %v1333_v62  ;;  %12375 = vmatpush3.msra.mxu1 %v13934_v60  ;;  %v1450_v60 = vld [vmem:[#allocation3 + $0x12] sm:$0x3]  ;;  %v1537_v27 = vcombine.low %v1457_v12, %v1458_v21  ;;  %v10333_v35 = vld [vmem:[%s19815_s4 + $0x80] sm:$0xff]  ;;  %v10352_v43 = vld [vmem:[%s19815_s4 + $0xf8] sm:$0xff]  ;;  %v1693_v44 = vcombine.low %v1652_v31, %v1653_v32  ;;  %v1552_v56 = vrot.slane %v1538_v29, %v13636_v39 }
 0x1de   :  { %12376 = vmatprep.subr.mxu1 %v10339_v4  ;;  %v1503_v50 = vcombine.low %v1449_v46, %v1450_v60  ;;  %v2587_v45 = vcombine.low %v2579_v1, %v2586_v41  ;;  %v1536_v49 = vcombine.low %v1528_v36, %v1535_v37  ;;  %v10351_v51 = vld [vmem:[%s19815_s4 + $0xf0] sm:$0xff]  ;;  %v1708_v53 = vrot.slane %v1694_v40, %v13636_v39  ;;  %v10350_v55 = vld [vmem:[%s19815_s4 + $0xe8] sm:$0xff]  ;;  %v10349_v61 = vld [vmem:[%s19815_s4 + $0xe0] sm:$0xff] }
 0x1df   :  { %12377 = vmatpush3.msra.mxu1 %v10339_v4  ;;  %v1545_v28 = vrot.slane %v1537_v27, %v13636_v39  ;;  %v1701_v57 = vrot.slane %v1693_v44, %v13636_v39  ;;  %v1658_v62 = vld [vmem:[#allocation3 + $0x1c] sm:$0x3]  ;;  %v1656_v4 = vld [vmem:[#allocation3 + $0x18] sm:$0x3]  ;;  %v1662_v2 = vld [vmem:[#allocation3 + $0x28] sm:$0x3] }
 0x1e0   :  { %12372 = vmatmul.mubr.msk.f32.gmra.mxu1 %vm278_vm0, %v1350_v0  ;;  %12378 = vmatprep.subr.mxu1 %v10338_v8  ;;  %v1511_v20 = vrot.slane %v1503_v50, %v13636_v39  ;;  %v1659_v0 = vld [vmem:[#allocation3 + $0x1e] sm:$0x3]  ;;  %v1660_v18 = vld [vmem:[#allocation3 + $0x24] sm:$0x3]  ;;  %v1663_v19 = vld [vmem:[#allocation3 + $0x2a] sm:$0x3] }
 0x1e1   :  { %12379 = vmatpush3.msra.mxu1 %v10338_v8  ;;  %12390 = vmatprep.mubr.msk.f32.mxu1 %vm278_vm0, %v1502_v52  ;;  %v1553_v59 = vcombine.low %v1545_v28, %v1552_v56  ;;  %v1709_v3 = vcombine.low %v1701_v57, %v1708_v53  ;;  %v10348_v8 = vld [vmem:[%s19815_s4 + $0xd8] sm:$0xff]  ;;  %v1711_v46 = vcombine.low %v1658_v62, %v1659_v0  ;;  %v10347_v22 = vld [vmem:[%s19815_s4 + $0xd0] sm:$0xff]  ;;  %v10346_v34 = vld [vmem:[%s19815_s4 + $0xc8] sm:$0xff] }
 0x1e2   :  { %12380 = vmatprep.subr.mxu1 %v10337_v16  ;;  %v1519_v47 = vcombine.low %v1511_v20, %v1518_v25  ;;  %12504 = vmatmul.mubr.msk.f32.gmra.mxu0 %vm278_vm0, %v2587_v45  ;;  %v1657_v52 = vld [vmem:[#allocation3 + $0x1a] sm:$0x3]  ;;  %v1728_v60 = vcombine.low %v1662_v2, %v1663_v19  ;;  %v1666_v5 = vld [vmem:[#allocation3 + $0x34] sm:$0x3]  ;;  %v1859_v50 = vld [vmem:[#allocation3 + $0x10] sm:$0x3] }
 0x1e3   :  { %12381 = vmatpush3.msra.mxu1 %v10337_v16  ;;  %v1661_v16 = vld [vmem:[#allocation3 + $0x26] sm:$0x3]  ;;  %v1710_v26 = vcombine.low %v1656_v4, %v1657_v52  ;;  %v1861_v6 = vld [vmem:[#allocation3 + $0x14] sm:$0x3]  ;;  %v1665_v58 = vld [vmem:[#allocation3 + $0x32] sm:$0x3]  ;;  %v1725_v9 = vrot.slane %v1711_v46, %v13636_v39 }
 0x1e4   :  { %12382 = vmatprep.subr.mxu1 %v10336_v30  ;;  %v1727_v38 = vcombine.low %v1660_v18, %v1661_v16  ;;  %v1667_v7 = vld [vmem:[#allocation3 + $0x36] sm:$0x3]  ;;  %v1860_v10 = vld [vmem:[#allocation3 + $0x12] sm:$0x3]  ;;  %v10345_v11 = vld [vmem:[%s19815_s4 + $0xc0] sm:$0xff]  ;;  %v1742_v12 = vrot.slane %v1728_v60, %v13636_v39 }
 0x1e5   :  { %12383 = vmatpush3.msra.mxu1 %v10336_v30  ;;  %v1664_v30 = vld [vmem:[#allocation3 + $0x30] sm:$0x3]  ;;  %v1745_v42 = vcombine.low %v1666_v5, %v1667_v7  ;;  %v1900_v14 = vcombine.low %v1860_v10, %v1861_v6  ;;  %v1718_v15 = vrot.slane %v1710_v26, %v13636_v39  ;;  %v10364_v20 = vld [vmem:[%s19815_s4 + $0x138] sm:$0xff]  ;;  %v10362_v1 = vld [vmem:[%s19815_s4 + $0x128] sm:$0xff] }
 0x1e6   :  { %12384 = vmatprep.subr.mxu1 %v10335_v54  ;;  %v1735_v21 = vrot.slane %v1727_v38, %v13636_v39  ;;  %v10363_v29 = vld [vmem:[%s19815_s4 + $0x130] sm:$0xff]  ;;  %v10361_v37 = vld [vmem:[%s19815_s4 + $0x120] sm:$0xff]  ;;  %v1863_v40 = vld [vmem:[#allocation3 + $0x1c] sm:$0x3] }
 0x1e7   :  { %12385 = vmatpush3.msra.mxu1 %v10335_v54  ;;  %v1858_v54 = vld [vmem:[#allocation3 + $0xe] sm:$0x3]  ;;  %v1726_v23 = vcombine.low %v1718_v15, %v1725_v9  ;;  %v1759_v25 = vrot.slane %v1745_v42, %v13636_v39  ;;  %v1914_v32 = vrot.slane %v1900_v14, %v13636_v39  ;;  %v1865_v41 = vld [vmem:[#allocation3 + $0x20] sm:$0x3]  ;;  %v1869_v44 = vld [vmem:[#allocation3 + $0x2c] sm:$0x3] }
 0x1e8   :  { %12386 = vmatprep.subr.mxu1 %v10334_v17  ;;  %v1899_v13 = vcombine.low %v1858_v54, %v1859_v50  ;;  %v1743_v27 = vcombine.low %v1735_v21, %v1742_v12  ;;  %v10360_v45 = vld [vmem:[%s19815_s4 + $0x118] sm:$0xff]  ;;  %v1868_v53 = vld [vmem:[#allocation3 + $0x2a] sm:$0x3]  ;;  %v2065_v62 = vld [vmem:[#allocation3 + $0x10] sm:$0x3] }
 0x1e9   :  { %12387 = vmatpush3.msra.mxu1 %v10334_v17  ;;  %v1744_v17 = vcombine.low %v1664_v30, %v1665_v58  ;;  %v1864_v28 = vld [vmem:[#allocation3 + $0x1e] sm:$0x3]  ;;  %v2067_v4 = vld [vmem:[#allocation3 + $0x14] sm:$0x3]  ;;  %v2068_v2 = vld [vmem:[#allocation3 + $0x16] sm:$0x3] }
 0x1ea   :  { %12388 = vmatprep.subr.mxu1 %v10333_v35  ;;  %v1907_v31 = vrot.slane %v1899_v13, %v13636_v39  ;;  %v1870_v52 = vld [vmem:[#allocation3 + $0x32] sm:$0x3]  ;;  %v1872_v0 = vld [vmem:[#allocation3 + $0x36] sm:$0x3]  ;;  %v10357_v60 = vld [vmem:[%s19815_s4 + $0x100] sm:$0xff]  ;;  %v2107_v50 = vcombine.low %v2067_v4, %v2068_v2 }
 0x1eb   :  { %12389 = vmatpush3.msra.mxu1 %v10333_v35  ;;  %v1752_v33 = vrot.slane %v1744_v17, %v13636_v39  ;;  %v10376_v6 = vld [vmem:[%s19815_s4 + $0x178] sm:$0xff]  ;;  %v10375_v9 = vld [vmem:[%s19815_s4 + $0x170] sm:$0xff]  ;;  %v10374_v10 = vld [vmem:[%s19815_s4 + $0x168] sm:$0xff] }
 0x1ec   :  { %12391 = vmatmul.mubr.msk.f32.vlgmr.msra.gmra.mxu1 %vm278_vm0, %v1519_v47  ;;  %12396 = vmatprep.subr.mxu1 %v10352_v43  ;;  %v1915_v36 = vcombine.low %v1907_v31, %v1914_v32  ;;  %v1862_v47 = vld [vmem:[#allocation3 + $0x1a] sm:$0x3]  ;;  %v2121_v54 = vrot.slane %v2107_v50, %v13636_v39  ;;  %v2072_v12 = vld [vmem:[#allocation3 + $0x22] sm:$0x3]  ;;  %v2069_v15 = vld [vmem:[#allocation3 + $0x1c] sm:$0x3] }
 0x1ed   :  { %12393 = vmatprep.mubr.msk.f32.mxu1 %vm278_vm0, %v1536_v49  ;;  %12397 = vmatpush3.msra.mxu1 %v10352_v43  ;;  %v1760_v35 = vcombine.low %v1752_v33, %v1759_v25  ;;  %v1867_v43 = vld [vmem:[#allocation3 + $0x28] sm:$0x3]  ;;  %v1916_v56 = vcombine.low %v1862_v47, %v1863_v40  ;;  %v1917_v49 = vcombine.low %v1864_v28, %v1865_v41  ;;  %v10373_v14 = vld [vmem:[%s19815_s4 + $0x160] sm:$0xff]  ;;  %v2075_v21 = vld [vmem:[#allocation3 + $0x2c] sm:$0x3] }
 0x1ee   :  { %12398 = vmatprep.subr.mxu1 %v10351_v51  ;;  %v2071_v17 = vld [vmem:[#allocation3 + $0x20] sm:$0x3]  ;;  %v10372_v25 = vld [vmem:[%s19815_s4 + $0x158] sm:$0xff]  ;;  %v2074_v32 = vld [vmem:[#allocation3 + $0x2a] sm:$0x3] }
 0x1ef   :  { %12399 = vmatpush3.msra.mxu1 %v10351_v51  ;;  %v1866_v51 = vld [vmem:[#allocation3 + $0x26] sm:$0x3]  ;;  %v1924_v46 = vrot.slane %v1916_v56, %v13636_v39  ;;  %v1931_v18 = vrot.slane %v1917_v49, %v13636_v39  ;;  %v2124_v31 = vcombine.low %v2071_v17, %v2072_v12  ;;  %v2080_v33 = vld [vmem:[#allocation3 + $0x3a] sm:$0x3]  ;;  %v2079_v40 = vld [vmem:[#allocation3 + $0x38] sm:$0x3] }
 0x1f0   :  { %12394 = vmatmul.mubr.msk.f32.gmra.mxu1 %vm278_vm0, %v1553_v59  ;;  %12400 = vmatprep.subr.mxu1 %v10350_v55  ;;  %v1933_v57 = vcombine.low %v1866_v51, %v1867_v43  ;;  %v1934_v59 = vcombine.low %v1868_v53, %v1869_v44  ;;  %v2274_v41 = vld [vmem:[#allocation3 + $0x1c] sm:$0x3]  ;;  %v10370_v43 = vld [vmem:[%s19815_s4 + $0x148] sm:$0xff]  ;;  %v2078_v44 = vld [vmem:[#allocation3 + $0x36] sm:$0x3]  ;;  %v2158_v56 = vcombine.low %v2079_v40, %v2080_v33 }
 0x1f1   :  { %12401 = vmatpush3.msra.mxu1 %v10350_v55  ;;  %12412 = vmatprep.mubr.msk.f32.mxu1 %vm278_vm0, %v1709_v3  ;;  %v10359_v55 = vld [vmem:[%s19815_s4 + $0x110] sm:$0xff]  ;;  %v2138_v47 = vrot.slane %v2124_v31, %v13636_v39  ;;  %v2272_v49 = vld [vmem:[#allocation3 + $0x18] sm:$0x3]  ;;  %v2273_v51 = vld [vmem:[#allocation3 + $0x1a] sm:$0x3] }
 0x1f2   :  { %12402 = vmatprep.subr.mxu1 %v10349_v61  ;;  %v1871_v3 = vld [vmem:[#allocation3 + $0x34] sm:$0x3]  ;;  %v1941_v5 = vrot.slane %v1933_v57, %v13636_v39  ;;  %v1948_v26 = vrot.slane %v1934_v59, %v13636_v39  ;;  %v2275_v53 = vld [vmem:[#allocation3 + $0x1e] sm:$0x3]  ;;  %v2284_v50 = vld [vmem:[#allocation3 + $0x3c] sm:$0x3] }
 0x1f3   :  { %12403 = vmatpush3.msra.mxu1 %v10349_v61  ;;  %v1873_v61 = vld [vmem:[#allocation3 + $0x38] sm:$0x3]  ;;  %v1950_v16 = vcombine.low %v1870_v52, %v1871_v3  ;;  %v2314_v3 = vcombine.low %v2274_v41, %v2275_v53  ;;  %v10383_v12 = vld [vmem:[%s19815_s4 + $0x190] sm:$0xff]  ;;  %v2687_v31 = vld [vmem:[#allocation3 + $0x1e] sm:$0x3] }
 0x1f4   :  { %12404 = vmatprep.subr.mxu1 %v10348_v8  ;;  %v1951_v19 = vcombine.low %v1872_v0, %v1873_v61  ;;  %v1949_v7 = vcombine.low %v1941_v5, %v1948_v26  ;;  %v10388_v61 = vld [vmem:[%s19815_s4 + $0x1b8] sm:$0xff]  ;;  %v10387_v0 = vld [vmem:[%s19815_s4 + $0x1b0] sm:$0xff]  ;;  %v2276_v26 = vld [vmem:[#allocation3 + $0x24] sm:$0x3] }
 0x1f5   :  { %12405 = vmatpush3.msra.mxu1 %v10348_v8  ;;  %v10358_v8 = vld [vmem:[%s19815_s4 + $0x108] sm:$0xff]  ;;  %v1958_v38 = vrot.slane %v1950_v16, %v13636_v39  ;;  %v10384_v5 = vld [vmem:[%s19815_s4 + $0x198] sm:$0xff]  ;;  %v10409_v53 = vld [vmem:[%s19815_s4 + $0x220] sm:$0xff] }
 0x1f6   :  { %12406 = vmatprep.subr.mxu1 %v10347_v22  ;;  %v1965_v58 = vrot.slane %v1951_v19, %v13636_v39  ;;  %v10412_v41 = vld [vmem:[%s19815_s4 + $0x238] sm:$0xff] }
 0x1f7   :  { %12407 = vmatpush3.msra.mxu1 %v10347_v22  ;;  %v2066_v22 = vld [vmem:[#allocation3 + $0x12] sm:$0x3] }
 0x1f8   :  { %12408 = vmatprep.subr.mxu1 %v10346_v34  ;;  %v2106_v30 = vcombine.low %v2065_v62, %v2066_v22  ;;  %v2313_v62 = vcombine.low %v2272_v49, %v2273_v51  ;;  %v10385_v22 = vld [vmem:[%s19815_s4 + $0x1a0] sm:$0xff]  ;;  %v10410_v51 = vld [vmem:[%s19815_s4 + $0x228] sm:$0xff] }
 0x1f9   :  { %12409 = vmatpush3.msra.mxu1 %v10346_v34  ;;  %v1932_v34 = vcombine.low %v1924_v46, %v1931_v18  ;;  %v2328_v46 = vrot.slane %v2314_v3, %v13636_v39  ;;  %v10386_v18 = vld [vmem:[%s19815_s4 + $0x1a8] sm:$0xff]  ;;  %v10408_v3 = vld [vmem:[%s19815_s4 + $0x218] sm:$0xff] }
 0x1fa   :  { %12410 = vmatprep.subr.mxu1 %v10345_v11  ;;  %v2114_v42 = vrot.slane %v2106_v30, %v13636_v39  ;;  %v2321_v16 = vrot.slane %v2313_v62, %v13636_v39  ;;  %v2278_v30 = vld [vmem:[#allocation3 + $0x28] sm:$0x3]  ;;  %v2691_v62 = vld [vmem:[#allocation3 + $0x2a] sm:$0x3] }
 0x1fb   :  { %12411 = vmatpush3.msra.mxu1 %v10345_v11  ;;  %v1966_v11 = vcombine.low %v1958_v38, %v1965_v58  ;;  %v2285_v38 = vld [vmem:[#allocation3 + $0x3e] sm:$0x3]  ;;  %v2279_v58 = vld [vmem:[#allocation3 + $0x2a] sm:$0x3] }
 0x1fc   :  { %12413 = vmatmul.mubr.msk.f32.vlgmr.msra.gmra.mxu1 %vm278_vm0, %v1726_v23  ;;  %12418 = vmatprep.subr.mxu1 %v10364_v20  ;;  %v2122_v13 = vcombine.low %v2114_v42, %v2121_v54  ;;  %v2076_v23 = vld [vmem:[#allocation3 + $0x2e] sm:$0x3]  ;;  %v2331_v42 = vcombine.low %v2278_v30, %v2279_v58  ;;  %v2280_v54 = vld [vmem:[#allocation3 + $0x30] sm:$0x3]  ;;  %v10405_v58 = vld [vmem:[%s19815_s4 + $0x200] sm:$0xff] }
 0x1fd   :  { %12415 = vmatprep.mubr.msk.f32.mxu1 %vm278_vm0, %v1743_v27  ;;  %12419 = vmatpush3.msra.mxu1 %v10364_v20  ;;  %v2073_v20 = vld [vmem:[#allocation3 + $0x28] sm:$0x3]  ;;  %v2070_v27 = vld [vmem:[#allocation3 + $0x1e] sm:$0x3] }
 0x1fe   :  { %12420 = vmatprep.subr.mxu1 %v10363_v29 }
 0x1ff   :  { %12421 = vmatpush3.msra.mxu1 %v10363_v29  ;;  %v2123_v29 = vcombine.low %v2069_v15, %v2070_v27  ;;  %v2364_v15 = vcombine.low %v2284_v50, %v2285_v38 }
 0x200   :  { %12416 = vmatmul.mubr.msk.f32.gmra.mxu1 %vm278_vm0, %v1760_v35  ;;  %12422 = vmatprep.subr.mxu1 %v10362_v1  ;;  %v2140_v35 = vcombine.low %v2073_v20, %v2074_v32  ;;  %v2686_v20 = vld [vmem:[#allocation3 + $0x1c] sm:$0x3]  ;;  %v10381_v32 = vld [vmem:[%s19815_s4 + $0x180] sm:$0xff] }
 0x201   :  { %12423 = vmatpush3.msra.mxu1 %v10362_v1  ;;  %12434 = vmatprep.mubr.msk.f32.mxu1 %vm278_vm0, %v1915_v36  ;;  %v10371_v1 = vld [vmem:[%s19815_s4 + $0x150] sm:$0xff]  ;;  %v2141_v36 = vcombine.low %v2075_v21, %v2076_v23  ;;  %v2688_v21 = vld [vmem:[#allocation3 + $0x20] sm:$0x3]  ;;  %v2689_v23 = vld [vmem:[#allocation3 + $0x22] sm:$0x3] }
 0x202   :  { %12424 = vmatprep.subr.mxu1 %v10361_v37  ;;  %v2148_v57 = vrot.slane %v2140_v35, %v13636_v39  ;;  %v2728_v35 = vcombine.low %v2688_v21, %v2689_v23 }
 0x203   :  { %12425 = vmatpush3.msra.mxu1 %v10361_v37  ;;  %v2077_v37 = vld [vmem:[#allocation3 + $0x34] sm:$0x3]  ;;  %v2155_v59 = vrot.slane %v2141_v36, %v13636_v39 }
 0x204   :  { %12426 = vmatprep.subr.mxu1 %v10360_v45  ;;  %v2157_v28 = vcombine.low %v2077_v37, %v2078_v44  ;;  %v2372_v37 = vrot.slane %v2364_v15, %v13636_v39 }
 0x205   :  { %12427 = vmatpush3.msra.mxu1 %v10360_v45  ;;  %v2131_v45 = vrot.slane %v2123_v29, %v13636_v39  ;;  %v2156_v52 = vcombine.low %v2148_v57, %v2155_v59  ;;  %v2345_v29 = vrot.slane %v2331_v42, %v13636_v39  ;;  %v2697_v57 = vld [vmem:[#allocation3 + $0x3a] sm:$0x3] }
 0x206   :  { %12428 = vmatprep.subr.mxu1 %v10359_v55  ;;  %v2165_v2 = vrot.slane %v2157_v28, %v13636_v39 }
 0x207   :  { %12429 = vmatpush3.msra.mxu1 %v10359_v55  ;;  %v10369_v55 = vld [vmem:[%s19815_s4 + $0x140] sm:$0xff]  ;;  %v2139_v4 = vcombine.low %v2131_v45, %v2138_v47  ;;  %v10411_v47 = vld [vmem:[%s19815_s4 + $0x230] sm:$0xff] }
 0x208   :  { %12430 = vmatprep.subr.mxu1 %v10358_v8 }
 0x209   :  { %12431 = vmatpush3.msra.mxu1 %v10358_v8  ;;  %v2172_v8 = vrot.slane %v2158_v56, %v13636_v39  ;;  %v2742_v56 = vrot.slane %v2728_v35, %v13636_v39 }
 0x20a   :  { %12432 = vmatprep.subr.mxu1 %v10357_v60 }
 0x20b   :  { %12433 = vmatpush3.msra.mxu1 %v10357_v60  ;;  %v2173_v19 = vcombine.low %v2165_v2, %v2172_v8  ;;  %v2329_v60 = vcombine.low %v2321_v16, %v2328_v46  ;;  %v2694_v2 = vld [vmem:[#allocation3 + $0x34] sm:$0x3]  ;;  %v2696_v8 = vld [vmem:[#allocation3 + $0x38] sm:$0x3]  ;;  %v2700_v46 = vld [vmem:[#allocation3 + $0x44] sm:$0x3] }
 0x20c   :  { %12435 = vmatmul.mubr.msk.f32.vlgmr.msra.gmra.mxu1 %vm278_vm0, %v1932_v34  ;;  %12440 = vmatprep.subr.mxu1 %v10376_v6  ;;  %v2282_v34 = vld [vmem:[#allocation3 + $0x34] sm:$0x3] }
 0x20d   :  { %12437 = vmatprep.mubr.msk.f32.mxu1 %vm278_vm0, %v1949_v7  ;;  %12441 = vmatpush3.msra.mxu1 %v10376_v6  ;;  %v2277_v6 = vld [vmem:[#allocation3 + $0x26] sm:$0x3]  ;;  %v2286_v7 = vld [vmem:[#allocation3 + $0x40] sm:$0x3] }
 0x20e   :  { %12442 = vmatprep.subr.mxu1 %v10375_v9 }
 0x20f   :  { %12443 = vmatpush3.msra.mxu1 %v10375_v9  ;;  %v2287_v9 = vld [vmem:[#allocation3 + $0x42] sm:$0x3] }
 0x210   :  { %12438 = vmatmul.mubr.msk.f32.gmra.mxu1 %vm278_vm0, %v1966_v11  ;;  %12444 = vmatprep.subr.mxu1 %v10374_v10  ;;  %v2283_v11 = vld [vmem:[#allocation3 + $0x36] sm:$0x3]  ;;  %v2365_v17 = vcombine.low %v2286_v7, %v2287_v9 }
 0x211   :  { %12445 = vmatpush3.msra.mxu1 %v10374_v10  ;;  %12456 = vmatprep.mubr.msk.f32.mxu1 %vm278_vm0, %v2122_v13  ;;  %v2281_v10 = vld [vmem:[#allocation3 + $0x32] sm:$0x3]  ;;  %v2348_v13 = vcombine.low %v2282_v34, %v2283_v11 }
 0x212   :  { %12446 = vmatprep.subr.mxu1 %v10373_v14  ;;  %v2347_v27 = vcombine.low %v2280_v54, %v2281_v10  ;;  %v2379_v40 = vrot.slane %v2365_v17, %v13636_v39 }
 0x213   :  { %12447 = vmatpush3.msra.mxu1 %v10373_v14  ;;  %v2330_v14 = vcombine.low %v2276_v26, %v2277_v6  ;;  %v2362_v33 = vrot.slane %v2348_v13, %v13636_v39  ;;  %v2762_v26 = vcombine.low %v2696_v8, %v2697_v57  ;;  %v10406_v6 = vld [vmem:[%s19815_s4 + $0x208] sm:$0xff]  ;;  %v10419_v8 = vld [vmem:[%s19789_s7 + $0x50] sm:$0xff] }
 0x214   :  { %12448 = vmatprep.subr.mxu1 %v10372_v25  ;;  %v2380_v49 = vcombine.low %v2372_v37, %v2379_v40  ;;  %v3124_v40 = vld [vmem:[%s19789_s7 + $0x38] sm:$0xff] }
 0x215   :  { %12449 = vmatpush3.msra.mxu1 %v10372_v25  ;;  %v10382_v25 = vld [vmem:[%s19815_s4 + $0x188] sm:$0xff]  ;;  %v2338_v36 = vrot.slane %v2330_v14, %v13636_v39  ;;  %v2776_v9 = vrot.slane %v2762_v26, %v13636_v39 }
 0x216   :  { %12450 = vmatprep.subr.mxu1 %v10371_v1  ;;  %v3126_v26 = vld [vmem:[#allocation4 + $0x2] sm:$0x3] }
 0x217   :  { %12451 = vmatpush3.msra.mxu1 %v10371_v1  ;;  %v2727_v1 = vcombine.low %v2686_v20, %v2687_v31  ;;  %v2346_v44 = vcombine.low %v2338_v36, %v2345_v29 }
 0x218   :  { %12452 = vmatprep.subr.mxu1 %v10370_v43 }
 0x219   :  { %12453 = vmatpush3.msra.mxu1 %v10370_v43  ;;  %v2355_v43 = vrot.slane %v2347_v27, %v13636_v39  ;;  %v2735_v28 = vrot.slane %v2727_v1, %v13636_v39 }
 0x21a   :  { %12454 = vmatprep.subr.mxu1 %v10369_v55 }
 0x21b   :  { %12455 = vmatpush3.msra.mxu1 %v10369_v55  ;;  %v2363_v45 = vcombine.low %v2355_v43, %v2362_v33  ;;  %v2693_v55 = vld [vmem:[#allocation3 + $0x2e] sm:$0x3]  ;;  %v2743_v59 = vcombine.low %v2735_v28, %v2742_v56  ;;  %v3123_v43 = vld [vmem:[%s19789_s7 + $0x30] sm:$0xff]  ;;  %v3121_v56 = vld [vmem:[%s19789_s7 + $0x20] sm:$0xff] }
 0x21c   :  { %12457 = vmatmul.mubr.msk.f32.vlgmr.msra.gmra.mxu1 %vm278_vm0, %v2139_v4  ;;  %12462 = vmatprep.subr.mxu1 %v10388_v61  ;;  %v2692_v4 = vld [vmem:[#allocation3 + $0x2c] sm:$0x3] }
 0x21d   :  { %12459 = vmatprep.mubr.msk.f32.mxu1 %vm278_vm0, %v2156_v52  ;;  %12463 = vmatpush3.msra.mxu1 %v10388_v61  ;;  %v2690_v61 = vld [vmem:[#allocation3 + $0x28] sm:$0x3]  ;;  %v2698_v52 = vld [vmem:[#allocation3 + $0x40] sm:$0x3] }
 0x21e   :  { %12464 = vmatprep.subr.mxu1 %v10387_v0  ;;  %v2744_v16 = vcombine.low %v2690_v61, %v2691_v62  ;;  %v10422_v28 = vld [vmem:[%s19789_s7 + $0x68] sm:$0xff] }
 0x21f   :  { %12465 = vmatpush3.msra.mxu1 %v10387_v0  ;;  %v2699_v0 = vld [vmem:[#allocation3 + $0x42] sm:$0x3]  ;;  %v3104_v61 = vld [vmem:[#allocation4 + $0x6] sm:$0x3] }
 0x220   :  { %12460 = vmatmul.mubr.msk.f32.gmra.mxu1 %vm278_vm0, %v2173_v19  ;;  %12466 = vmatprep.subr.mxu1 %v10386_v18  ;;  %v2745_v19 = vcombine.low %v2692_v4, %v2693_v55  ;;  %v2778_v30 = vcombine.low %v2698_v52, %v2699_v0  ;;  %v2752_v34 = vrot.slane %v2744_v16, %v13636_v39  ;;  %v3102_v55 = vld [vmem:[#allocation4 + $0x2] sm:$0x3] }
 0x221   :  { %12467 = vmatpush3.msra.mxu1 %v10386_v18  ;;  %12478 = vmatprep.mubr.msk.f32.mxu1 %vm278_vm0, %v2329_v60  ;;  %v2701_v18 = vld [vmem:[#allocation3 + $0x46] sm:$0x3]  ;;  %v10407_v60 = vld [vmem:[%s19815_s4 + $0x210] sm:$0xff]  ;;  %v10418_v16 = vld [vmem:[%s19789_s7 + $0x48] sm:$0xff] }
 0x222   :  { %12468 = vmatprep.subr.mxu1 %v10385_v22  ;;  %v2779_v50 = vcombine.low %v2700_v46, %v2701_v18  ;;  %v2759_v38 = vrot.slane %v2745_v19, %v13636_v39  ;;  %v2786_v42 = vrot.slane %v2778_v30, %v13636_v39  ;;  %v3118_v18 = vld [vmem:[%s19789_s7 + $0x8] sm:$0xff]  ;;  %v3117_v19 = vld [vmem:[%s19789_s7] sm:$0xff] }
 0x223   :  { %12469 = vmatpush3.msra.mxu1 %v10385_v22  ;;  %v2695_v22 = vld [vmem:[#allocation3 + $0x36] sm:$0x3]  ;;  %v3127_v30 = vld [vmem:[#allocation4 + $0x4] sm:$0x3] }
 0x224   :  { %12470 = vmatprep.subr.mxu1 %v10384_v5  ;;  %v2793_v54 = vrot.slane %v2779_v50, %v13636_v39  ;;  %v2760_v10 = vcombine.low %v2752_v34, %v2759_v38  ;;  %v3128_v50 = vld [vmem:[#allocation4 + $0x6] sm:$0x3]  ;;  %v3167_v34 = vcombine.low %v3126_v26, %v3127_v30  ;;  %v14266_v38 = vld [vmem:[%s19789_s7 + $0xf8] sm:$0xff] }
 0x225   :  { %12471 = vmatpush3.msra.mxu1 %v10384_v5  ;;  %v2761_v5 = vcombine.low %v2694_v2, %v2695_v22  ;;  %v3119_v2 = vld [vmem:[%s19789_s7 + $0x10] sm:$0xff]  ;;  %v10417_v22 = vld [vmem:[%s19789_s7 + $0x40] sm:$0xff] }
 0x226   :  { %12472 = vmatprep.subr.mxu1 %v10383_v12 }
 0x227   :  { %12473 = vmatpush3.msra.mxu1 %v10383_v12  ;;  %v2769_v7 = vrot.slane %v2761_v5, %v13636_v39  ;;  %v2794_v12 = vcombine.low %v2786_v42, %v2793_v54 }
 0x228   :  { %12474 = vmatprep.subr.mxu1 %v10382_v25 }
 0x229   :  { %12475 = vmatpush3.msra.mxu1 %v10382_v25  ;;  %v2777_v11 = vcombine.low %v2769_v7, %v2776_v9  ;;  %v3175_v7 = vrot.slane %v3167_v34, %v13636_v39  ;;  %v14272_v9 = vld [vmem:[%s19789_s7 + $0xb8] sm:$0xff] }
 0x22a   :  { %12476 = vmatprep.subr.mxu1 %v10381_v32 }
 0x22b   :  { %12477 = vmatpush3.msra.mxu1 %v10381_v32 }
 0x22c   :  { %12479 = vmatmul.mubr.msk.f32.vlgmr.msra.gmra.mxu1 %vm278_vm0, %v2346_v44  ;;  %12506 = vmatprep.subr.mxu1 %v10412_v41  ;;  %v10423_v44 = vld [vmem:[%s19789_s7 + $0x70] sm:$0xff] }
 0x22d   :  { %12481 = vmatprep.mubr.msk.f32.mxu1 %vm278_vm0, %v2363_v45  ;;  %12507 = vmatpush3.msra.mxu1 %v10412_v41  ;;  %v10424_v41 = vld [vmem:[%s19789_s7 + $0x78] sm:$0xff] }
 0x22e   :  { %12508 = vmatprep.subr.mxu1 %v10411_v47  ;;  %12528 = vmatprep.subr.mxu0 %v10424_v41 }
 0x22f   :  { %12509 = vmatpush3.msra.mxu1 %v10411_v47  ;;  %12529 = vmatpush3.msra.mxu0 %v10424_v41  ;;  %v3122_v47 = vld [vmem:[%s19789_s7 + $0x28] sm:$0xff] }
 0x230   :  { %12482 = vmatmul.mubr.msk.f32.gmra.mxu1 %vm278_vm0, %v2380_v49  ;;  %12510 = vmatprep.subr.mxu1 %v10410_v51  ;;  %v10421_v49 = vld [vmem:[%s19789_s7 + $0x60] sm:$0xff] }
 0x231   :  { %12511 = vmatpush3.msra.mxu1 %v10410_v51  ;;  %12522 = vmatprep.mubr.msk.f32.mxu1 %vm278_vm0, %v2743_v59  ;;  %v3120_v51 = vld [vmem:[%s19789_s7 + $0x18] sm:$0xff] }
 0x232   :  { %12512 = vmatprep.subr.mxu1 %v10409_v53  ;;  %12530 = vmatprep.subr.mxu0 %v10423_v44  ;;  %v10420_v59 = vld [vmem:[%s19789_s7 + $0x58] sm:$0xff] }
 0x233   :  { %12513 = vmatpush3.msra.mxu1 %v10409_v53  ;;  %12531 = vmatpush3.msra.mxu0 %v10423_v44  ;;  %v3101_v53 = vld [vmem:[#allocation4] sm:$0x3] }
 0x234   :  { %12514 = vmatprep.subr.mxu1 %v10408_v3  ;;  %12532 = vmatprep.subr.mxu0 %v10422_v28  ;;  %v3344_v62 = vcombine.low %v3101_v53, %v3102_v55 }
 0x235   :  { %12515 = vmatpush3.msra.mxu1 %v10408_v3  ;;  %12533 = vmatpush3.msra.mxu0 %v10422_v28  ;;  %v3103_v3 = vld [vmem:[#allocation4 + $0x4] sm:$0x3] }
 0x236   :  { %12516 = vmatprep.subr.mxu1 %v10407_v60  ;;  %12534 = vmatprep.subr.mxu0 %v10421_v49  ;;  %v3345_v4 = vcombine.low %v3103_v3, %v3104_v61  ;;  %v3352_v52 = vrot.slane %v3344_v62, %v13636_v39 }
 0x237   :  { %12517 = vmatpush3.msra.mxu1 %v10407_v60  ;;  %12535 = vmatpush3.msra.mxu0 %v10421_v49 }
 0x238   :  { %12518 = vmatprep.subr.mxu1 %v10406_v6  ;;  %12536 = vmatprep.subr.mxu0 %v10420_v59  ;;  %v3359_v0 = vrot.slane %v3345_v4, %v13636_v39 }
 0x239   :  { %12519 = vmatpush3.msra.mxu1 %v10406_v6  ;;  %12537 = vmatpush3.msra.mxu0 %v10420_v59  ;;  %v3129_v6 = vld [vmem:[#allocation4 + $0x8] sm:$0x3] }
 0x23a   :  { %12520 = vmatprep.subr.mxu1 %v10405_v58  ;;  %12538 = vmatprep.subr.mxu0 %v10419_v8  ;;  %v3360_v5 = vcombine.low %v3352_v52, %v3359_v0 }
 0x23b   :  { %12521 = vmatpush3.msra.mxu1 %v10405_v58  ;;  %12539 = vmatpush3.msra.mxu0 %v10419_v8  ;;  %v3168_v58 = vcombine.low %v3128_v50, %v3129_v6 }
 0x23c   :  { %12523 = vmatmul.mubr.msk.f32.vlgmr.msra.gmra.mxu1 %vm278_vm0, %v2760_v10  ;;  %12550 = vmatprep.subr.mxu1 %v3124_v40 }
 0x23d   :  { %12525 = vmatprep.mubr.msk.f32.mxu1 %vm278_vm0, %v2777_v11  ;;  %12551 = vmatpush3.msra.mxu1 %v3124_v40  ;;  %v3182_v54 = vrot.slane %v3168_v58, %v13636_v39 }
 0x23e   :  { %12552 = vmatprep.subr.mxu1 %v3123_v43  ;;  %12540 = vmatprep.subr.mxu0 %v10418_v16 }
 0x23f   :  { %12553 = vmatpush3.msra.mxu1 %v3123_v43  ;;  %12541 = vmatpush3.msra.mxu0 %v10418_v16  ;;  %v3183_v10 = vcombine.low %v3175_v7, %v3182_v54 }
 0x240   :  { %12526 = vmatmul.mubr.msk.f32.gmra.mxu1 %vm278_vm0, %v2794_v12  ;;  %12554 = vmatprep.subr.mxu1 %v3122_v47 }
 0x241   :  { %12555 = vmatpush3.msra.mxu1 %v3122_v47  ;;  %12542 = vmatprep.subr.mxu0 %v10417_v22 }
 0x242   :  { %12556 = vmatprep.subr.mxu1 %v3121_v56  ;;  %12566 = vmatprep.mubr.msk.f32.mxu1 %vm278_vm0, %v3360_v5 }
 0x243   :  { %12557 = vmatpush3.msra.mxu1 %v3121_v56  ;;  %12543 = vmatpush3.msra.mxu0 %v10417_v22 }
 0x244   :  { %12558 = vmatprep.subr.mxu1 %v3120_v51  ;;  %12572 = vmatprep.subr.mxu0 %v14272_v9 }
 0x245   :  { %12559 = vmatpush3.msra.mxu1 %v3120_v51  ;;  %12544 = vmatprep.mubr.msk.f32.mxu0 %vm278_vm0, %v3183_v10 }
 0x246   :  { %12560 = vmatprep.subr.mxu1 %v3119_v2 }
 0x247   :  { %12561 = vmatpush3.msra.mxu1 %v3119_v2 }
 0x248   :  { %12562 = vmatprep.subr.mxu1 %v3118_v18 }
 0x249   :  { %12563 = vmatpush3.msra.mxu1 %v3118_v18 }
 0x24a   :  { %12564 = vmatprep.subr.mxu1 %v3117_v19 }
 0x24b   :  { %12565 = vmatpush3.msra.mxu1 %v3117_v19 }
 0x24c   :  { %12594 = vmatprep.subr.mxu1 %v14266_v38 }
 0x27d   :  { %v14175_v13 = vpop.f32.mrf.mxu1 }
 0x27f   :  { %v14177_v14 = vpop.f32.mrf.mxu1 }
 0x297   :  { %v12502_v55 = vpop.f32.mrf.mxu0 }
 0x298   :  { %v14179_v15 = vpop.f32.mrf.mxu1 }
 0x29a   :  { %v14181_v17 = vpop.f32.mrf.mxu1 }
 0x29c   :  { %v14183_v20 = vpop.f32.mrf.mxu1 }
 0x29d   :  { %v1431_v41 = vadd.f32 %v14183_v20, %v14175_v13 }
 0x29e   :  { %v14185_v21 = vpop.f32.mrf.mxu1 }
 0x29f   :  { %v1426_v43 = vadd.f32 %v14185_v21, %v14177_v14 }
 0x2a0   :  { %v14187_v23 = vpop.f32.mrf.mxu1 }
 0x2a1   :  { %v1441_v56 = vadd.f32 %v14187_v23, %v14179_v15 }
 0x2a2   :  { %v14189_v25 = vpop.f32.mrf.mxu1 }
 0x2a3   :  { %v1436_v49 = vadd.f32 %v14189_v25, %v14181_v17  ;;  %v2662_v25 = vpop.f32.mrf.mxu0 }
 0x2a5   :  { %v12505_v61 = vpop.f32.mrf.mxu0 }
 0x2ac   :  { %v14191_v27 = vpop.f32.mrf.mxu1 }
 0x2ad   :  { %v1648_v44 = vadd.f32 %v14191_v27, %v1431_v41 }
 0x2ae   :  { %v14193_v29 = vpop.f32.mrf.mxu1 }
 0x2af   :  { %v1647_v47 = vadd.f32 %v14193_v29, %v1426_v43 }
 0x2b0   :  { %v14195_v31 = vpop.f32.mrf.mxu1 }
 0x2b1   :  { %v1650_v13 = vadd.f32 %v14195_v31, %v1441_v56 }
 0x2b2   :  { %v14197_v32 = vpop.f32.mrf.mxu1 }
 0x2b3   :  { %v1649_v14 = vadd.f32 %v14197_v32, %v1436_v49 }
 0x2bc   :  { %v14199_v33 = vpop.f32.mrf.mxu1 }
 0x2bd   :  { %v1855_v51 = vadd.f32 %v14199_v33, %v1648_v44 }
 0x2be   :  { %v14201_v1 = vpop.f32.mrf.mxu1 }
 0x2bf   :  { %v1854_v53 = vadd.f32 %v14201_v1, %v1647_v47 }
 0x2c0   :  { %v14203_v35 = vpop.f32.mrf.mxu1 }
 0x2c1   :  { %v1857_v29 = vadd.f32 %v14203_v35, %v1650_v13  ;;  %v2672_v35 = vpop.f32.mrf.mxu0 }
 0x2c2   :  { %v14205_v36 = vpop.f32.mrf.mxu1 }
 0x2c3   :  { %v1856_v15 = vadd.f32 %v14205_v36, %v1649_v14 }
 0x2cc   :  { %v14207_v37 = vpop.f32.mrf.mxu1 }
 0x2cd   :  { %v2061_v20 = vadd.f32 %v14207_v37, %v1855_v51 }
 0x2ce   :  { %v14221_v45 = vpop.f32.mrf.mxu1 }
 0x2cf   :  { %v2060_v21 = vadd.f32 %v14221_v45, %v1854_v53 }
 0x2d0   :  { %v14238_v57 = vpop.f32.mrf.mxu1 }
 0x2d1   :  { %v2063_v33 = vadd.f32 %v14238_v57, %v1857_v29 }
 0x2d2   :  { %v2051_v46 = vpop.f32.mrf.mxu1 }
 0x2d3   :  { %v2062_v1 = vadd.f32 %v2051_v46, %v1856_v15 }
 0x2dc   :  { %v12458_v60 = vpop.f32.mrf.mxu1 }
 0x2dd   :  { %v2268_v23 = vadd.f32 %v12458_v60, %v2061_v20 }
 0x2de   :  { %v2248_v42 = vpop.f32.mrf.mxu1 }
 0x2df   :  { %v2267_v17 = vadd.f32 %v2248_v42, %v2060_v21 }
 0x2e0   :  { %v12461_v11 = vpop.f32.mrf.mxu1 }
 0x2e1   :  { %v2270_v32 = vadd.f32 %v12461_v11, %v2063_v33 }
 0x2e2   :  { %v2258_v12 = vpop.f32.mrf.mxu1 }
 0x2e3   :  { %v2269_v62 = vadd.f32 %v2258_v12, %v2062_v1 }
 0x2ec   :  { %v12480_v40 = vpop.f32.mrf.mxu1 }
 0x2ed   :  { %v2475_v59 = vadd.f32 %v12480_v40, %v2268_v23 }
 0x2ee   :  { %v2455_v28 = vpop.f32.mrf.mxu1 }
 0x2ef   :  { %v2474_v3 = vadd.f32 %v2455_v28, %v2267_v17  ;;  %v2682_v2 = vadd.f32 %v12502_v55, %v2475_v59  ;;  %v2929_v59 = vld [vmem:[%s19818_s30] sm:$0x1] }
 0x2f0   :  { %v12483_v27 = vpop.f32.mrf.mxu1 }
 0x2f1   :  { %v2477_v4 = vadd.f32 %v12483_v27, %v2270_v32  ;;  %v2681_v8 = vadd.f32 %v2662_v25, %v2474_v3 }
 0x2f2   :  { %v2465_v31 = vpop.f32.mrf.mxu1 }
 0x2f3   :  { %v2476_v45 = vadd.f32 %v2465_v31, %v2269_v62  ;;  %v2684_v16 = vadd.f32 %v12505_v61, %v2477_v4  ;;  %v2933_v61 = vld [vmem:[%s19788_s6] sm:$0x1]  ;;  %s12958_s6 = scalar_lea.vmem %s10310_s22, 32 }
 0x2f4   :  { %p12959_p0 = scmp.ne.s32.totalorder %s10310_s22, %s12958_s6  ;;  %p12964_p2 = scmp.lt.s32.totalorder %s12958_s6, %s12958_s6 }
 0x2f5   :  { %v2683_v19 = vadd.f32 %v2672_v35, %v2476_v45 }
 0x2f6   :  { %p12965_p3 = por %p12964_p2, %p12963_p1 }
 0x2f8   :  { %p12966_p4 = pnand %p12965_p3, %p12959_p0 }
 0x2fc   :  { %v12524_v37 = vpop.f32.mrf.mxu1 }
 0x2fd   :  { %v2889_v36 = vadd.f32 %v12524_v37, %v2682_v2 }
 0x2fe   :  { %v2869_v52 = vpop.f32.mrf.mxu1 }
 0x2ff   :  { %v2888_v0 = vadd.f32 %v2869_v52, %v2681_v8  ;;  %v2893_v22 = vsel %vm278_vm0, %v2889_v36, 0.0 }
 0x300   :  { %v12527_v18 = vpop.f32.mrf.mxu1 }
 0x301   :  { %v2892_v57 = vsel %vm278_vm0, %v2888_v0, 0.0  ;;  %v2891_v60 = vadd.f32 %v12527_v18, %v2684_v16 }
 0x302   :  { %v2879_v46 = vpop.f32.mrf.mxu1  ;;  %v2894_v26 = vadd.f32 %v2893_v22, %v2892_v57 }
 0x303   :  { %v2890_v5 = vadd.f32 %v2879_v46, %v2683_v19  ;;  %v2897_v6 = vsel %vm278_vm0, %v2891_v60, 0.0 }
 0x305   :  { %v2895_v30 = vsel %vm278_vm0, %v2890_v5, 0.0 }
 0x306   :  { %v2896_v50 = vadd.f32 %v2895_v30, %v2894_v26 }
 0x308   :  { %v2898_v34 = vadd.f32 %v2897_v6, %v2896_v50 }
 0x30a   :  { %v2899_v58 = vrot.slane %v2898_v34, 4 }
 0x30c   :  { %v2900_v7 = vadd.f32 %v2899_v58, %v2898_v34 }
 0x30e   :  { %v2901_v42 = vrot.slane %v2900_v7, 2 }
 0x310   :  { %v2902_v54 = vadd.f32 %v2901_v42, %v2900_v7 }
 0x312   :  { %v2903_v10 = vrot.slane %v2902_v54, 1 }
 0x314   :  { %v2904_v11 = vadd.f32 %v2903_v10, %v2902_v54 }
 0x316   :  { %v2906_v12 = vmul.f32 0.03125, %v2904_v11 }
 0x318   :  { %v2907_v40 = vsub.f32 %v2888_v0, %v2906_v12  ;;  %v2908_v41 = vsub.f32 %v2889_v36, %v2906_v12  ;;  %v2909_v43 = vsub.f32 %v2890_v5, %v2906_v12  ;;  %v2910_v44 = vsub.f32 %v2891_v60, %v2906_v12 }
 0x31a   :  { %v2911_v47 = vmul.f32 %v2907_v40, %v2907_v40  ;;  %v2912_v28 = vmul.f32 %v2908_v41, %v2908_v41  ;;  %v2913_v56 = vmul.f32 %v2909_v43, %v2909_v43  ;;  %v2914_v49 = vmul.f32 %v2910_v44, %v2910_v44 }
 0x31c   :  { %v2915_v51 = vsel %vm278_vm0, %v2911_v47, 0.0  ;;  %v2916_v53 = vsel %vm278_vm0, %v2912_v28, 0.0  ;;  %v2918_v13 = vsel %vm278_vm0, %v2913_v56, 0.0  ;;  %v2920_v20 = vsel %vm278_vm0, %v2914_v49, 0.0  ;;  %v3105_v28 = vld [vmem:[#allocation4 + $0xc] sm:$0x3] }
 0x31d   :  { %v2917_v55 = vadd.f32 %v2916_v53, %v2915_v51  ;;  %v3109_v56 = vld [vmem:[#allocation4 + $0x18] sm:$0x3] }
 0x31f   :  { %v2919_v14 = vadd.f32 %v2918_v13, %v2917_v55  ;;  %v3113_v13 = vld [vmem:[#allocation4 + $0x24] sm:$0x3] }
 0x321   :  { %v2921_v21 = vadd.f32 %v2920_v20, %v2919_v14 }
 0x323   :  { %v2922_v27 = vrot.slane %v2921_v21, 4 }
 0x325   :  { %v2923_v29 = vadd.f32 %v2922_v27, %v2921_v21 }
 0x327   :  { %v2924_v15 = vrot.slane %v2923_v29, 2 }
 0x329   :  { %v2925_v23 = vadd.f32 %v2924_v15, %v2923_v29 }
 0x32b   :  { %v2926_v17 = vrot.slane %v2925_v23, 1 }
 0x32d   :  { %v2927_v25 = vadd.f32 %v2926_v17, %v2925_v23 }
 0x32f   :  { %v2928_v33 = vmul.f32 0.03125, %v2927_v25 }
 0x331   :  { %v2930_v1 = vadd.f32 1e-05, %v2928_v33 }
 0x333   :  { %12922 = vrsqrt.f32 %v2930_v1 }
 0x340   :  { %v12923_v3 = vpop.eup %12922 }
 0x341   :  { %v2932_v31 = vmul.f32 %v12923_v3, %v2929_v59 }
 0x343   :  { %v2934_v32 = vmul.f32 %v2932_v31, %v2906_v12  ;;  %v2940_v62 = vrot.slane %v2932_v31, %v13713_v48 }
 0x345   :  { %v2935_v37 = vsub.f32 %v2933_v61, %v2934_v32  ;;  %v2942_v4 = vmul.f32 %v2940_v62, %v2888_v0  ;;  %v2943_v45 = vmul.f32 %v2940_v62, %v2889_v36  ;;  %v2944_v2 = vmul.f32 %v2940_v62, %v2890_v5 }
 0x346   :  { %v2945_v8 = vmul.f32 %v2940_v62, %v2891_v60  ;;  %v3713_v62 = vld [vmem:[#allocation4 + $0xc] sm:$0x3] }
 0x347   :  { %v2950_v35 = vrot.slane %v2935_v37, %v13713_v48 }
 0x349   :  { %v2952_v52 = vadd.f32 %v2950_v35, %v2942_v4  ;;  %v2953_v18 = vadd.f32 %v2950_v35, %v2943_v45  ;;  %v2954_v16 = vadd.f32 %v2950_v35, %v2944_v2  ;;  %v2955_v19 = vadd.f32 %v2950_v35, %v2945_v8 }
 0x34b   :  { %v2956_v57 = vmax.f32 %v2952_v52, 0.0  ;;  %v2957_v46 = vmax.f32 %v2953_v18, 0.0  ;;  %v2958_v22 = vmax.f32 %v2954_v16, 0.0  ;;  %v2959_v26 = vmax.f32 %v2955_v19, 0.0 }
 0x34d   :  { %v3000_v30 = vcombine.high %v2956_v57, %v2956_v57  ;;  %v3007_v50 = vrot.slane %v2956_v57, %v13636_v39  ;;  %v3017_v6 = vcombine.high %v2957_v46, %v2957_v46  ;;  %v3024_v34 = vrot.slane %v2957_v46, %v13636_v39 }
 0x34e   :  { %v3034_v0 = vcombine.high %v2958_v22, %v2958_v22  ;;  %v3041_v36 = vrot.slane %v2958_v22, %v13636_v39  ;;  %v3051_v60 = vcombine.high %v2959_v26, %v2959_v26  ;;  %v3058_v5 = vrot.slane %v2959_v26, %v13636_v39 }
 0x34f   :  { %v3014_v58 = vrot.slane %v3000_v30, %v13636_v39  ;;  %v3015_v7 = vcombine.high %v3007_v50, %v3007_v50  ;;  %v3031_v42 = vrot.slane %v3017_v6, %v13636_v39  ;;  %v3032_v54 = vcombine.high %v3024_v34, %v3024_v34  ;;  %3085 = vst.msk [vmem:[#allocation4 + $0xe] sm:$0x3] %vm807_vm1, %v3007_v50 }
 0x350   :  { %3089 = vst.msk [vmem:[#allocation4 + $0x1a] sm:$0x3] %vm807_vm1, %v3024_v34  ;;  %v3048_v10 = vrot.slane %v3034_v0, %v13636_v39  ;;  %v3049_v11 = vcombine.high %v3041_v36, %v3041_v36  ;;  %v3065_v12 = vrot.slane %v3051_v60, %v13636_v39  ;;  %v3066_v40 = vcombine.high %v3058_v5, %v3058_v5 }
 0x351   :  { %3093 = vst.msk [vmem:[#allocation4 + $0x26] sm:$0x3] %vm807_vm1, %v3041_v36  ;;  %3097 = vst.msk [vmem:[#allocation4 + $0x32] sm:$0x3] %vm807_vm1, %v3058_v5  ;;  %v3016_v41 = vcombine.high %v3014_v58, %v3014_v58  ;;  %v3033_v43 = vcombine.high %v3031_v42, %v3031_v42  ;;  %v10451_v5 = vld [vmem:[%s19789_s7 + $0xf0] sm:$0xff] }
 0x352   :  { %3086 = vst.msk [vmem:[#allocation4 + $0x10] sm:$0x3] %vm807_vm1, %v3015_v7  ;;  %3087 = vst.msk [vmem:[#allocation4 + $0x12] sm:$0x3] %vm807_vm1, %v3014_v58  ;;  %v3050_v44 = vcombine.high %v3048_v10, %v3048_v10  ;;  %v3067_v47 = vcombine.high %v3065_v12, %v3065_v12 }
 0x353   :  { %3090 = vst.msk [vmem:[#allocation4 + $0x1c] sm:$0x3] %vm807_vm1, %v3032_v54  ;;  %3091 = vst.msk [vmem:[#allocation4 + $0x1e] sm:$0x3] %vm807_vm1, %v3031_v42 }
 0x354   :  { %3094 = vst.msk [vmem:[#allocation4 + $0x28] sm:$0x3] %vm807_vm1, %v3049_v11  ;;  %3095 = vst.msk [vmem:[#allocation4 + $0x2a] sm:$0x3] %vm807_vm1, %v3048_v10 }
 0x355   :  { %3098 = vst.msk [vmem:[#allocation4 + $0x34] sm:$0x3] %vm807_vm1, %v3066_v40  ;;  %3099 = vst.msk [vmem:[#allocation4 + $0x36] sm:$0x3] %vm807_vm1, %v3065_v12 }
 0x356   :  { %3088 = vst.msk [vmem:[#allocation4 + $0x14] sm:$0x3] %vm807_vm1, %v3016_v41  ;;  %3092 = vst.msk [vmem:[#allocation4 + $0x20] sm:$0x3] %vm807_vm1, %v3033_v43  ;;  %v3106_v49 = vld [vmem:[#allocation4 + $0xe] sm:$0x3] }
 0x357   :  { %3096 = vst.msk [vmem:[#allocation4 + $0x2c] sm:$0x3] %vm807_vm1, %v3050_v44  ;;  %3100 = vst.msk [vmem:[#allocation4 + $0x38] sm:$0x3] %vm807_vm1, %v3067_v47  ;;  %v3110_v51 = vld [vmem:[#allocation4 + $0x1a] sm:$0x3]  ;;  %v3361_v53 = vcombine.low %v3105_v28, %v3106_v49 }
 0x358   :  { %v3130_v55 = vld [vmem:[#allocation4 + $0xe] sm:$0x3]  ;;  %v3114_v14 = vld [vmem:[#allocation4 + $0x26] sm:$0x3]  ;;  %v3378_v29 = vcombine.low %v3109_v56, %v3110_v51  ;;  %v3134_v15 = vld [vmem:[#allocation4 + $0x1a] sm:$0x3] }
 0x359   :  { %v3107_v20 = vld [vmem:[#allocation4 + $0x10] sm:$0x3]  ;;  %v3108_v21 = vld [vmem:[#allocation4 + $0x12] sm:$0x3]  ;;  %v3395_v32 = vcombine.low %v3113_v13, %v3114_v14  ;;  %v3369_v37 = vrot.slane %v3361_v53, %v13636_v39  ;;  %v3714_v46 = vld [vmem:[#allocation4 + $0xe] sm:$0x3] }
 0x35a   :  { %v3111_v27 = vld [vmem:[#allocation4 + $0x1c] sm:$0x3]  ;;  %v3362_v23 = vcombine.low %v3107_v20, %v3108_v21  ;;  %v3112_v17 = vld [vmem:[#allocation4 + $0x1e] sm:$0x3]  ;;  %v3131_v25 = vld [vmem:[#allocation4 + $0x10] sm:$0x3]  ;;  %v3386_v18 = vrot.slane %v3378_v29, %v13636_v39  ;;  %v3754_v12 = vcombine.low %v3713_v62, %v3714_v46 }
 0x35b   :  { %v3132_v33 = vld [vmem:[#allocation4 + $0x12] sm:$0x3]  ;;  %v3379_v1 = vcombine.low %v3111_v27, %v3112_v17  ;;  %v3184_v3 = vcombine.low %v3130_v55, %v3131_v25  ;;  %v3135_v31 = vld [vmem:[#allocation4 + $0x1c] sm:$0x3]  ;;  %v3136_v61 = vld [vmem:[#allocation4 + $0x1e] sm:$0x3]  ;;  %v3403_v47 = vrot.slane %v3395_v32, %v13636_v39 }
 0x35c   :  { %v3376_v4 = vrot.slane %v3362_v23, %v13636_v39  ;;  %v3201_v8 = vcombine.low %v3134_v15, %v3135_v31  ;;  %v3115_v35 = vld [vmem:[#allocation4 + $0x28] sm:$0x3]  ;;  %v3116_v52 = vld [vmem:[#allocation4 + $0x2a] sm:$0x3]  ;;  %v3715_v22 = vld [vmem:[#allocation4 + $0x10] sm:$0x3]  ;;  %v3762_v21 = vrot.slane %v3754_v12, %v13636_v39 }
 0x35d   :  { %v3133_v59 = vld [vmem:[#allocation4 + $0x14] sm:$0x3]  ;;  %v3137_v2 = vld [vmem:[#allocation4 + $0x20] sm:$0x3]  ;;  %v3393_v16 = vrot.slane %v3379_v1, %v13636_v39  ;;  %v3396_v57 = vcombine.low %v3115_v35, %v3116_v52  ;;  %v3716_v26 = vld [vmem:[#allocation4 + $0x12] sm:$0x3]  ;;  %v3192_v50 = vrot.slane %v3184_v3, %v13636_v39 }
 0x35e   :  { %v3185_v45 = vcombine.low %v3132_v33, %v3133_v59  ;;  %v3202_v19 = vcombine.low %v3136_v61, %v3137_v2  ;;  %v3377_v30 = vcombine.low %v3369_v37, %v3376_v4  ;;  %v3755_v34 = vcombine.low %v3715_v22, %v3716_v26  ;;  %v3139_v0 = vld [vmem:[#allocation4 + $0x28] sm:$0x3]  ;;  %v3141_v36 = vld [vmem:[#allocation4 + $0x2c] sm:$0x3]  ;;  %v3138_v54 = vld [vmem:[#allocation4 + $0x26] sm:$0x3] }
 0x35f   :  { %v3394_v60 = vcombine.low %v3386_v18, %v3393_v16  ;;  %v3209_v58 = vrot.slane %v3201_v8, %v13636_v39  ;;  %v3410_v42 = vrot.slane %v3396_v57, %v13636_v39  ;;  %v3140_v10 = vld [vmem:[#allocation4 + $0x2a] sm:$0x3]  ;;  %v3218_v40 = vcombine.low %v3138_v54, %v3139_v0  ;;  %v10450_v28 = vld [vmem:[%s19789_s7 + $0xe8] sm:$0xff]  ;;  %v3508_v13 = vld [vmem:[#allocation4 + $0x8] sm:$0x3] }
 0x360   :  { %v3199_v6 = vrot.slane %v3185_v45, %v13636_v39  ;;  %v3216_v7 = vrot.slane %v3202_v19, %v13636_v39  ;;  %12567 = vmatmul.mubr.msk.f32.vlgmr.msra.gmra.mxu1 %vm278_vm0, %v3377_v30  ;;  %v3219_v41 = vcombine.low %v3140_v10, %v3141_v36  ;;  %v10439_v44 = vld [vmem:[%s19789_s7 + $0xb0] sm:$0xff]  ;;  %v3769_v56 = vrot.slane %v3755_v34, %v13636_v39  ;;  %v3506_v49 = vld [vmem:[#allocation4 + $0x4] sm:$0x3]  ;;  %v3507_v51 = vld [vmem:[#allocation4 + $0x6] sm:$0x3] }
 0x361   :  { %12595 = vmatpush3.msra.mxu1 %v14266_v38  ;;  %12569 = vmatprep.mubr.msk.f32.mxu1 %vm278_vm0, %v3394_v60  ;;  %v3411_v53 = vcombine.low %v3403_v47, %v3410_v42  ;;  %v10438_v55 = vld [vmem:[%s19789_s7 + $0xa8] sm:$0xff]  ;;  %v3509_v14 = vld [vmem:[#allocation4 + $0xa] sm:$0x3]  ;;  %v10449_v20 = vld [vmem:[%s19789_s7 + $0xe0] sm:$0xff]  ;;  %v3226_v27 = vrot.slane %v3218_v40, %v13636_v39  ;;  %v3547_v25 = vcombine.low %v3506_v49, %v3507_v51 }
 0x362   :  { %v3200_v11 = vcombine.low %v3192_v50, %v3199_v6  ;;  %v3217_v43 = vcombine.low %v3209_v58, %v3216_v7  ;;  %12596 = vmatprep.subr.mxu1 %v10451_v5  ;;  %v3233_v38 = vrot.slane %v3219_v41, %v13636_v39  ;;  %v3720_v29 = vld [vmem:[#allocation4 + $0x1e] sm:$0x3]  ;;  %v10448_v23 = vld [vmem:[%s19789_s7 + $0xd8] sm:$0xff]  ;;  %v3717_v17 = vld [vmem:[#allocation4 + $0x18] sm:$0x3]  ;;  %v3770_v33 = vcombine.low %v3762_v21, %v3769_v56 }
 0x363   :  { %12597 = vmatpush3.msra.mxu1 %v10451_v5  ;;  %v10437_v15 = vld [vmem:[%s19789_s7 + $0xa0] sm:$0xff]  ;;  %v3548_v3 = vcombine.low %v3508_v13, %v3509_v14  ;;  %v3723_v31 = vld [vmem:[#allocation4 + $0x28] sm:$0x3]  ;;  %v3724_v61 = vld [vmem:[#allocation4 + $0x2a] sm:$0x3]  ;;  %v14395_v26 = vrot.slane %v3547_v25, %v13636_v39 }
 0x364   :  { %12545 = vmatmul.mubr.msk.f32.vlgmr.msra.gmra.mxu0 %vm278_vm0, %v3200_v11  ;;  %12598 = vmatprep.subr.mxu1 %v10450_v28  ;;  %v3234_v1 = vcombine.low %v3226_v27, %v3233_v38  ;;  %v3718_v59 = vld [vmem:[#allocation4 + $0x1a] sm:$0x3]  ;;  %v10436_v32 = vld [vmem:[%s19789_s7 + $0x98] sm:$0xff]  ;;  %v10447_v62 = vld [vmem:[%s19789_s7 + $0xd0] sm:$0xff]  ;;  %v3789_v18 = vcombine.low %v3723_v31, %v3724_v61 }
 0x365   :  { %12573 = vmatpush3.msra.mxu0 %v14272_v9  ;;  %12547 = vmatprep.mubr.msk.f32.mxu0 %vm278_vm0, %v3217_v43  ;;  %v3719_v9 = vld [vmem:[#allocation4 + $0x1c] sm:$0x3]  ;;  %v3512_v4 = vld [vmem:[#allocation4 + $0x14] sm:$0x3]  ;;  %v3513_v45 = vld [vmem:[#allocation4 + $0x16] sm:$0x3]  ;;  %v3771_v52 = vcombine.low %v3717_v17, %v3718_v59  ;;  %v14398_v30 = vrot.slane %v3548_v3, %v13636_v39 }
 0x366   :  { %12574 = vmatprep.subr.mxu0 %v10439_v44  ;;  %12570 = vmatmul.mubr.msk.f32.gmra.mxu1 %vm278_vm0, %v3411_v53  ;;  %v3772_v37 = vcombine.low %v3719_v9, %v3720_v29  ;;  %v3721_v2 = vld [vmem:[#allocation4 + $0x24] sm:$0x3]  ;;  %v3722_v8 = vld [vmem:[#allocation4 + $0x26] sm:$0x3]  ;;  %v3517_v35 = vld [vmem:[#allocation4 + $0x22] sm:$0x3]  ;;  %v3565_v50 = vcombine.low %v3512_v4, %v3513_v45  ;;  %v3803_v12 = vrot.slane %v3789_v18, %v13636_v39 }
 0x367   :  { %12575 = vmatpush3.msra.mxu0 %v10439_v44  ;;  %12599 = vmatpush3.msra.mxu1 %v10450_v28  ;;  %v3510_v16 = vld [vmem:[#allocation4 + $0x10] sm:$0x3]  ;;  %v3511_v19 = vld [vmem:[#allocation4 + $0x12] sm:$0x3]  ;;  %v3516_v57 = vld [vmem:[#allocation4 + $0x20] sm:$0x3]  ;;  %v3788_v0 = vcombine.low %v3721_v2, %v3722_v8  ;;  %v3779_v11 = vrot.slane %v3771_v52, %v13636_v39  ;;  %v3563_v44 = vcombine.low %v14395_v26, %v14398_v30 }
 0x368   :  { %12576 = vmatprep.subr.mxu0 %v10438_v55  ;;  %12600 = vmatprep.subr.mxu1 %v10449_v20  ;;  %v10435_v46 = vld [vmem:[%s19789_s7 + $0x90] sm:$0xff]  ;;  %v10446_v22 = vld [vmem:[%s19789_s7 + $0xc8] sm:$0xff]  ;;  %v3786_v34 = vrot.slane %v3772_v37, %v13636_v39  ;;  %v3514_v36 = vld [vmem:[#allocation4 + $0x1c] sm:$0x3]  ;;  %v3564_v58 = vcombine.low %v3510_v16, %v3511_v19  ;;  %v3582_v7 = vcombine.low %v3516_v57, %v3517_v35 }
 0x369   :  { %12610 = vmatprep.mubr.msk.f32.mxu1 %vm278_vm0, %v3770_v33  ;;  %12548 = vmatmul.mubr.msk.f32.gmra.mxu0 %vm278_vm0, %v3234_v1  ;;  %v10434_v6 = vld [vmem:[%s19789_s7 + $0x88] sm:$0xff]  ;;  %v3515_v60 = vld [vmem:[#allocation4 + $0x1e] sm:$0x3]  ;;  %v3727_v42 = vld [vmem:[#allocation4 + $0x34] sm:$0x3]  ;;  %v3579_v47 = vrot.slane %v3565_v50, %v13636_v39 }
 0x36a   :  { %12577 = vmatpush3.msra.mxu0 %v10438_v55  ;;  %12601 = vmatpush3.msra.mxu1 %v10449_v20  ;;  %v10445_v5 = vld [vmem:[%s19789_s7 + $0xc0] sm:$0xff]  ;;  %v3728_v54 = vld [vmem:[#allocation4 + $0x36] sm:$0x3]  ;;  %v3725_v40 = vld [vmem:[#allocation4 + $0x30] sm:$0x3]  ;;  %v3581_v28 = vcombine.low %v3514_v36, %v3515_v60  ;;  %v3787_v51 = vcombine.low %v3779_v11, %v3786_v34  ;;  %v3796_v55 = vrot.slane %v3788_v0, %v13636_v39 }
 0x36b   :  { %12578 = vmatprep.subr.mxu0 %v10437_v15  ;;  %12602 = vmatprep.subr.mxu1 %v10448_v23  ;;  %v10433_v10 = vld [vmem:[%s19789_s7 + $0x80] sm:$0xff]  ;;  %v3726_v41 = vld [vmem:[#allocation4 + $0x32] sm:$0x3]  ;;  %v4129_v43 = vld [vmem:[#allocation4 + $0x16] sm:$0x3]  ;;  %v3806_v13 = vcombine.low %v3727_v42, %v3728_v54  ;;  %v3572_v21 = vrot.slane %v3564_v58, %v13636_v39  ;;  %v3596_v27 = vrot.slane %v3582_v7, %v13636_v39 }
 0x36c   :  { %12579 = vmatpush3.msra.mxu0 %v10437_v15  ;;  %12603 = vmatpush3.msra.mxu1 %v10448_v23  ;;  %v4128_v56 = vld [vmem:[#allocation4 + $0x14] sm:$0x3]  ;;  %v3520_v38 = vld [vmem:[#allocation4 + $0x2c] sm:$0x3]  ;;  %v3521_v49 = vld [vmem:[#allocation4 + $0x2e] sm:$0x3]  ;;  %v3805_v9 = vcombine.low %v3725_v40, %v3726_v41  ;;  %v3804_v17 = vcombine.low %v3796_v55, %v3803_v12  ;;  %v3589_v59 = vrot.slane %v3581_v28, %v13636_v39 }
 0x36d   :  { %12580 = vmatprep.subr.mxu0 %v10436_v32  ;;  %12604 = vmatprep.subr.mxu1 %v10447_v62  ;;  %v10476_v53 = vld [vmem:[%s19789_s7 + $0x178] sm:$0xff]  ;;  %v3518_v29 = vld [vmem:[#allocation4 + $0x28] sm:$0x3]  ;;  %v3519_v15 = vld [vmem:[#allocation4 + $0x2a] sm:$0x3]  ;;  %v4168_v25 = vcombine.low %v4128_v56, %v4129_v43  ;;  %v3599_v33 = vcombine.low %v3520_v38, %v3521_v49  ;;  %v3580_v1 = vcombine.low %v3572_v21, %v3579_v47 }
 0x36e   :  { %12581 = vmatpush3.msra.mxu0 %v10436_v32  ;;  %12605 = vmatpush3.msra.mxu1 %v10447_v62  ;;  %v4126_v14 = vld [vmem:[#allocation4 + $0x10] sm:$0x3]  ;;  %v4127_v20 = vld [vmem:[#allocation4 + $0x12] sm:$0x3]  ;;  %v3922_v23 = vld [vmem:[#allocation4 + $0x14] sm:$0x3]  ;;  %v3820_v37 = vrot.slane %v3806_v13, %v13636_v39  ;;  %v3598_v4 = vcombine.low %v3518_v29, %v3519_v15  ;;  %v3597_v2 = vcombine.low %v3589_v59, %v3596_v27 }
 0x36f   :  { %12582 = vmatprep.subr.mxu0 %v10435_v46  ;;  %12606 = vmatprep.subr.mxu1 %v10446_v22  ;;  %v4167_v3 = vcombine.low %v4126_v14, %v4127_v20  ;;  %v3920_v31 = vld [vmem:[#allocation4 + $0x10] sm:$0x3]  ;;  %v3921_v61 = vld [vmem:[#allocation4 + $0x12] sm:$0x3]  ;;  %v10475_v62 = vld [vmem:[%s19789_s7 + $0x170] sm:$0xff]  ;;  %v3813_v8 = vrot.slane %v3805_v9, %v13636_v39  ;;  %v4182_v18 = vrot.slane %v4168_v25, %v13636_v39 }
 0x370   :  { %12583 = vmatpush3.msra.mxu0 %v10435_v46  ;;  %12607 = vmatpush3.msra.mxu1 %v10446_v22  ;;  %v10464_v32 = vld [vmem:[%s19789_s7 + $0x138] sm:$0xff]  ;;  %v3961_v45 = vcombine.low %v3921_v61, %v3922_v23  ;;  %v3919_v35 = vld [vmem:[#allocation4 + $0xe] sm:$0x3]  ;;  %v3613_v16 = vrot.slane %v3599_v33, %v13636_v39  ;;  %v10474_v57 = vld [vmem:[%s19789_s7 + $0x168] sm:$0xff]  ;;  %v3606_v26 = vrot.slane %v3598_v4, %v13636_v39 }
 0x371   :  { %12584 = vmatprep.subr.mxu0 %v10434_v6  ;;  %12608 = vmatprep.subr.mxu1 %v10445_v5  ;;  %v10463_v52 = vld [vmem:[%s19789_s7 + $0x130] sm:$0xff]  ;;  %v3960_v19 = vcombine.low %v3919_v35, %v3920_v31  ;;  %v4175_v46 = vrot.slane %v4167_v3, %v13636_v39  ;;  %v3821_v22 = vcombine.low %v3813_v8, %v3820_v37  ;;  %v4132_v50 = vld [vmem:[#allocation4 + $0x20] sm:$0x3]  ;;  %v10473_v60 = vld [vmem:[%s19789_s7 + $0x160] sm:$0xff] }
 0x372   :  { %12585 = vmatpush3.msra.mxu0 %v10434_v6  ;;  %12609 = vmatpush3.msra.mxu1 %v10445_v5  ;;  %v3975_v30 = vrot.slane %v3961_v45, %v13636_v39  ;;  %v4133_v6 = vld [vmem:[#allocation4 + $0x22] sm:$0x3]  ;;  %v3614_v0 = vcombine.low %v3606_v26, %v3613_v16  ;;  %v4137_v58 = vld [vmem:[#allocation4 + $0x2e] sm:$0x3]  ;;  %v4130_v7 = vld [vmem:[#allocation4 + $0x1c] sm:$0x3] }
 0x373   :  { %12586 = vmatprep.subr.mxu0 %v10433_v10  ;;  %12611 = vmatmul.mubr.msk.f32.vlgmr.msra.gmra.mxu1 %vm278_vm0, %v3787_v51  ;;  %v4183_v34 = vcombine.low %v4175_v46, %v4182_v18  ;;  %v10462_v36 = vld [vmem:[%s19789_s7 + $0x128] sm:$0xff]  ;;  %v3968_v5 = vrot.slane %v3960_v19, %v13636_v39  ;;  %v4131_v42 = vld [vmem:[#allocation4 + $0x1e] sm:$0x3]  ;;  %v4136_v54 = vld [vmem:[#allocation4 + $0x2c] sm:$0x3]  ;;  %v4185_v40 = vcombine.low %v4132_v50, %v4133_v6 }
 0x374   :  { %12638 = vmatprep.subr.mxu1 %v10476_v53  ;;  %12587 = vmatpush3.msra.mxu0 %v10433_v10  ;;  %v10461_v11 = vld [vmem:[%s19789_s7 + $0x120] sm:$0xff]  ;;  %v10472_v12 = vld [vmem:[%s19789_s7 + $0x158] sm:$0xff]  ;;  %v3926_v41 = vld [vmem:[#allocation4 + $0x20] sm:$0x3]  ;;  %v4184_v28 = vcombine.low %v4130_v7, %v4131_v42  ;;  %v4202_v56 = vcombine.low %v4136_v54, %v4137_v58 }
 0x375   :  { %12588 = vmatprep.mubr.msk.f32.mxu0 %vm278_vm0, %v3563_v44  ;;  %12613 = vmatprep.mubr.msk.f32.mxu1 %vm278_vm0, %v3804_v17  ;;  %v3976_v10 = vcombine.low %v3968_v5, %v3975_v30  ;;  %v10460_v43 = vld [vmem:[%s19789_s7 + $0x118] sm:$0xff]  ;;  %v4134_v44 = vld [vmem:[#allocation4 + $0x28] sm:$0x3]  ;;  %v4135_v47 = vld [vmem:[#allocation4 + $0x2a] sm:$0x3]  ;;  %v4199_v21 = vrot.slane %v4185_v40, %v13636_v39 }
 0x376   :  { %12639 = vmatpush3.msra.mxu1 %v10476_v53  ;;  %12589 = vmatmul.mubr.msk.f32.vlgmr.msra.gmra.mxu0 %vm278_vm0, %v3580_v1  ;;  %v3924_v38 = vld [vmem:[#allocation4 + $0x1c] sm:$0x3]  ;;  %v3925_v49 = vld [vmem:[#allocation4 + $0x1e] sm:$0x3]  ;;  %v3930_v51 = vld [vmem:[#allocation4 + $0x2c] sm:$0x3]  ;;  %v4201_v27 = vcombine.low %v4134_v44, %v4135_v47  ;;  %v4192_v3 = vrot.slane %v4184_v28, %v13636_v39  ;;  %v4216_v31 = vrot.slane %v4202_v56, %v13636_v39 }
 0x377   :  { %12616 = vmatprep.subr.mxu0 %v10464_v32  ;;  %12640 = vmatprep.subr.mxu1 %v10475_v62  ;;  %v10471_v53 = vld [vmem:[%s19789_s7 + $0x150] sm:$0xff]  ;;  %v10470_v13 = vld [vmem:[%s19789_s7 + $0x148] sm:$0xff]  ;;  %v3978_v14 = vcombine.low %v3925_v49, %v3926_v41  ;;  %v14475_v20 = vld [vmem:[#allocation4 + $0x3a] sm:$0x3] }
 0x378   :  { %12591 = vmatprep.mubr.msk.f32.mxu0 %vm278_vm0, %v3597_v2  ;;  %12617 = vmatpush3.msra.mxu0 %v10464_v32  ;;  %v10459_v55 = vld [vmem:[%s19789_s7 + $0x110] sm:$0xff]  ;;  %v3923_v9 = vld [vmem:[#allocation4 + $0x1a] sm:$0x3]  ;;  %v10458_v23 = vld [vmem:[%s19789_s7 + $0x108] sm:$0xff]  ;;  %v4200_v35 = vcombine.low %v4192_v3, %v4199_v21 }
 0x379   :  { %12641 = vmatpush3.msra.mxu1 %v10475_v62  ;;  %12618 = vmatprep.subr.mxu0 %v10463_v52  ;;  %v3928_v29 = vld [vmem:[#allocation4 + $0x28] sm:$0x3]  ;;  %v3929_v15 = vld [vmem:[#allocation4 + $0x2a] sm:$0x3]  ;;  %v10469_v17 = vld [vmem:[%s19789_s7 + $0x140] sm:$0xff]  ;;  %v3977_v25 = vcombine.low %v3923_v9, %v3924_v38  ;;  %v3992_v4 = vrot.slane %v3978_v14, %v13636_v39 }
 0x37a   :  { %12614 = vmatmul.mubr.msk.f32.gmra.mxu1 %vm278_vm0, %v3821_v22  ;;  %12642 = vmatprep.subr.mxu1 %v10474_v57  ;;  %v3995_v33 = vcombine.low %v3929_v15, %v3930_v51  ;;  %v4140_v1 = vld [vmem:[#allocation4 + $0x38] sm:$0x3]  ;;  %v3927_v61 = vld [vmem:[#allocation4 + $0x26] sm:$0x3]  ;;  %v4138_v32 = vld [vmem:[#allocation4 + $0x34] sm:$0x3] }
 0x37b   :  { %12619 = vmatpush3.msra.mxu0 %v10463_v52  ;;  %12643 = vmatpush3.msra.mxu1 %v10474_v57  ;;  %v10457_v59 = vld [vmem:[%s19789_s7 + $0x100] sm:$0xff]  ;;  %v4139_v62 = vld [vmem:[#allocation4 + $0x36] sm:$0x3]  ;;  %v3994_v45 = vcombine.low %v3927_v61, %v3928_v29  ;;  %v4543_v2 = vld [vmem:[#allocation4 + $0x20] sm:$0x3]  ;;  %v4209_v52 = vrot.slane %v4201_v27, %v13636_v39  ;;  %v4219_v18 = vcombine.low %v4140_v1, %v14475_v20 }
 0x37c   :  { %12654 = vmatprep.mubr.msk.f32.mxu1 %vm278_vm0, %v4183_v34  ;;  %12592 = vmatmul.mubr.msk.f32.gmra.mxu0 %vm278_vm0, %v3614_v0  ;;  %v10500_v37 = vld [vmem:[%s19789_s7 + $0x1f8] sm:$0xff]  ;;  %v3934_v8 = vld [vmem:[#allocation4 + $0x38] sm:$0x3]  ;;  %v4541_v16 = vld [vmem:[#allocation4 + $0x1c] sm:$0x3]  ;;  %v3985_v46 = vrot.slane %v3977_v25, %v13636_v39  ;;  %v4009_v22 = vrot.slane %v3995_v33, %v13636_v39  ;;  %v4218_v26 = vcombine.low %v4138_v32, %v4139_v62 }
 0x37d   :  { %12620 = vmatprep.subr.mxu0 %v10462_v36  ;;  %12644 = vmatprep.subr.mxu1 %v10473_v60  ;;  %v4542_v19 = vld [vmem:[#allocation4 + $0x1e] sm:$0x3]  ;;  %v3932_v57 = vld [vmem:[#allocation4 + $0x34] sm:$0x3]  ;;  %v3933_v30 = vld [vmem:[#allocation4 + $0x36] sm:$0x3]  ;;  %v4217_v34 = vcombine.low %v4209_v52, %v4216_v31  ;;  %v4002_v58 = vrot.slane %v3994_v45, %v13636_v39  ;;  %v4233_v40 = vrot.slane %v4219_v18, %v13636_v39 }
 0x37e   :  { %12621 = vmatpush3.msra.mxu0 %v10462_v36  ;;  %12632 = vmatprep.mubr.msk.f32.mxu0 %vm278_vm0, %v3976_v10  ;;  %v4335_v50 = vld [vmem:[#allocation4 + $0x1c] sm:$0x3]  ;;  %v4336_v6 = vld [vmem:[#allocation4 + $0x1e] sm:$0x3]  ;;  %v4540_v0 = vld [vmem:[#allocation4 + $0x1a] sm:$0x3]  ;;  %v4582_v36 = vcombine.low %v4542_v19, %v4543_v2  ;;  %v3993_v5 = vcombine.low %v3985_v46, %v3992_v4  ;;  %v4226_v47 = vrot.slane %v4218_v26, %v13636_v39 }
 0x37f   :  { %12645 = vmatpush3.msra.mxu1 %v10473_v60  ;;  %12622 = vmatprep.subr.mxu0 %v10461_v11  ;;  %v4012_v60 = vcombine.low %v3933_v30, %v3934_v8  ;;  %v4581_v7 = vcombine.low %v4540_v0, %v4541_v16  ;;  %v3931_v42 = vld [vmem:[#allocation4 + $0x32] sm:$0x3]  ;;  %v4333_v54 = vld [vmem:[#allocation4 + $0x18] sm:$0x3]  ;;  %v4334_v10 = vld [vmem:[#allocation4 + $0x1a] sm:$0x3]  ;;  %v4010_v44 = vcombine.low %v4002_v58, %v4009_v22 }
 0x380   :  { %12646 = vmatprep.subr.mxu1 %v10472_v12  ;;  %12623 = vmatpush3.msra.mxu0 %v10461_v11  ;;  %v10488_v11 = vld [vmem:[%s19789_s7 + $0x1b8] sm:$0xff]  ;;  %v4011_v41 = vcombine.low %v3931_v42, %v3932_v57  ;;  %v10487_v28 = vld [vmem:[%s19789_s7 + $0x1b0] sm:$0xff]  ;;  %v4596_v56 = vrot.slane %v4582_v36, %v13636_v39  ;;  %v4374_v49 = vcombine.low %v4333_v54, %v4334_v10  ;;  %v10498_v51 = vld [vmem:[%s19789_s7 + $0x1e8] sm:$0xff] }
 0x381   :  { %12647 = vmatpush3.msra.mxu1 %v10472_v12  ;;  %12624 = vmatprep.subr.mxu0 %v10460_v43  ;;  %v10499_v12 = vld [vmem:[%s19789_s7 + $0x1f0] sm:$0xff]  ;;  %v4026_v38 = vrot.slane %v4012_v60, %v13636_v39  ;;  %v10486_v20 = vld [vmem:[%s19789_s7 + $0x1a8] sm:$0xff]  ;;  %v10497_v21 = vld [vmem:[%s19789_s7 + $0x1e0] sm:$0xff] }
 0x382   :  { %12648 = vmatprep.subr.mxu1 %v10471_v53  ;;  %12625 = vmatpush3.msra.mxu0 %v10460_v43  ;;  %v4375_v43 = vcombine.low %v4335_v50, %v4336_v6  ;;  %v14527_v27 = vld [vmem:[#allocation4 + $0x3c] sm:$0x3]  ;;  %v4382_v15 = vrot.slane %v4374_v49, %v13636_v39  ;;  %v14534_v25 = vld [vmem:[#allocation4 + $0x3e] sm:$0x3]  ;;  %v14536_v33 = vld [vmem:[#allocation4 + $0x40] sm:$0x3] }
 0x383   :  { %12649 = vmatpush3.msra.mxu1 %v10471_v53  ;;  %12626 = vmatprep.subr.mxu0 %v10459_v55  ;;  %v4589_v53 = vrot.slane %v4581_v7, %v13636_v39  ;;  %v10496_v1 = vld [vmem:[%s19789_s7 + $0x1d8] sm:$0xff]  ;;  %v4547_v3 = vld [vmem:[#allocation4 + $0x2c] sm:$0x3]  ;;  %v14543_v31 = vld [vmem:[#allocation4 + $0x42] sm:$0x3]  ;;  %v4632_v60 = vcombine.low %v14534_v25, %v14536_v33 }
 0x384   :  { %12650 = vmatprep.subr.mxu1 %v10470_v13  ;;  %12627 = vmatpush3.msra.mxu0 %v10459_v55  ;;  %v4234_v55 = vcombine.low %v4226_v47, %v4233_v40  ;;  %v4389_v14 = vrot.slane %v4375_v43, %v13636_v39  ;;  %v14545_v61 = vld [vmem:[#allocation4 + $0x44] sm:$0x3]  ;;  %v10484_v62 = vld [vmem:[%s19789_s7 + $0x198] sm:$0xff]  ;;  %v4339_v45 = vld [vmem:[#allocation4 + $0x28] sm:$0x3] }
 0x385   :  { %12651 = vmatpush3.msra.mxu1 %v10470_v13  ;;  %12628 = vmatprep.subr.mxu0 %v10458_v23  ;;  %v4019_v13 = vrot.slane %v4011_v41, %v13636_v39  ;;  %v4597_v9 = vcombine.low %v4589_v53, %v4596_v56  ;;  %v14552_v4 = vld [vmem:[#allocation4 + $0x24] sm:$0x3]  ;;  %v4340_v2 = vld [vmem:[#allocation4 + $0x2a] sm:$0x3]  ;;  %v14554_v8 = vld [vmem:[#allocation4 + $0x40] sm:$0x3]  ;;  %v4633_v54 = vcombine.low %v14543_v31, %v14545_v61 }
 0x386   :  { %12652 = vmatprep.subr.mxu1 %v10469_v17  ;;  %12629 = vmatpush3.msra.mxu0 %v10458_v23  ;;  %v10485_v23 = vld [vmem:[%s19789_s7 + $0x1a0] sm:$0xff]  ;;  %v4390_v32 = vcombine.low %v4382_v15, %v4389_v14  ;;  %v4546_v52 = vld [vmem:[#allocation4 + $0x2a] sm:$0x3]  ;;  %v4341_v18 = vld [vmem:[#allocation4 + $0x30] sm:$0x3]  ;;  %v4392_v0 = vcombine.low %v4339_v45, %v4340_v2  ;;  %v4640_v53 = vrot.slane %v4632_v60, %v13636_v39 }
 0x387   :  { %12653 = vmatpush3.msra.mxu1 %v10469_v17  ;;  %12630 = vmatprep.subr.mxu0 %v10457_v59  ;;  %v4027_v29 = vcombine.low %v4019_v13, %v4026_v38  ;;  %v4346_v17 = vld [vmem:[#allocation4 + $0x3e] sm:$0x3]  ;;  %v4343_v16 = vld [vmem:[#allocation4 + $0x34] sm:$0x3]  ;;  %v4344_v19 = vld [vmem:[#allocation4 + $0x36] sm:$0x3]  ;;  %v4599_v57 = vcombine.low %v4546_v52, %v4547_v3 }
 0x388   :  { %12655 = vmatmul.mubr.msk.f32.vlgmr.msra.gmra.mxu1 %vm278_vm0, %v4200_v35  ;;  %12682 = vmatprep.subr.mxu1 %v10500_v37  ;;  %v14556_v35 = vld [vmem:[#allocation4 + $0x42] sm:$0x3]  ;;  %v4549_v46 = vld [vmem:[#allocation4 + $0x34] sm:$0x3]  ;;  %v4550_v22 = vld [vmem:[#allocation4 + $0x36] sm:$0x3]  ;;  %v4425_v30 = vcombine.low %v14527_v27, %v4346_v17  ;;  %v4409_v42 = vcombine.low %v4343_v16, %v4344_v19  ;;  %v4647_v27 = vrot.slane %v4633_v54, %v13636_v39 }
 0x389   :  { %12631 = vmatpush3.msra.mxu0 %v10457_v59  ;;  %12657 = vmatprep.mubr.msk.f32.mxu1 %vm278_vm0, %v4217_v34  ;;  %v14541_v59 = vld [vmem:[#allocation4 + $0x28] sm:$0x3]  ;;  %v4338_v26 = vld [vmem:[#allocation4 + $0x26] sm:$0x3]  ;;  %v4342_v36 = vld [vmem:[#allocation4 + $0x32] sm:$0x3]  ;;  %v4426_v40 = vcombine.low %v14554_v8, %v14556_v35  ;;  %v4613_v43 = vrot.slane %v4599_v57, %v13636_v39 }
 0x38a   :  { %12683 = vmatpush3.msra.mxu1 %v10500_v37  ;;  %12633 = vmatmul.mubr.msk.f32.vlgmr.msra.gmra.mxu0 %vm278_vm0, %v3993_v5  ;;  %v4551_v37 = vld [vmem:[#allocation4 + $0x38] sm:$0x3]  ;;  %v10495_v50 = vld [vmem:[%s19789_s7 + $0x1d0] sm:$0xff]  ;;  %v4544_v6 = vld [vmem:[#allocation4 + $0x26] sm:$0x3]  ;;  %v4433_v47 = vrot.slane %v4425_v30, %v13636_v39  ;;  %v4423_v14 = vrot.slane %v4409_v42, %v13636_v39  ;;  %v4648_v61 = vcombine.low %v4640_v53, %v4647_v27 }
 0x38b   :  { %12660 = vmatprep.subr.mxu0 %v10488_v11  ;;  %12684 = vmatprep.subr.mxu1 %v10499_v12  ;;  %v4616_v34 = vcombine.low %v4550_v22, %v4551_v37  ;;  %v10483_v5 = vld [vmem:[%s19789_s7 + $0x190] sm:$0xff]  ;;  %v4598_v58 = vcombine.low %v4544_v6, %v14541_v59  ;;  %v4548_v7 = vld [vmem:[#allocation4 + $0x32] sm:$0x3]  ;;  %v10494_v10 = vld [vmem:[%s19789_s7 + $0x1c8] sm:$0xff]  ;;  %v4440_v25 = vrot.slane %v4426_v40, %v13636_v39 }
 0x38c   :  { %12635 = vmatprep.mubr.msk.f32.mxu0 %vm278_vm0, %v4010_v44  ;;  %12661 = vmatpush3.msra.mxu0 %v10488_v11  ;;  %v4615_v11 = vcombine.low %v4548_v7, %v4549_v46  ;;  %v10482_v41 = vld [vmem:[%s19789_s7 + $0x188] sm:$0xff]  ;;  %v4408_v44 = vcombine.low %v4341_v18, %v4342_v36  ;;  %v10493_v38 = vld [vmem:[%s19789_s7 + $0x1c0] sm:$0xff]  ;;  %v10512_v59 = vld [vmem:[%s19789_s7 + $0x238] sm:$0xff] }
 0x38d   :  { %12685 = vmatpush3.msra.mxu1 %v10499_v12  ;;  %12662 = vmatprep.subr.mxu0 %v10487_v28  ;;  %v4391_v12 = vcombine.low %v14552_v4, %v4338_v26  ;;  %v4750_v56 = vld [vmem:[#allocation4 + $0x22] sm:$0x3]  ;;  %v4630_v49 = vrot.slane %v4616_v34, %v13636_v39  ;;  %v4606_v13 = vrot.slane %v4598_v58, %v13636_v39  ;;  %v10509_v2 = vld [vmem:[%s19789_s7 + $0x220] sm:$0xff]  ;;  %v4754_v8 = vld [vmem:[#allocation4 + $0x2e] sm:$0x3] }
 0x38e   :  { %12658 = vmatmul.mubr.msk.f32.gmra.mxu1 %vm278_vm0, %v4234_v55  ;;  %12686 = vmatprep.subr.mxu1 %v10498_v51  ;;  %v10481_v55 = vld [vmem:[%s19789_s7 + $0x180] sm:$0xff]  ;;  %v4416_v17 = vrot.slane %v4408_v44, %v13636_v39  ;;  %v4441_v37 = vcombine.low %v4433_v47, %v4440_v25  ;;  %v10510_v4 = vld [vmem:[%s19789_s7 + $0x228] sm:$0xff]  ;;  %v10508_v18 = vld [vmem:[%s19789_s7 + $0x218] sm:$0xff] }
 0x38f   :  { %12663 = vmatpush3.msra.mxu0 %v10487_v28  ;;  %12687 = vmatpush3.msra.mxu1 %v10498_v51  ;;  %v4749_v28 = vld [vmem:[#allocation4 + $0x20] sm:$0x3]  ;;  %v4406_v51 = vrot.slane %v4392_v0, %v13636_v39  ;;  %v4758_v35 = vld [vmem:[#allocation4 + $0x3a] sm:$0x3]  ;;  %v4753_v16 = vld [vmem:[#allocation4 + $0x2c] sm:$0x3] }
 0x390   :  { %12698 = vmatprep.mubr.msk.f32.mxu1 %vm278_vm0, %v4597_v9  ;;  %12636 = vmatmul.mubr.msk.f32.gmra.mxu0 %vm278_vm0, %v4027_v29  ;;  %v4623_v9 = vrot.slane %v4615_v11, %v13636_v39  ;;  %v4399_v29 = vrot.slane %v4391_v12, %v13636_v39  ;;  %v4789_v15 = vcombine.low %v4749_v28, %v4750_v56  ;;  %v4759_v19 = vld [vmem:[#allocation4 + $0x40] sm:$0x3]  ;;  %v4757_v57 = vld [vmem:[#allocation4 + $0x38] sm:$0x3]  ;;  %v4760_v46 = vld [vmem:[#allocation4 + $0x42] sm:$0x3] }
 0x391   :  { %12664 = vmatprep.subr.mxu0 %v10486_v20  ;;  %12688 = vmatprep.subr.mxu1 %v10497_v21  ;;  %v4424_v31 = vcombine.low %v4416_v17, %v4423_v14  ;;  %v4761_v22 = vld [vmem:[#allocation4 + $0x44] sm:$0x3]  ;;  %v4751_v26 = vld [vmem:[#allocation4 + $0x28] sm:$0x3]  ;;  %v4752_v30 = vld [vmem:[#allocation4 + $0x2a] sm:$0x3]  ;;  %v4806_v6 = vcombine.low %v4753_v16, %v4754_v8  ;;  %v4823_v60 = vcombine.low %v4757_v57, %v4758_v35 }
 0x392   :  { %12665 = vmatpush3.msra.mxu0 %v10486_v20  ;;  %12676 = vmatprep.mubr.msk.f32.mxu0 %vm278_vm0, %v4390_v32  ;;  %v4747_v20 = vld [vmem:[#allocation4 + $0x1c] sm:$0x3]  ;;  %v4631_v33 = vcombine.low %v4623_v9, %v4630_v49  ;;  %v10511_v32 = vld [vmem:[%s19789_s7 + $0x230] sm:$0xff]  ;;  %v4755_v34 = vld [vmem:[#allocation4 + $0x34] sm:$0x3]  ;;  %v4839_v58 = vcombine.low %v4759_v19, %v4760_v46 }
 0x393   :  { %12689 = vmatpush3.msra.mxu1 %v10497_v21  ;;  %12666 = vmatprep.subr.mxu0 %v10485_v23  ;;  %v4748_v21 = vld [vmem:[#allocation4 + $0x1e] sm:$0x3]  ;;  %v4756_v0 = vld [vmem:[#allocation4 + $0x36] sm:$0x3]  ;;  %v10507_v36 = vld [vmem:[%s19789_s7 + $0x210] sm:$0xff]  ;;  %v4837_v12 = vrot.slane %v4823_v60, %v13636_v39 }
 0x394   :  { %12690 = vmatprep.subr.mxu1 %v10496_v1  ;;  %12667 = vmatpush3.msra.mxu0 %v10485_v23  ;;  %v4614_v23 = vcombine.low %v4606_v13, %v4613_v43  ;;  %v4788_v3 = vcombine.low %v4747_v20, %v4748_v21  ;;  %v10506_v42 = vld [vmem:[%s19789_s7 + $0x208] sm:$0xff]  ;;  %v4822_v54 = vcombine.low %v4755_v34, %v4756_v0  ;;  %v10505_v11 = vld [vmem:[%s19789_s7 + $0x200] sm:$0xff]  ;;  %v10524_v21 = vld [vmem:[%s19792_s10 + $0x78] sm:$0xff] }
 0x395   :  { %12691 = vmatpush3.msra.mxu1 %v10496_v1  ;;  %12668 = vmatprep.subr.mxu0 %v10484_v62  ;;  %v4407_v1 = vcombine.low %v4399_v29, %v4406_v51  ;;  %v5172_v27 = vld [vmem:[%s19792_s10 + $0x38] sm:$0xff]  ;;  %v10523_v9 = vld [vmem:[%s19792_s10 + $0x70] sm:$0xff]  ;;  %v10522_v17 = vld [vmem:[%s19792_s10 + $0x68] sm:$0xff] }
 0x396   :  { %12692 = vmatprep.subr.mxu1 %v10495_v50  ;;  %12669 = vmatpush3.msra.mxu0 %v10484_v62  ;;  %v4803_v62 = vrot.slane %v4789_v15, %v13636_v39  ;;  %v4796_v45 = vrot.slane %v4788_v3, %v13636_v39  ;;  %v4830_v44 = vrot.slane %v4822_v54, %v13636_v39  ;;  %v5171_v29 = vld [vmem:[%s19792_s10 + $0x30] sm:$0xff]  ;;  %v5170_v25 = vld [vmem:[%s19792_s10 + $0x28] sm:$0xff] }
 0x397   :  { %12693 = vmatpush3.msra.mxu1 %v10495_v50  ;;  %12670 = vmatprep.subr.mxu0 %v10483_v5  ;;  %v4762_v50 = vld [vmem:[#allocation4 + $0x46] sm:$0x3] }
 0x398   :  { %12694 = vmatprep.subr.mxu1 %v10494_v10  ;;  %12671 = vmatpush3.msra.mxu0 %v10483_v5  ;;  %v4804_v52 = vcombine.low %v4796_v45, %v4803_v62  ;;  %v4805_v5 = vcombine.low %v4751_v26, %v4752_v30  ;;  %v4840_v7 = vcombine.low %v4761_v22, %v4762_v50  ;;  %v10519_v62 = vld [vmem:[%s19792_s10 + $0x50] sm:$0xff]  ;;  %v10518_v45 = vld [vmem:[%s19792_s10 + $0x48] sm:$0xff] }
 0x399   :  { %12695 = vmatpush3.msra.mxu1 %v10494_v10  ;;  %12672 = vmatprep.subr.mxu0 %v10482_v41  ;;  %v4820_v10 = vrot.slane %v4806_v6, %v13636_v39  ;;  %v4838_v28 = vcombine.low %v4830_v44, %v4837_v12 }
 0x39a   :  { %12696 = vmatprep.subr.mxu1 %v10493_v38  ;;  %12673 = vmatpush3.msra.mxu0 %v10482_v41  ;;  %v4813_v40 = vrot.slane %v4805_v5, %v13636_v39  ;;  %v4847_v41 = vrot.slane %v4839_v58, %v13636_v39  ;;  %v4854_v43 = vrot.slane %v4840_v7, %v13636_v39 }
 0x39b   :  { %12697 = vmatpush3.msra.mxu1 %v10493_v38  ;;  %12674 = vmatprep.subr.mxu0 %v10481_v55 }
 0x39c   :  { %12699 = vmatmul.mubr.msk.f32.vlgmr.msra.gmra.mxu1 %vm278_vm0, %v4614_v23  ;;  %12675 = vmatpush3.msra.mxu0 %v10481_v55  ;;  %v4821_v47 = vcombine.low %v4813_v40, %v4820_v10  ;;  %v4855_v56 = vcombine.low %v4847_v41, %v4854_v43 }
 0x39d   :  { %12701 = vmatprep.mubr.msk.f32.mxu1 %vm278_vm0, %v4631_v33  ;;  %12677 = vmatmul.mubr.msk.f32.vlgmr.msra.gmra.mxu0 %vm278_vm0, %v4407_v1  ;;  %v10521_v1 = vld [vmem:[%s19792_s10 + $0x60] sm:$0xff] }
 0x39e   :  { %12704 = vmatprep.subr.mxu0 %v10512_v59  ;;  %12679 = vmatprep.mubr.msk.f32.mxu0 %vm278_vm0, %v4424_v31  ;;  %v10520_v31 = vld [vmem:[%s19792_s10 + $0x58] sm:$0xff] }
 0x39f   :  { %12705 = vmatpush3.msra.mxu0 %v10512_v59  ;;  %12726 = vmatprep.subr.mxu1 %v12981_v63  ;;  %v5169_v59 = vld [vmem:[%s19792_s10 + $0x20] sm:$0xff] }
 0x3a0   :  { %12706 = vmatprep.subr.mxu0 %v10511_v32  ;;  %12702 = vmatmul.mubr.msk.f32.gmra.mxu1 %vm278_vm0, %v4648_v61  ;;  %v5168_v61 = vld [vmem:[%s19792_s10 + $0x18] sm:$0xff] }
 0x3a1   :  { %12707 = vmatpush3.msra.mxu0 %v10511_v32  ;;  %12727 = vmatpush3.msra.mxu1 %v10524_v21 }
 0x3a2   :  { %12680 = vmatmul.mubr.msk.f32.gmra.mxu0 %vm278_vm0, %v4441_v37  ;;  %12708 = vmatprep.subr.mxu0 %v10510_v4  ;;  %v5167_v37 = vld [vmem:[%s19792_s10 + $0x10] sm:$0xff] }
 0x3a3   :  { %12709 = vmatpush3.msra.mxu0 %v10510_v4  ;;  %12720 = vmatprep.mubr.msk.f32.mxu0 %vm278_vm0, %v4804_v52  ;;  %v10517_v52 = vld [vmem:[%s19792_s10 + $0x40] sm:$0xff] }
 0x3a4   :  { %12710 = vmatprep.subr.mxu0 %v10509_v2  ;;  %12728 = vmatprep.subr.mxu1 %v12981_v63 }
 0x3a5   :  { %12711 = vmatpush3.msra.mxu0 %v10509_v2  ;;  %12729 = vmatpush3.msra.mxu1 %v10523_v9  ;;  %v5166_v2 = vld [vmem:[%s19792_s10 + $0x8] sm:$0xff] }
 0x3a6   :  { %12712 = vmatprep.subr.mxu0 %v10508_v18  ;;  %12730 = vmatprep.subr.mxu1 %v12981_v63 }
 0x3a7   :  { %12713 = vmatpush3.msra.mxu0 %v10508_v18  ;;  %12731 = vmatpush3.msra.mxu1 %v10522_v17  ;;  %v5165_v18 = vld [vmem:[%s19792_s10] sm:$0xff] }
 0x3a8   :  { %12714 = vmatprep.subr.mxu0 %v10507_v36  ;;  %12732 = vmatprep.subr.mxu1 %v12981_v63 }
 0x3a9   :  { %12715 = vmatpush3.msra.mxu0 %v10507_v36  ;;  %12733 = vmatpush3.msra.mxu1 %v10521_v1 }
 0x3aa   :  { %12716 = vmatprep.subr.mxu0 %v10506_v42  ;;  %12734 = vmatprep.subr.mxu1 %v12981_v63 }
 0x3ab   :  { %12717 = vmatpush3.msra.mxu0 %v10506_v42  ;;  %12735 = vmatpush3.msra.mxu1 %v10520_v31 }
 0x3ac   :  { %12718 = vmatprep.subr.mxu0 %v10505_v11  ;;  %12736 = vmatprep.subr.mxu1 %v12981_v63 }
 0x3ad   :  { %12719 = vmatpush3.msra.mxu0 %v10505_v11  ;;  %12737 = vmatpush3.msra.mxu1 %v10519_v62 }
 0x3ae   :  { %12721 = vmatmul.mubr.msk.f32.vlgmr.msra.gmra.mxu0 %vm278_vm0, %v4821_v47  ;;  %12745 = vmatprep.subr.mxu0 %v12981_v63 }
 0x3af   :  { %12723 = vmatprep.mubr.msk.f32.mxu0 %vm278_vm0, %v4838_v28  ;;  %12746 = vmatpush3.msra.mxu0 %v5172_v27 }
 0x3b0   :  { %12747 = vmatprep.subr.mxu0 %v12981_v63  ;;  %12738 = vmatprep.subr.mxu1 %v12981_v63 }
 0x3b1   :  { %12748 = vmatpush3.msra.mxu0 %v5171_v29  ;;  %12739 = vmatpush3.msra.mxu1 %v10518_v45 }
 0x3b2   :  { %12724 = vmatmul.mubr.msk.f32.gmra.mxu0 %vm278_vm0, %v4855_v56  ;;  %12749 = vmatprep.subr.mxu0 %v12981_v63 }
 0x3b3   :  { %12750 = vmatpush3.msra.mxu0 %v5170_v25  ;;  %12740 = vmatprep.subr.mxu1 %v12981_v63 }
 0x3b4   :  { %12751 = vmatprep.subr.mxu0 %v12981_v63  ;;  %12741 = vmatpush3.msra.mxu1 %v10517_v52 }
 0x3b5   :  { %12752 = vmatpush3.msra.mxu0 %v5169_v59  ;;  %12742 = vmatprep.mubr.msk.f32.mxu1 %vm12982_vm2, %v12981_v63 }
 0x3b6   :  { %12753 = vmatprep.subr.mxu0 %v12981_v63  ;;  %12761 = vmatprep.mubr.msk.f32.mxu0 %vm12982_vm2, %v12981_v63 }
 0x3b7   :  { %12754 = vmatpush3.msra.mxu0 %v5168_v61  ;;  %12764 = vmatprep.subr.mxu1 %v12981_v63 }
 0x3b8   :  { %12755 = vmatprep.subr.mxu0 %v12981_v63 }
 0x3b9   :  { %12756 = vmatpush3.msra.mxu0 %v5167_v37 }
 0x3ba   :  { %12757 = vmatprep.subr.mxu0 %v12981_v63 }
 0x3bb   :  { %12758 = vmatpush3.msra.mxu0 %v5166_v2 }
 0x3bc   :  { %12759 = vmatprep.subr.mxu0 %v12981_v63 }
 0x3bd   :  { %12760 = vmatpush3.msra.mxu0 %v5165_v18 }
 0x3be   :  { %12783 = vmatprep.subr.mxu0 %v12981_v63 }
 0x420   :  { %v14646_v51 = vpop.f32.mrf.mxu1 }
 0x422   :  { %v14650_v55 = vpop.f32.mrf.mxu1 }
 0x424   :  { %v14642_v38 = vpop.f32.mrf.mxu0 }
 0x425   :  { %v3492_v26 = vadd.f32 %v14646_v51, %v14642_v38 }
 0x426   :  { %v14644_v49 = vpop.f32.mrf.mxu0  ;;  %v14654_v14 = vpop.f32.mrf.mxu1 }
 0x427   :  { %v3487_v30 = vadd.f32 %v14650_v55, %v14644_v49 }
 0x428   :  { %v14670_v15 = vpop.f32.mrf.mxu1 }
 0x429   :  { %v14648_v53 = vpop.f32.mrf.mxu0 }
 0x42a   :  { %v3502_v60 = vadd.f32 %v14654_v14, %v14648_v53 }
 0x42b   :  { %v14652_v13 = vpop.f32.mrf.mxu0 }
 0x42c   :  { %v3497_v5 = vadd.f32 %v14670_v15, %v14652_v13 }
 0x433   :  { %v12612_v33 = vpop.f32.mrf.mxu1 }
 0x435   :  { %v3896_v32 = vpop.f32.mrf.mxu1 }
 0x436   :  { %v14656_v20 = vpop.f32.mrf.mxu0 }
 0x437   :  { %v3709_v6 = vadd.f32 %v14656_v20, %v3492_v26 }
 0x438   :  { %v3689_v23 = vpop.f32.mrf.mxu0 }
 0x439   :  { %v3708_v34 = vadd.f32 %v3689_v23, %v3487_v30  ;;  %v3916_v42 = vadd.f32 %v12612_v33, %v3709_v6 }
 0x43a   :  { %v12615_v8 = vpop.f32.mrf.mxu1 }
 0x43b   :  { %v3915_v54 = vadd.f32 %v3896_v32, %v3708_v34 }
 0x43c   :  { %v12593_v3 = vpop.f32.mrf.mxu0  ;;  %v3906_v16 = vpop.f32.mrf.mxu1 }
 0x43d   :  { %v3711_v58 = vadd.f32 %v12593_v3, %v3502_v60 }
 0x43e   :  { %v3699_v4 = vpop.f32.mrf.mxu0 }
 0x43f   :  { %v3710_v7 = vadd.f32 %v3699_v4, %v3497_v5  ;;  %v3918_v43 = vadd.f32 %v12615_v8, %v3711_v58 }
 0x441   :  { %v3917_v44 = vadd.f32 %v3906_v16, %v3710_v7 }
 0x448   :  { %v12656_v57 = vpop.f32.mrf.mxu1 }
 0x44a   :  { %v12634_v35 = vpop.f32.mrf.mxu0  ;;  %v4309_v22 = vpop.f32.mrf.mxu1 }
 0x44b   :  { %v4122_v12 = vadd.f32 %v12634_v35, %v3916_v42 }
 0x44c   :  { %v4102_v19 = vpop.f32.mrf.mxu0 }
 0x44d   :  { %v4121_v40 = vadd.f32 %v4102_v19, %v3915_v54  ;;  %v4329_v38 = vadd.f32 %v12656_v57, %v4122_v12 }
 0x44e   :  { %v12659_v0 = vpop.f32.mrf.mxu1 }
 0x44f   :  { %v4328_v49 = vadd.f32 %v4309_v22, %v4121_v40 }
 0x450   :  { %v12637_v46 = vpop.f32.mrf.mxu0  ;;  %v4319_v10 = vpop.f32.mrf.mxu1 }
 0x451   :  { %v4124_v28 = vadd.f32 %v12637_v46, %v3918_v43 }
 0x452   :  { %v4112_v50 = vpop.f32.mrf.mxu0 }
 0x453   :  { %v4123_v56 = vadd.f32 %v4112_v50, %v3917_v44  ;;  %v4331_v20 = vadd.f32 %v12659_v0, %v4124_v28 }
 0x455   :  { %v4330_v21 = vadd.f32 %v4319_v10, %v4123_v56 }
 0x45c   :  { %v12700_v41 = vpop.f32.mrf.mxu1 }
 0x45d   :  { %v12678_v36 = vpop.f32.mrf.mxu0 }
 0x45e   :  { %v4723_v51 = vpop.f32.mrf.mxu1  ;;  %v4536_v53 = vadd.f32 %v12678_v36, %v4329_v38 }
 0x45f   :  { %v4516_v11 = vpop.f32.mrf.mxu0 }
 0x460   :  { %v4535_v55 = vadd.f32 %v4516_v11, %v4328_v49  ;;  %v12703_v14 = vpop.f32.mrf.mxu1  ;;  %v4743_v15 = vadd.f32 %v12700_v41, %v4536_v53  ;;  %v4989_v49 = vld [vmem:[%s19790_s8] sm:$0x1] }
 0x462   :  { %v12681_v47 = vpop.f32.mrf.mxu0  ;;  %v4742_v23 = vadd.f32 %v4723_v51, %v4535_v55  ;;  %v4733_v17 = vpop.f32.mrf.mxu1  ;;  %v4993_v55 = vld [vmem:[%s19791_s9] sm:$0x1] }
 0x463   :  { %v4538_v9 = vadd.f32 %v12681_v47, %v4331_v20 }
 0x464   :  { %v4526_v13 = vpop.f32.mrf.mxu0 }
 0x465   :  { %v4537_v29 = vadd.f32 %v4526_v13, %v4330_v21  ;;  %v4745_v3 = vadd.f32 %v12703_v14, %v4538_v9 }
 0x467   :  { %v4744_v31 = vadd.f32 %v4733_v17, %v4537_v29 }
 0x46e   :  { %v12722_v27 = vpop.f32.mrf.mxu0 }
 0x46f   :  { %v4950_v33 = vadd.f32 %v12722_v27, %v4743_v15 }
 0x470   :  { %v4930_v25 = vpop.f32.mrf.mxu0 }
 0x471   :  { %v4949_v1 = vadd.f32 %v4930_v25, %v4742_v23  ;;  %v4954_v62 = vsel %vm278_vm0, %v4950_v33, 0.0 }
 0x472   :  { %v12725_v59 = vpop.f32.mrf.mxu0 }
 0x473   :  { %v4953_v61 = vsel %vm278_vm0, %v4949_v1, 0.0  ;;  %v4952_v37 = vadd.f32 %v12725_v59, %v4745_v3 }
 0x474   :  { %v4940_v32 = vpop.f32.mrf.mxu0  ;;  %v4955_v45 = vadd.f32 %v4954_v62, %v4953_v61 }
 0x475   :  { %v4951_v4 = vadd.f32 %v4940_v32, %v4744_v31  ;;  %v4958_v35 = vsel %vm278_vm0, %v4952_v37, 0.0 }
 0x477   :  { %v4956_v2 = vsel %vm278_vm0, %v4951_v4, 0.0 }
 0x478   :  { %v4957_v8 = vadd.f32 %v4956_v2, %v4955_v45 }
 0x47a   :  { %v4959_v52 = vadd.f32 %v4958_v35, %v4957_v8 }
 0x47c   :  { %v4960_v18 = vrot.slane %v4959_v52, 4 }
 0x47e   :  { %v4961_v16 = vadd.f32 %v4960_v18, %v4959_v52 }
 0x480   :  { %v4962_v19 = vrot.slane %v4961_v16, 2 }
 0x482   :  { %v4963_v57 = vadd.f32 %v4962_v19, %v4961_v16 }
 0x484   :  { %v4964_v46 = vrot.slane %v4963_v57, 1 }
 0x486   :  { %v4965_v22 = vadd.f32 %v4964_v46, %v4963_v57 }
 0x488   :  { %v4966_v26 = vmul.f32 0.03125, %v4965_v22 }
 0x48a   :  { %v4967_v30 = vsub.f32 %v4949_v1, %v4966_v26  ;;  %v4968_v50 = vsub.f32 %v4950_v33, %v4966_v26  ;;  %v4969_v6 = vsub.f32 %v4951_v4, %v4966_v26  ;;  %v4970_v34 = vsub.f32 %v4952_v37, %v4966_v26 }
 0x48c   :  { %v4971_v0 = vmul.f32 %v4967_v30, %v4967_v30  ;;  %v4972_v36 = vmul.f32 %v4968_v50, %v4968_v50  ;;  %v4973_v60 = vmul.f32 %v4969_v6, %v4969_v6  ;;  %v4974_v5 = vmul.f32 %v4970_v34, %v4970_v34  ;;  %v12940_v34 = vld.sshfl [vmem:[#allocation5 + $0x2] sm:$0xf pattern:$0x76325410] }
 0x48e   :  { %v4975_v58 = vsel %vm278_vm0, %v4971_v0, 0.0  ;;  %v4976_v7 = vsel %vm278_vm0, %v4972_v36, 0.0  ;;  %v4978_v54 = vsel %vm278_vm0, %v4973_v60, 0.0  ;;  %v4980_v11 = vsel %vm278_vm0, %v4974_v5, 0.0 }
 0x48f   :  { %v4977_v42 = vadd.f32 %v4976_v7, %v4975_v58  ;;  %v12941_v0 = vld.sshfl [vmem:[#allocation5] sm:$0xf pattern:$0x76325410]  ;;  %v10534_v58 = vld [vmem:[%s19792_s10 + $0xb8] sm:$0xff] }
 0x490   :  { %v10543_v7 = vld [vmem:[%s19792_s10 + $0xf8] sm:$0xff] }
 0x491   :  { %v4979_v10 = vadd.f32 %v4978_v54, %v4977_v42  ;;  %v10533_v54 = vld [vmem:[%s19792_s10 + $0xb0] sm:$0xff] }
 0x493   :  { %v4981_v12 = vadd.f32 %v4980_v11, %v4979_v10  ;;  %v10542_v10 = vld [vmem:[%s19792_s10 + $0xf0] sm:$0xff]  ;;  %v10532_v11 = vld [vmem:[%s19792_s10 + $0xa8] sm:$0xff] }
 0x495   :  { %v4982_v40 = vrot.slane %v4981_v12, 4 }
 0x497   :  { %v4983_v41 = vadd.f32 %v4982_v40, %v4981_v12  ;;  %v10541_v12 = vld [vmem:[%s19792_s10 + $0xe8] sm:$0xff]  ;;  %v10531_v40 = vld [vmem:[%s19792_s10 + $0xa0] sm:$0xff] }
 0x499   :  { %v4984_v43 = vrot.slane %v4983_v41, 2 }
 0x49b   :  { %v4985_v44 = vadd.f32 %v4984_v43, %v4983_v41  ;;  %v10540_v41 = vld [vmem:[%s19792_s10 + $0xe0] sm:$0xff]  ;;  %v10530_v43 = vld [vmem:[%s19792_s10 + $0x98] sm:$0xff] }
 0x49d   :  { %v4986_v47 = vrot.slane %v4985_v44, 1 }
 0x49f   :  { %v4987_v28 = vadd.f32 %v4986_v47, %v4985_v44  ;;  %v10539_v44 = vld [vmem:[%s19792_s10 + $0xd8] sm:$0xff] }
 0x4a0   :  { %v12944_v47 = vld.sshfl [vmem:[#allocation5 + $0x4] sm:$0xf pattern:$0x76325410] }
 0x4a1   :  { %v4988_v56 = vmul.f32 0.03125, %v4987_v28 }
 0x4a3   :  { %v4990_v38 = vadd.f32 1e-05, %v4988_v56  ;;  %v10529_v56 = vld [vmem:[%s19792_s10 + $0x90] sm:$0xff] }
 0x4a5   :  { %12924 = vrsqrt.f32 %v4990_v38 }
 0x4b2   :  { %v12925_v51 = vpop.eup %12924 }
 0x4b3   :  { %v4992_v53 = vmul.f32 %v12925_v51, %v4989_v49  ;;  %v10538_v51 = vld [vmem:[%s19792_s10 + $0xd0] sm:$0xff] }
 0x4b5   :  { %v4994_v13 = vmul.f32 %v4992_v53, %v4966_v26  ;;  %v5000_v14 = vrot.slane %v4992_v53, %v13713_v48  ;;  %v10528_v53 = vld [vmem:[%s19792_s10 + $0x88] sm:$0xff] }
 0x4b7   :  { %v4995_v20 = vsub.f32 %v4993_v55, %v4994_v13  ;;  %v5002_v21 = vmul.f32 %v5000_v14, %v4949_v1  ;;  %v5003_v27 = vmul.f32 %v5000_v14, %v4950_v33  ;;  %v5004_v9 = vmul.f32 %v5000_v14, %v4951_v4  ;;  %v10537_v55 = vld [vmem:[%s19792_s10 + $0xc8] sm:$0xff]  ;;  %v10527_v13 = vld [vmem:[%s19792_s10 + $0x80] sm:$0xff] }
 0x4b8   :  { %v5005_v29 = vmul.f32 %v5000_v14, %v4952_v37  ;;  %v10536_v14 = vld [vmem:[%s19792_s10 + $0xc0] sm:$0xff] }
 0x4b9   :  { %v5010_v15 = vrot.slane %v4995_v20, %v13713_v48 }
 0x4bb   :  { %v5012_v23 = vadd.f32 %v5010_v15, %v5002_v21  ;;  %v5013_v17 = vadd.f32 %v5010_v15, %v5003_v27  ;;  %v5014_v25 = vadd.f32 %v5010_v15, %v5004_v9  ;;  %v5015_v59 = vadd.f32 %v5010_v15, %v5005_v29  ;;  %v10552_v27 = vld [vmem:[%s19792_s10 + $0x138] sm:$0xff]  ;;  %v10551_v29 = vld [vmem:[%s19792_s10 + $0x130] sm:$0xff] }
 0x4bc   :  { %v10561_v9 = vld [vmem:[%s19792_s10 + $0x178] sm:$0xff]  ;;  %v10560_v15 = vld [vmem:[%s19792_s10 + $0x170] sm:$0xff] }
 0x4bd   :  { %v5016_v3 = vmax.f32 %v5012_v23, 0.0  ;;  %v5017_v31 = vmax.f32 %v5013_v17, 0.0  ;;  %v5018_v61 = vmax.f32 %v5014_v25, 0.0  ;;  %v5019_v32 = vmax.f32 %v5015_v59, 0.0  ;;  %v10550_v23 = vld [vmem:[%s19792_s10 + $0x128] sm:$0xff]  ;;  %v10549_v25 = vld [vmem:[%s19792_s10 + $0x120] sm:$0xff] }
 0x4be   :  { %v10559_v17 = vld [vmem:[%s19792_s10 + $0x168] sm:$0xff]  ;;  %v10558_v59 = vld [vmem:[%s19792_s10 + $0x160] sm:$0xff] }
 0x4bf   :  { %v5060_v62 = vcombine.high %v5016_v3, %v5016_v3  ;;  %v5067_v45 = vrot.slane %v5016_v3, %v13636_v39  ;;  %v5077_v2 = vcombine.high %v5017_v31, %v5017_v31  ;;  %v5084_v8 = vrot.slane %v5017_v31, %v13636_v39  ;;  %v10548_v3 = vld [vmem:[%s19792_s10 + $0x118] sm:$0xff] }
 0x4c0   :  { %v5094_v1 = vcombine.high %v5018_v61, %v5018_v61  ;;  %v5101_v33 = vrot.slane %v5018_v61, %v13636_v39  ;;  %v5111_v37 = vcombine.high %v5019_v32, %v5019_v32  ;;  %v5118_v4 = vrot.slane %v5019_v32, %v13636_v39  ;;  %v10557_v31 = vld [vmem:[%s19792_s10 + $0x158] sm:$0xff] }
 0x4c1   :  { %v5074_v35 = vrot.slane %v5060_v62, %v13636_v39  ;;  %v5075_v52 = vcombine.high %v5067_v45, %v5067_v45  ;;  %v5091_v18 = vrot.slane %v5077_v2, %v13636_v39  ;;  %v5092_v16 = vcombine.high %v5084_v8, %v5084_v8  ;;  %5145 = vst.msk [vmem:[#allocation5 + $0xe] sm:$0x3] %vm807_vm1, %v5067_v45  ;;  %v10547_v62 = vld [vmem:[%s19792_s10 + $0x110] sm:$0xff] }
 0x4c2   :  { %5149 = vst.msk [vmem:[#allocation5 + $0x1a] sm:$0x3] %vm807_vm1, %v5084_v8  ;;  %v5108_v19 = vrot.slane %v5094_v1, %v13636_v39  ;;  %v5109_v57 = vcombine.high %v5101_v33, %v5101_v33  ;;  %v5125_v46 = vrot.slane %v5111_v37, %v13636_v39  ;;  %v5126_v22 = vcombine.high %v5118_v4, %v5118_v4  ;;  %v10556_v8 = vld [vmem:[%s19792_s10 + $0x150] sm:$0xff]  ;;  %v10546_v1 = vld [vmem:[%s19792_s10 + $0x108] sm:$0xff]  ;;  %v10545_v37 = vld [vmem:[%s19792_s10 + $0x100] sm:$0xff] }
 0x4c3   :  { %5153 = vst.msk [vmem:[#allocation5 + $0x26] sm:$0x3] %vm807_vm1, %v5101_v33  ;;  %5157 = vst.msk [vmem:[#allocation5 + $0x32] sm:$0x3] %vm807_vm1, %v5118_v4  ;;  %v5076_v26 = vcombine.high %v5074_v35, %v5074_v35  ;;  %v5093_v30 = vcombine.high %v5091_v18, %v5091_v18  ;;  %v10555_v33 = vld [vmem:[%s19792_s10 + $0x148] sm:$0xff]  ;;  %v10554_v4 = vld [vmem:[%s19792_s10 + $0x140] sm:$0xff] }
 0x4c4   :  { %5146 = vst.msk [vmem:[#allocation5 + $0x10] sm:$0x3] %vm807_vm1, %v5075_v52  ;;  %5147 = vst.msk [vmem:[#allocation5 + $0x12] sm:$0x3] %vm807_vm1, %v5074_v35  ;;  %v5110_v50 = vcombine.high %v5108_v19, %v5108_v19  ;;  %v5127_v6 = vcombine.high %v5125_v46, %v5125_v46 }
 0x4c5   :  { %5150 = vst.msk [vmem:[#allocation5 + $0x1c] sm:$0x3] %vm807_vm1, %v5092_v16  ;;  %5151 = vst.msk [vmem:[#allocation5 + $0x1e] sm:$0x3] %vm807_vm1, %v5091_v18  ;;  %v10570_v18 = vld [vmem:[%s19792_s10 + $0x1b8] sm:$0xff] }
 0x4c6   :  { %5154 = vst.msk [vmem:[#allocation5 + $0x28] sm:$0x3] %vm807_vm1, %v5109_v57  ;;  %5155 = vst.msk [vmem:[#allocation5 + $0x2a] sm:$0x3] %vm807_vm1, %v5108_v19  ;;  %v10579_v16 = vld [vmem:[%s19792_s10 + $0x1f8] sm:$0xff]  ;;  %v10569_v19 = vld [vmem:[%s19792_s10 + $0x1b0] sm:$0xff] }
 0x4c7   :  { %5158 = vst.msk [vmem:[#allocation5 + $0x34] sm:$0x3] %vm807_vm1, %v5126_v22  ;;  %5159 = vst.msk [vmem:[#allocation5 + $0x36] sm:$0x3] %vm807_vm1, %v5125_v46  ;;  %v10578_v57 = vld [vmem:[%s19792_s10 + $0x1f0] sm:$0xff]  ;;  %v10568_v46 = vld [vmem:[%s19792_s10 + $0x1a8] sm:$0xff] }
 0x4c8   :  { %5148 = vst.msk [vmem:[#allocation5 + $0x14] sm:$0x3] %vm807_vm1, %v5076_v26  ;;  %5152 = vst.msk [vmem:[#allocation5 + $0x20] sm:$0x3] %vm807_vm1, %v5093_v30  ;;  %v10577_v22 = vld [vmem:[%s19792_s10 + $0x1e8] sm:$0xff]  ;;  %v10567_v26 = vld [vmem:[%s19792_s10 + $0x1a0] sm:$0xff] }
 0x4c9   :  { %5156 = vst.msk [vmem:[#allocation5 + $0x2c] sm:$0x3] %vm807_vm1, %v5110_v50  ;;  %5160 = vst.msk [vmem:[#allocation5 + $0x38] sm:$0x3] %vm807_vm1, %v5127_v6  ;;  %v10576_v30 = vld [vmem:[%s19792_s10 + $0x1e0] sm:$0xff]  ;;  %v10566_v50 = vld [vmem:[%s19792_s10 + $0x198] sm:$0xff] }
 0x4ca   :  { %v10575_v6 = vld [vmem:[%s19792_s10 + $0x1d8] sm:$0xff] }
 0x4cb   :  { %v12946_v38 = vld.sshfl [vmem:[#allocation5 + $0xc] sm:$0xf pattern:$0x76325410] }
 0x4cc   :  { %v12942_v36 = vld.sshfl [vmem:[#allocation5 + $0x1a] sm:$0xf pattern:$0x76325410] }
 0x4cd   :  { %v12943_v60 = vld.sshfl [vmem:[#allocation5 + $0x18] sm:$0xf pattern:$0x76325410]  ;;  %v5207_v5 = vcombine.low %v12940_v34, %v12942_v36  ;;  %v10565_v36 = vld [vmem:[%s19792_s10 + $0x190] sm:$0xff] }
 0x4ce   :  { %v5300_v42 = vcombine.low %v12941_v0, %v12943_v60  ;;  %v12947_v49 = vld.sshfl [vmem:[#allocation5 + $0x24] sm:$0xf pattern:$0x76325410] }
 0x4cf   :  { %12743 = vmatmul.mubr.msk.f32.vlgmr.msra.gmra.mxu1 %vm278_vm0, %v5207_v5  ;;  %v12945_v28 = vld.sshfl [vmem:[#allocation5 + $0x1c] sm:$0xf pattern:$0x76325410]  ;;  %v5515_v21 = vcombine.low %v12946_v38, %v12947_v49 }
 0x4d0   :  { %12762 = vmatmul.mubr.msk.f32.vlgmr.msra.gmra.mxu0 %vm278_vm0, %v5300_v42  ;;  %12765 = vmatpush3.msra.mxu1 %v10534_v58  ;;  %v5407_v20 = vcombine.low %v12944_v47, %v12945_v28  ;;  %v12948_v61 = vld.sshfl [vmem:[#allocation5 + $0xe] sm:$0xf pattern:$0x76325410]  ;;  %v10574_v58 = vld [vmem:[%s19792_s10 + $0x1d0] sm:$0xff]  ;;  %v10573_v42 = vld [vmem:[%s19792_s10 + $0x1c8] sm:$0xff] }
 0x4d1   :  { %12784 = vmatpush3.msra.mxu0 %v10543_v7  ;;  %12766 = vmatprep.subr.mxu1 %v12981_v63  ;;  %v12949_v32 = vld.sshfl [vmem:[#allocation5 + $0x26] sm:$0xf pattern:$0x76325410]  ;;  %v10564_v7 = vld [vmem:[%s19792_s10 + $0x188] sm:$0xff] }
 0x4d2   :  { %12785 = vmatprep.subr.mxu0 %v12981_v63  ;;  %12767 = vmatpush3.msra.mxu1 %v10533_v54  ;;  %v12950_v45 = vld.sshfl [vmem:[#allocation5 + $0x10] sm:$0xf pattern:$0x76325410]  ;;  %v5622_v35 = vcombine.low %v12948_v61, %v12949_v32  ;;  %v10584_v47 = vld [vmem:[%s19792_s10 + $0x218] sm:$0xff]  ;;  %v10583_v38 = vld [vmem:[%s19792_s10 + $0x210] sm:$0xff] }
 0x4d3   :  { %12786 = vmatpush3.msra.mxu0 %v10542_v10  ;;  %12768 = vmatprep.subr.mxu1 %v12981_v63  ;;  %v12951_v2 = vld.sshfl [vmem:[#allocation5 + $0x28] sm:$0xf pattern:$0x76325410]  ;;  %v10563_v54 = vld [vmem:[%s19792_s10 + $0x180] sm:$0xff]  ;;  %v10582_v49 = vld [vmem:[%s19792_s10 + $0x208] sm:$0xff] }
 0x4d4   :  { %12787 = vmatprep.subr.mxu0 %v12981_v63  ;;  %12769 = vmatpush3.msra.mxu1 %v10532_v11  ;;  %v5730_v52 = vcombine.low %v12950_v45, %v12951_v2  ;;  %v12952_v34 = vld.sshfl [vmem:[#allocation5 + $0x18] sm:$0xf pattern:$0x76325410]  ;;  %v10572_v10 = vld [vmem:[%s19792_s10 + $0x1c0] sm:$0xff]  ;;  %v10614_v32 = vld [vmem:[%s19795_s13 + $0x1b0] sm:$0xff] }
 0x4d5   :  { %12788 = vmatpush3.msra.mxu0 %v10541_v12  ;;  %12770 = vmatprep.subr.mxu1 %v12981_v63  ;;  %v12953_v0 = vld.sshfl [vmem:[#allocation5 + $0x30] sm:$0xf pattern:$0x76325410]  ;;  %v6236_v61 = vld [vmem:[%s19795_s13 + $0xc8] sm:$0xff]  ;;  %v6234_v2 = vld [vmem:[%s19795_s13 + $0xb8] sm:$0xff] }
 0x4d6   :  { %12789 = vmatprep.subr.mxu0 %v12981_v63  ;;  %12771 = vmatpush3.msra.mxu1 %v10531_v40  ;;  %v12954_v60 = vld.sshfl [vmem:[#allocation5 + $0x1a] sm:$0xf pattern:$0x76325410]  ;;  %v5838_v11 = vcombine.low %v12952_v34, %v12953_v0  ;;  %v10588_v40 = vld [vmem:[%s19792_s10 + $0x238] sm:$0xff]  ;;  %v6225_v34 = vld [vmem:[%s19795_s13 + $0x70] sm:$0xff] }
 0x4d7   :  { %12790 = vmatpush3.msra.mxu0 %v10540_v41  ;;  %12772 = vmatprep.subr.mxu1 %v12981_v63  ;;  %v12955_v5 = vld.sshfl [vmem:[#allocation5 + $0x32] sm:$0xf pattern:$0x76325410]  ;;  %v10587_v41 = vld [vmem:[%s19792_s10 + $0x230] sm:$0xff]  ;;  %v10613_v45 = vld [vmem:[%s19795_s13 + $0x1a8] sm:$0xff] }
 0x4d8   :  { %12791 = vmatprep.subr.mxu0 %v12981_v63  ;;  %12773 = vmatpush3.msra.mxu1 %v10530_v43  ;;  %v5946_v12 = vcombine.low %v12954_v60, %v12955_v5  ;;  %v10586_v43 = vld [vmem:[%s19792_s10 + $0x228] sm:$0xff]  ;;  %v10603_v0 = vld [vmem:[%s19795_s13 + $0x158] sm:$0xff]  ;;  %v10602_v60 = vld [vmem:[%s19795_s13 + $0x150] sm:$0xff] }
 0x4d9   :  { %12792 = vmatpush3.msra.mxu0 %v10539_v44  ;;  %12774 = vmatprep.subr.mxu1 %v12981_v63  ;;  %v10585_v44 = vld [vmem:[%s19792_s10 + $0x220] sm:$0xff]  ;;  %v12956_v28 = vld.sshfl [vmem:[#allocation5 + $0x1c] sm:$0xf pattern:$0x76325410] }
 0x4da   :  { %12793 = vmatprep.subr.mxu0 %v12981_v63  ;;  %12775 = vmatpush3.msra.mxu1 %v10529_v56  ;;  %v12957_v56 = vld.sshfl [vmem:[#allocation5 + $0x34] sm:$0xf pattern:$0x76325410] }
 0x4db   :  { %12794 = vmatpush3.msra.mxu0 %v10538_v51  ;;  %12776 = vmatprep.subr.mxu1 %v12981_v63  ;;  %v10581_v51 = vld [vmem:[%s19792_s10 + $0x200] sm:$0xff] }
 0x4dc   :  { %12795 = vmatprep.subr.mxu0 %v12981_v63  ;;  %12777 = vmatpush3.msra.mxu1 %v10528_v53  ;;  %v10623_v53 = vld [vmem:[%s19795_s13 + $0x1f8] sm:$0xff]  ;;  %v6223_v5 = vld [vmem:[%s19795_s13 + $0x60] sm:$0xff] }
 0x4dd   :  { %12796 = vmatpush3.msra.mxu0 %v10537_v55  ;;  %12778 = vmatprep.subr.mxu1 %v12981_v63  ;;  %v10622_v55 = vld [vmem:[%s19795_s13 + $0x1f0] sm:$0xff] }
 0x4de   :  { %12797 = vmatprep.subr.mxu0 %v12981_v63  ;;  %12779 = vmatpush3.msra.mxu1 %v10527_v13  ;;  %v10621_v13 = vld [vmem:[%s19795_s13 + $0x1e8] sm:$0xff] }
 0x4df   :  { %12780 = vmatprep.mubr.msk.f32.mxu1 %vm12982_vm2, %v12981_v63  ;;  %12798 = vmatpush3.msra.mxu0 %v10536_v14  ;;  %v6054_v14 = vcombine.low %v12956_v28, %v12957_v56  ;;  %v10595_v28 = vld [vmem:[%s19795_s13 + $0x118] sm:$0xff]  ;;  %v6216_v56 = vld [vmem:[%s19795_s13 + $0x28] sm:$0xff] }
 0x4e0   :  { %12799 = vmatprep.mubr.msk.f32.mxu0 %vm12982_vm2, %v12981_v63  ;;  %12781 = vmatmul.mubr.msk.f32.vlgmr.msra.gmra.mxu1 %vm278_vm0, %v5407_v20  ;;  %v6242_v20 = vld [vmem:[%s19795_s13 + $0xf8] sm:$0xff] }
 0x4e1   :  { %12800 = vmatmul.mubr.msk.f32.vlgmr.msra.gmra.mxu0 %vm278_vm0, %v5515_v21  ;;  %12802 = vmatprep.subr.mxu1 %v12981_v63  ;;  %v10620_v21 = vld [vmem:[%s19795_s13 + $0x1e0] sm:$0xff] }
 0x4e2   :  { %12821 = vmatprep.subr.mxu0 %v12981_v63  ;;  %12803 = vmatpush3.msra.mxu1 %v10552_v27  ;;  %v6241_v27 = vld [vmem:[%s19795_s13 + $0xf0] sm:$0xff] }
 0x4e3   :  { %12822 = vmatpush3.msra.mxu0 %v10561_v9  ;;  %12804 = vmatprep.subr.mxu1 %v12981_v63  ;;  %v10619_v9 = vld [vmem:[%s19795_s13 + $0x1d8] sm:$0xff] }
 0x4e4   :  { %12823 = vmatprep.subr.mxu0 %v12981_v63  ;;  %12805 = vmatpush3.msra.mxu1 %v10551_v29  ;;  %v6240_v29 = vld [vmem:[%s19795_s13 + $0xe8] sm:$0xff] }
 0x4e5   :  { %12824 = vmatpush3.msra.mxu0 %v10560_v15  ;;  %12806 = vmatprep.subr.mxu1 %v12981_v63  ;;  %v10618_v15 = vld [vmem:[%s19795_s13 + $0x1d0] sm:$0xff] }
 0x4e6   :  { %12825 = vmatprep.subr.mxu0 %v12981_v63  ;;  %12807 = vmatpush3.msra.mxu1 %v10550_v23  ;;  %v6239_v23 = vld [vmem:[%s19795_s13 + $0xe0] sm:$0xff] }
 0x4e7   :  { %12826 = vmatpush3.msra.mxu0 %v10559_v17  ;;  %12808 = vmatprep.subr.mxu1 %v12981_v63  ;;  %v10617_v17 = vld [vmem:[%s19795_s13 + $0x1c8] sm:$0xff] }
 0x4e8   :  { %12827 = vmatprep.subr.mxu0 %v12981_v63  ;;  %12809 = vmatpush3.msra.mxu1 %v10549_v25  ;;  %v6238_v25 = vld [vmem:[%s19795_s13 + $0xd8] sm:$0xff] }
 0x4e9   :  { %12828 = vmatpush3.msra.mxu0 %v10558_v59  ;;  %12810 = vmatprep.subr.mxu1 %v12981_v63  ;;  %v10616_v59 = vld [vmem:[%s19795_s13 + $0x1c0] sm:$0xff] }
 0x4ea   :  { %12829 = vmatprep.subr.mxu0 %v12981_v63  ;;  %12811 = vmatpush3.msra.mxu1 %v10548_v3  ;;  %v6237_v3 = vld [vmem:[%s19795_s13 + $0xd0] sm:$0xff] }
 0x4eb   :  { %12830 = vmatpush3.msra.mxu0 %v10557_v31  ;;  %12812 = vmatprep.subr.mxu1 %v12981_v63  ;;  %v10615_v31 = vld [vmem:[%s19795_s13 + $0x1b8] sm:$0xff] }
 0x4ec   :  { %12831 = vmatprep.subr.mxu0 %v12981_v63  ;;  %12813 = vmatpush3.msra.mxu1 %v10547_v62  ;;  %v6235_v62 = vld [vmem:[%s19795_s13 + $0xc0] sm:$0xff] }
 0x4ed   :  { %12832 = vmatpush3.msra.mxu0 %v10556_v8  ;;  %12814 = vmatprep.subr.mxu1 %v12981_v63  ;;  %v10612_v8 = vld [vmem:[%s19795_s13 + $0x1a0] sm:$0xff] }
 0x4ee   :  { %12833 = vmatprep.subr.mxu0 %v12981_v63  ;;  %12815 = vmatpush3.msra.mxu1 %v10546_v1  ;;  %v6233_v1 = vld [vmem:[%s19795_s13 + $0xb0] sm:$0xff] }
 0x4ef   :  { %12834 = vmatpush3.msra.mxu0 %v10555_v33  ;;  %12816 = vmatprep.subr.mxu1 %v12981_v63  ;;  %v10611_v33 = vld [vmem:[%s19795_s13 + $0x198] sm:$0xff] }
 0x4f0   :  { %12835 = vmatprep.subr.mxu0 %v12981_v63  ;;  %12817 = vmatpush3.msra.mxu1 %v10545_v37  ;;  %v6232_v37 = vld [vmem:[%s19795_s13 + $0xa8] sm:$0xff] }
 0x4f1   :  { %12818 = vmatprep.mubr.msk.f32.mxu1 %vm12982_vm2, %v12981_v63  ;;  %12836 = vmatpush3.msra.mxu0 %v10554_v4  ;;  %v10610_v4 = vld [vmem:[%s19795_s13 + $0x190] sm:$0xff] }
 0x4f2   :  { %12837 = vmatprep.mubr.msk.f32.mxu0 %vm12982_vm2, %v12981_v63  ;;  %12819 = vmatmul.mubr.msk.f32.vlgmr.msra.gmra.mxu1 %vm278_vm0, %v5622_v35  ;;  %v6231_v35 = vld [vmem:[%s19795_s13 + $0xa0] sm:$0xff] }
 0x4f3   :  { %12838 = vmatmul.mubr.msk.f32.vlgmr.msra.gmra.mxu0 %vm278_vm0, %v5730_v52  ;;  %12840 = vmatprep.subr.mxu1 %v12981_v63  ;;  %v10609_v52 = vld [vmem:[%s19795_s13 + $0x188] sm:$0xff] }
 0x4f4   :  { %12859 = vmatprep.subr.mxu0 %v12981_v63  ;;  %12841 = vmatpush3.msra.mxu1 %v10570_v18  ;;  %v6230_v18 = vld [vmem:[%s19795_s13 + $0x98] sm:$0xff] }
 0x4f5   :  { %12860 = vmatpush3.msra.mxu0 %v10579_v16  ;;  %12842 = vmatprep.subr.mxu1 %v12981_v63  ;;  %v10608_v16 = vld [vmem:[%s19795_s13 + $0x180] sm:$0xff] }
 0x4f6   :  { %12861 = vmatprep.subr.mxu0 %v12981_v63  ;;  %12843 = vmatpush3.msra.mxu1 %v10569_v19  ;;  %v6229_v19 = vld [vmem:[%s19795_s13 + $0x90] sm:$0xff] }
 0x4f7   :  { %12862 = vmatpush3.msra.mxu0 %v10578_v57  ;;  %12844 = vmatprep.subr.mxu1 %v12981_v63  ;;  %v10607_v57 = vld [vmem:[%s19795_s13 + $0x178] sm:$0xff] }
 0x4f8   :  { %12863 = vmatprep.subr.mxu0 %v12981_v63  ;;  %12845 = vmatpush3.msra.mxu1 %v10568_v46  ;;  %v6228_v46 = vld [vmem:[%s19795_s13 + $0x88] sm:$0xff] }
 0x4f9   :  { %12864 = vmatpush3.msra.mxu0 %v10577_v22  ;;  %12846 = vmatprep.subr.mxu1 %v12981_v63  ;;  %v10606_v22 = vld [vmem:[%s19795_s13 + $0x170] sm:$0xff] }
 0x4fa   :  { %12865 = vmatprep.subr.mxu0 %v12981_v63  ;;  %12847 = vmatpush3.msra.mxu1 %v10567_v26  ;;  %v6227_v26 = vld [vmem:[%s19795_s13 + $0x80] sm:$0xff] }
 0x4fb   :  { %12866 = vmatpush3.msra.mxu0 %v10576_v30  ;;  %12848 = vmatprep.subr.mxu1 %v12981_v63  ;;  %v10605_v30 = vld [vmem:[%s19795_s13 + $0x168] sm:$0xff] }
 0x4fc   :  { %12867 = vmatprep.subr.mxu0 %v12981_v63  ;;  %12849 = vmatpush3.msra.mxu1 %v10566_v50  ;;  %v6226_v50 = vld [vmem:[%s19795_s13 + $0x78] sm:$0xff] }
 0x4fd   :  { %12868 = vmatpush3.msra.mxu0 %v10575_v6  ;;  %12850 = vmatprep.subr.mxu1 %v12981_v63  ;;  %v10604_v6 = vld [vmem:[%s19795_s13 + $0x160] sm:$0xff] }
 0x4fe   :  { %12869 = vmatprep.subr.mxu0 %v12981_v63  ;;  %12851 = vmatpush3.msra.mxu1 %v10565_v36  ;;  %v6224_v36 = vld [vmem:[%s19795_s13 + $0x68] sm:$0xff] }
 0x4ff   :  { %12870 = vmatpush3.msra.mxu0 %v10574_v58  ;;  %12852 = vmatprep.subr.mxu1 %v12981_v63  ;;  %v10601_v58 = vld [vmem:[%s19795_s13 + $0x148] sm:$0xff] }
 0x500   :  { %12871 = vmatprep.subr.mxu0 %v12981_v63  ;;  %12853 = vmatpush3.msra.mxu1 %v10564_v7  ;;  %v6222_v7 = vld [vmem:[%s19795_s13 + $0x58] sm:$0xff] }
 0x501   :  { %12872 = vmatpush3.msra.mxu0 %v10573_v42  ;;  %12854 = vmatprep.subr.mxu1 %v12981_v63  ;;  %v10600_v42 = vld [vmem:[%s19795_s13 + $0x140] sm:$0xff] }
 0x502   :  { %12873 = vmatprep.subr.mxu0 %v12981_v63  ;;  %12855 = vmatpush3.msra.mxu1 %v10563_v54  ;;  %v6221_v54 = vld [vmem:[%s19795_s13 + $0x50] sm:$0xff] }
 0x503   :  { %12856 = vmatprep.mubr.msk.f32.mxu1 %vm12982_vm2, %v12981_v63  ;;  %12874 = vmatpush3.msra.mxu0 %v10572_v10  ;;  %v10599_v10 = vld [vmem:[%s19795_s13 + $0x138] sm:$0xff] }
 0x504   :  { %12875 = vmatprep.mubr.msk.f32.mxu0 %vm12982_vm2, %v12981_v63  ;;  %12857 = vmatmul.mubr.msk.f32.vlgmr.msra.gmra.mxu1 %vm278_vm0, %v5838_v11  ;;  %v6220_v11 = vld [vmem:[%s19795_s13 + $0x48] sm:$0xff] }
 0x505   :  { %12876 = vmatmul.mubr.msk.f32.vlgmr.msra.gmra.mxu0 %vm278_vm0, %v5946_v12  ;;  %12878 = vmatprep.subr.mxu1 %v12981_v63  ;;  %v10598_v12 = vld [vmem:[%s19795_s13 + $0x130] sm:$0xff] }
 0x506   :  { %12879 = vmatpush3.msra.mxu1 %v10588_v40  ;;  %12894 = vmatprep.mubr.msk.f32.mxu1 %vm12982_vm2, %v12981_v63  ;;  %v6219_v40 = vld [vmem:[%s19795_s13 + $0x40] sm:$0xff] }
 0x507   :  { %12880 = vmatprep.subr.mxu1 %v12981_v63  ;;  %6342 = vmatprep.mubr.f32.mxu0 %v12981_v63 }
 0x508   :  { %12881 = vmatpush3.msra.mxu1 %v10587_v41  ;;  %6278 = vmatprep.subr.mxu0 %v10623_v53  ;;  %v10597_v41 = vld [vmem:[%s19795_s13 + $0x128] sm:$0xff]  ;;  %v6214_v53 = vld [vmem:[%s19795_s13 + $0x18] sm:$0xff] }
 0x509   :  { %12882 = vmatprep.subr.mxu1 %v12981_v63  ;;  %6279 = vmatpush1.msra.mxu0 %v10622_v55  ;;  %v10592_v55 = vld [vmem:[%s19795_s13 + $0x100] sm:$0xff] }
 0x50a   :  { %12883 = vmatpush3.msra.mxu1 %v10586_v43  ;;  %6280 = vmatprep.subr.mxu0 %v10621_v13  ;;  %v6218_v43 = vld [vmem:[%s19795_s13 + $0x38] sm:$0xff]  ;;  %v6213_v13 = vld [vmem:[%s19795_s13 + $0x10] sm:$0xff] }
 0x50b   :  { %12884 = vmatprep.subr.mxu1 %v12981_v63  ;;  %6281 = vmatpush1.msra.mxu0 %v10620_v21  ;;  %v6244_v21 = vld [vmem:[#allocation6 + $0x2] sm:$0x3] }
 0x50c   :  { %12885 = vmatpush3.msra.mxu1 %v10585_v44  ;;  %6282 = vmatprep.subr.mxu0 %v10619_v9  ;;  %v10596_v44 = vld [vmem:[%s19795_s13 + $0x120] sm:$0xff]  ;;  %v10654_v9 = vld [vmem:[%s19795_s13 + $0x2f0] sm:$0xff] }
 0x50d   :  { %12886 = vmatprep.subr.mxu1 %v12981_v63  ;;  %6283 = vmatpush1.msra.mxu0 %v10618_v15  ;;  %v10653_v15 = vld [vmem:[%s19795_s13 + $0x2e8] sm:$0xff] }
 0x50e   :  { %12887 = vmatpush3.msra.mxu1 %v10584_v47  ;;  %6284 = vmatprep.subr.mxu0 %v10617_v17  ;;  %v6217_v47 = vld [vmem:[%s19795_s13 + $0x30] sm:$0xff]  ;;  %v10652_v17 = vld [vmem:[%s19795_s13 + $0x2e0] sm:$0xff] }
 0x50f   :  { %12888 = vmatprep.subr.mxu1 %v12981_v63  ;;  %6285 = vmatpush1.msra.mxu0 %v10616_v59  ;;  %v10651_v59 = vld [vmem:[%s19795_s13 + $0x2d8] sm:$0xff] }
 0x510   :  { %12889 = vmatpush3.msra.mxu1 %v10583_v38  ;;  %6286 = vmatprep.subr.mxu0 %v10615_v31  ;;  %v10594_v38 = vld [vmem:[%s19795_s13 + $0x110] sm:$0xff] }
 0x511   :  { %12890 = vmatprep.subr.mxu1 %v12981_v63  ;;  %6287 = vmatpush1.msra.mxu0 %v10614_v32  ;;  %v10650_v31 = vld [vmem:[%s19795_s13 + $0x2d0] sm:$0xff]  ;;  %v10649_v32 = vld [vmem:[%s19795_s13 + $0x2c8] sm:$0xff] }
 0x512   :  { %12891 = vmatpush3.msra.mxu1 %v10582_v49  ;;  %6288 = vmatprep.subr.mxu0 %v10613_v45  ;;  %v6215_v49 = vld [vmem:[%s19795_s13 + $0x20] sm:$0xff] }
 0x513   :  { %12892 = vmatprep.subr.mxu1 %v12981_v63  ;;  %6289 = vmatpush1.msra.mxu0 %v10612_v8  ;;  %v10648_v45 = vld [vmem:[%s19795_s13 + $0x2c0] sm:$0xff]  ;;  %v10647_v8 = vld [vmem:[%s19795_s13 + $0x2b8] sm:$0xff] }
 0x514   :  { %12893 = vmatpush3.msra.mxu1 %v10581_v51  ;;  %6290 = vmatprep.subr.mxu0 %v10611_v33  ;;  %v10593_v51 = vld [vmem:[%s19795_s13 + $0x108] sm:$0xff]  ;;  %v10646_v33 = vld [vmem:[%s19795_s13 + $0x2b0] sm:$0xff] }
 0x515   :  { %12895 = vmatmul.mubr.msk.f32.vlgmr.msra.gmra.mxu1 %vm278_vm0, %v6054_v14  ;;  %6349 = vmatprep.subr.mxu1 %v6242_v20  ;;  %v6212_v14 = vld [vmem:[%s19795_s13 + $0x8] sm:$0xff]  ;;  %v10655_v20 = vld [vmem:[%s19795_s13 + $0x2f8] sm:$0xff] }
 0x516   :  { %6350 = vmatpush1.msra.mxu1 %v6241_v27  ;;  %6413 = vmatprep.mubr.f32.mxu1 %v12981_v63  ;;  %v6211_v27 = vld [vmem:[%s19795_s13] sm:$0xff] }
 0x517   :  { %6351 = vmatprep.subr.mxu1 %v6240_v29  ;;  %6291 = vmatpush1.msra.mxu0 %v10610_v4  ;;  %v10687_v29 = vld [vmem:[%s19795_s13 + $0x3f8] sm:$0xff]  ;;  %v10645_v4 = vld [vmem:[%s19795_s13 + $0x2a8] sm:$0xff] }
 0x518   :  { %6352 = vmatpush1.msra.mxu1 %v6239_v23  ;;  %6292 = vmatprep.subr.mxu0 %v10609_v52  ;;  %v6210_v23 = vld [vmem:[#allocation6] sm:$0x3]  ;;  %v10644_v52 = vld [vmem:[%s19795_s13 + $0x2a0] sm:$0xff] }
 0x519   :  { %6353 = vmatprep.subr.mxu1 %v6238_v25  ;;  %6293 = vmatpush1.msra.mxu0 %v10608_v16  ;;  %v10686_v25 = vld [vmem:[%s19795_s13 + $0x3f0] sm:$0xff]  ;;  %v10643_v16 = vld [vmem:[%s19795_s13 + $0x298] sm:$0xff] }
 0x51a   :  { %6354 = vmatpush1.msra.mxu1 %v6237_v3  ;;  %6294 = vmatprep.subr.mxu0 %v10607_v57  ;;  %v10685_v3 = vld [vmem:[%s19795_s13 + $0x3e8] sm:$0xff]  ;;  %v10642_v57 = vld [vmem:[%s19795_s13 + $0x290] sm:$0xff] }
 0x51b   :  { %6355 = vmatprep.subr.mxu1 %v6236_v61  ;;  %6295 = vmatpush1.msra.mxu0 %v10606_v22  ;;  %v10684_v61 = vld [vmem:[%s19795_s13 + $0x3e0] sm:$0xff]  ;;  %v10641_v22 = vld [vmem:[%s19795_s13 + $0x288] sm:$0xff] }
 0x51c   :  { %6356 = vmatpush1.msra.mxu1 %v6235_v62  ;;  %6296 = vmatprep.subr.mxu0 %v10605_v30  ;;  %v10683_v62 = vld [vmem:[%s19795_s13 + $0x3d8] sm:$0xff]  ;;  %v10640_v30 = vld [vmem:[%s19795_s13 + $0x280] sm:$0xff] }
 0x51d   :  { %6357 = vmatprep.subr.mxu1 %v6234_v2  ;;  %6297 = vmatpush1.msra.mxu0 %v10604_v6  ;;  %v10682_v2 = vld [vmem:[%s19795_s13 + $0x3d0] sm:$0xff]  ;;  %v10639_v6 = vld [vmem:[%s19795_s13 + $0x278] sm:$0xff] }
 0x51e   :  { %6358 = vmatpush1.msra.mxu1 %v6233_v1  ;;  %6298 = vmatprep.subr.mxu0 %v10603_v0  ;;  %v10681_v1 = vld [vmem:[%s19795_s13 + $0x3c8] sm:$0xff]  ;;  %v10638_v0 = vld [vmem:[%s19795_s13 + $0x270] sm:$0xff] }
 0x51f   :  { %6359 = vmatprep.subr.mxu1 %v6232_v37  ;;  %6299 = vmatpush1.msra.mxu0 %v10602_v60  ;;  %v10680_v37 = vld [vmem:[%s19795_s13 + $0x3c0] sm:$0xff]  ;;  %v10637_v60 = vld [vmem:[%s19795_s13 + $0x268] sm:$0xff] }
 0x520   :  { %6360 = vmatpush1.msra.mxu1 %v6231_v35  ;;  %6300 = vmatprep.subr.mxu0 %v10601_v58  ;;  %v10679_v35 = vld [vmem:[%s19795_s13 + $0x3b8] sm:$0xff]  ;;  %v10636_v58 = vld [vmem:[%s19795_s13 + $0x260] sm:$0xff] }
 0x521   :  { %6361 = vmatprep.subr.mxu1 %v6230_v18  ;;  %6301 = vmatpush1.msra.mxu0 %v10600_v42  ;;  %v10678_v18 = vld [vmem:[%s19795_s13 + $0x3b0] sm:$0xff]  ;;  %v10635_v42 = vld [vmem:[%s19795_s13 + $0x258] sm:$0xff] }
 0x522   :  { %6362 = vmatpush1.msra.mxu1 %v6229_v19  ;;  %6302 = vmatprep.subr.mxu0 %v10599_v10  ;;  %v10677_v19 = vld [vmem:[%s19795_s13 + $0x3a8] sm:$0xff]  ;;  %v10634_v10 = vld [vmem:[%s19795_s13 + $0x250] sm:$0xff] }
 0x523   :  { %6363 = vmatprep.subr.mxu1 %v6228_v46  ;;  %6303 = vmatpush1.msra.mxu0 %v10598_v12  ;;  %v10676_v46 = vld [vmem:[%s19795_s13 + $0x3a0] sm:$0xff]  ;;  %v10633_v12 = vld [vmem:[%s19795_s13 + $0x248] sm:$0xff] }
 0x524   :  { %6364 = vmatpush1.msra.mxu1 %v6227_v26  ;;  %6304 = vmatprep.subr.mxu0 %v10597_v41  ;;  %v10675_v26 = vld [vmem:[%s19795_s13 + $0x398] sm:$0xff]  ;;  %v10632_v41 = vld [vmem:[%s19795_s13 + $0x240] sm:$0xff] }
 0x525   :  { %6365 = vmatprep.subr.mxu1 %v6226_v50  ;;  %6305 = vmatpush1.msra.mxu0 %v10596_v44  ;;  %v10674_v50 = vld [vmem:[%s19795_s13 + $0x390] sm:$0xff]  ;;  %v10631_v44 = vld [vmem:[%s19795_s13 + $0x238] sm:$0xff] }
 0x526   :  { %6366 = vmatpush1.msra.mxu1 %v6225_v34  ;;  %6306 = vmatprep.subr.mxu0 %v10595_v28  ;;  %v10673_v34 = vld [vmem:[%s19795_s13 + $0x388] sm:$0xff]  ;;  %v10630_v28 = vld [vmem:[%s19795_s13 + $0x230] sm:$0xff] }
 0x527   :  { %6367 = vmatprep.subr.mxu1 %v6224_v36  ;;  %6307 = vmatpush1.msra.mxu0 %v10594_v38  ;;  %v10672_v36 = vld [vmem:[%s19795_s13 + $0x380] sm:$0xff]  ;;  %v10629_v38 = vld [vmem:[%s19795_s13 + $0x228] sm:$0xff] }
 0x528   :  { %6368 = vmatpush1.msra.mxu1 %v6223_v5  ;;  %6308 = vmatprep.subr.mxu0 %v10593_v51  ;;  %v10671_v5 = vld [vmem:[%s19795_s13 + $0x378] sm:$0xff]  ;;  %v10628_v51 = vld [vmem:[%s19795_s13 + $0x220] sm:$0xff] }
 0x529   :  { %6369 = vmatprep.subr.mxu1 %v6222_v7  ;;  %6309 = vmatpush1.msra.mxu0 %v10592_v55  ;;  %v10670_v7 = vld [vmem:[%s19795_s13 + $0x370] sm:$0xff]  ;;  %v10627_v55 = vld [vmem:[%s19795_s13 + $0x218] sm:$0xff] }
 0x52a   :  { %6370 = vmatpush1.msra.mxu1 %v6221_v54  ;;  %6455 = vmatprep.subr.mxu0 %v10655_v20  ;;  %v10669_v54 = vld [vmem:[%s19795_s13 + $0x368] sm:$0xff]  ;;  %v10660_v20 = vld [vmem:[%s19795_s13 + $0x320] sm:$0xff] }
 0x52b   :  { %6371 = vmatprep.subr.mxu1 %v6220_v11  ;;  %6343 = vmatmul.mubr.f32.vlgmr.msra.gmra.mxu0 %v6244_v21  ;;  %v10668_v11 = vld [vmem:[%s19795_s13 + $0x360] sm:$0xff]  ;;  %v10625_v21 = vld [vmem:[%s19795_s13 + $0x208] sm:$0xff] }
 0x52c   :  { %6372 = vmatpush1.msra.mxu1 %v6219_v40  ;;  %6456 = vmatpush1.msra.mxu0 %v10654_v9  ;;  %v10667_v40 = vld [vmem:[%s19795_s13 + $0x358] sm:$0xff]  ;;  %v10624_v9 = vld [vmem:[%s19795_s13 + $0x200] sm:$0xff] }
 0x52d   :  { %6373 = vmatprep.subr.mxu1 %v6218_v43  ;;  %6457 = vmatprep.subr.mxu0 %v10653_v15  ;;  %v10666_v43 = vld [vmem:[%s19795_s13 + $0x350] sm:$0xff]  ;;  %v6421_v15 = vld [vmem:[#allocation6 + $0x4] sm:$0x3] }
 0x52e   :  { %6374 = vmatpush1.msra.mxu1 %v6217_v47  ;;  %6458 = vmatpush1.msra.mxu0 %v10652_v17  ;;  %v10665_v47 = vld [vmem:[%s19795_s13 + $0x348] sm:$0xff]  ;;  %v10656_v17 = vld [vmem:[%s19795_s13 + $0x300] sm:$0xff] }
 0x52f   :  { %6375 = vmatprep.subr.mxu1 %v6216_v56  ;;  %6459 = vmatprep.subr.mxu0 %v10651_v59  ;;  %v10664_v56 = vld [vmem:[%s19795_s13 + $0x340] sm:$0xff] }
 0x530   :  { %6376 = vmatpush1.msra.mxu1 %v6215_v49  ;;  %6460 = vmatpush1.msra.mxu0 %v10650_v31  ;;  %v10663_v49 = vld [vmem:[%s19795_s13 + $0x338] sm:$0xff] }
 0x531   :  { %6377 = vmatprep.subr.mxu1 %v6214_v53  ;;  %6461 = vmatprep.subr.mxu0 %v10649_v32  ;;  %v10662_v53 = vld [vmem:[%s19795_s13 + $0x330] sm:$0xff]  ;;  %v10719_v32 = vld [vmem:[%s19795_s13 + $0x4f8] sm:$0xff] }
 0x532   :  { %6378 = vmatpush1.msra.mxu1 %v6213_v13  ;;  %6462 = vmatpush1.msra.mxu0 %v10648_v45  ;;  %v10661_v13 = vld [vmem:[%s19795_s13 + $0x328] sm:$0xff] }
 0x533   :  { %6379 = vmatprep.subr.mxu1 %v6212_v14  ;;  %6463 = vmatprep.subr.mxu0 %v10647_v8  ;;  %v10626_v14 = vld [vmem:[%s19795_s13 + $0x210] sm:$0xff]  ;;  %v10717_v45 = vld [vmem:[%s19795_s13 + $0x4e8] sm:$0xff]  ;;  %v10715_v8 = vld [vmem:[%s19795_s13 + $0x4d8] sm:$0xff] }
 0x534   :  { %6380 = vmatpush1.msra.mxu1 %v6211_v27  ;;  %6519 = vmatprep.mubr.f32.mxu0 %v12981_v63  ;;  %v10659_v27 = vld [vmem:[%s19795_s13 + $0x318] sm:$0xff] }
 0x535   :  { %6563 = vmatprep.subr.mxu1 %v10687_v29  ;;  %6414 = vmatmul.mubr.f32.vlgmr.msra.gmra.mxu1 %v6210_v23  ;;  %v10658_v29 = vld [vmem:[%s19795_s13 + $0x310] sm:$0xff]  ;;  %v10657_v23 = vld [vmem:[%s19795_s13 + $0x308] sm:$0xff] }
 0x536   :  { %6564 = vmatpush1.msra.mxu1 %v10686_v25  ;;  %6627 = vmatprep.mubr.f32.mxu1 %v12981_v63  ;;  %v6529_v25 = vld [vmem:[#allocation6 + $0x8] sm:$0x3] }
 0x537   :  { %6565 = vmatprep.subr.mxu1 %v10685_v3  ;;  %6464 = vmatpush1.msra.mxu0 %v10646_v33  ;;  %v10714_v33 = vld [vmem:[%s19795_s13 + $0x4d0] sm:$0xff] }
 0x538   :  { %6566 = vmatpush1.msra.mxu1 %v10684_v61  ;;  %6465 = vmatprep.subr.mxu0 %v10645_v4  ;;  %v10713_v4 = vld [vmem:[%s19795_s13 + $0x4c8] sm:$0xff] }
 0x539   :  { %6567 = vmatprep.subr.mxu1 %v10683_v62  ;;  %6466 = vmatpush1.msra.mxu0 %v10644_v52  ;;  %v10718_v62 = vld [vmem:[%s19795_s13 + $0x4f0] sm:$0xff]  ;;  %v10712_v52 = vld [vmem:[%s19795_s13 + $0x4c0] sm:$0xff] }
 0x53a   :  { %6568 = vmatpush1.msra.mxu1 %v10682_v2  ;;  %6467 = vmatprep.subr.mxu0 %v10643_v16  ;;  %v10716_v2 = vld [vmem:[%s19795_s13 + $0x4e0] sm:$0xff]  ;;  %v10711_v16 = vld [vmem:[%s19795_s13 + $0x4b8] sm:$0xff] }
 0x53b   :  { %6569 = vmatprep.subr.mxu1 %v10681_v1  ;;  %6468 = vmatpush1.msra.mxu0 %v10642_v57  ;;  %v10751_v1 = vld [vmem:[%s19795_s13 + $0x5f8] sm:$0xff]  ;;  %v10710_v57 = vld [vmem:[%s19795_s13 + $0x4b0] sm:$0xff] }
 0x53c   :  { %6570 = vmatpush1.msra.mxu1 %v10680_v37  ;;  %6469 = vmatprep.subr.mxu0 %v10641_v22  ;;  %v10750_v37 = vld [vmem:[%s19795_s13 + $0x5f0] sm:$0xff]  ;;  %v10709_v22 = vld [vmem:[%s19795_s13 + $0x4a8] sm:$0xff] }
 0x53d   :  { %6571 = vmatprep.subr.mxu1 %v10679_v35  ;;  %6470 = vmatpush1.msra.mxu0 %v10640_v30  ;;  %v10749_v35 = vld [vmem:[%s19795_s13 + $0x5e8] sm:$0xff]  ;;  %v10708_v30 = vld [vmem:[%s19795_s13 + $0x4a0] sm:$0xff] }
 0x53e   :  { %6572 = vmatpush1.msra.mxu1 %v10678_v18  ;;  %6471 = vmatprep.subr.mxu0 %v10639_v6  ;;  %v10748_v18 = vld [vmem:[%s19795_s13 + $0x5e0] sm:$0xff]  ;;  %v10707_v6 = vld [vmem:[%s19795_s13 + $0x498] sm:$0xff] }
 0x53f   :  { %6573 = vmatprep.subr.mxu1 %v10677_v19  ;;  %6472 = vmatpush1.msra.mxu0 %v10638_v0  ;;  %v10747_v19 = vld [vmem:[%s19795_s13 + $0x5d8] sm:$0xff]  ;;  %v10706_v0 = vld [vmem:[%s19795_s13 + $0x490] sm:$0xff] }
 0x540   :  { %6574 = vmatpush1.msra.mxu1 %v10676_v46  ;;  %6473 = vmatprep.subr.mxu0 %v10637_v60  ;;  %v10746_v46 = vld [vmem:[%s19795_s13 + $0x5d0] sm:$0xff]  ;;  %v10705_v60 = vld [vmem:[%s19795_s13 + $0x488] sm:$0xff] }
 0x541   :  { %6575 = vmatprep.subr.mxu1 %v10675_v26  ;;  %6474 = vmatpush1.msra.mxu0 %v10636_v58  ;;  %v10745_v26 = vld [vmem:[%s19795_s13 + $0x5c8] sm:$0xff] }
 0x542   :  { %6576 = vmatpush1.msra.mxu1 %v10674_v50  ;;  %6475 = vmatprep.subr.mxu0 %v10635_v42  ;;  %v10744_v50 = vld [vmem:[%s19795_s13 + $0x5c0] sm:$0xff] }
 0x543   :  { %6577 = vmatprep.subr.mxu1 %v10673_v34  ;;  %6476 = vmatpush1.msra.mxu0 %v10634_v10  ;;  %v10743_v34 = vld [vmem:[%s19795_s13 + $0x5b8] sm:$0xff]  ;;  %v10740_v42 = vld [vmem:[%s19795_s13 + $0x5a0] sm:$0xff] }
 0x544   :  { %6578 = vmatpush1.msra.mxu1 %v10672_v36  ;;  %6477 = vmatprep.subr.mxu0 %v10633_v12  ;;  %v10742_v36 = vld [vmem:[%s19795_s13 + $0x5b0] sm:$0xff]  ;;  %v10703_v10 = vld [vmem:[%s19795_s13 + $0x478] sm:$0xff] }
 0x545   :  { %6579 = vmatprep.subr.mxu1 %v10671_v5  ;;  %6478 = vmatpush1.msra.mxu0 %v10632_v41  ;;  %v10741_v5 = vld [vmem:[%s19795_s13 + $0x5a8] sm:$0xff]  ;;  %v10738_v41 = vld [vmem:[%s19795_s13 + $0x590] sm:$0xff] }
 0x546   :  { %6580 = vmatpush1.msra.mxu1 %v10670_v7  ;;  %6479 = vmatprep.subr.mxu0 %v10631_v44  ;;  %v10704_v7 = vld [vmem:[%s19795_s13 + $0x480] sm:$0xff]  ;;  %v10701_v44 = vld [vmem:[%s19795_s13 + $0x468] sm:$0xff] }
 0x547   :  { %6581 = vmatprep.subr.mxu1 %v10669_v54  ;;  %6480 = vmatpush1.msra.mxu0 %v10630_v28  ;;  %v10700_v28 = vld [vmem:[%s19795_s13 + $0x460] sm:$0xff] }
 0x548   :  { %6582 = vmatpush1.msra.mxu1 %v10668_v11  ;;  %6481 = vmatprep.subr.mxu0 %v10629_v38  ;;  %v10739_v11 = vld [vmem:[%s19795_s13 + $0x598] sm:$0xff] }
 0x549   :  { %6583 = vmatprep.subr.mxu1 %v10667_v40  ;;  %6482 = vmatpush1.msra.mxu0 %v10628_v51  ;;  %v10702_v40 = vld [vmem:[%s19795_s13 + $0x470] sm:$0xff]  ;;  %v10699_v38 = vld [vmem:[%s19795_s13 + $0x458] sm:$0xff] }
 0x54a   :  { %6584 = vmatpush1.msra.mxu1 %v10666_v43  ;;  %6483 = vmatprep.subr.mxu0 %v10627_v55  ;;  %v10698_v51 = vld [vmem:[%s19795_s13 + $0x450] sm:$0xff]  ;;  %v10697_v55 = vld [vmem:[%s19795_s13 + $0x448] sm:$0xff] }
 0x54b   :  { %6585 = vmatprep.subr.mxu1 %v10665_v47  ;;  %6484 = vmatpush1.msra.mxu0 %v10626_v14  ;;  %v10737_v47 = vld [vmem:[%s19795_s13 + $0x588] sm:$0xff]  ;;  %v10696_v14 = vld [vmem:[%s19795_s13 + $0x440] sm:$0xff] }
 0x54c   :  { %6586 = vmatpush1.msra.mxu1 %v10664_v56  ;;  %6485 = vmatprep.subr.mxu0 %v10625_v21  ;;  %v10736_v56 = vld [vmem:[%s19795_s13 + $0x580] sm:$0xff]  ;;  %v10695_v21 = vld [vmem:[%s19795_s13 + $0x438] sm:$0xff] }
 0x54d   :  { %6587 = vmatprep.subr.mxu1 %v10663_v49  ;;  %6486 = vmatpush1.msra.mxu0 %v10624_v9  ;;  %v10735_v49 = vld [vmem:[%s19795_s13 + $0x578] sm:$0xff]  ;;  %v10694_v9 = vld [vmem:[%s19795_s13 + $0x430] sm:$0xff] }
 0x54e   :  { %6588 = vmatpush1.msra.mxu1 %v10662_v53  ;;  %6520 = vmatmul.mubr.f32.vlgmr.msra.gmra.mxu0 %v6421_v15  ;;  %v10734_v53 = vld [vmem:[%s19795_s13 + $0x570] sm:$0xff]  ;;  %v10693_v15 = vld [vmem:[%s19795_s13 + $0x428] sm:$0xff] }
 0x54f   :  { %6589 = vmatprep.subr.mxu1 %v10661_v13  ;;  %6734 = vmatprep.mubr.f32.mxu0 %v12981_v63  ;;  %v10733_v13 = vld [vmem:[%s19795_s13 + $0x568] sm:$0xff] }
 0x550   :  { %6590 = vmatpush1.msra.mxu1 %v10660_v20  ;;  %6670 = vmatprep.subr.mxu0 %v10719_v32  ;;  %v10732_v20 = vld [vmem:[%s19795_s13 + $0x560] sm:$0xff]  ;;  %v10690_v32 = vld [vmem:[%s19795_s13 + $0x410] sm:$0xff] }
 0x551   :  { %6591 = vmatprep.subr.mxu1 %v10659_v27  ;;  %6671 = vmatpush1.msra.mxu0 %v10718_v62  ;;  %v10731_v27 = vld [vmem:[%s19795_s13 + $0x558] sm:$0xff]  ;;  %v10726_v62 = vld [vmem:[%s19795_s13 + $0x530] sm:$0xff] }
 0x552   :  { %6592 = vmatpush1.msra.mxu1 %v10658_v29  ;;  %6672 = vmatprep.subr.mxu0 %v10717_v45  ;;  %v10730_v29 = vld [vmem:[%s19795_s13 + $0x550] sm:$0xff]  ;;  %v10689_v45 = vld [vmem:[%s19795_s13 + $0x408] sm:$0xff] }
 0x553   :  { %6593 = vmatprep.subr.mxu1 %v10657_v23  ;;  %6673 = vmatpush1.msra.mxu0 %v10716_v2  ;;  %v10729_v23 = vld [vmem:[%s19795_s13 + $0x548] sm:$0xff] }
 0x554   :  { %6594 = vmatpush1.msra.mxu1 %v10656_v17  ;;  %6674 = vmatprep.subr.mxu0 %v10715_v8  ;;  %v10692_v17 = vld [vmem:[%s19795_s13 + $0x420] sm:$0xff]  ;;  %v10725_v2 = vld [vmem:[%s19795_s13 + $0x528] sm:$0xff] }
 0x555   :  { %6628 = vmatmul.mubr.f32.vlgmr.msra.gmra.mxu1 %v6529_v25  ;;  %6778 = vmatprep.subr.mxu1 %v10751_v1  ;;  %v10728_v25 = vld [vmem:[%s19795_s13 + $0x540] sm:$0xff] }
 0x556   :  { %6842 = vmatprep.mubr.f32.mxu1 %v12981_v63  ;;  %6675 = vmatpush1.msra.mxu0 %v10714_v33  ;;  %v10688_v8 = vld [vmem:[%s19795_s13 + $0x400] sm:$0xff]  ;;  %v10723_v33 = vld [vmem:[%s19795_s13 + $0x518] sm:$0xff] }
 0x557   :  { %6779 = vmatpush1.msra.mxu1 %v10750_v37  ;;  %6676 = vmatprep.subr.mxu0 %v10713_v4  ;;  %v10724_v1 = vld [vmem:[%s19795_s13 + $0x520] sm:$0xff]  ;;  %v10783_v37 = vld [vmem:[%s19795_s13 + $0x6f8] sm:$0xff] }
 0x558   :  { %6780 = vmatprep.subr.mxu1 %v10749_v35  ;;  %6677 = vmatpush1.msra.mxu0 %v10712_v52  ;;  %v10722_v35 = vld [vmem:[%s19795_s13 + $0x510] sm:$0xff] }
 0x559   :  { %6781 = vmatpush1.msra.mxu1 %v10748_v18  ;;  %6678 = vmatprep.subr.mxu0 %v10711_v16  ;;  %v10721_v18 = vld [vmem:[%s19795_s13 + $0x508] sm:$0xff] }
 0x55a   :  { %6782 = vmatprep.subr.mxu1 %v10747_v19  ;;  %6679 = vmatpush1.msra.mxu0 %v10710_v57  ;;  %v10720_v19 = vld [vmem:[%s19795_s13 + $0x500] sm:$0xff] }
 0x55b   :  { %6783 = vmatpush1.msra.mxu1 %v10746_v46  ;;  %6680 = vmatprep.subr.mxu0 %v10709_v22  ;;  %v10815_v46 = vld [vmem:[%s19795_s13 + $0x7f8] sm:$0xff] }
 0x55c   :  { %6784 = vmatprep.subr.mxu1 %v10745_v26  ;;  %6681 = vmatpush1.msra.mxu0 %v10708_v30 }
 0x55d   :  { %6785 = vmatpush1.msra.mxu1 %v10744_v50  ;;  %6682 = vmatprep.subr.mxu0 %v10707_v6 }
 0x55e   :  { %6786 = vmatprep.subr.mxu1 %v10743_v34  ;;  %6683 = vmatpush1.msra.mxu0 %v10706_v0 }
 0x55f   :  { %6787 = vmatpush1.msra.mxu1 %v10742_v36  ;;  %6684 = vmatprep.subr.mxu0 %v10705_v60 }
 0x560   :  { %6788 = vmatprep.subr.mxu1 %v10741_v5  ;;  %6685 = vmatpush1.msra.mxu0 %v10704_v7 }
 0x561   :  { %6789 = vmatpush1.msra.mxu1 %v10740_v42  ;;  %6686 = vmatprep.subr.mxu0 %v10703_v10 }
 0x562   :  { %6790 = vmatprep.subr.mxu1 %v10739_v11  ;;  %6687 = vmatpush1.msra.mxu0 %v10702_v40 }
 0x563   :  { %6791 = vmatpush1.msra.mxu1 %v10738_v41  ;;  %6688 = vmatprep.subr.mxu0 %v10701_v44 }
 0x564   :  { %6792 = vmatprep.subr.mxu1 %v10737_v47  ;;  %6689 = vmatpush1.msra.mxu0 %v10700_v28 }
 0x565   :  { %6793 = vmatpush1.msra.mxu1 %v10736_v56  ;;  %6690 = vmatprep.subr.mxu0 %v10699_v38 }
 0x566   :  { %6794 = vmatprep.subr.mxu1 %v10735_v49  ;;  %6691 = vmatpush1.msra.mxu0 %v10698_v51 }
 0x567   :  { %6795 = vmatpush1.msra.mxu1 %v10734_v53  ;;  %6692 = vmatprep.subr.mxu0 %v10697_v55 }
 0x568   :  { %6796 = vmatprep.subr.mxu1 %v10733_v13  ;;  %6693 = vmatpush1.msra.mxu0 %v10696_v14  ;;  %v6145_v13 = vld [vmem:[%s19793_s11] sm:$0x1] }
 0x569   :  { %6797 = vmatpush1.msra.mxu1 %v10732_v20  ;;  %6694 = vmatprep.subr.mxu0 %v10695_v21  ;;  %v6149_v21 = vld [vmem:[%s19794_s12] sm:$0x1] }
 0x56a   :  { %6798 = vmatprep.subr.mxu1 %v10731_v27  ;;  %6695 = vmatpush1.msra.mxu0 %v10694_v9 }
 0x56b   :  { %6799 = vmatpush1.msra.mxu1 %v10730_v29  ;;  %6696 = vmatprep.subr.mxu0 %v10693_v15 }
 0x56c   :  { %6800 = vmatprep.subr.mxu1 %v10729_v23  ;;  %6697 = vmatpush1.msra.mxu0 %v10692_v17 }
 0x56d   :  { %6801 = vmatpush1.msra.mxu1 %v10728_v25 }
 0x58f   :  { %v15412_v59 = vpop.f32.mrf.mxu1 }
 0x590   :  { %v15414_v3 = vpop.f32.mrf.mxu0 }
 0x591   :  { %v12744_v31 = vpop.f32.mrf.mxu1  ;;  %v5370_v22 = vadd.f32 %v15414_v3, %v15412_v59 }
 0x592   :  { %v12763_v61 = vpop.f32.mrf.mxu0  ;;  %v10691_v31 = vld [vmem:[%s19795_s13 + $0x418] sm:$0xff] }
 0x593   :  { %v10727_v61 = vld [vmem:[%s19795_s13 + $0x538] sm:$0xff]  ;;  %6698 = vmatprep.subr.mxu0 %v10691_v31 }
 0x594   :  { %6802 = vmatprep.subr.mxu1 %v10727_v61  ;;  %6699 = vmatpush1.msra.mxu0 %v10690_v32 }
 0x595   :  { %6803 = vmatpush1.msra.mxu1 %v10726_v62  ;;  %6700 = vmatprep.subr.mxu0 %v10689_v45 }
 0x596   :  { %6804 = vmatprep.subr.mxu1 %v10725_v2  ;;  %6701 = vmatpush1.msra.mxu0 %v10688_v8  ;;  %v10782_v2 = vld [vmem:[%s19795_s13 + $0x6f0] sm:$0xff] }
 0x597   :  { %6805 = vmatpush1.msra.mxu1 %v10724_v1  ;;  %6886 = vmatprep.subr.mxu0 %v10783_v37  ;;  %v10781_v1 = vld [vmem:[%s19795_s13 + $0x6e8] sm:$0xff]  ;;  %v10778_v37 = vld [vmem:[%s19795_s13 + $0x6d0] sm:$0xff] }
 0x598   :  { %6806 = vmatprep.subr.mxu1 %v10723_v33  ;;  %v10780_v33 = vld [vmem:[%s19795_s13 + $0x6e0] sm:$0xff] }
 0x599   :  { %6807 = vmatpush1.msra.mxu1 %v10722_v35 }
 0x59a   :  { %6808 = vmatprep.subr.mxu1 %v10721_v18  ;;  %v10813_v18 = vld [vmem:[%s19795_s13 + $0x7e8] sm:$0xff] }
 0x59b   :  { %6809 = vmatpush1.msra.mxu1 %v10720_v19  ;;  %v10812_v19 = vld [vmem:[%s19795_s13 + $0x7e0] sm:$0xff] }
 0x59c   :  { %6994 = vmatprep.subr.mxu1 %v10815_v46  ;;  %v10811_v46 = vld [vmem:[%s19795_s13 + $0x7d8] sm:$0xff] }
 0x5a0   :  { %v15494_v58 = vpop.f32.mrf.mxu1 }
 0x5a1   :  { %v15502_v54 = vpop.f32.mrf.mxu0  ;;  %v5480_v26 = vadd.f32 %v15494_v58, %v5370_v22  ;;  %v10774_v22 = vld [vmem:[%s19795_s13 + $0x6b0] sm:$0xff] }
 0x5a2   :  { %v12782_v12 = vpop.f32.mrf.mxu1 }
 0x5a3   :  { %v12801_v43 = vpop.f32.mrf.mxu0  ;;  %v5588_v0 = vadd.f32 %v15502_v54, %v5480_v26  ;;  %v10810_v26 = vld [vmem:[%s19795_s13 + $0x7d0] sm:$0xff] }
 0x5b2   :  { %v5691_v4 = vpop.f32.mrf.mxu1 }
 0x5b3   :  { %v5799_v52 = vpop.f32.mrf.mxu0  ;;  %v5695_v36 = vadd.f32 %v5691_v4, %v5588_v0  ;;  %v10814_v4 = vld [vmem:[%s19795_s13 + $0x7f0] sm:$0xff]  ;;  %v10771_v0 = vld [vmem:[%s19795_s13 + $0x698] sm:$0xff] }
 0x5b4   :  { %v12820_v16 = vpop.f32.mrf.mxu1 }
 0x5b5   :  { %v12839_v57 = vpop.f32.mrf.mxu0  ;;  %v5803_v60 = vadd.f32 %v5799_v52, %v5695_v36  ;;  %v10777_v52 = vld [vmem:[%s19795_s13 + $0x6c8] sm:$0xff]  ;;  %v10776_v16 = vld [vmem:[%s19795_s13 + $0x6c0] sm:$0xff]  ;;  %v10807_v36 = vld [vmem:[%s19795_s13 + $0x7b8] sm:$0xff] }
 0x5b6   :  { %v10775_v57 = vld [vmem:[%s19795_s13 + $0x6b8] sm:$0xff] }
 0x5c4   :  { %v5907_v30 = vpop.f32.mrf.mxu1 }
 0x5c5   :  { %v6015_v50 = vpop.f32.mrf.mxu0  ;;  %v5911_v5 = vadd.f32 %v5907_v30, %v5803_v60  ;;  %v10773_v30 = vld [vmem:[%s19795_s13 + $0x6a8] sm:$0xff]  ;;  %v10770_v60 = vld [vmem:[%s19795_s13 + $0x690] sm:$0xff] }
 0x5c6   :  { %v12858_v6 = vpop.f32.mrf.mxu1 }
 0x5c7   :  { %v12877_v34 = vpop.f32.mrf.mxu0  ;;  %v6019_v7 = vadd.f32 %v6015_v50, %v5911_v5  ;;  %v10809_v50 = vld [vmem:[%s19795_s13 + $0x7c8] sm:$0xff]  ;;  %v10772_v6 = vld [vmem:[%s19795_s13 + $0x6a0] sm:$0xff]  ;;  %v10806_v5 = vld [vmem:[%s19795_s13 + $0x7b0] sm:$0xff] }
 0x5c8   :  { %v10808_v34 = vld [vmem:[%s19795_s13 + $0x7c0] sm:$0xff] }
 0x5d5   :  { %v6123_v42 = vpop.f32.mrf.mxu1 }
 0x5d6   :  { %v6127_v10 = vadd.f32 %v6123_v42, %v6019_v7  ;;  %v10769_v7 = vld [vmem:[%s19795_s13 + $0x688] sm:$0xff] }
 0x5d7   :  { %v12896_v11 = vpop.f32.mrf.mxu1  ;;  %v10805_v42 = vld [vmem:[%s19795_s13 + $0x7a8] sm:$0xff] }
 0x5d8   :  { %v6128_v12 = vrot.slane %v6127_v10, 4  ;;  %v10804_v11 = vld [vmem:[%s19795_s13 + $0x7a0] sm:$0xff] }
 0x5da   :  { %v6129_v40 = vadd.f32 %v6128_v12, %v6127_v10  ;;  %v10767_v12 = vld [vmem:[%s19795_s13 + $0x678] sm:$0xff] }
 0x5dc   :  { %v6130_v41 = vrot.slane %v6129_v40, 2 }
 0x5de   :  { %v6131_v43 = vadd.f32 %v6130_v41, %v6129_v40  ;;  %v10803_v40 = vld [vmem:[%s19795_s13 + $0x798] sm:$0xff]  ;;  %v10766_v41 = vld [vmem:[%s19795_s13 + $0x670] sm:$0xff] }
 0x5e0   :  { %v6132_v59 = vrot.slane %v6131_v43, 1 }
 0x5e2   :  { %v6133_v3 = vadd.f32 %v6132_v59, %v6131_v43  ;;  %v10802_v43 = vld [vmem:[%s19795_s13 + $0x790] sm:$0xff]  ;;  %v10765_v59 = vld [vmem:[%s19795_s13 + $0x668] sm:$0xff] }
 0x5e4   :  { %v6135_v58 = vmul.f32 0.125, %v6133_v3  ;;  %v10801_v3 = vld [vmem:[%s19795_s13 + $0x788] sm:$0xff] }
 0x5e6   :  { %v6136_v44 = vsub.f32 %v6127_v10, %v6135_v58 }
 0x5e8   :  { %v6137_v47 = vmul.f32 %v6136_v44, %v6136_v44  ;;  %v10800_v44 = vld [vmem:[%s19795_s13 + $0x780] sm:$0xff] }
 0x5ea   :  { %v6138_v28 = vrot.slane %v6137_v47, 4 }
 0x5ec   :  { %v6139_v56 = vadd.f32 %v6138_v28, %v6137_v47  ;;  %v10763_v47 = vld [vmem:[%s19795_s13 + $0x658] sm:$0xff] }
 0x5ed   :  { %v10799_v28 = vld [vmem:[%s19795_s13 + $0x778] sm:$0xff] }
 0x5ee   :  { %v6140_v38 = vrot.slane %v6139_v56, 2 }
 0x5f0   :  { %v6141_v54 = vadd.f32 %v6140_v38, %v6139_v56  ;;  %v10762_v56 = vld [vmem:[%s19795_s13 + $0x650] sm:$0xff] }
 0x5f1   :  { %v10798_v38 = vld [vmem:[%s19795_s13 + $0x770] sm:$0xff] }
 0x5f2   :  { %v6142_v49 = vrot.slane %v6141_v54, 1 }
 0x5f4   :  { %v6143_v51 = vadd.f32 %v6142_v49, %v6141_v54  ;;  %v10761_v54 = vld [vmem:[%s19795_s13 + $0x648] sm:$0xff] }
 0x5f5   :  { %v10797_v49 = vld [vmem:[%s19795_s13 + $0x768] sm:$0xff] }
 0x5f6   :  { %v6144_v53 = vmul.f32 0.125, %v6143_v51  ;;  %v10760_v51 = vld [vmem:[%s19795_s13 + $0x640] sm:$0xff] }
 0x5f8   :  { %v6146_v55 = vadd.f32 1e-05, %v6144_v53  ;;  %v10796_v53 = vld [vmem:[%s19795_s13 + $0x760] sm:$0xff] }
 0x5fa   :  { %12926 = vrsqrt.f32 %v6146_v55  ;;  %v10759_v55 = vld [vmem:[%s19795_s13 + $0x638] sm:$0xff] }
 0x607   :  { %v12927_v14 = vpop.eup %12926 }
 0x608   :  { %v6148_v20 = vmul.f32 %v12927_v14, %v6145_v13  ;;  %v10795_v13 = vld [vmem:[%s19795_s13 + $0x758] sm:$0xff]  ;;  %v10758_v14 = vld [vmem:[%s19795_s13 + $0x630] sm:$0xff] }
 0x60a   :  { %v6150_v27 = vmul.f32 %v6148_v20, %v6135_v58  ;;  %v6156_v9 = vrot.slane %v6148_v20, %v13713_v48  ;;  %v10764_v58 = vld [vmem:[%s19795_s13 + $0x660] sm:$0xff]  ;;  %v10794_v20 = vld [vmem:[%s19795_s13 + $0x750] sm:$0xff] }
 0x60c   :  { %v6151_v29 = vsub.f32 %v6149_v21, %v6150_v27  ;;  %v6158_v15 = vmul.f32 %v6156_v9, %v6127_v10  ;;  %v10768_v10 = vld [vmem:[%s19795_s13 + $0x680] sm:$0xff]  ;;  %v10757_v21 = vld [vmem:[%s19795_s13 + $0x628] sm:$0xff] }
 0x60d   :  { %v10793_v27 = vld [vmem:[%s19795_s13 + $0x748] sm:$0xff]  ;;  %v10756_v9 = vld [vmem:[%s19795_s13 + $0x620] sm:$0xff] }
 0x60e   :  { %v6163_v23 = vrot.slane %v6151_v29, %v13713_v48  ;;  %v10792_v29 = vld [vmem:[%s19795_s13 + $0x740] sm:$0xff] }
 0x610   :  { %v6165_v17 = vadd.f32 %v6163_v23, %v6158_v15  ;;  %v10755_v15 = vld [vmem:[%s19795_s13 + $0x618] sm:$0xff] }
 0x611   :  { %v10791_v23 = vld [vmem:[%s19795_s13 + $0x738] sm:$0xff] }
 0x612   :  { %v6166_v25 = vmax.f32 %v6165_v17, 0.0  ;;  %v10754_v17 = vld [vmem:[%s19795_s13 + $0x610] sm:$0xff] }
 0x614   :  { %v6184_v31 = vcombine.high %v6166_v25, %v6166_v25  ;;  %v6191_v61 = vrot.slane %v6166_v25, %v13636_v39  ;;  %10590 = vst.sshfl [vmem:[#allocation6 + $0xa] sm:$0x3 pattern:$0x76325410] %v6166_v25  ;;  %v10790_v25 = vld [vmem:[%s19795_s13 + $0x730] sm:$0xff] }
 0x616   :  { %v6198_v32 = vrot.slane %v6184_v31, %v13636_v39  ;;  %v6199_v62 = vcombine.high %v6191_v61, %v6191_v61  ;;  %10591 = vst.sshfl [vmem:[#allocation6 + $0x12] sm:$0x3 pattern:$0x76325410] %v6184_v31  ;;  %v10779_v39 = vld [vmem:[%s19795_s13 + $0x6d8] sm:$0xff]  ;;  %v10753_v31 = vld [vmem:[%s19795_s13 + $0x608] sm:$0xff] }
 0x617   :  { %v10789_v61 = vld [vmem:[%s19795_s13 + $0x728] sm:$0xff] }
 0x618   :  { %v6200_v45 = vcombine.high %v6198_v32, %v6198_v32  ;;  %6207 = vst [vmem:[#allocation6 + $0xc] sm:$0x3] %v6199_v62  ;;  %v10752_v32 = vld [vmem:[%s19795_s13 + $0x600] sm:$0xff] }
 0x619   :  { %v10788_v62 = vld [vmem:[%s19795_s13 + $0x720] sm:$0xff] }
 0x61a   :  { %6209 = vst [vmem:[#allocation6 + $0x14] sm:$0x3] %v6200_v45  ;;  %v6852_v45 = vld [vmem:[#allocation6 + $0x10] sm:$0x3] }
 0x61b   :  { %v6636_v8 = vld [vmem:[#allocation6 + $0xa] sm:$0x3] }
 0x61c   :  { %6735 = vmatmul.mubr.f32.vlgmr.msra.gmra.mxu0 %v6636_v8  ;;  %v10847_v8 = vld [vmem:[%s19795_s13 + $0x8f8] sm:$0xff] }
 0x61d   :  { %6887 = vmatpush1.msra.mxu0 %v10782_v2  ;;  %6950 = vmatprep.mubr.f32.mxu0 %v12981_v63  ;;  %v10787_v2 = vld [vmem:[%s19795_s13 + $0x718] sm:$0xff] }
 0x61e   :  { %6888 = vmatprep.subr.mxu0 %v10781_v1  ;;  %v10786_v1 = vld [vmem:[%s19795_s13 + $0x710] sm:$0xff] }
 0x61f   :  { %6889 = vmatpush1.msra.mxu0 %v10780_v33  ;;  %v6744_v35 = vld [vmem:[#allocation6 + $0xc] sm:$0x3]  ;;  %v10846_v33 = vld [vmem:[%s19795_s13 + $0x8f0] sm:$0xff] }
 0x620   :  { %6890 = vmatprep.subr.mxu0 %v10779_v39  ;;  %6843 = vmatmul.mubr.f32.vlgmr.msra.gmra.mxu1 %v6744_v35  ;;  %v10785_v39 = vld [vmem:[%s19795_s13 + $0x708] sm:$0xff]  ;;  %v10844_v35 = vld [vmem:[%s19795_s13 + $0x8e0] sm:$0xff] }
 0x621   :  { %6891 = vmatpush1.msra.mxu0 %v10778_v37  ;;  %6995 = vmatpush1.msra.mxu1 %v10814_v4  ;;  %v10845_v37 = vld [vmem:[%s19795_s13 + $0x8e8] sm:$0xff]  ;;  %v10784_v4 = vld [vmem:[%s19795_s13 + $0x700] sm:$0xff] }
 0x622   :  { %6892 = vmatprep.subr.mxu0 %v10777_v52  ;;  %6996 = vmatprep.subr.mxu1 %v10813_v18  ;;  %v10843_v52 = vld [vmem:[%s19795_s13 + $0x8d8] sm:$0xff]  ;;  %v10910_v18 = vld [vmem:[%s19798_s16 + $0x5e8] sm:$0xff] }
 0x623   :  { %6893 = vmatpush1.msra.mxu0 %v10776_v16  ;;  %6997 = vmatpush1.msra.mxu1 %v10812_v19  ;;  %v10842_v16 = vld [vmem:[%s19795_s13 + $0x8d0] sm:$0xff]  ;;  %v6960_v19 = vld [vmem:[#allocation6 + $0x12] sm:$0x3] }
 0x624   :  { %6894 = vmatprep.subr.mxu0 %v10775_v57  ;;  %6998 = vmatprep.subr.mxu1 %v10811_v46  ;;  %v10909_v57 = vld [vmem:[%s19798_s16 + $0x5e0] sm:$0xff]  ;;  %v10841_v46 = vld [vmem:[%s19795_s13 + $0x8c8] sm:$0xff] }
 0x625   :  { %6895 = vmatpush1.msra.mxu0 %v10774_v22  ;;  %6999 = vmatpush1.msra.mxu1 %v10810_v26  ;;  %v10906_v22 = vld [vmem:[%s19798_s16 + $0x5c8] sm:$0xff]  ;;  %v10840_v26 = vld [vmem:[%s19795_s13 + $0x8c0] sm:$0xff] }
 0x626   :  { %6896 = vmatprep.subr.mxu0 %v10773_v30  ;;  %7000 = vmatprep.subr.mxu1 %v10809_v50  ;;  %v10905_v30 = vld [vmem:[%s19798_s16 + $0x5c0] sm:$0xff]  ;;  %v10839_v50 = vld [vmem:[%s19795_s13 + $0x8b8] sm:$0xff] }
 0x627   :  { %6897 = vmatpush1.msra.mxu0 %v10772_v6  ;;  %7001 = vmatpush1.msra.mxu1 %v10808_v34  ;;  %v10902_v6 = vld [vmem:[%s19798_s16 + $0x5a8] sm:$0xff]  ;;  %v10838_v34 = vld [vmem:[%s19795_s13 + $0x8b0] sm:$0xff] }
 0x628   :  { %6898 = vmatprep.subr.mxu0 %v10771_v0  ;;  %7002 = vmatprep.subr.mxu1 %v10807_v36  ;;  %v10901_v0 = vld [vmem:[%s19798_s16 + $0x5a0] sm:$0xff]  ;;  %v10837_v36 = vld [vmem:[%s19795_s13 + $0x8a8] sm:$0xff] }
 0x629   :  { %6899 = vmatpush1.msra.mxu0 %v10770_v60  ;;  %7003 = vmatpush1.msra.mxu1 %v10806_v5  ;;  %v10898_v60 = vld [vmem:[%s19798_s16 + $0x588] sm:$0xff]  ;;  %v10836_v5 = vld [vmem:[%s19795_s13 + $0x8a0] sm:$0xff] }
 0x62a   :  { %6900 = vmatprep.subr.mxu0 %v10769_v7  ;;  %7004 = vmatprep.subr.mxu1 %v10805_v42  ;;  %v10897_v7 = vld [vmem:[%s19798_s16 + $0x580] sm:$0xff]  ;;  %v10835_v42 = vld [vmem:[%s19795_s13 + $0x898] sm:$0xff] }
 0x62b   :  { %6901 = vmatpush1.msra.mxu0 %v10768_v10  ;;  %7005 = vmatpush1.msra.mxu1 %v10804_v11  ;;  %v10894_v10 = vld [vmem:[%s19798_s16 + $0x568] sm:$0xff]  ;;  %v10834_v11 = vld [vmem:[%s19795_s13 + $0x890] sm:$0xff] }
 0x62c   :  { %6902 = vmatprep.subr.mxu0 %v10767_v12  ;;  %7006 = vmatprep.subr.mxu1 %v10803_v40  ;;  %v10893_v12 = vld [vmem:[%s19798_s16 + $0x560] sm:$0xff]  ;;  %v10833_v40 = vld [vmem:[%s19795_s13 + $0x888] sm:$0xff] }
 0x62d   :  { %6903 = vmatpush1.msra.mxu0 %v10766_v41  ;;  %7007 = vmatpush1.msra.mxu1 %v10802_v43  ;;  %v10890_v41 = vld [vmem:[%s19798_s16 + $0x548] sm:$0xff]  ;;  %v10832_v43 = vld [vmem:[%s19795_s13 + $0x880] sm:$0xff] }
 0x62e   :  { %6904 = vmatprep.subr.mxu0 %v10765_v59  ;;  %7008 = vmatprep.subr.mxu1 %v10801_v3  ;;  %v10889_v59 = vld [vmem:[%s19798_s16 + $0x540] sm:$0xff]  ;;  %v10831_v3 = vld [vmem:[%s19795_s13 + $0x878] sm:$0xff] }
 0x62f   :  { %6905 = vmatpush1.msra.mxu0 %v10764_v58  ;;  %7009 = vmatpush1.msra.mxu1 %v10800_v44  ;;  %v10886_v58 = vld [vmem:[%s19798_s16 + $0x528] sm:$0xff]  ;;  %v10830_v44 = vld [vmem:[%s19795_s13 + $0x870] sm:$0xff] }
 0x630   :  { %6906 = vmatprep.subr.mxu0 %v10763_v47  ;;  %7010 = vmatprep.subr.mxu1 %v10799_v28  ;;  %v10885_v47 = vld [vmem:[%s19798_s16 + $0x520] sm:$0xff]  ;;  %v10829_v28 = vld [vmem:[%s19795_s13 + $0x868] sm:$0xff] }
 0x631   :  { %6907 = vmatpush1.msra.mxu0 %v10762_v56  ;;  %7011 = vmatpush1.msra.mxu1 %v10798_v38  ;;  %v10882_v56 = vld [vmem:[%s19798_s16 + $0x508] sm:$0xff]  ;;  %v10828_v38 = vld [vmem:[%s19795_s13 + $0x860] sm:$0xff] }
 0x632   :  { %6908 = vmatprep.subr.mxu0 %v10761_v54  ;;  %7012 = vmatprep.subr.mxu1 %v10797_v49  ;;  %v10881_v54 = vld [vmem:[%s19798_s16 + $0x500] sm:$0xff]  ;;  %v10827_v49 = vld [vmem:[%s19795_s13 + $0x858] sm:$0xff] }
 0x633   :  { %6909 = vmatpush1.msra.mxu0 %v10760_v51  ;;  %7013 = vmatpush1.msra.mxu1 %v10796_v53  ;;  %v10878_v51 = vld [vmem:[%s19798_s16 + $0x4e8] sm:$0xff]  ;;  %v10826_v53 = vld [vmem:[%s19795_s13 + $0x850] sm:$0xff] }
 0x634   :  { %6910 = vmatprep.subr.mxu0 %v10759_v55  ;;  %7014 = vmatprep.subr.mxu1 %v10795_v13  ;;  %v10877_v55 = vld [vmem:[%s19798_s16 + $0x4e0] sm:$0xff]  ;;  %v10825_v13 = vld [vmem:[%s19795_s13 + $0x848] sm:$0xff] }
 0x635   :  { %6911 = vmatpush1.msra.mxu0 %v10758_v14  ;;  %7015 = vmatpush1.msra.mxu1 %v10794_v20  ;;  %v10874_v14 = vld [vmem:[%s19798_s16 + $0x4c8] sm:$0xff]  ;;  %v10824_v20 = vld [vmem:[%s19795_s13 + $0x840] sm:$0xff] }
 0x636   :  { %6912 = vmatprep.subr.mxu0 %v10757_v21  ;;  %7016 = vmatprep.subr.mxu1 %v10793_v27  ;;  %v10873_v21 = vld [vmem:[%s19798_s16 + $0x4c0] sm:$0xff]  ;;  %v10823_v27 = vld [vmem:[%s19795_s13 + $0x838] sm:$0xff] }
 0x637   :  { %6913 = vmatpush1.msra.mxu0 %v10756_v9  ;;  %7017 = vmatpush1.msra.mxu1 %v10792_v29  ;;  %v10870_v9 = vld [vmem:[%s19798_s16 + $0x4a8] sm:$0xff]  ;;  %v10822_v29 = vld [vmem:[%s19795_s13 + $0x830] sm:$0xff] }
 0x638   :  { %6914 = vmatprep.subr.mxu0 %v10755_v15  ;;  %7018 = vmatprep.subr.mxu1 %v10791_v23  ;;  %v10869_v15 = vld [vmem:[%s19798_s16 + $0x4a0] sm:$0xff]  ;;  %v10821_v23 = vld [vmem:[%s19795_s13 + $0x828] sm:$0xff] }
 0x639   :  { %6915 = vmatpush1.msra.mxu0 %v10754_v17  ;;  %7019 = vmatpush1.msra.mxu1 %v10790_v25  ;;  %v10866_v17 = vld [vmem:[%s19798_s16 + $0x488] sm:$0xff]  ;;  %v10820_v25 = vld [vmem:[%s19795_s13 + $0x820] sm:$0xff] }
 0x63a   :  { %6916 = vmatprep.subr.mxu0 %v10753_v31  ;;  %7020 = vmatprep.subr.mxu1 %v10789_v61  ;;  %v10865_v31 = vld [vmem:[%s19798_s16 + $0x480] sm:$0xff]  ;;  %v10819_v61 = vld [vmem:[%s19795_s13 + $0x818] sm:$0xff] }
 0x63b   :  { %6917 = vmatpush1.msra.mxu0 %v10752_v32  ;;  %7021 = vmatpush1.msra.mxu1 %v10788_v62  ;;  %v10862_v32 = vld [vmem:[%s19798_s16 + $0x468] sm:$0xff]  ;;  %v10818_v62 = vld [vmem:[%s19795_s13 + $0x810] sm:$0xff] }
 0x63c   :  { %6951 = vmatmul.mubr.f32.vlgmr.msra.gmra.mxu0 %v6852_v45  ;;  %7022 = vmatprep.subr.mxu1 %v10787_v2  ;;  %v10861_v45 = vld [vmem:[%s19798_s16 + $0x460] sm:$0xff]  ;;  %v10817_v2 = vld [vmem:[%s19795_s13 + $0x808] sm:$0xff] }
 0x63d   :  { %7102 = vmatprep.subr.mxu0 %v10847_v8  ;;  %7023 = vmatpush1.msra.mxu1 %v10786_v1  ;;  %v10858_v8 = vld [vmem:[%s19798_s16 + $0x448] sm:$0xff]  ;;  %v10816_v1 = vld [vmem:[%s19795_s13 + $0x800] sm:$0xff] }
 0x63e   :  { %7103 = vmatpush1.msra.mxu0 %v10846_v33  ;;  %7024 = vmatprep.subr.mxu1 %v10785_v39  ;;  %v10857_v33 = vld [vmem:[%s19798_s16 + $0x440] sm:$0xff]  ;;  %v10854_v39 = vld [vmem:[%s19798_s16 + $0x428] sm:$0xff] }
 0x63f   :  { %7104 = vmatprep.subr.mxu0 %v10845_v37  ;;  %7025 = vmatpush1.msra.mxu1 %v10784_v4  ;;  %v10912_v37 = vld [vmem:[%s19798_s16 + $0x5f8] sm:$0xff]  ;;  %v10853_v4 = vld [vmem:[%s19798_s16 + $0x420] sm:$0xff] }
 0x640   :  { %7058 = vmatprep.mubr.f32.mxu1 %v12981_v63  ;;  %7105 = vmatpush1.msra.mxu0 %v10844_v35  ;;  %v7068_v35 = vld [vmem:[#allocation6 + $0x14] sm:$0x3] }
 0x641   :  { %7059 = vmatmul.mubr.f32.vlgmr.msra.gmra.mxu1 %v6960_v19  ;;  %7106 = vmatprep.subr.mxu0 %v10843_v52  ;;  %v10911_v52 = vld [vmem:[%s19798_s16 + $0x5f0] sm:$0xff] }
 0x642   :  { %7580 = vmatprep.subr.mxu1 %v10910_v18  ;;  %7107 = vmatpush1.msra.mxu0 %v10842_v16  ;;  %v10850_v18 = vld [vmem:[%s19798_s16 + $0x408] sm:$0xff]  ;;  %v10908_v16 = vld [vmem:[%s19798_s16 + $0x5d8] sm:$0xff]  ;;  %v10907_v19 = vld [vmem:[%s19798_s16 + $0x5d0] sm:$0xff] }
 0x643   :  { %7581 = vmatpush1.msra.mxu1 %v10909_v57  ;;  %7108 = vmatprep.subr.mxu0 %v10841_v46  ;;  %v10974_v57 = vld [vmem:[%s19798_s16 + $0x7e8] sm:$0xff]  ;;  %v10904_v46 = vld [vmem:[%s19798_s16 + $0x5b8] sm:$0xff] }
 0x644   :  { %7582 = vmatprep.subr.mxu1 %v10906_v22  ;;  %7109 = vmatpush1.msra.mxu0 %v10840_v26  ;;  %v10973_v22 = vld [vmem:[%s19798_s16 + $0x7e0] sm:$0xff]  ;;  %v10903_v26 = vld [vmem:[%s19798_s16 + $0x5b0] sm:$0xff] }
 0x645   :  { %7583 = vmatpush1.msra.mxu1 %v10905_v30  ;;  %7110 = vmatprep.subr.mxu0 %v10839_v50  ;;  %v10970_v30 = vld [vmem:[%s19798_s16 + $0x7c8] sm:$0xff]  ;;  %v10900_v50 = vld [vmem:[%s19798_s16 + $0x598] sm:$0xff] }
 0x646   :  { %7584 = vmatprep.subr.mxu1 %v10902_v6  ;;  %7111 = vmatpush1.msra.mxu0 %v10838_v34  ;;  %v10969_v6 = vld [vmem:[%s19798_s16 + $0x7c0] sm:$0xff]  ;;  %v10899_v34 = vld [vmem:[%s19798_s16 + $0x590] sm:$0xff] }
 0x647   :  { %7585 = vmatpush1.msra.mxu1 %v10901_v0  ;;  %7112 = vmatprep.subr.mxu0 %v10837_v36  ;;  %v10966_v0 = vld [vmem:[%s19798_s16 + $0x7a8] sm:$0xff]  ;;  %v10896_v36 = vld [vmem:[%s19798_s16 + $0x578] sm:$0xff] }
 0x648   :  { %7586 = vmatprep.subr.mxu1 %v10898_v60  ;;  %7113 = vmatpush1.msra.mxu0 %v10836_v5  ;;  %v10965_v60 = vld [vmem:[%s19798_s16 + $0x7a0] sm:$0xff]  ;;  %v10895_v5 = vld [vmem:[%s19798_s16 + $0x570] sm:$0xff] }
 0x649   :  { %7587 = vmatpush1.msra.mxu1 %v10897_v7  ;;  %7114 = vmatprep.subr.mxu0 %v10835_v42  ;;  %v10962_v7 = vld [vmem:[%s19798_s16 + $0x788] sm:$0xff]  ;;  %v10892_v42 = vld [vmem:[%s19798_s16 + $0x558] sm:$0xff] }
 0x64a   :  { %7588 = vmatprep.subr.mxu1 %v10894_v10  ;;  %7115 = vmatpush1.msra.mxu0 %v10834_v11  ;;  %v10961_v10 = vld [vmem:[%s19798_s16 + $0x780] sm:$0xff]  ;;  %v10891_v11 = vld [vmem:[%s19798_s16 + $0x550] sm:$0xff] }
 0x64b   :  { %7589 = vmatpush1.msra.mxu1 %v10893_v12  ;;  %7116 = vmatprep.subr.mxu0 %v10833_v40  ;;  %v10958_v12 = vld [vmem:[%s19798_s16 + $0x768] sm:$0xff]  ;;  %v10888_v40 = vld [vmem:[%s19798_s16 + $0x538] sm:$0xff] }
 0x64c   :  { %7590 = vmatprep.subr.mxu1 %v10890_v41  ;;  %7117 = vmatpush1.msra.mxu0 %v10832_v43  ;;  %v10957_v41 = vld [vmem:[%s19798_s16 + $0x760] sm:$0xff]  ;;  %v10887_v43 = vld [vmem:[%s19798_s16 + $0x530] sm:$0xff] }
 0x64d   :  { %7591 = vmatpush1.msra.mxu1 %v10889_v59  ;;  %7118 = vmatprep.subr.mxu0 %v10831_v3  ;;  %v10954_v59 = vld [vmem:[%s19798_s16 + $0x748] sm:$0xff]  ;;  %v10884_v3 = vld [vmem:[%s19798_s16 + $0x518] sm:$0xff] }
 0x64e   :  { %7592 = vmatprep.subr.mxu1 %v10886_v58  ;;  %7119 = vmatpush1.msra.mxu0 %v10830_v44  ;;  %v10953_v58 = vld [vmem:[%s19798_s16 + $0x740] sm:$0xff]  ;;  %v10883_v44 = vld [vmem:[%s19798_s16 + $0x510] sm:$0xff] }
 0x64f   :  { %7593 = vmatpush1.msra.mxu1 %v10885_v47  ;;  %7120 = vmatprep.subr.mxu0 %v10829_v28  ;;  %v10950_v47 = vld [vmem:[%s19798_s16 + $0x728] sm:$0xff]  ;;  %v10880_v28 = vld [vmem:[%s19798_s16 + $0x4f8] sm:$0xff] }
 0x650   :  { %7594 = vmatprep.subr.mxu1 %v10882_v56  ;;  %7121 = vmatpush1.msra.mxu0 %v10828_v38  ;;  %v10949_v56 = vld [vmem:[%s19798_s16 + $0x720] sm:$0xff]  ;;  %v10879_v38 = vld [vmem:[%s19798_s16 + $0x4f0] sm:$0xff] }
 0x651   :  { %7595 = vmatpush1.msra.mxu1 %v10881_v54  ;;  %7122 = vmatprep.subr.mxu0 %v10827_v49  ;;  %v10946_v54 = vld [vmem:[%s19798_s16 + $0x708] sm:$0xff]  ;;  %v10876_v49 = vld [vmem:[%s19798_s16 + $0x4d8] sm:$0xff] }
 0x652   :  { %7596 = vmatprep.subr.mxu1 %v10878_v51  ;;  %7123 = vmatpush1.msra.mxu0 %v10826_v53  ;;  %v10945_v51 = vld [vmem:[%s19798_s16 + $0x700] sm:$0xff]  ;;  %v10875_v53 = vld [vmem:[%s19798_s16 + $0x4d0] sm:$0xff] }
 0x653   :  { %7597 = vmatpush1.msra.mxu1 %v10877_v55  ;;  %7124 = vmatprep.subr.mxu0 %v10825_v13  ;;  %v10942_v55 = vld [vmem:[%s19798_s16 + $0x6e8] sm:$0xff]  ;;  %v10872_v13 = vld [vmem:[%s19798_s16 + $0x4b8] sm:$0xff] }
 0x654   :  { %7598 = vmatprep.subr.mxu1 %v10874_v14  ;;  %7125 = vmatpush1.msra.mxu0 %v10824_v20  ;;  %v10941_v14 = vld [vmem:[%s19798_s16 + $0x6e0] sm:$0xff]  ;;  %v10871_v20 = vld [vmem:[%s19798_s16 + $0x4b0] sm:$0xff] }
 0x655   :  { %7599 = vmatpush1.msra.mxu1 %v10873_v21  ;;  %7126 = vmatprep.subr.mxu0 %v10823_v27  ;;  %v10938_v21 = vld [vmem:[%s19798_s16 + $0x6c8] sm:$0xff]  ;;  %v10868_v27 = vld [vmem:[%s19798_s16 + $0x498] sm:$0xff] }
 0x656   :  { %7600 = vmatprep.subr.mxu1 %v10870_v9  ;;  %7127 = vmatpush1.msra.mxu0 %v10822_v29  ;;  %v10937_v9 = vld [vmem:[%s19798_s16 + $0x6c0] sm:$0xff]  ;;  %v10867_v29 = vld [vmem:[%s19798_s16 + $0x490] sm:$0xff] }
 0x657   :  { %7601 = vmatpush1.msra.mxu1 %v10869_v15  ;;  %7128 = vmatprep.subr.mxu0 %v10821_v23  ;;  %v10934_v15 = vld [vmem:[%s19798_s16 + $0x6a8] sm:$0xff]  ;;  %v10864_v23 = vld [vmem:[%s19798_s16 + $0x478] sm:$0xff] }
 0x658   :  { %7602 = vmatprep.subr.mxu1 %v10866_v17  ;;  %7129 = vmatpush1.msra.mxu0 %v10820_v25  ;;  %v10933_v17 = vld [vmem:[%s19798_s16 + $0x6a0] sm:$0xff]  ;;  %v10863_v25 = vld [vmem:[%s19798_s16 + $0x470] sm:$0xff] }
 0x659   :  { %7603 = vmatpush1.msra.mxu1 %v10865_v31  ;;  %7130 = vmatprep.subr.mxu0 %v10819_v61  ;;  %v10930_v31 = vld [vmem:[%s19798_s16 + $0x688] sm:$0xff]  ;;  %v10860_v61 = vld [vmem:[%s19798_s16 + $0x458] sm:$0xff] }
 0x65a   :  { %7604 = vmatprep.subr.mxu1 %v10862_v32  ;;  %7131 = vmatpush1.msra.mxu0 %v10818_v62  ;;  %v10929_v32 = vld [vmem:[%s19798_s16 + $0x680] sm:$0xff]  ;;  %v10859_v62 = vld [vmem:[%s19798_s16 + $0x450] sm:$0xff] }
 0x65b   :  { %7605 = vmatpush1.msra.mxu1 %v10861_v45  ;;  %7132 = vmatprep.subr.mxu0 %v10817_v2  ;;  %v10926_v45 = vld [vmem:[%s19798_s16 + $0x668] sm:$0xff]  ;;  %v10856_v2 = vld [vmem:[%s19798_s16 + $0x438] sm:$0xff] }
 0x65c   :  { %7606 = vmatprep.subr.mxu1 %v10858_v8  ;;  %7133 = vmatpush1.msra.mxu0 %v10816_v1  ;;  %v10925_v8 = vld [vmem:[%s19798_s16 + $0x660] sm:$0xff]  ;;  %v10855_v1 = vld [vmem:[%s19798_s16 + $0x430] sm:$0xff] }
 0x65d   :  { %7166 = vmatprep.mubr.f32.mxu0 %v12981_v63  ;;  %7607 = vmatpush1.msra.mxu1 %v10857_v33  ;;  %v10849_v63 = vld [vmem:[%s19798_s16 + $0x400] sm:$0xff]  ;;  %v10922_v33 = vld [vmem:[%s19798_s16 + $0x648] sm:$0xff] }
 0x65e   :  { %7167 = vmatmul.mubr.f32.vlgmr.msra.gmra.mxu0 %v7068_v35  ;;  %7608 = vmatprep.subr.mxu1 %v10854_v39  ;;  %v10852_v39 = vld [vmem:[%s19798_s16 + $0x418] sm:$0xff]  ;;  %v10918_v35 = vld [vmem:[%s19798_s16 + $0x628] sm:$0xff] }
 0x65f   :  { %7651 = vmatprep.subr.mxu0 %v10912_v37  ;;  %7609 = vmatpush1.msra.mxu1 %v10853_v4  ;;  %v10921_v37 = vld [vmem:[%s19798_s16 + $0x640] sm:$0xff]  ;;  %v10851_v4 = vld [vmem:[%s19798_s16 + $0x410] sm:$0xff] }
 0x660   :  { %7652 = vmatpush1.msra.mxu0 %v10911_v52  ;;  %7610 = vmatprep.subr.mxu1 %v10850_v18  ;;  %v16196_v52 = vld.sshfl [vmem:[#allocation7 + $0x4] sm:$0x33 pattern:$0x76325410] }
 0x661   :  { %7653 = vmatprep.subr.mxu0 %v10908_v16  ;;  %7611 = vmatpush1.msra.mxu1 %v10849_v63  ;;  %v10976_v18 = vld [vmem:[%s19798_s16 + $0x7f8] sm:$0xff]  ;;  %v10917_v16 = vld [vmem:[%s19798_s16 + $0x620] sm:$0xff]  ;;  %v10975_v63 = vld [vmem:[%s19798_s16 + $0x7f0] sm:$0xff] }
 0x662   :  { %7654 = vmatpush1.msra.mxu0 %v10907_v19  ;;  %7612 = vmatprep.subr.mxu1 %v10974_v57  ;;  %v10914_v19 = vld [vmem:[%s19798_s16 + $0x608] sm:$0xff]  ;;  %v10972_v57 = vld [vmem:[%s19798_s16 + $0x7d8] sm:$0xff] }
 0x663   :  { %7655 = vmatprep.subr.mxu0 %v10904_v46  ;;  %7613 = vmatpush2.msra.mxu1 %v10973_v22  ;;  %v10913_v46 = vld [vmem:[%s19798_s16 + $0x600] sm:$0xff]  ;;  %v16218_v22 = vcombine.high %v16196_v52, %v16196_v52 }
 0x664   :  { %7656 = vmatpush1.msra.mxu0 %v10903_v26  ;;  %7614 = vmatprep.subr.mxu1 %v10970_v30  ;;  %v10971_v26 = vld [vmem:[%s19798_s16 + $0x7d0] sm:$0xff]  ;;  %v10968_v30 = vld [vmem:[%s19798_s16 + $0x7b8] sm:$0xff] }
 0x665   :  { %7657 = vmatprep.subr.mxu0 %v10900_v50  ;;  %7615 = vmatpush2.msra.mxu1 %v10969_v6  ;;  %v7371_v50 = vld [vmem:[%s19798_s16 + $0x1e8] sm:$0xff]  ;;  %v10967_v6 = vld [vmem:[%s19798_s16 + $0x7b0] sm:$0xff] }
 0x666   :  { %7658 = vmatpush1.msra.mxu0 %v10899_v34  ;;  %7616 = vmatprep.subr.mxu1 %v10966_v0  ;;  %v7370_v34 = vld [vmem:[%s19798_s16 + $0x1e0] sm:$0xff]  ;;  %v10964_v0 = vld [vmem:[%s19798_s16 + $0x798] sm:$0xff] }
 0x667   :  { %7659 = vmatprep.subr.mxu0 %v10896_v36  ;;  %7617 = vmatpush2.msra.mxu1 %v10965_v60  ;;  %v7367_v36 = vld [vmem:[%s19798_s16 + $0x1c8] sm:$0xff]  ;;  %v10963_v60 = vld [vmem:[%s19798_s16 + $0x790] sm:$0xff] }
 0x668   :  { %7660 = vmatpush1.msra.mxu0 %v10895_v5  ;;  %7618 = vmatprep.subr.mxu1 %v10962_v7  ;;  %v7366_v5 = vld [vmem:[%s19798_s16 + $0x1c0] sm:$0xff]  ;;  %v10960_v7 = vld [vmem:[%s19798_s16 + $0x778] sm:$0xff] }
 0x669   :  { %7661 = vmatprep.subr.mxu0 %v10892_v42  ;;  %7619 = vmatpush2.msra.mxu1 %v10961_v10  ;;  %v7363_v42 = vld [vmem:[%s19798_s16 + $0x1a8] sm:$0xff]  ;;  %v10959_v10 = vld [vmem:[%s19798_s16 + $0x770] sm:$0xff] }
 0x66a   :  { %7662 = vmatpush1.msra.mxu0 %v10891_v11  ;;  %7620 = vmatprep.subr.mxu1 %v10958_v12  ;;  %v7362_v11 = vld [vmem:[%s19798_s16 + $0x1a0] sm:$0xff]  ;;  %v10956_v12 = vld [vmem:[%s19798_s16 + $0x758] sm:$0xff] }
 0x66b   :  { %7663 = vmatprep.subr.mxu0 %v10888_v40  ;;  %7621 = vmatpush2.msra.mxu1 %v10957_v41  ;;  %v7359_v40 = vld [vmem:[%s19798_s16 + $0x188] sm:$0xff]  ;;  %v10955_v41 = vld [vmem:[%s19798_s16 + $0x750] sm:$0xff] }
 0x66c   :  { %7664 = vmatpush1.msra.mxu0 %v10887_v43  ;;  %7622 = vmatprep.subr.mxu1 %v10954_v59  ;;  %v7358_v43 = vld [vmem:[%s19798_s16 + $0x180] sm:$0xff]  ;;  %v10952_v59 = vld [vmem:[%s19798_s16 + $0x738] sm:$0xff] }
 0x66d   :  { %7665 = vmatprep.subr.mxu0 %v10884_v3  ;;  %7623 = vmatpush2.msra.mxu1 %v10953_v58  ;;  %v7355_v3 = vld [vmem:[%s19798_s16 + $0x168] sm:$0xff]  ;;  %v10951_v58 = vld [vmem:[%s19798_s16 + $0x730] sm:$0xff] }
 0x66e   :  { %7666 = vmatpush1.msra.mxu0 %v10883_v44  ;;  %7624 = vmatprep.subr.mxu1 %v10950_v47  ;;  %v7354_v44 = vld [vmem:[%s19798_s16 + $0x160] sm:$0xff]  ;;  %v10948_v47 = vld [vmem:[%s19798_s16 + $0x718] sm:$0xff] }
 0x66f   :  { %7667 = vmatprep.subr.mxu0 %v10880_v28  ;;  %7625 = vmatpush2.msra.mxu1 %v10949_v56  ;;  %v7351_v28 = vld [vmem:[%s19798_s16 + $0x148] sm:$0xff]  ;;  %v10947_v56 = vld [vmem:[%s19798_s16 + $0x710] sm:$0xff] }
 0x670   :  { %7668 = vmatpush1.msra.mxu0 %v10879_v38  ;;  %7626 = vmatprep.subr.mxu1 %v10946_v54  ;;  %v7350_v38 = vld [vmem:[%s19798_s16 + $0x140] sm:$0xff]  ;;  %v10944_v54 = vld [vmem:[%s19798_s16 + $0x6f8] sm:$0xff] }
 0x671   :  { %7669 = vmatprep.subr.mxu0 %v10876_v49  ;;  %7627 = vmatpush2.msra.mxu1 %v10945_v51  ;;  %v7347_v49 = vld [vmem:[%s19798_s16 + $0x128] sm:$0xff]  ;;  %v10943_v51 = vld [vmem:[%s19798_s16 + $0x6f0] sm:$0xff] }
 0x672   :  { %7670 = vmatpush1.msra.mxu0 %v10875_v53  ;;  %7628 = vmatprep.subr.mxu1 %v10942_v55  ;;  %v7346_v53 = vld [vmem:[%s19798_s16 + $0x120] sm:$0xff]  ;;  %v10940_v55 = vld [vmem:[%s19798_s16 + $0x6d8] sm:$0xff] }
 0x673   :  { %7671 = vmatprep.subr.mxu0 %v10872_v13  ;;  %7629 = vmatpush2.msra.mxu1 %v10941_v14  ;;  %v7343_v13 = vld [vmem:[%s19798_s16 + $0x108] sm:$0xff]  ;;  %v10939_v14 = vld [vmem:[%s19798_s16 + $0x6d0] sm:$0xff] }
 0x674   :  { %7672 = vmatpush1.msra.mxu0 %v10871_v20  ;;  %7630 = vmatprep.subr.mxu1 %v10938_v21  ;;  %v7342_v20 = vld [vmem:[%s19798_s16 + $0x100] sm:$0xff]  ;;  %v10936_v21 = vld [vmem:[%s19798_s16 + $0x6b8] sm:$0xff] }
 0x675   :  { %7673 = vmatprep.subr.mxu0 %v10868_v27  ;;  %7631 = vmatpush2.msra.mxu1 %v10937_v9  ;;  %v7339_v27 = vld [vmem:[%s19798_s16 + $0xe8] sm:$0xff]  ;;  %v10935_v9 = vld [vmem:[%s19798_s16 + $0x6b0] sm:$0xff] }
 0x676   :  { %7674 = vmatpush1.msra.mxu0 %v10867_v29  ;;  %7632 = vmatprep.subr.mxu1 %v10934_v15  ;;  %v7338_v29 = vld [vmem:[%s19798_s16 + $0xe0] sm:$0xff]  ;;  %v10932_v15 = vld [vmem:[%s19798_s16 + $0x698] sm:$0xff] }
 0x677   :  { %7675 = vmatprep.subr.mxu0 %v10864_v23  ;;  %7633 = vmatpush2.msra.mxu1 %v10933_v17  ;;  %v7335_v23 = vld [vmem:[%s19798_s16 + $0xc8] sm:$0xff]  ;;  %v10931_v17 = vld [vmem:[%s19798_s16 + $0x690] sm:$0xff] }
 0x678   :  { %7676 = vmatpush1.msra.mxu0 %v10863_v25  ;;  %7634 = vmatprep.subr.mxu1 %v10930_v31  ;;  %v7334_v25 = vld [vmem:[%s19798_s16 + $0xc0] sm:$0xff]  ;;  %v10928_v31 = vld [vmem:[%s19798_s16 + $0x678] sm:$0xff] }
 0x679   :  { %7677 = vmatprep.subr.mxu0 %v10860_v61  ;;  %7635 = vmatpush2.msra.mxu1 %v10929_v32  ;;  %v7331_v61 = vld [vmem:[%s19798_s16 + $0xa8] sm:$0xff]  ;;  %v10927_v32 = vld [vmem:[%s19798_s16 + $0x670] sm:$0xff] }
 0x67a   :  { %7678 = vmatpush1.msra.mxu0 %v10859_v62  ;;  %7636 = vmatprep.subr.mxu1 %v10926_v45  ;;  %v7330_v62 = vld [vmem:[%s19798_s16 + $0xa0] sm:$0xff]  ;;  %v10924_v45 = vld [vmem:[%s19798_s16 + $0x658] sm:$0xff] }
 0x67b   :  { %7679 = vmatprep.subr.mxu0 %v10856_v2  ;;  %7637 = vmatpush2.msra.mxu1 %v10925_v8  ;;  %v7327_v2 = vld [vmem:[%s19798_s16 + $0x88] sm:$0xff]  ;;  %v10923_v8 = vld [vmem:[%s19798_s16 + $0x650] sm:$0xff] }
 0x67c   :  { %7680 = vmatpush1.msra.mxu0 %v10855_v1  ;;  %7638 = vmatprep.subr.mxu1 %v10922_v33  ;;  %v7326_v1 = vld [vmem:[%s19798_s16 + $0x80] sm:$0xff]  ;;  %v10920_v33 = vld [vmem:[%s19798_s16 + $0x638] sm:$0xff] }
 0x67d   :  { %7681 = vmatprep.subr.mxu0 %v10852_v39  ;;  %7639 = vmatpush2.msra.mxu1 %v10921_v37  ;;  %v7323_v39 = vld [vmem:[%s19798_s16 + $0x68] sm:$0xff]  ;;  %v10919_v37 = vld [vmem:[%s19798_s16 + $0x630] sm:$0xff] }
 0x67e   :  { %7682 = vmatpush1.msra.mxu0 %v10851_v4  ;;  %7640 = vmatprep.subr.mxu1 %v10918_v35  ;;  %v7322_v4 = vld [vmem:[%s19798_s16 + $0x60] sm:$0xff]  ;;  %v10916_v35 = vld [vmem:[%s19798_s16 + $0x618] sm:$0xff] }
 0x67f   :  { %7683 = vmatprep.subr.mxu0 %v10976_v18  ;;  %7641 = vmatpush2.msra.mxu1 %v10917_v16  ;;  %v7319_v18 = vld [vmem:[%s19798_s16 + $0x48] sm:$0xff]  ;;  %v10915_v16 = vld [vmem:[%s19798_s16 + $0x610] sm:$0xff] }
 0x680   :  { %7684 = vmatpush2.msra.mxu0 %v10975_v63  ;;  %7642 = vmatprep.subr.mxu1 %v10914_v19  ;;  %v7318_v63 = vld [vmem:[%s19798_s16 + $0x40] sm:$0xff]  ;;  %v7315_v19 = vld [vmem:[%s19798_s16 + $0x28] sm:$0xff] }
 0x681   :  { %7685 = vmatprep.subr.mxu0 %v10972_v57  ;;  %7643 = vmatpush2.msra.mxu1 %v10913_v46  ;;  %v7373_v57 = vld [vmem:[%s19798_s16 + $0x1f8] sm:$0xff]  ;;  %v7314_v46 = vld [vmem:[%s19798_s16 + $0x20] sm:$0xff] }
 0x682   :  { %7686 = vmatpush2.msra.mxu0 %v10971_v26  ;;  %7644 = vmatprep.mubr.f32.mxu1 %v16218_v22  ;;  %v7372_v26 = vld [vmem:[%s19798_s16 + $0x1f0] sm:$0xff] }
 0x683   :  { %7687 = vmatprep.subr.mxu0 %v10968_v30  ;;  %7733 = vmatprep.subr.mxu1 %v7371_v50  ;;  %v7311_v30 = vld [vmem:[%s19798_s16 + $0x8] sm:$0xff]  ;;  %v7369_v50 = vld [vmem:[%s19798_s16 + $0x1d8] sm:$0xff] }
 0x684   :  { %7645 = vmatmul.mubr.f32.vlgmr.msra.gmra.mxu1 %v16196_v52  ;;  %7688 = vmatpush2.msra.mxu0 %v10967_v6  ;;  %v7368_v6 = vld [vmem:[%s19798_s16 + $0x1d0] sm:$0xff] }
 0x685   :  { %7734 = vmatpush1.msra.mxu1 %v7370_v34  ;;  %7689 = vmatprep.subr.mxu0 %v10964_v0  ;;  %v7435_v34 = vld [vmem:[%s19798_s16 + $0x3e8] sm:$0xff]  ;;  %v7434_v0 = vld [vmem:[%s19798_s16 + $0x3e0] sm:$0xff] }
 0x686   :  { %7735 = vmatprep.subr.mxu1 %v7367_v36  ;;  %7690 = vmatpush2.msra.mxu0 %v10963_v60  ;;  %v7364_v36 = vld [vmem:[%s19798_s16 + $0x1b0] sm:$0xff]  ;;  %v7431_v60 = vld [vmem:[%s19798_s16 + $0x3c8] sm:$0xff] }
 0x687   :  { %7736 = vmatpush1.msra.mxu1 %v7366_v5  ;;  %7691 = vmatprep.subr.mxu0 %v10960_v7  ;;  %v7361_v5 = vld [vmem:[%s19798_s16 + $0x198] sm:$0xff]  ;;  %v7430_v7 = vld [vmem:[%s19798_s16 + $0x3c0] sm:$0xff] }
 0x688   :  { %7737 = vmatprep.subr.mxu1 %v7363_v42  ;;  %7692 = vmatpush2.msra.mxu0 %v10959_v10  ;;  %v7360_v42 = vld [vmem:[%s19798_s16 + $0x190] sm:$0xff]  ;;  %v7427_v10 = vld [vmem:[%s19798_s16 + $0x3a8] sm:$0xff] }
 0x689   :  { %7738 = vmatpush1.msra.mxu1 %v7362_v11  ;;  %7693 = vmatprep.subr.mxu0 %v10956_v12  ;;  %v7357_v11 = vld [vmem:[%s19798_s16 + $0x178] sm:$0xff]  ;;  %v7426_v12 = vld [vmem:[%s19798_s16 + $0x3a0] sm:$0xff] }
 0x68a   :  { %7739 = vmatprep.subr.mxu1 %v7359_v40  ;;  %7694 = vmatpush2.msra.mxu0 %v10955_v41  ;;  %v7356_v40 = vld [vmem:[%s19798_s16 + $0x170] sm:$0xff]  ;;  %v7423_v41 = vld [vmem:[%s19798_s16 + $0x388] sm:$0xff] }
 0x68b   :  { %7740 = vmatpush1.msra.mxu1 %v7358_v43  ;;  %7695 = vmatprep.subr.mxu0 %v10952_v59  ;;  %v7353_v43 = vld [vmem:[%s19798_s16 + $0x158] sm:$0xff]  ;;  %v7422_v59 = vld [vmem:[%s19798_s16 + $0x380] sm:$0xff] }
 0x68c   :  { %7741 = vmatprep.subr.mxu1 %v7355_v3  ;;  %7696 = vmatpush2.msra.mxu0 %v10951_v58  ;;  %v7352_v3 = vld [vmem:[%s19798_s16 + $0x150] sm:$0xff]  ;;  %v7419_v58 = vld [vmem:[%s19798_s16 + $0x368] sm:$0xff] }
 0x68d   :  { %7742 = vmatpush1.msra.mxu1 %v7354_v44  ;;  %7697 = vmatprep.subr.mxu0 %v10948_v47  ;;  %v7349_v44 = vld [vmem:[%s19798_s16 + $0x138] sm:$0xff]  ;;  %v7418_v47 = vld [vmem:[%s19798_s16 + $0x360] sm:$0xff] }
 0x68e   :  { %7743 = vmatprep.subr.mxu1 %v7351_v28  ;;  %7698 = vmatpush2.msra.mxu0 %v10947_v56  ;;  %v7348_v28 = vld [vmem:[%s19798_s16 + $0x130] sm:$0xff]  ;;  %v7415_v56 = vld [vmem:[%s19798_s16 + $0x348] sm:$0xff] }
 0x68f   :  { %7744 = vmatpush1.msra.mxu1 %v7350_v38  ;;  %7699 = vmatprep.subr.mxu0 %v10944_v54  ;;  %v7345_v38 = vld [vmem:[%s19798_s16 + $0x118] sm:$0xff]  ;;  %v7414_v54 = vld [vmem:[%s19798_s16 + $0x340] sm:$0xff] }
 0x690   :  { %7745 = vmatprep.subr.mxu1 %v7347_v49  ;;  %7700 = vmatpush2.msra.mxu0 %v10943_v51  ;;  %v7344_v49 = vld [vmem:[%s19798_s16 + $0x110] sm:$0xff]  ;;  %v7411_v51 = vld [vmem:[%s19798_s16 + $0x328] sm:$0xff] }
 0x691   :  { %7746 = vmatpush1.msra.mxu1 %v7346_v53  ;;  %7701 = vmatprep.subr.mxu0 %v10940_v55  ;;  %v7341_v53 = vld [vmem:[%s19798_s16 + $0xf8] sm:$0xff]  ;;  %v7410_v55 = vld [vmem:[%s19798_s16 + $0x320] sm:$0xff] }
 0x692   :  { %7747 = vmatprep.subr.mxu1 %v7343_v13  ;;  %7702 = vmatpush2.msra.mxu0 %v10939_v14  ;;  %v7340_v13 = vld [vmem:[%s19798_s16 + $0xf0] sm:$0xff]  ;;  %v7407_v14 = vld [vmem:[%s19798_s16 + $0x308] sm:$0xff] }
 0x693   :  { %7748 = vmatpush1.msra.mxu1 %v7342_v20  ;;  %7703 = vmatprep.subr.mxu0 %v10936_v21  ;;  %v7337_v20 = vld [vmem:[%s19798_s16 + $0xd8] sm:$0xff]  ;;  %v7406_v21 = vld [vmem:[%s19798_s16 + $0x300] sm:$0xff] }
 0x694   :  { %7749 = vmatprep.subr.mxu1 %v7339_v27  ;;  %7704 = vmatpush2.msra.mxu0 %v10935_v9  ;;  %v7336_v27 = vld [vmem:[%s19798_s16 + $0xd0] sm:$0xff]  ;;  %v7403_v9 = vld [vmem:[%s19798_s16 + $0x2e8] sm:$0xff] }
 0x695   :  { %7750 = vmatpush1.msra.mxu1 %v7338_v29  ;;  %7705 = vmatprep.subr.mxu0 %v10932_v15  ;;  %v7333_v29 = vld [vmem:[%s19798_s16 + $0xb8] sm:$0xff]  ;;  %v7402_v15 = vld [vmem:[%s19798_s16 + $0x2e0] sm:$0xff] }
 0x696   :  { %7751 = vmatprep.subr.mxu1 %v7335_v23  ;;  %7706 = vmatpush2.msra.mxu0 %v10931_v17  ;;  %v7332_v23 = vld [vmem:[%s19798_s16 + $0xb0] sm:$0xff]  ;;  %v7399_v17 = vld [vmem:[%s19798_s16 + $0x2c8] sm:$0xff] }
 0x697   :  { %7752 = vmatpush1.msra.mxu1 %v7334_v25  ;;  %7707 = vmatprep.subr.mxu0 %v10928_v31  ;;  %v7329_v25 = vld [vmem:[%s19798_s16 + $0x98] sm:$0xff]  ;;  %v7398_v31 = vld [vmem:[%s19798_s16 + $0x2c0] sm:$0xff] }
 0x698   :  { %7753 = vmatprep.subr.mxu1 %v7331_v61  ;;  %7708 = vmatpush2.msra.mxu0 %v10927_v32  ;;  %v7328_v61 = vld [vmem:[%s19798_s16 + $0x90] sm:$0xff]  ;;  %v7395_v32 = vld [vmem:[%s19798_s16 + $0x2a8] sm:$0xff] }
 0x699   :  { %7754 = vmatpush1.msra.mxu1 %v7330_v62  ;;  %7709 = vmatprep.subr.mxu0 %v10924_v45  ;;  %v7325_v62 = vld [vmem:[%s19798_s16 + $0x78] sm:$0xff]  ;;  %v7394_v45 = vld [vmem:[%s19798_s16 + $0x2a0] sm:$0xff] }
 0x69a   :  { %7755 = vmatprep.subr.mxu1 %v7327_v2  ;;  %7710 = vmatpush2.msra.mxu0 %v10923_v8  ;;  %v7324_v2 = vld [vmem:[%s19798_s16 + $0x70] sm:$0xff]  ;;  %v7391_v8 = vld [vmem:[%s19798_s16 + $0x288] sm:$0xff] }
 0x69b   :  { %7756 = vmatpush1.msra.mxu1 %v7326_v1  ;;  %7711 = vmatprep.subr.mxu0 %v10920_v33  ;;  %v7321_v1 = vld [vmem:[%s19798_s16 + $0x58] sm:$0xff]  ;;  %v7390_v33 = vld [vmem:[%s19798_s16 + $0x280] sm:$0xff] }
 0x69c   :  { %7757 = vmatprep.subr.mxu1 %v7323_v39  ;;  %7712 = vmatpush2.msra.mxu0 %v10919_v37  ;;  %v7320_v39 = vld [vmem:[%s19798_s16 + $0x50] sm:$0xff]  ;;  %v7387_v37 = vld [vmem:[%s19798_s16 + $0x268] sm:$0xff] }
 0x69d   :  { %7758 = vmatpush1.msra.mxu1 %v7322_v4  ;;  %7713 = vmatprep.subr.mxu0 %v10916_v35  ;;  %v7317_v4 = vld [vmem:[%s19798_s16 + $0x38] sm:$0xff]  ;;  %v7386_v35 = vld [vmem:[%s19798_s16 + $0x260] sm:$0xff] }
 0x69e   :  { %7759 = vmatprep.subr.mxu1 %v7319_v18  ;;  %7714 = vmatpush2.msra.mxu0 %v10915_v16  ;;  %v7316_v18 = vld [vmem:[%s19798_s16 + $0x30] sm:$0xff]  ;;  %v7383_v16 = vld [vmem:[%s19798_s16 + $0x248] sm:$0xff] }
 0x69f   :  { %7715 = vmatprep.mubr.f32.mxu0 %v16218_v22  ;;  %7760 = vmatpush1.msra.mxu1 %v7318_v63  ;;  %v7310_v22 = vld [vmem:[%s19798_s16] sm:$0xff]  ;;  %v7313_v63 = vld [vmem:[%s19798_s16 + $0x18] sm:$0xff] }
 0x6a0   :  { %7716 = vmatmul.mubr.f32.vlgmr.msra.gmra.mxu0 %v16196_v52  ;;  %7761 = vmatprep.subr.mxu1 %v7315_v19  ;;  %v7365_v52 = vld [vmem:[%s19798_s16 + $0x1b8] sm:$0xff]  ;;  %v7382_v19 = vld [vmem:[%s19798_s16 + $0x240] sm:$0xff] }
 0x6a1   :  { %7804 = vmatprep.subr.mxu0 %v7373_v57  ;;  %7762 = vmatpush1.msra.mxu1 %v7314_v46  ;;  %v7312_v57 = vld [vmem:[%s19798_s16 + $0x10] sm:$0xff]  ;;  %v7379_v46 = vld [vmem:[%s19798_s16 + $0x228] sm:$0xff] }
 0x6a2   :  { %7805 = vmatpush1.msra.mxu0 %v7372_v26  ;;  %7763 = vmatprep.subr.mxu1 %v7311_v30  ;;  %v16590_v26 = vld.sshfl [vmem:[#allocation7] sm:$0x33 pattern:$0x76325410] }
 0x6a3   :  { %7806 = vmatprep.subr.mxu0 %v7369_v50  ;;  %7764 = vmatpush1.msra.mxu1 %v7310_v22  ;;  %v7437_v30 = vld [vmem:[%s19798_s16 + $0x3f8] sm:$0xff]  ;;  %v7378_v50 = vld [vmem:[%s19798_s16 + $0x220] sm:$0xff]  ;;  %v7436_v22 = vld [vmem:[%s19798_s16 + $0x3f0] sm:$0xff] }
 0x6a4   :  { %7807 = vmatpush1.msra.mxu0 %v7368_v6  ;;  %7765 = vmatprep.subr.mxu1 %v7435_v34  ;;  %v7375_v6 = vld [vmem:[%s19798_s16 + $0x208] sm:$0xff]  ;;  %v7433_v34 = vld [vmem:[%s19798_s16 + $0x3d8] sm:$0xff] }
 0x6a5   :  { %7808 = vmatprep.subr.mxu0 %v7365_v52  ;;  %7766 = vmatpush2.msra.mxu1 %v7434_v0  ;;  %v7374_v52 = vld [vmem:[%s19798_s16 + $0x200] sm:$0xff]  ;;  %v16612_v0 = vcombine.high %v16590_v26, %v16590_v26 }
 0x6a6   :  { %7809 = vmatpush1.msra.mxu0 %v7364_v36  ;;  %7767 = vmatprep.subr.mxu1 %v7431_v60  ;;  %v7432_v36 = vld [vmem:[%s19798_s16 + $0x3d0] sm:$0xff]  ;;  %v7429_v60 = vld [vmem:[%s19798_s16 + $0x3b8] sm:$0xff] }
 0x6a7   :  { %7810 = vmatprep.subr.mxu0 %v7361_v5  ;;  %7768 = vmatpush2.msra.mxu1 %v7430_v7  ;;  %v11040_v5 = vld [vmem:[%s19798_s16 + $0x9e8] sm:$0xff]  ;;  %v7428_v7 = vld [vmem:[%s19798_s16 + $0x3b0] sm:$0xff] }
 0x6a8   :  { %7811 = vmatpush1.msra.mxu0 %v7360_v42  ;;  %7769 = vmatprep.subr.mxu1 %v7427_v10  ;;  %v11039_v42 = vld [vmem:[%s19798_s16 + $0x9e0] sm:$0xff]  ;;  %v7425_v10 = vld [vmem:[%s19798_s16 + $0x398] sm:$0xff] }
 0x6a9   :  { %7812 = vmatprep.subr.mxu0 %v7357_v11  ;;  %7770 = vmatpush2.msra.mxu1 %v7426_v12  ;;  %v11036_v11 = vld [vmem:[%s19798_s16 + $0x9c8] sm:$0xff]  ;;  %v7424_v12 = vld [vmem:[%s19798_s16 + $0x390] sm:$0xff] }
 0x6aa   :  { %7813 = vmatpush1.msra.mxu0 %v7356_v40  ;;  %7771 = vmatprep.subr.mxu1 %v7423_v41  ;;  %v11035_v40 = vld [vmem:[%s19798_s16 + $0x9c0] sm:$0xff]  ;;  %v7421_v41 = vld [vmem:[%s19798_s16 + $0x378] sm:$0xff] }
 0x6ab   :  { %7814 = vmatprep.subr.mxu0 %v7353_v43  ;;  %7772 = vmatpush2.msra.mxu1 %v7422_v59  ;;  %v11032_v43 = vld [vmem:[%s19798_s16 + $0x9a8] sm:$0xff]  ;;  %v7420_v59 = vld [vmem:[%s19798_s16 + $0x370] sm:$0xff] }
 0x6ac   :  { %7815 = vmatpush1.msra.mxu0 %v7352_v3  ;;  %7773 = vmatprep.subr.mxu1 %v7419_v58  ;;  %v11031_v3 = vld [vmem:[%s19798_s16 + $0x9a0] sm:$0xff]  ;;  %v7417_v58 = vld [vmem:[%s19798_s16 + $0x358] sm:$0xff] }
 0x6ad   :  { %7816 = vmatprep.subr.mxu0 %v7349_v44  ;;  %7774 = vmatpush2.msra.mxu1 %v7418_v47  ;;  %v11028_v44 = vld [vmem:[%s19798_s16 + $0x988] sm:$0xff]  ;;  %v7416_v47 = vld [vmem:[%s19798_s16 + $0x350] sm:$0xff] }
 0x6ae   :  { %7817 = vmatpush1.msra.mxu0 %v7348_v28  ;;  %7775 = vmatprep.subr.mxu1 %v7415_v56  ;;  %v11027_v28 = vld [vmem:[%s19798_s16 + $0x980] sm:$0xff]  ;;  %v7413_v56 = vld [vmem:[%s19798_s16 + $0x338] sm:$0xff] }
 0x6af   :  { %7818 = vmatprep.subr.mxu0 %v7345_v38  ;;  %7776 = vmatpush2.msra.mxu1 %v7414_v54  ;;  %v11024_v38 = vld [vmem:[%s19798_s16 + $0x968] sm:$0xff]  ;;  %v7412_v54 = vld [vmem:[%s19798_s16 + $0x330] sm:$0xff] }
 0x6b0   :  { %7819 = vmatpush1.msra.mxu0 %v7344_v49  ;;  %7777 = vmatprep.subr.mxu1 %v7411_v51  ;;  %v11023_v49 = vld [vmem:[%s19798_s16 + $0x960] sm:$0xff]  ;;  %v7409_v51 = vld [vmem:[%s19798_s16 + $0x318] sm:$0xff] }
 0x6b1   :  { %7820 = vmatprep.subr.mxu0 %v7341_v53  ;;  %7778 = vmatpush2.msra.mxu1 %v7410_v55  ;;  %v11020_v53 = vld [vmem:[%s19798_s16 + $0x948] sm:$0xff]  ;;  %v7408_v55 = vld [vmem:[%s19798_s16 + $0x310] sm:$0xff] }
 0x6b2   :  { %7821 = vmatpush1.msra.mxu0 %v7340_v13  ;;  %7779 = vmatprep.subr.mxu1 %v7407_v14  ;;  %v11019_v13 = vld [vmem:[%s19798_s16 + $0x940] sm:$0xff]  ;;  %v7405_v14 = vld [vmem:[%s19798_s16 + $0x2f8] sm:$0xff] }
 0x6b3   :  { %7822 = vmatprep.subr.mxu0 %v7337_v20  ;;  %7780 = vmatpush2.msra.mxu1 %v7406_v21  ;;  %v11016_v20 = vld [vmem:[%s19798_s16 + $0x928] sm:$0xff]  ;;  %v7404_v21 = vld [vmem:[%s19798_s16 + $0x2f0] sm:$0xff] }
 0x6b4   :  { %7823 = vmatpush1.msra.mxu0 %v7336_v27  ;;  %7781 = vmatprep.subr.mxu1 %v7403_v9  ;;  %v11015_v27 = vld [vmem:[%s19798_s16 + $0x920] sm:$0xff]  ;;  %v7401_v9 = vld [vmem:[%s19798_s16 + $0x2d8] sm:$0xff] }
 0x6b5   :  { %7824 = vmatprep.subr.mxu0 %v7333_v29  ;;  %7782 = vmatpush2.msra.mxu1 %v7402_v15  ;;  %v11012_v29 = vld [vmem:[%s19798_s16 + $0x908] sm:$0xff]  ;;  %v7400_v15 = vld [vmem:[%s19798_s16 + $0x2d0] sm:$0xff] }
 0x6b6   :  { %7825 = vmatpush1.msra.mxu0 %v7332_v23  ;;  %7783 = vmatprep.subr.mxu1 %v7399_v17  ;;  %v11011_v23 = vld [vmem:[%s19798_s16 + $0x900] sm:$0xff]  ;;  %v7397_v17 = vld [vmem:[%s19798_s16 + $0x2b8] sm:$0xff] }
 0x6b7   :  { %7826 = vmatprep.subr.mxu0 %v7329_v25  ;;  %7784 = vmatpush2.msra.mxu1 %v7398_v31  ;;  %v11008_v25 = vld [vmem:[%s19798_s16 + $0x8e8] sm:$0xff]  ;;  %v7396_v31 = vld [vmem:[%s19798_s16 + $0x2b0] sm:$0xff] }
 0x6b8   :  { %7827 = vmatpush1.msra.mxu0 %v7328_v61  ;;  %7785 = vmatprep.subr.mxu1 %v7395_v32  ;;  %v11007_v61 = vld [vmem:[%s19798_s16 + $0x8e0] sm:$0xff]  ;;  %v7393_v32 = vld [vmem:[%s19798_s16 + $0x298] sm:$0xff] }
 0x6b9   :  { %7828 = vmatprep.subr.mxu0 %v7325_v62  ;;  %7786 = vmatpush2.msra.mxu1 %v7394_v45  ;;  %v11004_v62 = vld [vmem:[%s19798_s16 + $0x8c8] sm:$0xff]  ;;  %v7392_v45 = vld [vmem:[%s19798_s16 + $0x290] sm:$0xff] }
 0x6ba   :  { %7829 = vmatpush1.msra.mxu0 %v7324_v2  ;;  %7787 = vmatprep.subr.mxu1 %v7391_v8  ;;  %v11003_v2 = vld [vmem:[%s19798_s16 + $0x8c0] sm:$0xff]  ;;  %v7389_v8 = vld [vmem:[%s19798_s16 + $0x278] sm:$0xff] }
 0x6bb   :  { %7830 = vmatprep.subr.mxu0 %v7321_v1  ;;  %7788 = vmatpush2.msra.mxu1 %v7390_v33  ;;  %v11000_v1 = vld [vmem:[%s19798_s16 + $0x8a8] sm:$0xff]  ;;  %v7388_v33 = vld [vmem:[%s19798_s16 + $0x270] sm:$0xff] }
 0x6bc   :  { %7831 = vmatpush1.msra.mxu0 %v7320_v39  ;;  %7789 = vmatprep.subr.mxu1 %v7387_v37  ;;  %v10999_v39 = vld [vmem:[%s19798_s16 + $0x8a0] sm:$0xff]  ;;  %v7385_v37 = vld [vmem:[%s19798_s16 + $0x258] sm:$0xff] }
 0x6bd   :  { %7832 = vmatprep.subr.mxu0 %v7317_v4  ;;  %7790 = vmatpush2.msra.mxu1 %v7386_v35  ;;  %v10996_v4 = vld [vmem:[%s19798_s16 + $0x888] sm:$0xff]  ;;  %v7384_v35 = vld [vmem:[%s19798_s16 + $0x250] sm:$0xff] }
 0x6be   :  { %7833 = vmatpush1.msra.mxu0 %v7316_v18  ;;  %7791 = vmatprep.subr.mxu1 %v7383_v16  ;;  %v10995_v18 = vld [vmem:[%s19798_s16 + $0x880] sm:$0xff]  ;;  %v7381_v16 = vld [vmem:[%s19798_s16 + $0x238] sm:$0xff] }
 0x6bf   :  { %7834 = vmatprep.subr.mxu0 %v7313_v63  ;;  %7792 = vmatpush2.msra.mxu1 %v7382_v19  ;;  %v10992_v63 = vld [vmem:[%s19798_s16 + $0x868] sm:$0xff]  ;;  %v7380_v19 = vld [vmem:[%s19798_s16 + $0x230] sm:$0xff] }
 0x6c0   :  { %7835 = vmatpush1.msra.mxu0 %v7312_v57  ;;  %7793 = vmatprep.subr.mxu1 %v7379_v46  ;;  %v10991_v57 = vld [vmem:[%s19798_s16 + $0x860] sm:$0xff]  ;;  %v7377_v46 = vld [vmem:[%s19798_s16 + $0x218] sm:$0xff] }
 0x6c1   :  { %7836 = vmatprep.subr.mxu0 %v7437_v30  ;;  %7794 = vmatpush2.msra.mxu1 %v7378_v50  ;;  %v10988_v30 = vld [vmem:[%s19798_s16 + $0x848] sm:$0xff]  ;;  %v7376_v50 = vld [vmem:[%s19798_s16 + $0x210] sm:$0xff] }
 0x6c2   :  { %7837 = vmatpush2.msra.mxu0 %v7436_v22  ;;  %7795 = vmatprep.subr.mxu1 %v7375_v6  ;;  %v10987_v22 = vld [vmem:[%s19798_s16 + $0x840] sm:$0xff]  ;;  %v10984_v6 = vld [vmem:[%s19798_s16 + $0x828] sm:$0xff] }
 0x6c3   :  { %7838 = vmatprep.subr.mxu0 %v7433_v34  ;;  %7796 = vmatpush2.msra.mxu1 %v7374_v52  ;;  %v11042_v34 = vld [vmem:[%s19798_s16 + $0x9f8] sm:$0xff]  ;;  %v10983_v52 = vld [vmem:[%s19798_s16 + $0x820] sm:$0xff] }
 0x6c4   :  { %7797 = vmatprep.mubr.f32.mxu1 %v16612_v0  ;;  %7839 = vmatpush2.msra.mxu0 %v7432_v36  ;;  %v11041_v36 = vld [vmem:[%s19798_s16 + $0x9f0] sm:$0xff] }
 0x6c5   :  { %7798 = vmatmul.mubr.f32.vlgmr.msra.gmra.mxu1 %v16590_v26  ;;  %7840 = vmatprep.subr.mxu0 %v7429_v60  ;;  %v10980_v60 = vld [vmem:[%s19798_s16 + $0x808] sm:$0xff] }
 0x6c6   :  { %8017 = vmatprep.subr.mxu1 %v11040_v5  ;;  %7841 = vmatpush2.msra.mxu0 %v7428_v7  ;;  %v11038_v5 = vld [vmem:[%s19798_s16 + $0x9d8] sm:$0xff]  ;;  %v11037_v7 = vld [vmem:[%s19798_s16 + $0x9d0] sm:$0xff] }
 0x6c7   :  { %8018 = vmatpush1.msra.mxu1 %v11039_v42  ;;  %7842 = vmatprep.subr.mxu0 %v7425_v10  ;;  %v11104_v42 = vld [vmem:[%s19798_s16 + $0xbe8] sm:$0xff]  ;;  %v11103_v10 = vld [vmem:[%s19798_s16 + $0xbe0] sm:$0xff] }
 0x6c8   :  { %8019 = vmatprep.subr.mxu1 %v11036_v11  ;;  %7843 = vmatpush2.msra.mxu0 %v7424_v12  ;;  %v11033_v11 = vld [vmem:[%s19798_s16 + $0x9b0] sm:$0xff]  ;;  %v11100_v12 = vld [vmem:[%s19798_s16 + $0xbc8] sm:$0xff] }
 0x6c9   :  { %8020 = vmatpush1.msra.mxu1 %v11035_v40  ;;  %7844 = vmatprep.subr.mxu0 %v7421_v41  ;;  %v11030_v40 = vld [vmem:[%s19798_s16 + $0x998] sm:$0xff]  ;;  %v11099_v41 = vld [vmem:[%s19798_s16 + $0xbc0] sm:$0xff] }
 0x6ca   :  { %8021 = vmatprep.subr.mxu1 %v11032_v43  ;;  %7845 = vmatpush2.msra.mxu0 %v7420_v59  ;;  %v11029_v43 = vld [vmem:[%s19798_s16 + $0x990] sm:$0xff]  ;;  %v11096_v59 = vld [vmem:[%s19798_s16 + $0xba8] sm:$0xff] }
 0x6cb   :  { %8022 = vmatpush1.msra.mxu1 %v11031_v3  ;;  %7846 = vmatprep.subr.mxu0 %v7417_v58  ;;  %v11026_v3 = vld [vmem:[%s19798_s16 + $0x978] sm:$0xff]  ;;  %v11095_v58 = vld [vmem:[%s19798_s16 + $0xba0] sm:$0xff] }
 0x6cc   :  { %8023 = vmatprep.subr.mxu1 %v11028_v44  ;;  %7847 = vmatpush2.msra.mxu0 %v7416_v47  ;;  %v11025_v44 = vld [vmem:[%s19798_s16 + $0x970] sm:$0xff]  ;;  %v11092_v47 = vld [vmem:[%s19798_s16 + $0xb88] sm:$0xff] }
 0x6cd   :  { %8024 = vmatpush1.msra.mxu1 %v11027_v28  ;;  %7848 = vmatprep.subr.mxu0 %v7413_v56  ;;  %v11022_v28 = vld [vmem:[%s19798_s16 + $0x958] sm:$0xff]  ;;  %v11091_v56 = vld [vmem:[%s19798_s16 + $0xb80] sm:$0xff] }
 0x6ce   :  { %8025 = vmatprep.subr.mxu1 %v11024_v38  ;;  %7849 = vmatpush2.msra.mxu0 %v7412_v54  ;;  %v11021_v38 = vld [vmem:[%s19798_s16 + $0x950] sm:$0xff]  ;;  %v11088_v54 = vld [vmem:[%s19798_s16 + $0xb68] sm:$0xff] }
 0x6cf   :  { %8026 = vmatpush1.msra.mxu1 %v11023_v49  ;;  %7850 = vmatprep.subr.mxu0 %v7409_v51  ;;  %v11018_v49 = vld [vmem:[%s19798_s16 + $0x938] sm:$0xff]  ;;  %v11087_v51 = vld [vmem:[%s19798_s16 + $0xb60] sm:$0xff] }
 0x6d0   :  { %8027 = vmatprep.subr.mxu1 %v11020_v53  ;;  %7851 = vmatpush2.msra.mxu0 %v7408_v55  ;;  %v11017_v53 = vld [vmem:[%s19798_s16 + $0x930] sm:$0xff]  ;;  %v11084_v55 = vld [vmem:[%s19798_s16 + $0xb48] sm:$0xff] }
 0x6d1   :  { %8028 = vmatpush1.msra.mxu1 %v11019_v13  ;;  %7852 = vmatprep.subr.mxu0 %v7405_v14  ;;  %v11014_v13 = vld [vmem:[%s19798_s16 + $0x918] sm:$0xff]  ;;  %v11083_v14 = vld [vmem:[%s19798_s16 + $0xb40] sm:$0xff] }
 0x6d2   :  { %8029 = vmatprep.subr.mxu1 %v11016_v20  ;;  %7853 = vmatpush2.msra.mxu0 %v7404_v21  ;;  %v11013_v20 = vld [vmem:[%s19798_s16 + $0x910] sm:$0xff]  ;;  %v11080_v21 = vld [vmem:[%s19798_s16 + $0xb28] sm:$0xff] }
 0x6d3   :  { %8030 = vmatpush1.msra.mxu1 %v11015_v27  ;;  %7854 = vmatprep.subr.mxu0 %v7401_v9  ;;  %v11010_v27 = vld [vmem:[%s19798_s16 + $0x8f8] sm:$0xff]  ;;  %v11079_v9 = vld [vmem:[%s19798_s16 + $0xb20] sm:$0xff] }
 0x6d4   :  { %8031 = vmatprep.subr.mxu1 %v11012_v29  ;;  %7855 = vmatpush2.msra.mxu0 %v7400_v15  ;;  %v11009_v29 = vld [vmem:[%s19798_s16 + $0x8f0] sm:$0xff]  ;;  %v11076_v15 = vld [vmem:[%s19798_s16 + $0xb08] sm:$0xff] }
 0x6d5   :  { %8032 = vmatpush1.msra.mxu1 %v11011_v23  ;;  %7856 = vmatprep.subr.mxu0 %v7397_v17  ;;  %v11006_v23 = vld [vmem:[%s19798_s16 + $0x8d8] sm:$0xff]  ;;  %v11075_v17 = vld [vmem:[%s19798_s16 + $0xb00] sm:$0xff] }
 0x6d6   :  { %8033 = vmatprep.subr.mxu1 %v11008_v25  ;;  %7857 = vmatpush2.msra.mxu0 %v7396_v31  ;;  %v11005_v25 = vld [vmem:[%s19798_s16 + $0x8d0] sm:$0xff]  ;;  %v11072_v31 = vld [vmem:[%s19798_s16 + $0xae8] sm:$0xff] }
 0x6d7   :  { %8034 = vmatpush1.msra.mxu1 %v11007_v61  ;;  %7858 = vmatprep.subr.mxu0 %v7393_v32  ;;  %v11002_v61 = vld [vmem:[%s19798_s16 + $0x8b8] sm:$0xff]  ;;  %v11071_v32 = vld [vmem:[%s19798_s16 + $0xae0] sm:$0xff] }
 0x6d8   :  { %8035 = vmatprep.subr.mxu1 %v11004_v62  ;;  %7859 = vmatpush2.msra.mxu0 %v7392_v45  ;;  %v11001_v62 = vld [vmem:[%s19798_s16 + $0x8b0] sm:$0xff]  ;;  %v11068_v45 = vld [vmem:[%s19798_s16 + $0xac8] sm:$0xff] }
 0x6d9   :  { %8036 = vmatpush1.msra.mxu1 %v11003_v2  ;;  %7860 = vmatprep.subr.mxu0 %v7389_v8  ;;  %v10998_v2 = vld [vmem:[%s19798_s16 + $0x898] sm:$0xff]  ;;  %v11067_v8 = vld [vmem:[%s19798_s16 + $0xac0] sm:$0xff] }
 0x6da   :  { %8037 = vmatprep.subr.mxu1 %v11000_v1  ;;  %7861 = vmatpush2.msra.mxu0 %v7388_v33  ;;  %v10997_v1 = vld [vmem:[%s19798_s16 + $0x890] sm:$0xff]  ;;  %v11064_v33 = vld [vmem:[%s19798_s16 + $0xaa8] sm:$0xff] }
 0x6db   :  { %8038 = vmatpush1.msra.mxu1 %v10999_v39  ;;  %7862 = vmatprep.subr.mxu0 %v7385_v37  ;;  %v10994_v39 = vld [vmem:[%s19798_s16 + $0x878] sm:$0xff]  ;;  %v11063_v37 = vld [vmem:[%s19798_s16 + $0xaa0] sm:$0xff] }
 0x6dc   :  { %8039 = vmatprep.subr.mxu1 %v10996_v4  ;;  %7863 = vmatpush2.msra.mxu0 %v7384_v35  ;;  %v10993_v4 = vld [vmem:[%s19798_s16 + $0x870] sm:$0xff]  ;;  %v11060_v35 = vld [vmem:[%s19798_s16 + $0xa88] sm:$0xff] }
 0x6dd   :  { %8040 = vmatpush1.msra.mxu1 %v10995_v18  ;;  %7864 = vmatprep.subr.mxu0 %v7381_v16  ;;  %v10990_v18 = vld [vmem:[%s19798_s16 + $0x858] sm:$0xff]  ;;  %v11059_v16 = vld [vmem:[%s19798_s16 + $0xa80] sm:$0xff] }
 0x6de   :  { %8041 = vmatprep.subr.mxu1 %v10992_v63  ;;  %7865 = vmatpush2.msra.mxu0 %v7380_v19  ;;  %v10989_v63 = vld [vmem:[%s19798_s16 + $0x850] sm:$0xff]  ;;  %v11056_v19 = vld [vmem:[%s19798_s16 + $0xa68] sm:$0xff] }
 0x6df   :  { %8042 = vmatpush1.msra.mxu1 %v10991_v57  ;;  %7866 = vmatprep.subr.mxu0 %v7377_v46  ;;  %v10986_v57 = vld [vmem:[%s19798_s16 + $0x838] sm:$0xff]  ;;  %v11055_v46 = vld [vmem:[%s19798_s16 + $0xa60] sm:$0xff] }
 0x6e0   :  { %8043 = vmatprep.subr.mxu1 %v10988_v30  ;;  %7867 = vmatpush2.msra.mxu0 %v7376_v50  ;;  %v10985_v30 = vld [vmem:[%s19798_s16 + $0x830] sm:$0xff]  ;;  %v11052_v50 = vld [vmem:[%s19798_s16 + $0xa48] sm:$0xff] }
 0x6e1   :  { %7868 = vmatprep.mubr.f32.mxu0 %v16612_v0  ;;  %8044 = vmatpush1.msra.mxu1 %v10987_v22  ;;  %v10979_v0 = vld [vmem:[%s19798_s16 + $0x800] sm:$0xff]  ;;  %v10982_v22 = vld [vmem:[%s19798_s16 + $0x818] sm:$0xff] }
 0x6e2   :  { %7869 = vmatmul.mubr.f32.vlgmr.msra.gmra.mxu0 %v16590_v26  ;;  %8045 = vmatprep.subr.mxu1 %v10984_v6  ;;  %v11034_v26 = vld [vmem:[%s19798_s16 + $0x9b8] sm:$0xff]  ;;  %v11051_v6 = vld [vmem:[%s19798_s16 + $0xa40] sm:$0xff] }
 0x6e3   :  { %8088 = vmatprep.subr.mxu0 %v11042_v34  ;;  %8046 = vmatpush1.msra.mxu1 %v10983_v52  ;;  %v10981_v34 = vld [vmem:[%s19798_s16 + $0x810] sm:$0xff]  ;;  %v11048_v52 = vld [vmem:[%s19798_s16 + $0xa28] sm:$0xff] }
 0x6e4   :  { %8089 = vmatpush1.msra.mxu0 %v11041_v36  ;;  %8047 = vmatprep.subr.mxu1 %v10980_v60  ;;  %v16984_v36 = vld.sshfl [vmem:[#allocation7 + $0x8] sm:$0x33 pattern:$0x76325410]  ;;  %v11106_v60 = vld [vmem:[%s19798_s16 + $0xbf8] sm:$0xff] }
 0x6e5   :  { %8090 = vmatprep.subr.mxu0 %v11038_v5  ;;  %8048 = vmatpush1.msra.mxu1 %v10979_v0  ;;  %v11047_v5 = vld [vmem:[%s19798_s16 + $0xa20] sm:$0xff]  ;;  %v11105_v0 = vld [vmem:[%s19798_s16 + $0xbf0] sm:$0xff] }
 0x6e6   :  { %8091 = vmatpush1.msra.mxu0 %v11037_v7  ;;  %8049 = vmatprep.subr.mxu1 %v11104_v42  ;;  %v11044_v7 = vld [vmem:[%s19798_s16 + $0xa08] sm:$0xff]  ;;  %v6344_v42 = vpop.f32.mrf.mxu0 }
 0x6e7   :  { %8092 = vmatprep.subr.mxu0 %v11034_v26  ;;  %8050 = vmatpush2.msra.mxu1 %v11103_v10  ;;  %v11102_v26 = vld [vmem:[%s19798_s16 + $0xbd8] sm:$0xff]  ;;  %v11043_v10 = vld [vmem:[%s19798_s16 + $0xa00] sm:$0xff] }
 0x6e8   :  { %8093 = vmatpush1.msra.mxu0 %v11033_v11  ;;  %8051 = vmatprep.subr.mxu1 %v11100_v12  ;;  %v17006_v11 = vcombine.high %v16984_v36, %v16984_v36  ;;  %v11101_v12 = vld [vmem:[%s19798_s16 + $0xbd0] sm:$0xff] }
 0x6e9   :  { %8094 = vmatprep.subr.mxu0 %v11030_v40  ;;  %8052 = vmatpush2.msra.mxu1 %v11099_v41  ;;  %v6415_v40 = vpop.f32.mrf.mxu1  ;;  %v11098_v41 = vld [vmem:[%s19798_s16 + $0xbb8] sm:$0xff] }
 0x6ea   :  { %8095 = vmatpush1.msra.mxu0 %v11029_v43  ;;  %8053 = vmatprep.subr.mxu1 %v11096_v59  ;;  %v11169_v43 = vld [vmem:[%s19798_s16 + $0xde8] sm:$0xff]  ;;  %v11097_v59 = vld [vmem:[%s19798_s16 + $0xbb0] sm:$0xff] }
 0x6eb   :  { %8096 = vmatprep.subr.mxu0 %v11026_v3  ;;  %8054 = vmatpush2.msra.mxu1 %v11095_v58  ;;  %v6346_v3 = vpop.f32.mrf.mxu0  ;;  %v11168_v58 = vld [vmem:[%s19798_s16 + $0xde0] sm:$0xff] }
 0x6ec   :  { %8097 = vmatpush1.msra.mxu0 %v11025_v44  ;;  %8055 = vmatprep.subr.mxu1 %v11092_v47  ;;  %v11094_v44 = vld [vmem:[%s19798_s16 + $0xb98] sm:$0xff]  ;;  %v11165_v47 = vld [vmem:[%s19798_s16 + $0xdc8] sm:$0xff] }
 0x6ed   :  { %8098 = vmatprep.subr.mxu0 %v11022_v28  ;;  %8056 = vmatpush2.msra.mxu1 %v11091_v56  ;;  %v11093_v28 = vld [vmem:[%s19798_s16 + $0xb90] sm:$0xff]  ;;  %v6417_v56 = vpop.f32.mrf.mxu1 }
 0x6ee   :  { %8099 = vmatpush1.msra.mxu0 %v11021_v38  ;;  %8057 = vmatprep.subr.mxu1 %v11088_v54  ;;  %v11164_v38 = vld [vmem:[%s19798_s16 + $0xdc0] sm:$0xff]  ;;  %v11090_v54 = vld [vmem:[%s19798_s16 + $0xb78] sm:$0xff] }
 0x6ef   :  { %8100 = vmatprep.subr.mxu0 %v11018_v49  ;;  %8058 = vmatpush2.msra.mxu1 %v11087_v51  ;;  %v11161_v49 = vld [vmem:[%s19798_s16 + $0xda8] sm:$0xff]  ;;  %v11089_v51 = vld [vmem:[%s19798_s16 + $0xb70] sm:$0xff] }
 0x6f0   :  { %8101 = vmatpush1.msra.mxu0 %v11017_v53  ;;  %8059 = vmatprep.subr.mxu1 %v11084_v55  ;;  %v6521_v53 = vpop.f32.mrf.mxu0  ;;  %v11160_v55 = vld [vmem:[%s19798_s16 + $0xda0] sm:$0xff] }
 0x6f1   :  { %8102 = vmatprep.subr.mxu0 %v11014_v13  ;;  %8060 = vmatpush2.msra.mxu1 %v11083_v14  ;;  %v11086_v13 = vld [vmem:[%s19798_s16 + $0xb58] sm:$0xff]  ;;  %v11157_v14 = vld [vmem:[%s19798_s16 + $0xd88] sm:$0xff] }
 0x6f2   :  { %8103 = vmatpush1.msra.mxu0 %v11013_v20  ;;  %8061 = vmatprep.subr.mxu1 %v11080_v21  ;;  %v11085_v20 = vld [vmem:[%s19798_s16 + $0xb50] sm:$0xff]  ;;  %v6629_v21 = vpop.f32.mrf.mxu1 }
 0x6f3   :  { %8104 = vmatprep.subr.mxu0 %v11010_v27  ;;  %8062 = vmatpush2.msra.mxu1 %v11079_v9  ;;  %v11156_v27 = vld [vmem:[%s19798_s16 + $0xd80] sm:$0xff]  ;;  %v11082_v9 = vld [vmem:[%s19798_s16 + $0xb38] sm:$0xff] }
 0x6f4   :  { %8105 = vmatpush1.msra.mxu0 %v11009_v29  ;;  %8063 = vmatprep.subr.mxu1 %v11076_v15  ;;  %v6416_v29 = vadd.f32 %v6415_v40, %v6344_v42  ;;  %v11153_v15 = vld [vmem:[%s19798_s16 + $0xd68] sm:$0xff]  ;;  %v11058_v40 = vld [vmem:[%s19798_s16 + $0xa78] sm:$0xff] }
 0x6f5   :  { %8106 = vmatprep.subr.mxu0 %v11006_v23  ;;  %8064 = vmatpush2.msra.mxu1 %v11075_v17  ;;  %v11081_v23 = vld [vmem:[%s19798_s16 + $0xb30] sm:$0xff]  ;;  %v6523_v17 = vpop.f32.mrf.mxu0  ;;  %v11133_v42 = vld [vmem:[%s19798_s16 + $0xcc8] sm:$0xff] }
 0x6f6   :  { %8107 = vmatpush1.msra.mxu0 %v11005_v25  ;;  %8065 = vmatprep.subr.mxu1 %v11072_v31  ;;  %v11152_v25 = vld [vmem:[%s19798_s16 + $0xd60] sm:$0xff]  ;;  %v11078_v31 = vld [vmem:[%s19798_s16 + $0xb18] sm:$0xff] }
 0x6f7   :  { %8108 = vmatprep.subr.mxu0 %v11002_v61  ;;  %8066 = vmatpush2.msra.mxu1 %v11071_v32  ;;  %v6418_v61 = vadd.f32 %v6417_v56, %v6346_v3  ;;  %v11149_v32 = vld [vmem:[%s19798_s16 + $0xd48] sm:$0xff]  ;;  %v11057_v3 = vld [vmem:[%s19798_s16 + $0xa70] sm:$0xff] }
 0x6f8   :  { %8109 = vmatpush1.msra.mxu0 %v11001_v62  ;;  %8067 = vmatprep.subr.mxu1 %v11068_v45  ;;  %v11077_v62 = vld [vmem:[%s19798_s16 + $0xb10] sm:$0xff]  ;;  %v6631_v45 = vpop.f32.mrf.mxu1 }
 0x6f9   :  { %8110 = vmatprep.subr.mxu0 %v10998_v2  ;;  %8068 = vmatpush2.msra.mxu1 %v11067_v8  ;;  %v6736_v2 = vpop.f32.mrf.mxu0  ;;  %v11148_v8 = vld [vmem:[%s19798_s16 + $0xd40] sm:$0xff] }
 0x6fa   :  { %8111 = vmatpush1.msra.mxu0 %v10997_v1  ;;  %8069 = vmatprep.subr.mxu1 %v11064_v33  ;;  %v11074_v1 = vld [vmem:[%s19798_s16 + $0xaf8] sm:$0xff]  ;;  %v6526_v33 = vadd.f32 %v6521_v53, %v6416_v29 }
 0x6fb   :  { %8112 = vmatprep.subr.mxu0 %v10994_v39  ;;  %8070 = vmatpush2.msra.mxu1 %v11063_v37  ;;  %v11145_v39 = vld [vmem:[%s19798_s16 + $0xd28] sm:$0xff]  ;;  %v11073_v37 = vld [vmem:[%s19798_s16 + $0xaf0] sm:$0xff]  ;;  %v11050_v53 = vld [vmem:[%s19798_s16 + $0xa38] sm:$0xff] }
 0x6fc   :  { %8113 = vmatpush1.msra.mxu0 %v10993_v4  ;;  %8071 = vmatprep.subr.mxu1 %v11060_v35  ;;  %v6844_v4 = vpop.f32.mrf.mxu1  ;;  %v11144_v35 = vld [vmem:[%s19798_s16 + $0xd20] sm:$0xff] }
 0x6fd   :  { %8114 = vmatprep.subr.mxu0 %v10990_v18  ;;  %8072 = vmatpush2.msra.mxu1 %v11059_v16  ;;  %v11070_v18 = vld [vmem:[%s19798_s16 + $0xad8] sm:$0xff]  ;;  %v6527_v16 = vadd.f32 %v6523_v17, %v6418_v61 }
 0x6fe   :  { %8115 = vmatpush1.msra.mxu0 %v10989_v63  ;;  %8073 = vmatprep.subr.mxu1 %v11056_v19  ;;  %v11141_v63 = vld [vmem:[%s19798_s16 + $0xd08] sm:$0xff]  ;;  %v11069_v19 = vld [vmem:[%s19798_s16 + $0xad0] sm:$0xff] }
 0x6ff   :  { %8116 = vmatprep.subr.mxu0 %v10986_v57  ;;  %8074 = vmatpush2.msra.mxu1 %v11055_v46  ;;  %v6738_v57 = vpop.f32.mrf.mxu0  ;;  %v11140_v46 = vld [vmem:[%s19798_s16 + $0xd00] sm:$0xff] }
 0x700   :  { %8117 = vmatpush1.msra.mxu0 %v10985_v30  ;;  %8075 = vmatprep.subr.mxu1 %v11052_v50  ;;  %v11066_v30 = vld [vmem:[%s19798_s16 + $0xab8] sm:$0xff]  ;;  %v6634_v50 = vadd.f32 %v6629_v21, %v6526_v33  ;;  %v11120_v21 = vld [vmem:[%s19798_s16 + $0xc60] sm:$0xff] }
 0x701   :  { %8118 = vmatprep.subr.mxu0 %v10982_v22  ;;  %8076 = vmatpush2.msra.mxu1 %v11051_v6  ;;  %v11137_v22 = vld [vmem:[%s19798_s16 + $0xce8] sm:$0xff]  ;;  %v11065_v6 = vld [vmem:[%s19798_s16 + $0xab0] sm:$0xff] }
 0x702   :  { %8119 = vmatpush1.msra.mxu0 %v10981_v34  ;;  %8077 = vmatprep.subr.mxu1 %v11048_v52  ;;  %v6846_v34 = vpop.f32.mrf.mxu1  ;;  %v6952_v52 = vpop.f32.mrf.mxu0 }
 0x703   :  { %8120 = vmatprep.subr.mxu0 %v11106_v60  ;;  %8078 = vmatpush2.msra.mxu1 %v11047_v5  ;;  %v11136_v60 = vld [vmem:[%s19798_s16 + $0xce0] sm:$0xff]  ;;  %v11062_v5 = vld [vmem:[%s19798_s16 + $0xa98] sm:$0xff] }
 0x704   :  { %8121 = vmatpush2.msra.mxu0 %v11105_v0  ;;  %8079 = vmatprep.subr.mxu1 %v11044_v7  ;;  %v6635_v0 = vadd.f32 %v6631_v45, %v6527_v16  ;;  %v6741_v7 = vadd.f32 %v6736_v2, %v6634_v50  ;;  %v11171_v2 = vld [vmem:[%s19798_s16 + $0xdf8] sm:$0xff] }
 0x705   :  { %8122 = vmatprep.subr.mxu0 %v11102_v26  ;;  %8080 = vmatpush2.msra.mxu1 %v11043_v10  ;;  %v11061_v26 = vld [vmem:[%s19798_s16 + $0xa90] sm:$0xff]  ;;  %v7060_v10 = vpop.f32.mrf.mxu1 }
 0x706   :  { %8081 = vmatprep.mubr.f32.mxu1 %v17006_v11  ;;  %8123 = vmatpush2.msra.mxu0 %v11101_v12  ;;  %v11132_v12 = vld [vmem:[%s19798_s16 + $0xcc0] sm:$0xff] }
 0x707   :  { %8082 = vmatmul.mubr.f32.vlgmr.msra.gmra.mxu1 %v16984_v36  ;;  %8124 = vmatprep.subr.mxu0 %v11098_v41  ;;  %v6742_v41 = vadd.f32 %v6738_v57, %v6635_v0  ;;  %v11232_v57 = vld [vmem:[%s19798_s16 + $0xfe0] sm:$0xff] }
 0x708   :  { %8305 = vmatprep.subr.mxu1 %v11169_v43  ;;  %8125 = vmatpush2.msra.mxu0 %v11097_v59  ;;  %v6849_v43 = vadd.f32 %v6844_v4, %v6741_v7  ;;  %v11129_v59 = vld [vmem:[%s19798_s16 + $0xca8] sm:$0xff]  ;;  %v11155_v7 = vld [vmem:[%s19798_s16 + $0xd78] sm:$0xff] }
 0x709   :  { %8306 = vmatpush1.msra.mxu1 %v11168_v58  ;;  %8126 = vmatprep.subr.mxu0 %v11094_v44  ;;  %v6954_v58 = vpop.f32.mrf.mxu0  ;;  %v11128_v44 = vld [vmem:[%s19798_s16 + $0xca0] sm:$0xff] }
 0x70a   :  { %8307 = vmatprep.subr.mxu1 %v11165_v47  ;;  %8127 = vmatpush2.msra.mxu0 %v11093_v28  ;;  %v11054_v47 = vld [vmem:[%s19798_s16 + $0xa58] sm:$0xff]  ;;  %v6850_v28 = vadd.f32 %v6846_v34, %v6742_v41  ;;  %v6957_v56 = vadd.f32 %v6952_v52, %v6849_v43  ;;  %v11228_v34 = vld [vmem:[%s19798_s16 + $0xfc0] sm:$0xff]  ;;  %v11158_v52 = vld [vmem:[%s19798_s16 + $0xd90] sm:$0xff] }
 0x70b   :  { %8308 = vmatpush1.msra.mxu1 %v11164_v38  ;;  %8128 = vmatprep.subr.mxu0 %v11090_v54  ;;  %v11125_v38 = vld [vmem:[%s19798_s16 + $0xc88] sm:$0xff]  ;;  %v11053_v54 = vld [vmem:[%s19798_s16 + $0xa50] sm:$0xff]  ;;  %v11151_v41 = vld [vmem:[%s19798_s16 + $0xd58] sm:$0xff] }
 0x70c   :  { %8309 = vmatprep.subr.mxu1 %v11161_v49  ;;  %8129 = vmatpush2.msra.mxu0 %v11089_v51  ;;  %v7062_v49 = vpop.f32.mrf.mxu1  ;;  %v11124_v51 = vld [vmem:[%s19798_s16 + $0xc80] sm:$0xff] }
 0x70d   :  { %8310 = vmatpush1.msra.mxu1 %v11160_v55  ;;  %8130 = vmatprep.subr.mxu0 %v11086_v13  ;;  %v6958_v55 = vadd.f32 %v6954_v58, %v6850_v28  ;;  %v7065_v13 = vadd.f32 %v7060_v10, %v6957_v56  ;;  %v11221_v10 = vld [vmem:[%s19798_s16 + $0xf88] sm:$0xff]  ;;  %v11220_v43 = vld [vmem:[%s19798_s16 + $0xf80] sm:$0xff]  ;;  %v11146_v56 = vld [vmem:[%s19798_s16 + $0xd30] sm:$0xff] }
 0x70e   :  { %8311 = vmatprep.subr.mxu1 %v11157_v14  ;;  %8131 = vmatpush2.msra.mxu0 %v11085_v20  ;;  %v11121_v14 = vld [vmem:[%s19798_s16 + $0xc68] sm:$0xff]  ;;  %v11049_v20 = vld [vmem:[%s19798_s16 + $0xa30] sm:$0xff]  ;;  %v11216_v28 = vld [vmem:[%s19798_s16 + $0xf60] sm:$0xff] }
 0x70f   :  { %8312 = vmatpush1.msra.mxu1 %v11156_v27  ;;  %8132 = vmatprep.subr.mxu0 %v11082_v9  ;;  %v11046_v27 = vld [vmem:[%s19798_s16 + $0xa18] sm:$0xff]  ;;  %v7066_v29 = vadd.f32 %v7062_v49, %v6958_v55  ;;  %v11142_v55 = vld [vmem:[%s19798_s16 + $0xd10] sm:$0xff] }
 0x710   :  { %8313 = vmatprep.subr.mxu1 %v11153_v15  ;;  %8133 = vmatpush2.msra.mxu0 %v11081_v23  ;;  %v11117_v15 = vld [vmem:[%s19798_s16 + $0xc48] sm:$0xff]  ;;  %v11045_v23 = vld [vmem:[%s19798_s16 + $0xa10] sm:$0xff] }
 0x711   :  { %8314 = vmatpush1.msra.mxu1 %v11152_v25  ;;  %8134 = vmatprep.subr.mxu0 %v11078_v31  ;;  %v11116_v25 = vld [vmem:[%s19798_s16 + $0xc40] sm:$0xff] }
 0x712   :  { %8315 = vmatprep.subr.mxu1 %v11149_v32  ;;  %8135 = vmatpush2.msra.mxu0 %v11077_v62  ;;  %v11113_v32 = vld [vmem:[%s19798_s16 + $0xc28] sm:$0xff] }
 0x713   :  { %8316 = vmatpush1.msra.mxu1 %v11148_v8  ;;  %8136 = vmatprep.subr.mxu0 %v11074_v1  ;;  %v11112_v8 = vld [vmem:[%s19798_s16 + $0xc20] sm:$0xff]  ;;  %v11170_v1 = vld [vmem:[%s19798_s16 + $0xdf0] sm:$0xff] }
 0x714   :  { %8317 = vmatprep.subr.mxu1 %v11145_v39  ;;  %8137 = vmatpush2.msra.mxu0 %v11073_v37  ;;  %v11109_v39 = vld [vmem:[%s19798_s16 + $0xc08] sm:$0xff] }
 0x715   :  { %8318 = vmatpush1.msra.mxu1 %v11144_v35  ;;  %8138 = vmatprep.subr.mxu0 %v11070_v18  ;;  %v11108_v35 = vld [vmem:[%s19798_s16 + $0xc00] sm:$0xff]  ;;  %v11166_v18 = vld [vmem:[%s19798_s16 + $0xdd0] sm:$0xff] }
 0x716   :  { %8319 = vmatprep.subr.mxu1 %v11141_v63  ;;  %8139 = vmatpush2.msra.mxu0 %v11069_v19  ;;  %v11163_v19 = vld [vmem:[%s19798_s16 + $0xdb8] sm:$0xff] }
 0x717   :  { %8320 = vmatpush1.msra.mxu1 %v11140_v46  ;;  %8140 = vmatprep.subr.mxu0 %v11066_v30  ;;  %v11162_v46 = vld [vmem:[%s19798_s16 + $0xdb0] sm:$0xff]  ;;  %v11229_v30 = vld [vmem:[%s19798_s16 + $0xfc8] sm:$0xff] }
 0x718   :  { %8321 = vmatprep.subr.mxu1 %v11137_v22  ;;  %8141 = vmatpush2.msra.mxu0 %v11065_v6  ;;  %v11159_v6 = vld [vmem:[%s19798_s16 + $0xd98] sm:$0xff] }
 0x719   :  { %8322 = vmatpush1.msra.mxu1 %v11136_v60  ;;  %8142 = vmatprep.subr.mxu0 %v11062_v5  ;;  %v11225_v60 = vld [vmem:[%s19798_s16 + $0xfa8] sm:$0xff] }
 0x71a   :  { %8323 = vmatprep.subr.mxu1 %v11133_v42  ;;  %8143 = vmatpush2.msra.mxu0 %v11061_v26  ;;  %v11224_v42 = vld [vmem:[%s19798_s16 + $0xfa0] sm:$0xff]  ;;  %v11154_v26 = vld [vmem:[%s19798_s16 + $0xd70] sm:$0xff] }
 0x71b   :  { %8324 = vmatpush1.msra.mxu1 %v11132_v12  ;;  %8144 = vmatprep.subr.mxu0 %v11058_v40 }
 0x71c   :  { %8325 = vmatprep.subr.mxu1 %v11129_v59  ;;  %8145 = vmatpush2.msra.mxu0 %v11057_v3  ;;  %v11150_v59 = vld [vmem:[%s19798_s16 + $0xd50] sm:$0xff]  ;;  %v11217_v3 = vld [vmem:[%s19798_s16 + $0xf68] sm:$0xff] }
 0x71d   :  { %8326 = vmatpush1.msra.mxu1 %v11128_v44  ;;  %8146 = vmatprep.subr.mxu0 %v11054_v47  ;;  %v11147_v47 = vld [vmem:[%s19798_s16 + $0xd38] sm:$0xff] }
 0x71e   :  { %8327 = vmatprep.subr.mxu1 %v11125_v38  ;;  %8147 = vmatpush2.msra.mxu0 %v11053_v54  ;;  %v7168_v9 = vpop.f32.mrf.mxu0  ;;  %v11213_v38 = vld [vmem:[%s19798_s16 + $0xf48] sm:$0xff] }
 0x71f   :  { %8328 = vmatpush1.msra.mxu1 %v11124_v51  ;;  %8148 = vmatprep.subr.mxu0 %v11050_v53  ;;  %v17178_v17 = vadd.f32 %v7168_v9, %v7065_v13  ;;  %v11143_v51 = vld [vmem:[%s19798_s16 + $0xd18] sm:$0xff]  ;;  %v11212_v53 = vld [vmem:[%s19798_s16 + $0xf40] sm:$0xff]  ;;  %v11209_v13 = vld [vmem:[%s19798_s16 + $0xf28] sm:$0xff] }
 0x720   :  { %8329 = vmatprep.subr.mxu1 %v11121_v14  ;;  %8149 = vmatpush2.msra.mxu0 %v11049_v20  ;;  %v7170_v31 = vpop.f32.mrf.mxu0  ;;  %v11138_v9 = vld [vmem:[%s19798_s16 + $0xcf0] sm:$0xff] }
 0x721   :  { %8330 = vmatpush1.msra.mxu1 %v11120_v21  ;;  %8150 = vmatprep.subr.mxu0 %v11046_v27  ;;  %v7176_v61 = vsel %vm7175_vm3, %v17178_v17, 0.0  ;;  %v17188_v62 = vadd.f32 %v7170_v31, %v7066_v29  ;;  %v11139_v21 = vld [vmem:[%s19798_s16 + $0xcf8] sm:$0xff]  ;;  %v11208_v27 = vld [vmem:[%s19798_s16 + $0xf20] sm:$0xff]  ;;  %v11205_v29 = vld [vmem:[%s19798_s16 + $0xf08] sm:$0xff] }
 0x722   :  { %8331 = vmatprep.subr.mxu1 %v11117_v15  ;;  %8151 = vmatpush2.msra.mxu0 %v11045_v23  ;;  %v7177_v45 = vrot.slane %v7176_v61, 4  ;;  %v11204_v31 = vld [vmem:[%s19798_s16 + $0xf00] sm:$0xff] }
 0x723   :  { %8152 = vmatprep.mubr.f32.mxu0 %v17006_v11  ;;  %8332 = vmatpush1.msra.mxu1 %v11116_v25  ;;  %v7183_v33 = vsel %vm7175_vm3, %v17188_v62, 0.0  ;;  %v11167_v11 = vld [vmem:[%s19798_s16 + $0xdd8] sm:$0xff] }
 0x724   :  { %v7178_v37 = vadd.f32 %v7177_v45, %v7176_v61  ;;  %8153 = vmatmul.mubr.f32.vlgmr.msra.gmra.mxu0 %v16984_v36  ;;  %8333 = vmatprep.subr.mxu1 %v11113_v32  ;;  %v7184_v4 = vrot.slane %v7183_v33, 4  ;;  %v11233_v36 = vld [vmem:[%s19798_s16 + $0xfe8] sm:$0xff]  ;;  %v11135_v25 = vld [vmem:[%s19798_s16 + $0xcd8] sm:$0xff]  ;;  %v11134_v32 = vld [vmem:[%s19798_s16 + $0xcd0] sm:$0xff] }
 0x725   :  { %8376 = vmatprep.subr.mxu0 %v11171_v2  ;;  %8334 = vmatpush1.msra.mxu1 %v11112_v8  ;;  %v11201_v45 = vld [vmem:[%s19798_s16 + $0xee8] sm:$0xff]  ;;  %v11131_v8 = vld [vmem:[%s19798_s16 + $0xcb8] sm:$0xff] }
 0x726   :  { %v7179_v16 = vrot.slane %v7178_v37, 2  ;;  %8377 = vmatpush1.msra.mxu0 %v11170_v1  ;;  %v7185_v63 = vadd.f32 %v7184_v4, %v7183_v33  ;;  %8335 = vmatprep.subr.mxu1 %v11109_v39  ;;  %v11200_v1 = vld [vmem:[%s19798_s16 + $0xee0] sm:$0xff]  ;;  %v11197_v4 = vld [vmem:[%s19798_s16 + $0xec8] sm:$0xff] }
 0x727   :  { %8378 = vmatprep.subr.mxu0 %v11167_v11  ;;  %8336 = vmatpush1.msra.mxu1 %v11108_v35  ;;  %v11127_v11 = vld [vmem:[%s19798_s16 + $0xc98] sm:$0xff]  ;;  %v11196_v35 = vld [vmem:[%s19798_s16 + $0xec0] sm:$0xff] }
 0x728   :  { %v7180_v50 = vadd.f32 %v7179_v16, %v7178_v37  ;;  %v7186_v22 = vrot.slane %v7185_v63, 2  ;;  %8379 = vmatpush1.msra.mxu0 %v11166_v18  ;;  %8337 = vmatprep.subr.mxu1 %v11233_v36  ;;  %v11130_v37 = vld [vmem:[%s19798_s16 + $0xcb0] sm:$0xff] }
 0x729   :  { %8380 = vmatprep.subr.mxu0 %v11163_v19  ;;  %8338 = vmatpush2.msra.mxu1 %v11232_v57  ;;  %v11126_v16 = vld [vmem:[%s19798_s16 + $0xc90] sm:$0xff]  ;;  %v11123_v19 = vld [vmem:[%s19798_s16 + $0xc78] sm:$0xff]  ;;  %v11192_v57 = vld [vmem:[%s19798_s16 + $0xea0] sm:$0xff] }
 0x72a   :  { %v7181_v5 = vrot.slane %v7180_v50, 1  ;;  %v7187_v0 = vadd.f32 %v7186_v22, %v7185_v63  ;;  %8381 = vmatpush1.msra.mxu0 %v11162_v46  ;;  %8339 = vmatprep.subr.mxu1 %v11229_v30  ;;  %v11193_v63 = vld [vmem:[%s19798_s16 + $0xea8] sm:$0xff] }
 0x72b   :  { %8382 = vmatprep.subr.mxu0 %v11159_v6  ;;  %8340 = vmatpush2.msra.mxu1 %v11228_v34  ;;  %v11189_v22 = vld [vmem:[%s19798_s16 + $0xe88] sm:$0xff]  ;;  %v11119_v6 = vld [vmem:[%s19798_s16 + $0xc58] sm:$0xff]  ;;  %v11188_v34 = vld [vmem:[%s19798_s16 + $0xe80] sm:$0xff] }
 0x72c   :  { %v7182_v12 = vadd.f32 %v7181_v5, %v7180_v50  ;;  %v7188_v40 = vrot.slane %v7187_v0, 1  ;;  %8383 = vmatpush1.msra.mxu0 %v11158_v52  ;;  %8341 = vmatprep.subr.mxu1 %v11225_v60  ;;  %v11122_v50 = vld [vmem:[%s19798_s16 + $0xc70] sm:$0xff] }
 0x72d   :  { %8384 = vmatprep.subr.mxu0 %v11155_v7  ;;  %8342 = vmatpush2.msra.mxu1 %v11224_v42  ;;  %v11118_v5 = vld [vmem:[%s19798_s16 + $0xc50] sm:$0xff]  ;;  %v11115_v7 = vld [vmem:[%s19798_s16 + $0xc38] sm:$0xff]  ;;  %v11184_v42 = vld [vmem:[%s19798_s16 + $0xe60] sm:$0xff] }
 0x72e   :  { %v17266_v58 = vmul.f32 0.5, %v7182_v12  ;;  %v7189_v44 = vadd.f32 %v7188_v40, %v7187_v0  ;;  %8385 = vmatpush1.msra.mxu0 %v11154_v26  ;;  %8343 = vmatprep.subr.mxu1 %v11221_v10  ;;  %v11185_v0 = vld [vmem:[%s19798_s16 + $0xe68] sm:$0xff]  ;;  %v11114_v12 = vld [vmem:[%s19798_s16 + $0xc30] sm:$0xff] }
 0x72f   :  { %8386 = vmatprep.subr.mxu0 %v11151_v41  ;;  %8344 = vmatpush2.msra.mxu1 %v11220_v43  ;;  %v11181_v40 = vld [vmem:[%s19798_s16 + $0xe48] sm:$0xff]  ;;  %v11111_v41 = vld [vmem:[%s19798_s16 + $0xc18] sm:$0xff]  ;;  %v11180_v43 = vld [vmem:[%s19798_s16 + $0xe40] sm:$0xff] }
 0x730   :  { %v7193_v54 = vsub.f32 %v17178_v17, %v17266_v58  ;;  %v17282_v49 = vmul.f32 0.5, %v7189_v44  ;;  %8387 = vmatpush1.msra.mxu0 %v11150_v59  ;;  %8345 = vmatprep.subr.mxu1 %v11217_v3  ;;  %v11110_v59 = vld [vmem:[%s19798_s16 + $0xc10] sm:$0xff] }
 0x731   :  { %8388 = vmatprep.subr.mxu0 %v11147_v47  ;;  %8346 = vmatpush2.msra.mxu1 %v11216_v28  ;;  %v11177_v47 = vld [vmem:[%s19798_s16 + $0xe28] sm:$0xff]  ;;  %v17396_v28 = vld.sshfl [vmem:[#allocation7 + $0xc] sm:$0x33 pattern:$0x76325410] }
 0x732   :  { %v7195_v14 = vmul.f32 %v7193_v54, %v7193_v54  ;;  %v7194_v20 = vsub.f32 %v17188_v62, %v17282_v49  ;;  %8389 = vmatpush1.msra.mxu0 %v11146_v56  ;;  %8347 = vmatprep.subr.mxu1 %v11213_v38  ;;  %v11235_v56 = vld [vmem:[%s19798_s16 + $0xff8] sm:$0xff]  ;;  %v11176_v38 = vld [vmem:[%s19798_s16 + $0xe20] sm:$0xff] }
 0x733   :  { %8390 = vmatprep.subr.mxu0 %v11143_v51  ;;  %8348 = vmatpush2.msra.mxu1 %v11212_v53  ;;  %v11234_v53 = vld [vmem:[%s19798_s16 + $0xff0] sm:$0xff] }
 0x734   :  { %v7197_v15 = vsel %vm7175_vm3, %v7195_v14, 0.0  ;;  %v7196_v23 = vmul.f32 %v7194_v20, %v7194_v20  ;;  %8391 = vmatpush1.msra.mxu0 %v11142_v55  ;;  %8349 = vmatprep.subr.mxu1 %v11209_v13  ;;  %v11173_v55 = vld [vmem:[%s19798_s16 + $0xe08] sm:$0xff]  ;;  %v11231_v13 = vld [vmem:[%s19798_s16 + $0xfd8] sm:$0xff]  ;;  %v11172_v14 = vld [vmem:[%s19798_s16 + $0xe00] sm:$0xff]  ;;  %v17418_v20 = vcombine.high %v17396_v28, %v17396_v28 }
 0x735   :  { %v7198_v61 = vrot.slane %v7197_v15, 4  ;;  %8392 = vmatprep.subr.mxu0 %v11139_v21  ;;  %8350 = vmatpush2.msra.mxu1 %v11208_v27  ;;  %v11230_v27 = vld [vmem:[%s19798_s16 + $0xfd0] sm:$0xff] }
 0x736   :  { %v7204_v2 = vsel %vm7175_vm3, %v7196_v23, 0.0  ;;  %8393 = vmatpush1.msra.mxu0 %v11138_v9  ;;  %8351 = vmatprep.subr.mxu1 %v11205_v29  ;;  %v11227_v9 = vld [vmem:[%s19798_s16 + $0xfb8] sm:$0xff]  ;;  %v11298_v29 = vld [vmem:[%s19798_s16 + $0x11e8] sm:$0xff]  ;;  %v11297_v23 = vld [vmem:[%s19798_s16 + $0x11e0] sm:$0xff] }
 0x737   :  { %v7199_v33 = vadd.f32 %v7198_v61, %v7197_v15  ;;  %v7205_v39 = vrot.slane %v7204_v2, 4  ;;  %8394 = vmatprep.subr.mxu0 %v11135_v25  ;;  %8352 = vmatpush2.msra.mxu1 %v11204_v31  ;;  %v11226_v15 = vld [vmem:[%s19798_s16 + $0xfb0] sm:$0xff]  ;;  %v11223_v25 = vld [vmem:[%s19798_s16 + $0xf98] sm:$0xff]  ;;  %v11294_v31 = vld [vmem:[%s19798_s16 + $0x11c8] sm:$0xff] }
 0x738   :  { %8395 = vmatpush1.msra.mxu0 %v11134_v32  ;;  %8353 = vmatprep.subr.mxu1 %v11201_v45  ;;  %v11222_v61 = vld [vmem:[%s19798_s16 + $0xf90] sm:$0xff]  ;;  %v11293_v32 = vld [vmem:[%s19798_s16 + $0x11c0] sm:$0xff]  ;;  %v11219_v45 = vld [vmem:[%s19798_s16 + $0xf78] sm:$0xff] }
 0x739   :  { %v7200_v18 = vrot.slane %v7199_v33, 2  ;;  %v7206_v36 = vadd.f32 %v7205_v39, %v7204_v2  ;;  %8396 = vmatprep.subr.mxu0 %v11131_v8  ;;  %8354 = vmatpush2.msra.mxu1 %v11200_v1  ;;  %v12983_v2 = vmov 1966171168   ;;  %v11290_v1 = vld [vmem:[%s19798_s16 + $0x11a8] sm:$0xff]  ;;  %v11289_v39 = vld [vmem:[%s19798_s16 + $0x11a0] sm:$0xff] }
 0x73a   :  { %8397 = vmatpush1.msra.mxu0 %v11130_v37  ;;  %8355 = vmatprep.subr.mxu1 %v11197_v4  ;;  %v7222_v8 = vunpack.c.l.s4 %v12983_v2  ;;  %v11215_v37 = vld [vmem:[%s19798_s16 + $0xf58] sm:$0xff]  ;;  %v11286_v4 = vld [vmem:[%s19798_s16 + $0x1188] sm:$0xff] }
 0x73b   :  { %v7201_v46 = vadd.f32 %v7200_v18, %v7199_v33  ;;  %v7207_v30 = vrot.slane %v7206_v36, 2  ;;  %8398 = vmatprep.subr.mxu0 %v11127_v11  ;;  %8356 = vmatpush2.msra.mxu1 %v11196_v35  ;;  %v11218_v33 = vld [vmem:[%s19798_s16 + $0xf70] sm:$0xff]  ;;  %v11285_v35 = vld [vmem:[%s19798_s16 + $0x1180] sm:$0xff]  ;;  %v11211_v18 = vld [vmem:[%s19798_s16 + $0xf38] sm:$0xff] }
 0x73c   :  { %8399 = vmatpush1.msra.mxu0 %v11126_v16  ;;  %8357 = vmatprep.subr.mxu1 %v11193_v63  ;;  %v11214_v11 = vld [vmem:[%s19798_s16 + $0xf50] sm:$0xff]  ;;  %v11282_v16 = vld [vmem:[%s19798_s16 + $0x1168] sm:$0xff] }
 0x73d   :  { %v7202_v52 = vrot.slane %v7201_v46, 1  ;;  %v7208_v60 = vadd.f32 %v7207_v30, %v7206_v36  ;;  %8400 = vmatprep.subr.mxu0 %v11123_v19  ;;  %8358 = vmatpush2.msra.mxu1 %v11192_v57  ;;  %v7223_v36 = vunpack.c.0.s8 %v7222_v8  ;;  %v11210_v63 = vld [vmem:[%s19798_s16 + $0xf30] sm:$0xff]  ;;  %v11281_v19 = vld [vmem:[%s19798_s16 + $0x1160] sm:$0xff]  ;;  %v11207_v57 = vld [vmem:[%s19798_s16 + $0xf18] sm:$0xff] }
 0x73e   :  { %8401 = vmatpush1.msra.mxu0 %v11122_v50  ;;  %8359 = vmatprep.subr.mxu1 %v11189_v22  ;;  %v11206_v30 = vld [vmem:[%s19798_s16 + $0xf10] sm:$0xff]  ;;  %v11277_v50 = vld [vmem:[%s19798_s16 + $0x1140] sm:$0xff]  ;;  %v11203_v22 = vld [vmem:[%s19798_s16 + $0xef8] sm:$0xff] }
 0x73f   :  { %v7203_v26 = vadd.f32 %v7202_v52, %v7201_v46  ;;  %v7209_v10 = vrot.slane %v7208_v60, 1  ;;  %8402 = vmatprep.subr.mxu0 %v11119_v6  ;;  %8360 = vmatpush2.msra.mxu1 %v11188_v34  ;;  %v11278_v46 = vld [vmem:[%s19798_s16 + $0x1148] sm:$0xff]  ;;  %v17501_v34 = vsub.s32 %v7223_v36, %v13619_v24  ;;  %v11178_v8 = vld [vmem:[%s19798_s16 + $0xe30] sm:$0xff] }
 0x740   :  { %8403 = vmatpush1.msra.mxu0 %v11118_v5  ;;  %8361 = vmatprep.subr.mxu1 %v11185_v0  ;;  %v11274_v52 = vld [vmem:[%s19798_s16 + $0x1128] sm:$0xff]  ;;  %v11273_v0 = vld [vmem:[%s19798_s16 + $0x1120] sm:$0xff] }
 0x741   :  { %v7211_v3 = vmul.f32 0.5, %v7203_v26  ;;  %v7210_v44 = vadd.f32 %v7209_v10, %v7208_v60  ;;  %8404 = vmatprep.subr.mxu0 %v11115_v7  ;;  %8362 = vmatpush2.msra.mxu1 %v11184_v42  ;;  %v11202_v60 = vld [vmem:[%s19798_s16 + $0xef0] sm:$0xff]  ;;  %v11199_v7 = vld [vmem:[%s19798_s16 + $0xed8] sm:$0xff]  ;;  %v11270_v26 = vld [vmem:[%s19798_s16 + $0x1108] sm:$0xff] }
 0x742   :  { %8405 = vmatpush1.msra.mxu0 %v11114_v12  ;;  %8363 = vmatprep.subr.mxu1 %v11181_v40  ;;  %v11198_v10 = vld [vmem:[%s19798_s16 + $0xed0] sm:$0xff]  ;;  %v11269_v12 = vld [vmem:[%s19798_s16 + $0x1100] sm:$0xff]  ;;  %v11195_v40 = vld [vmem:[%s19798_s16 + $0xeb8] sm:$0xff] }
 0x743   :  { %v7214_v54 = vadd.f32 1e-05, %v7211_v3  ;;  %v7212_v51 = vmul.f32 0.5, %v7210_v44  ;;  %8406 = vmatprep.subr.mxu0 %v11111_v41  ;;  %8364 = vmatpush2.msra.mxu1 %v11180_v43  ;;  %v11266_v43 = vld [vmem:[%s19798_s16 + $0x10e8] sm:$0xff]  ;;  %v7213_v3 = vld [vmem:[%s19796_s14] sm:$0x3] }
 0x744   :  { %8407 = vmatpush1.msra.mxu0 %v11110_v59  ;;  %8365 = vmatprep.subr.mxu1 %v11177_v47  ;;  %v11194_v59 = vld [vmem:[%s19798_s16 + $0xeb0] sm:$0xff]  ;;  %v11265_v44 = vld [vmem:[%s19798_s16 + $0x10e0] sm:$0xff]  ;;  %v11191_v47 = vld [vmem:[%s19798_s16 + $0xe98] sm:$0xff] }
 0x745   :  { %v7215_v21 = vadd.f32 1e-05, %v7212_v51  ;;  %8408 = vmatprep.subr.mxu0 %v11235_v56  ;;  %8366 = vmatpush2.msra.mxu1 %v11176_v38  ;;  %12928 = vrsqrt.f32 %v7214_v54  ;;  %v17545_v38 = vsub.s32 1, %v13619_v24  ;;  %v11262_v54 = vld [vmem:[%s19798_s16 + $0x10c8] sm:$0xff]  ;;  %v11190_v51 = vld [vmem:[%s19798_s16 + $0xe90] sm:$0xff] }
 0x746   :  { %8409 = vmatpush2.msra.mxu0 %v11234_v53  ;;  %8367 = vmatprep.subr.mxu1 %v11173_v55  ;;  %v11261_v53 = vld [vmem:[%s19798_s16 + $0x10c0] sm:$0xff]  ;;  %v11187_v55 = vld [vmem:[%s19798_s16 + $0xe78] sm:$0xff]  ;;  %v11250_v2 = vld [vmem:[%s19798_s16 + $0x1068] sm:$0xff] }
 0x747   :  { %12930 = vrsqrt.f32 %v7215_v21  ;;  %8410 = vmatprep.subr.mxu0 %v11231_v13  ;;  %8368 = vmatpush2.msra.mxu1 %v11172_v14  ;;  %v11258_v14 = vld [vmem:[%s19798_s16 + $0x10a8] sm:$0xff]  ;;  %v11186_v21 = vld [vmem:[%s19798_s16 + $0xe70] sm:$0xff] }
 0x748   :  { %8369 = vmatprep.mubr.f32.mxu1 %v17418_v20  ;;  %8411 = vmatpush2.msra.mxu0 %v11230_v27  ;;  %v11257_v27 = vld [vmem:[%s19798_s16 + $0x10a0] sm:$0xff] }
 0x749   :  { %8370 = vmatmul.mubr.f32.vlgmr.msra.gmra.mxu1 %v17396_v28  ;;  %8412 = vmatprep.subr.mxu0 %v11227_v9 }
 0x74a   :  { %8592 = vmatprep.subr.mxu1 %v11298_v29  ;;  %8413 = vmatpush2.msra.mxu0 %v11226_v15  ;;  %v11183_v15 = vld [vmem:[%s19798_s16 + $0xe58] sm:$0xff] }
 0x74b   :  { %8593 = vmatpush1.msra.mxu1 %v11297_v23  ;;  %8414 = vmatprep.subr.mxu0 %v11223_v25  ;;  %v11254_v23 = vld [vmem:[%s19798_s16 + $0x1088] sm:$0xff]  ;;  %v11182_v25 = vld [vmem:[%s19798_s16 + $0xe50] sm:$0xff] }
 0x74c   :  { %8594 = vmatprep.subr.mxu1 %v11294_v31  ;;  %8415 = vmatpush2.msra.mxu0 %v11222_v61  ;;  %v11253_v31 = vld [vmem:[%s19798_s16 + $0x1080] sm:$0xff] }
 0x74d   :  { %8595 = vmatpush1.msra.mxu1 %v11293_v32  ;;  %8416 = vmatprep.subr.mxu0 %v11219_v45  ;;  %v11179_v45 = vld [vmem:[%s19798_s16 + $0xe38] sm:$0xff] }
 0x74e   :  { %8596 = vmatprep.subr.mxu1 %v11290_v1  ;;  %8417 = vmatpush2.msra.mxu0 %v11218_v33  ;;  %v11175_v1 = vld [vmem:[%s19798_s16 + $0xe18] sm:$0xff]  ;;  %v11246_v33 = vld [vmem:[%s19798_s16 + $0x1048] sm:$0xff] }
 0x74f   :  { %8597 = vmatpush1.msra.mxu1 %v11289_v39  ;;  %8418 = vmatprep.subr.mxu0 %v11215_v37  ;;  %v11174_v39 = vld [vmem:[%s19798_s16 + $0xe10] sm:$0xff] }
 0x750   :  { %8598 = vmatprep.subr.mxu1 %v11286_v4  ;;  %8419 = vmatpush2.msra.mxu0 %v11214_v11  ;;  %v11245_v4 = vld [vmem:[%s19798_s16 + $0x1040] sm:$0xff] }
 0x751   :  { %8599 = vmatpush1.msra.mxu1 %v11285_v35  ;;  %8420 = vmatprep.subr.mxu0 %v11211_v18  ;;  %v7237_v11 = vld [vmem:[%s19797_s15] sm:$0x3]  ;;  %v11242_v35 = vld [vmem:[%s19798_s16 + $0x1028] sm:$0xff]  ;;  %v11300_v18 = vld [vmem:[%s19798_s16 + $0x11f8] sm:$0xff] }
 0x752   :  { %8600 = vmatprep.subr.mxu1 %v11282_v16  ;;  %8421 = vmatpush2.msra.mxu0 %v11210_v63  ;;  %v12929_v6 = vpop.eup %12928  ;;  %v11241_v16 = vld [vmem:[%s19798_s16 + $0x1020] sm:$0xff]  ;;  %v11299_v63 = vld [vmem:[%s19798_s16 + $0x11f0] sm:$0xff] }
 0x753   :  { %8601 = vmatpush1.msra.mxu1 %v11281_v19  ;;  %8422 = vmatprep.subr.mxu0 %v11207_v57  ;;  %v11238_v19 = vld [vmem:[%s19798_s16 + $0x1008] sm:$0xff]  ;;  %v11296_v57 = vld [vmem:[%s19798_s16 + $0x11d8] sm:$0xff] }
 0x754   :  { %v12931_v5 = vpop.eup %12930  ;;  %8602 = vmatprep.subr.mxu1 %v11278_v46  ;;  %8423 = vmatpush2.msra.mxu0 %v11206_v30  ;;  %v11237_v46 = vld [vmem:[%s19798_s16 + $0x1000] sm:$0xff]  ;;  %v11295_v30 = vld [vmem:[%s19798_s16 + $0x11d0] sm:$0xff] }
 0x755   :  { %v7220_v42 = vcombine.low %v12929_v6, %v12931_v5  ;;  %8603 = vmatpush1.msra.mxu1 %v11277_v50  ;;  %8424 = vmatprep.subr.mxu0 %v11203_v22  ;;  %v11362_v50 = vld [vmem:[%s19798_s16 + $0x13e8] sm:$0xff]  ;;  %v11292_v22 = vld [vmem:[%s19798_s16 + $0x11b8] sm:$0xff]  ;;  %v11291_v5 = vld [vmem:[%s19798_s16 + $0x11b0] sm:$0xff] }
 0x756   :  { %8604 = vmatprep.subr.mxu1 %v11274_v52  ;;  %8425 = vmatpush2.msra.mxu0 %v11202_v60 }
 0x757   :  { %v7227_v41 = vrot.slane %v7220_v42, %v17501_v34  ;;  %8605 = vmatpush1.msra.mxu1 %v11273_v0  ;;  %8426 = vmatprep.subr.mxu0 %v11199_v7  ;;  %v11288_v0 = vld [vmem:[%s19798_s16 + $0x1198] sm:$0xff] }
 0x758   :  { %8606 = vmatprep.subr.mxu1 %v11270_v26  ;;  %8427 = vmatpush2.msra.mxu0 %v11198_v10  ;;  %v11357_v26 = vld [vmem:[%s19798_s16 + $0x13c0] sm:$0xff]  ;;  %v11287_v10 = vld [vmem:[%s19798_s16 + $0x1190] sm:$0xff] }
 0x759   :  { %v7234_v56 = vrot.slane %v7227_v41, %v17501_v34  ;;  %8607 = vmatpush1.msra.mxu1 %v11269_v12  ;;  %8428 = vmatprep.subr.mxu0 %v11195_v40  ;;  %v11354_v12 = vld [vmem:[%s19798_s16 + $0x13a8] sm:$0xff]  ;;  %v11284_v40 = vld [vmem:[%s19798_s16 + $0x1178] sm:$0xff] }
 0x75a   :  { %8608 = vmatprep.subr.mxu1 %v11266_v43  ;;  %8429 = vmatpush2.msra.mxu0 %v11194_v59  ;;  %v11353_v59 = vld [vmem:[%s19798_s16 + $0x13a0] sm:$0xff] }
 0x75b   :  { %v7236_v13 = vmul.f32 %v7234_v56, %v7213_v3  ;;  %8609 = vmatpush1.msra.mxu1 %v11265_v44  ;;  %8430 = vmatprep.subr.mxu0 %v11191_v47  ;;  %v11283_v3 = vld [vmem:[%s19798_s16 + $0x1170] sm:$0xff]  ;;  %v11350_v44 = vld [vmem:[%s19798_s16 + $0x1388] sm:$0xff]  ;;  %v11280_v47 = vld [vmem:[%s19798_s16 + $0x1158] sm:$0xff] }
 0x75c   :  { %8610 = vmatprep.subr.mxu1 %v11262_v54  ;;  %8431 = vmatpush2.msra.mxu0 %v11190_v51  ;;  %v11349_v54 = vld [vmem:[%s19798_s16 + $0x1380] sm:$0xff]  ;;  %v11279_v51 = vld [vmem:[%s19798_s16 + $0x1150] sm:$0xff] }
 0x75d   :  { %v7242_v9 = vrot.slane %v7236_v13, %v13713_v48  ;;  %v7246_v29 = vrot.slane %v7236_v13, %v17545_v38  ;;  %8611 = vmatpush1.msra.mxu1 %v11261_v53  ;;  %8432 = vmatprep.subr.mxu0 %v11187_v55  ;;  %v11346_v53 = vld [vmem:[%s19798_s16 + $0x1368] sm:$0xff]  ;;  %v11276_v55 = vld [vmem:[%s19798_s16 + $0x1138] sm:$0xff]  ;;  %v11345_v13 = vld [vmem:[%s19798_s16 + $0x1360] sm:$0xff] }
 0x75e   :  { %8612 = vmatprep.subr.mxu1 %v11258_v14  ;;  %8433 = vmatpush2.msra.mxu0 %v11186_v21  ;;  %v11275_v14 = vld [vmem:[%s19798_s16 + $0x1130] sm:$0xff]  ;;  %v11342_v21 = vld [vmem:[%s19798_s16 + $0x1348] sm:$0xff] }
 0x75f   :  { %v7249_v61 = vmul.f32 %v7242_v9, %v17266_v58  ;;  %v7250_v32 = vmul.f32 %v7246_v29, %v17282_v49  ;;  %8613 = vmatpush1.msra.mxu1 %v11257_v27  ;;  %8434 = vmatprep.subr.mxu0 %v11183_v15  ;;  %v11249_v58 = vld [vmem:[%s19798_s16 + $0x1060] sm:$0xff]  ;;  %v7271_v6 = vmul.f32 %v7246_v29, %v17188_v62  ;;  %v11358_v62 = vld [vmem:[%s19798_s16 + $0x13c8] sm:$0xff]  ;;  %v11272_v27 = vld [vmem:[%s19798_s16 + $0x1118] sm:$0xff] }
 0x760   :  { %8614 = vmatprep.subr.mxu1 %v11254_v23  ;;  %8435 = vmatpush2.msra.mxu0 %v11182_v25  ;;  %v11271_v29 = vld [vmem:[%s19798_s16 + $0x1110] sm:$0xff]  ;;  %v11338_v15 = vld [vmem:[%s19798_s16 + $0x1328] sm:$0xff]  ;;  %v11268_v23 = vld [vmem:[%s19798_s16 + $0x10f8] sm:$0xff] }
 0x761   :  { %v7253_v49 = vcombine.low %v7249_v61, %v7250_v32  ;;  %8615 = vmatpush1.msra.mxu1 %v11253_v31  ;;  %8436 = vmatprep.subr.mxu0 %v11179_v45  ;;  %v11337_v25 = vld [vmem:[%s19798_s16 + $0x1320] sm:$0xff]  ;;  %v11267_v31 = vld [vmem:[%s19798_s16 + $0x10f0] sm:$0xff]  ;;  %v11334_v61 = vld [vmem:[%s19798_s16 + $0x1308] sm:$0xff] }
 0x762   :  { %8616 = vmatprep.subr.mxu1 %v11250_v2  ;;  %8437 = vmatpush2.msra.mxu0 %v11178_v8  ;;  %v11264_v32 = vld [vmem:[%s19798_s16 + $0x10d8] sm:$0xff]  ;;  %v11333_v45 = vld [vmem:[%s19798_s16 + $0x1300] sm:$0xff]  ;;  %v11263_v2 = vld [vmem:[%s19798_s16 + $0x10d0] sm:$0xff] }
 0x763   :  { %v7260_v37 = vrot.slane %v7253_v49, %v17501_v34  ;;  %8617 = vmatpush1.msra.mxu1 %v11249_v58  ;;  %8438 = vmatprep.subr.mxu0 %v11175_v1  ;;  %v11330_v8 = vld [vmem:[%s19798_s16 + $0x12e8] sm:$0xff]  ;;  %v11260_v58 = vld [vmem:[%s19798_s16 + $0x10b8] sm:$0xff]  ;;  %v11329_v49 = vld [vmem:[%s19798_s16 + $0x12e0] sm:$0xff] }
 0x764   :  { %8618 = vmatprep.subr.mxu1 %v11246_v33  ;;  %8439 = vmatpush2.msra.mxu0 %v11174_v39  ;;  %v11259_v1 = vld [vmem:[%s19798_s16 + $0x10b0] sm:$0xff]  ;;  %v11326_v33 = vld [vmem:[%s19798_s16 + $0x12c8] sm:$0xff]  ;;  %v11256_v39 = vld [vmem:[%s19798_s16 + $0x1098] sm:$0xff] }
 0x765   :  { %v7267_v36 = vrot.slane %v7260_v37, %v17501_v34  ;;  %8440 = vmatprep.mubr.f32.mxu0 %v17418_v20  ;;  %8619 = vmatpush1.msra.mxu1 %v11245_v4  ;;  %v11325_v37 = vld [vmem:[%s19798_s16 + $0x12c0] sm:$0xff]  ;;  %v11255_v4 = vld [vmem:[%s19798_s16 + $0x1090] sm:$0xff] }
 0x766   :  { %8441 = vmatmul.mubr.f32.vlgmr.msra.gmra.mxu0 %v17396_v28  ;;  %8620 = vmatprep.subr.mxu1 %v11242_v35  ;;  %v7270_v28 = vmul.f32 %v7242_v9, %v17178_v17  ;;  %v11361_v17 = vld [vmem:[%s19798_s16 + $0x13e0] sm:$0xff]  ;;  %v11252_v35 = vld [vmem:[%s19798_s16 + $0x1078] sm:$0xff] }
 0x767   :  { %v7269_v20 = vsub.f32 %v7237_v11, %v7267_v36  ;;  %8663 = vmatprep.subr.mxu0 %v11300_v18  ;;  %8621 = vmatpush1.msra.mxu1 %v11241_v16  ;;  %v11341_v9 = vld [vmem:[%s19798_s16 + $0x1340] sm:$0xff]  ;;  %v11322_v11 = vld [vmem:[%s19798_s16 + $0x12a8] sm:$0xff]  ;;  %v11251_v36 = vld [vmem:[%s19798_s16 + $0x1070] sm:$0xff] }
 0x768   :  { %8664 = vmatpush1.msra.mxu0 %v11299_v63  ;;  %8622 = vmatprep.subr.mxu1 %v11238_v19  ;;  %v11321_v18 = vld [vmem:[%s19798_s16 + $0x12a0] sm:$0xff]  ;;  %v11318_v63 = vld [vmem:[%s19798_s16 + $0x1288] sm:$0xff]  ;;  %v11248_v19 = vld [vmem:[%s19798_s16 + $0x1058] sm:$0xff] }
 0x769   :  { %v7276_v52 = vrot.slane %v7269_v20, %v13713_v48  ;;  %v7280_v60 = vrot.slane %v7269_v20, %v17545_v38  ;;  %8665 = vmatprep.subr.mxu0 %v11296_v57  ;;  %8623 = vmatpush1.msra.mxu1 %v11237_v46  ;;  %v11317_v57 = vld [vmem:[%s19798_s16 + $0x1280] sm:$0xff]  ;;  %v11247_v20 = vld [vmem:[%s19798_s16 + $0x1050] sm:$0xff]  ;;  %v11314_v46 = vld [vmem:[%s19798_s16 + $0x1268] sm:$0xff] }
 0x76a   :  { %8666 = vmatpush1.msra.mxu0 %v11295_v30  ;;  %8624 = vmatprep.subr.mxu1 %v11362_v50  ;;  %v11244_v30 = vld [vmem:[%s19798_s16 + $0x1038] sm:$0xff]  ;;  %v11313_v50 = vld [vmem:[%s19798_s16 + $0x1260] sm:$0xff] }
 0x76b   :  { %v7283_v7 = vadd.f32 %v7276_v52, %v7270_v28  ;;  %v7284_v42 = vadd.f32 %v7280_v60, %v7271_v6  ;;  %8667 = vmatprep.subr.mxu0 %v11292_v22  ;;  %8625 = vmatpush2.msra.mxu1 %v11361_v17  ;;  %v11243_v22 = vld [vmem:[%s19798_s16 + $0x1030] sm:$0xff]  ;;  %v11310_v6 = vld [vmem:[%s19798_s16 + $0x1248] sm:$0xff]  ;;  %v11240_v52 = vld [vmem:[%s19798_s16 + $0x1018] sm:$0xff] }
 0x76c   :  { %8668 = vmatpush1.msra.mxu0 %v11291_v5  ;;  %8626 = vmatprep.subr.mxu1 %v11358_v62  ;;  %v11309_v60 = vld [vmem:[%s19798_s16 + $0x1240] sm:$0xff]  ;;  %v11239_v17 = vld [vmem:[%s19798_s16 + $0x1010] sm:$0xff]  ;;  %v11306_v5 = vld [vmem:[%s19798_s16 + $0x1228] sm:$0xff] }
 0x76d   :  { %v7285_v41 = vmax.f32 %v7283_v7, 0.0  ;;  %v7286_v43 = vmax.f32 %v7284_v42, 0.0  ;;  %8669 = vmatprep.subr.mxu0 %v11288_v0  ;;  %8627 = vmatpush2.msra.mxu1 %v11357_v26  ;;  %v11364_v62 = vld [vmem:[%s19798_s16 + $0x13f8] sm:$0xff]  ;;  %v11305_v0 = vld [vmem:[%s19798_s16 + $0x1220] sm:$0xff]  ;;  %v11363_v7 = vld [vmem:[%s19798_s16 + $0x13f0] sm:$0xff] }
 0x76e   :  { %8670 = vmatpush1.msra.mxu0 %v11287_v10  ;;  %8628 = vmatprep.subr.mxu1 %v11354_v12  ;;  %v11302_v42 = vld [vmem:[%s19798_s16 + $0x1208] sm:$0xff]  ;;  %v11360_v26 = vld [vmem:[%s19798_s16 + $0x13d8] sm:$0xff]  ;;  %v11301_v10 = vld [vmem:[%s19798_s16 + $0x1200] sm:$0xff] }
 0x76f   :  { %v7298_v56 = vcombine.low %v7285_v41, %v7286_v43  ;;  %8671 = vmatprep.subr.mxu0 %v11284_v40  ;;  %8629 = vmatpush2.msra.mxu1 %v11353_v59  ;;  %v11359_v12 = vld [vmem:[%s19798_s16 + $0x13d0] sm:$0xff]  ;;  %v11356_v40 = vld [vmem:[%s19798_s16 + $0x13b8] sm:$0xff]  ;;  %v11427_v41 = vld [vmem:[%s19798_s16 + $0x15e8] sm:$0xff] }
 0x770   :  { %8672 = vmatpush1.msra.mxu0 %v11283_v3  ;;  %8630 = vmatprep.subr.mxu1 %v11350_v44  ;;  %v11355_v43 = vld [vmem:[%s19798_s16 + $0x13b0] sm:$0xff]  ;;  %v11426_v59 = vld [vmem:[%s19798_s16 + $0x15e0] sm:$0xff]  ;;  %v11352_v3 = vld [vmem:[%s19798_s16 + $0x1398] sm:$0xff] }
 0x771   :  { %10848 = vst.sshfl [vmem:[#allocation7 + $0x10] sm:$0x33 pattern:$0x76325410] %v7298_v56  ;;  %8673 = vmatprep.subr.mxu0 %v11280_v47  ;;  %8631 = vmatpush2.msra.mxu1 %v11349_v54  ;;  %v11423_v44 = vld [vmem:[%s19798_s16 + $0x15c8] sm:$0xff]  ;;  %v11351_v47 = vld [vmem:[%s19798_s16 + $0x1390] sm:$0xff] }
 0x772   :  { %8674 = vmatpush1.msra.mxu0 %v11279_v51  ;;  %8632 = vmatprep.subr.mxu1 %v11346_v53  ;;  %v11422_v56 = vld [vmem:[%s19798_s16 + $0x15c0] sm:$0xff]  ;;  %v11348_v54 = vld [vmem:[%s19798_s16 + $0x1378] sm:$0xff]  ;;  %v11419_v51 = vld [vmem:[%s19798_s16 + $0x15a8] sm:$0xff] }
 0x773   :  { %8675 = vmatprep.subr.mxu0 %v11276_v55  ;;  %8633 = vmatpush2.msra.mxu1 %v11345_v13  ;;  %v11347_v53 = vld [vmem:[%s19798_s16 + $0x1370] sm:$0xff]  ;;  %v11418_v55 = vld [vmem:[%s19798_s16 + $0x15a0] sm:$0xff]  ;;  %v11344_v13 = vld [vmem:[%s19798_s16 + $0x1358] sm:$0xff] }
 0x774   :  { %8676 = vmatpush1.msra.mxu0 %v11275_v14  ;;  %8634 = vmatprep.subr.mxu1 %v11342_v21  ;;  %v11415_v14 = vld [vmem:[%s19798_s16 + $0x1588] sm:$0xff]  ;;  %v11343_v21 = vld [vmem:[%s19798_s16 + $0x1350] sm:$0xff] }
 0x775   :  { %8677 = vmatprep.subr.mxu0 %v11272_v27  ;;  %8635 = vmatpush2.msra.mxu1 %v11341_v9  ;;  %v11414_v27 = vld [vmem:[%s19798_s16 + $0x1580] sm:$0xff]  ;;  %v11340_v9 = vld [vmem:[%s19798_s16 + $0x1338] sm:$0xff] }
 0x776   :  { %8678 = vmatpush1.msra.mxu0 %v11271_v29  ;;  %8636 = vmatprep.subr.mxu1 %v11338_v15  ;;  %v11411_v29 = vld [vmem:[%s19798_s16 + $0x1568] sm:$0xff]  ;;  %v11339_v15 = vld [vmem:[%s19798_s16 + $0x1330] sm:$0xff] }
 0x777   :  { %8679 = vmatprep.subr.mxu0 %v11268_v23  ;;  %8637 = vmatpush2.msra.mxu1 %v11337_v25  ;;  %v11410_v23 = vld [vmem:[%s19798_s16 + $0x1560] sm:$0xff]  ;;  %v11336_v25 = vld [vmem:[%s19798_s16 + $0x1318] sm:$0xff] }
 0x778   :  { %8680 = vmatpush1.msra.mxu0 %v11267_v31  ;;  %8638 = vmatprep.subr.mxu1 %v11334_v61  ;;  %v17775_v16 = vld.sshfl [vmem:[#allocation7 + $0x10] sm:$0x33 pattern:$0x76325410]  ;;  %v11335_v61 = vld [vmem:[%s19798_s16 + $0x1310] sm:$0xff] }
 0x779   :  { %8681 = vmatprep.subr.mxu0 %v11264_v32  ;;  %8639 = vmatpush2.msra.mxu1 %v11333_v45  ;;  %v8589_v28 = vcombine.high %v17775_v16, %v17775_v16  ;;  %v11407_v31 = vld [vmem:[%s19798_s16 + $0x1548] sm:$0xff]  ;;  %v11406_v32 = vld [vmem:[%s19798_s16 + $0x1540] sm:$0xff]  ;;  %v11332_v45 = vld [vmem:[%s19798_s16 + $0x12f8] sm:$0xff] }
 0x77a   :  { %8682 = vmatpush1.msra.mxu0 %v11263_v2  ;;  %8640 = vmatprep.subr.mxu1 %v11330_v8  ;;  %v11403_v2 = vld [vmem:[%s19798_s16 + $0x1528] sm:$0xff]  ;;  %v11331_v8 = vld [vmem:[%s19798_s16 + $0x12f0] sm:$0xff] }
 0x77b   :  { %8683 = vmatprep.subr.mxu0 %v11260_v58  ;;  %8641 = vmatpush2.msra.mxu1 %v11329_v49  ;;  %v11402_v58 = vld [vmem:[%s19798_s16 + $0x1520] sm:$0xff]  ;;  %v11328_v49 = vld [vmem:[%s19798_s16 + $0x12d8] sm:$0xff] }
 0x77c   :  { %8684 = vmatpush1.msra.mxu0 %v11259_v1  ;;  %8642 = vmatprep.subr.mxu1 %v11326_v33  ;;  %v11399_v1 = vld [vmem:[%s19798_s16 + $0x1508] sm:$0xff]  ;;  %v11327_v33 = vld [vmem:[%s19798_s16 + $0x12d0] sm:$0xff] }
 0x77d   :  { %8685 = vmatprep.subr.mxu0 %v11256_v39  ;;  %8643 = vmatpush2.msra.mxu1 %v11325_v37  ;;  %v11398_v39 = vld [vmem:[%s19798_s16 + $0x1500] sm:$0xff]  ;;  %v11324_v37 = vld [vmem:[%s19798_s16 + $0x12b8] sm:$0xff] }
 0x77e   :  { %8686 = vmatpush1.msra.mxu0 %v11255_v4  ;;  %8644 = vmatprep.subr.mxu1 %v11322_v11  ;;  %v11395_v4 = vld [vmem:[%s19798_s16 + $0x14e8] sm:$0xff]  ;;  %v11323_v11 = vld [vmem:[%s19798_s16 + $0x12b0] sm:$0xff] }
 0x77f   :  { %8687 = vmatprep.subr.mxu0 %v11252_v35  ;;  %8645 = vmatpush2.msra.mxu1 %v11321_v18  ;;  %v11394_v35 = vld [vmem:[%s19798_s16 + $0x14e0] sm:$0xff]  ;;  %v11320_v18 = vld [vmem:[%s19798_s16 + $0x1298] sm:$0xff] }
 0x780   :  { %8688 = vmatpush1.msra.mxu0 %v11251_v36  ;;  %8646 = vmatprep.subr.mxu1 %v11318_v63  ;;  %v11391_v36 = vld [vmem:[%s19798_s16 + $0x14c8] sm:$0xff]  ;;  %v11319_v63 = vld [vmem:[%s19798_s16 + $0x1290] sm:$0xff] }
 0x781   :  { %8689 = vmatprep.subr.mxu0 %v11248_v19  ;;  %8647 = vmatpush2.msra.mxu1 %v11317_v57  ;;  %v11390_v19 = vld [vmem:[%s19798_s16 + $0x14c0] sm:$0xff]  ;;  %v11316_v57 = vld [vmem:[%s19798_s16 + $0x1278] sm:$0xff] }
 0x782   :  { %8690 = vmatpush1.msra.mxu0 %v11247_v20  ;;  %8648 = vmatprep.subr.mxu1 %v11314_v46  ;;  %v11387_v20 = vld [vmem:[%s19798_s16 + $0x14a8] sm:$0xff]  ;;  %v11315_v46 = vld [vmem:[%s19798_s16 + $0x1270] sm:$0xff] }
 0x783   :  { %8691 = vmatprep.subr.mxu0 %v11244_v30  ;;  %8649 = vmatpush2.msra.mxu1 %v11313_v50  ;;  %v11386_v30 = vld [vmem:[%s19798_s16 + $0x14a0] sm:$0xff]  ;;  %v11383_v50 = vld [vmem:[%s19798_s16 + $0x1488] sm:$0xff] }
 0x784   :  { %8656 = vmatprep.mubr.f32.mxu1 %v8589_v28  ;;  %8692 = vmatpush1.msra.mxu0 %v11243_v22  ;;  %v11311_v22 = vld [vmem:[%s19798_s16 + $0x1250] sm:$0xff] }
 0x785   :  { %8727 = vmatprep.mubr.f32.mxu0 %v8589_v28  ;;  %8650 = vmatprep.subr.mxu1 %v11310_v6  ;;  %v11312_v28 = vld [vmem:[%s19798_s16 + $0x1258] sm:$0xff]  ;;  %v11382_v6 = vld [vmem:[%s19798_s16 + $0x1480] sm:$0xff] }
 0x786   :  { %8693 = vmatprep.subr.mxu0 %v11240_v52  ;;  %8651 = vmatpush2.msra.mxu1 %v11309_v60  ;;  %v11308_v52 = vld [vmem:[%s19798_s16 + $0x1238] sm:$0xff]  ;;  %v11379_v60 = vld [vmem:[%s19798_s16 + $0x1468] sm:$0xff] }
 0x787   :  { %8694 = vmatpush1.msra.mxu0 %v11239_v17  ;;  %8652 = vmatprep.subr.mxu1 %v11306_v5  ;;  %v11307_v17 = vld [vmem:[%s19798_s16 + $0x1230] sm:$0xff]  ;;  %v11378_v5 = vld [vmem:[%s19798_s16 + $0x1460] sm:$0xff] }
 0x788   :  { %8695 = vmatprep.subr.mxu0 %v11364_v62  ;;  %8653 = vmatpush2.msra.mxu1 %v11305_v0  ;;  %v11304_v62 = vld [vmem:[%s19798_s16 + $0x1218] sm:$0xff]  ;;  %v11375_v0 = vld [vmem:[%s19798_s16 + $0x1448] sm:$0xff] }
 0x789   :  { %8696 = vmatpush2.msra.mxu0 %v11363_v7  ;;  %8654 = vmatprep.subr.mxu1 %v11302_v42  ;;  %v11303_v7 = vld [vmem:[%s19798_s16 + $0x1210] sm:$0xff]  ;;  %v11374_v42 = vld [vmem:[%s19798_s16 + $0x1440] sm:$0xff] }
 0x78a   :  { %8697 = vmatprep.subr.mxu0 %v11360_v26  ;;  %8655 = vmatpush2.msra.mxu1 %v11301_v10  ;;  %v11371_v26 = vld [vmem:[%s19798_s16 + $0x1428] sm:$0xff]  ;;  %v11429_v10 = vld [vmem:[%s19798_s16 + $0x15f8] sm:$0xff] }
 0x78b   :  { %8698 = vmatpush2.msra.mxu0 %v11359_v12  ;;  %8657 = vmatmul.mubr.f32.vlgmr.msra.gmra.mxu1 %v17775_v16  ;;  %v11370_v12 = vld [vmem:[%s19798_s16 + $0x1420] sm:$0xff] }
 0x78c   :  { %8699 = vmatprep.subr.mxu0 %v11356_v40  ;;  %8880 = vmatprep.subr.mxu1 %v11427_v41  ;;  %v11428_v40 = vld [vmem:[%s19798_s16 + $0x15f0] sm:$0xff]  ;;  %v11367_v41 = vld [vmem:[%s19798_s16 + $0x1408] sm:$0xff] }
 0x78d   :  { %8700 = vmatpush2.msra.mxu0 %v11355_v43  ;;  %8881 = vmatpush1.msra.mxu1 %v11426_v59  ;;  %v11425_v43 = vld [vmem:[%s19798_s16 + $0x15d8] sm:$0xff]  ;;  %v11366_v59 = vld [vmem:[%s19798_s16 + $0x1400] sm:$0xff] }
 0x78e   :  { %8701 = vmatprep.subr.mxu0 %v11352_v3  ;;  %8882 = vmatprep.subr.mxu1 %v11423_v44  ;;  %v11424_v3 = vld [vmem:[%s19798_s16 + $0x15d0] sm:$0xff]  ;;  %v11421_v44 = vld [vmem:[%s19798_s16 + $0x15b8] sm:$0xff] }
 0x78f   :  { %8702 = vmatpush2.msra.mxu0 %v11351_v47  ;;  %8883 = vmatpush1.msra.mxu1 %v11422_v56  ;;  %v11490_v47 = vld [vmem:[%s19798_s16 + $0x17e0] sm:$0xff]  ;;  %v11420_v56 = vld [vmem:[%s19798_s16 + $0x15b0] sm:$0xff] }
 0x790   :  { %8703 = vmatprep.subr.mxu0 %v11348_v54  ;;  %8884 = vmatprep.subr.mxu1 %v11419_v51  ;;  %v11487_v54 = vld [vmem:[%s19798_s16 + $0x17c8] sm:$0xff]  ;;  %v11417_v51 = vld [vmem:[%s19798_s16 + $0x1598] sm:$0xff] }
 0x791   :  { %8704 = vmatpush2.msra.mxu0 %v11347_v53  ;;  %8885 = vmatpush1.msra.mxu1 %v11418_v55  ;;  %v11486_v53 = vld [vmem:[%s19798_s16 + $0x17c0] sm:$0xff]  ;;  %v11416_v55 = vld [vmem:[%s19798_s16 + $0x1590] sm:$0xff] }
 0x792   :  { %8705 = vmatprep.subr.mxu0 %v11344_v13  ;;  %8886 = vmatprep.subr.mxu1 %v11415_v14  ;;  %v11483_v13 = vld [vmem:[%s19798_s16 + $0x17a8] sm:$0xff]  ;;  %v11413_v14 = vld [vmem:[%s19798_s16 + $0x1578] sm:$0xff] }
 0x793   :  { %8706 = vmatpush2.msra.mxu0 %v11343_v21  ;;  %8887 = vmatpush1.msra.mxu1 %v11414_v27  ;;  %v11482_v21 = vld [vmem:[%s19798_s16 + $0x17a0] sm:$0xff]  ;;  %v11412_v27 = vld [vmem:[%s19798_s16 + $0x1570] sm:$0xff] }
 0x794   :  { %8707 = vmatprep.subr.mxu0 %v11340_v9  ;;  %8888 = vmatprep.subr.mxu1 %v11411_v29  ;;  %v11479_v9 = vld [vmem:[%s19798_s16 + $0x1788] sm:$0xff]  ;;  %v11409_v29 = vld [vmem:[%s19798_s16 + $0x1558] sm:$0xff] }
 0x795   :  { %8708 = vmatpush2.msra.mxu0 %v11339_v15  ;;  %8889 = vmatpush1.msra.mxu1 %v11410_v23  ;;  %v11478_v15 = vld [vmem:[%s19798_s16 + $0x1780] sm:$0xff]  ;;  %v11408_v23 = vld [vmem:[%s19798_s16 + $0x1550] sm:$0xff] }
 0x796   :  { %8709 = vmatprep.subr.mxu0 %v11336_v25  ;;  %8890 = vmatprep.subr.mxu1 %v11407_v31  ;;  %v11475_v25 = vld [vmem:[%s19798_s16 + $0x1768] sm:$0xff]  ;;  %v11405_v31 = vld [vmem:[%s19798_s16 + $0x1538] sm:$0xff] }
 0x797   :  { %8710 = vmatpush2.msra.mxu0 %v11335_v61  ;;  %8891 = vmatpush1.msra.mxu1 %v11406_v32  ;;  %v11474_v61 = vld [vmem:[%s19798_s16 + $0x1760] sm:$0xff]  ;;  %v11404_v32 = vld [vmem:[%s19798_s16 + $0x1530] sm:$0xff] }
 0x798   :  { %8711 = vmatprep.subr.mxu0 %v11332_v45  ;;  %8892 = vmatprep.subr.mxu1 %v11403_v2  ;;  %v11471_v45 = vld [vmem:[%s19798_s16 + $0x1748] sm:$0xff]  ;;  %v11401_v2 = vld [vmem:[%s19798_s16 + $0x1518] sm:$0xff] }
 0x799   :  { %8712 = vmatpush2.msra.mxu0 %v11331_v8  ;;  %8893 = vmatpush1.msra.mxu1 %v11402_v58  ;;  %v11470_v8 = vld [vmem:[%s19798_s16 + $0x1740] sm:$0xff]  ;;  %v11400_v58 = vld [vmem:[%s19798_s16 + $0x1510] sm:$0xff] }
 0x79a   :  { %8713 = vmatprep.subr.mxu0 %v11328_v49  ;;  %8894 = vmatprep.subr.mxu1 %v11399_v1  ;;  %v11467_v49 = vld [vmem:[%s19798_s16 + $0x1728] sm:$0xff]  ;;  %v11397_v1 = vld [vmem:[%s19798_s16 + $0x14f8] sm:$0xff] }
 0x79b   :  { %8714 = vmatpush2.msra.mxu0 %v11327_v33  ;;  %8895 = vmatpush1.msra.mxu1 %v11398_v39  ;;  %v11466_v33 = vld [vmem:[%s19798_s16 + $0x1720] sm:$0xff]  ;;  %v11396_v39 = vld [vmem:[%s19798_s16 + $0x14f0] sm:$0xff] }
 0x79c   :  { %8715 = vmatprep.subr.mxu0 %v11324_v37  ;;  %8896 = vmatprep.subr.mxu1 %v11395_v4  ;;  %v11463_v37 = vld [vmem:[%s19798_s16 + $0x1708] sm:$0xff]  ;;  %v11393_v4 = vld [vmem:[%s19798_s16 + $0x14d8] sm:$0xff] }
 0x79d   :  { %8716 = vmatpush2.msra.mxu0 %v11323_v11  ;;  %8897 = vmatpush1.msra.mxu1 %v11394_v35  ;;  %v11462_v11 = vld [vmem:[%s19798_s16 + $0x1700] sm:$0xff]  ;;  %v11392_v35 = vld [vmem:[%s19798_s16 + $0x14d0] sm:$0xff] }
 0x79e   :  { %8717 = vmatprep.subr.mxu0 %v11320_v18  ;;  %8898 = vmatprep.subr.mxu1 %v11391_v36  ;;  %v11459_v18 = vld [vmem:[%s19798_s16 + $0x16e8] sm:$0xff]  ;;  %v11389_v36 = vld [vmem:[%s19798_s16 + $0x14b8] sm:$0xff] }
 0x79f   :  { %8718 = vmatpush2.msra.mxu0 %v11319_v63  ;;  %8899 = vmatpush1.msra.mxu1 %v11390_v19  ;;  %v11458_v63 = vld [vmem:[%s19798_s16 + $0x16e0] sm:$0xff]  ;;  %v11388_v19 = vld [vmem:[%s19798_s16 + $0x14b0] sm:$0xff] }
 0x7a0   :  { %8719 = vmatprep.subr.mxu0 %v11316_v57  ;;  %8900 = vmatprep.subr.mxu1 %v11387_v20  ;;  %v11455_v57 = vld [vmem:[%s19798_s16 + $0x16c8] sm:$0xff]  ;;  %v11385_v20 = vld [vmem:[%s19798_s16 + $0x1498] sm:$0xff] }
 0x7a1   :  { %8720 = vmatpush2.msra.mxu0 %v11315_v46  ;;  %8901 = vmatpush1.msra.mxu1 %v11386_v30  ;;  %v11454_v46 = vld [vmem:[%s19798_s16 + $0x16c0] sm:$0xff]  ;;  %v11384_v30 = vld [vmem:[%s19798_s16 + $0x1490] sm:$0xff] }
 0x7a2   :  { %8721 = vmatprep.subr.mxu0 %v11312_v28  ;;  %8902 = vmatprep.subr.mxu1 %v11383_v50  ;;  %v11451_v28 = vld [vmem:[%s19798_s16 + $0x16a8] sm:$0xff]  ;;  %v11381_v50 = vld [vmem:[%s19798_s16 + $0x1478] sm:$0xff] }
 0x7a3   :  { %8722 = vmatpush2.msra.mxu0 %v11311_v22  ;;  %8903 = vmatpush1.msra.mxu1 %v11382_v6  ;;  %v11450_v22 = vld [vmem:[%s19798_s16 + $0x16a0] sm:$0xff]  ;;  %v11380_v6 = vld [vmem:[%s19798_s16 + $0x1470] sm:$0xff] }
 0x7a4   :  { %8723 = vmatprep.subr.mxu0 %v11308_v52  ;;  %8904 = vmatprep.subr.mxu1 %v11379_v60  ;;  %v11447_v52 = vld [vmem:[%s19798_s16 + $0x1688] sm:$0xff]  ;;  %v11377_v60 = vld [vmem:[%s19798_s16 + $0x1458] sm:$0xff] }
 0x7a5   :  { %8724 = vmatpush2.msra.mxu0 %v11307_v17  ;;  %8905 = vmatpush1.msra.mxu1 %v11378_v5  ;;  %v11446_v17 = vld [vmem:[%s19798_s16 + $0x1680] sm:$0xff]  ;;  %v11376_v5 = vld [vmem:[%s19798_s16 + $0x1450] sm:$0xff] }
 0x7a6   :  { %8725 = vmatprep.subr.mxu0 %v11304_v62  ;;  %8906 = vmatprep.subr.mxu1 %v11375_v0  ;;  %v11443_v62 = vld [vmem:[%s19798_s16 + $0x1668] sm:$0xff]  ;;  %v11373_v0 = vld [vmem:[%s19798_s16 + $0x1438] sm:$0xff] }
 0x7a7   :  { %8726 = vmatpush2.msra.mxu0 %v11303_v7  ;;  %8907 = vmatpush1.msra.mxu1 %v11374_v42  ;;  %v11442_v7 = vld [vmem:[%s19798_s16 + $0x1660] sm:$0xff]  ;;  %v11372_v42 = vld [vmem:[%s19798_s16 + $0x1430] sm:$0xff] }
 0x7a8   :  { %8728 = vmatmul.mubr.f32.vlgmr.msra.gmra.mxu0 %v17775_v16  ;;  %8908 = vmatprep.subr.mxu1 %v11371_v26  ;;  %v11491_v16 = vld [vmem:[%s19798_s16 + $0x17e8] sm:$0xff] }
 0x7a9   :  { %8951 = vmatprep.subr.mxu0 %v11429_v10  ;;  %8909 = vmatpush1.msra.mxu1 %v11370_v12  ;;  %v11439_v26 = vld [vmem:[%s19798_s16 + $0x1648] sm:$0xff]  ;;  %v11369_v10 = vld [vmem:[%s19798_s16 + $0x1418] sm:$0xff]  ;;  %v11438_v12 = vld [vmem:[%s19798_s16 + $0x1640] sm:$0xff] }
 0x7aa   :  { %8952 = vmatpush1.msra.mxu0 %v11428_v40  ;;  %8910 = vmatprep.subr.mxu1 %v11367_v41  ;;  %v11368_v40 = vld [vmem:[%s19798_s16 + $0x1410] sm:$0xff]  ;;  %v18201_v41 = vld.sshfl [vmem:[#allocation7 + $0x14] sm:$0x33 pattern:$0x76325410] }
 0x7ab   :  { %8953 = vmatprep.subr.mxu0 %v11425_v43  ;;  %8911 = vmatpush1.msra.mxu1 %v11366_v59  ;;  %v11435_v43 = vld [vmem:[%s19798_s16 + $0x1628] sm:$0xff]  ;;  %v11493_v59 = vld [vmem:[%s19798_s16 + $0x17f8] sm:$0xff] }
 0x7ac   :  { %8954 = vmatpush1.msra.mxu0 %v11424_v3  ;;  %8912 = vmatprep.subr.mxu1 %v11491_v16  ;;  %v11434_v3 = vld [vmem:[%s19798_s16 + $0x1620] sm:$0xff]  ;;  %v11492_v16 = vld [vmem:[%s19798_s16 + $0x17f0] sm:$0xff] }
 0x7ad   :  { %8955 = vmatprep.subr.mxu0 %v11421_v44  ;;  %8913 = vmatpush2.msra.mxu1 %v11490_v47  ;;  %v11431_v44 = vld [vmem:[%s19798_s16 + $0x1608] sm:$0xff]  ;;  %v11489_v47 = vld [vmem:[%s19798_s16 + $0x17d8] sm:$0xff] }
 0x7ae   :  { %8956 = vmatpush1.msra.mxu0 %v11420_v56  ;;  %8914 = vmatprep.subr.mxu1 %v11487_v54  ;;  %v18223_v56 = vcombine.high %v18201_v41, %v18201_v41  ;;  %v11430_v54 = vld [vmem:[%s19798_s16 + $0x1600] sm:$0xff] }
 0x7af   :  { %8957 = vmatprep.subr.mxu0 %v11417_v51  ;;  %8915 = vmatpush2.msra.mxu1 %v11486_v53  ;;  %v11488_v51 = vld [vmem:[%s19798_s16 + $0x17d0] sm:$0xff]  ;;  %v11485_v53 = vld [vmem:[%s19798_s16 + $0x17b8] sm:$0xff] }
 0x7b0   :  { %8958 = vmatpush1.msra.mxu0 %v11416_v55  ;;  %8916 = vmatprep.subr.mxu1 %v11483_v13  ;;  %v11556_v55 = vld [vmem:[%s19798_s16 + $0x19e8] sm:$0xff]  ;;  %v11484_v13 = vld [vmem:[%s19798_s16 + $0x17b0] sm:$0xff] }
 0x7b1   :  { %8959 = vmatprep.subr.mxu0 %v11413_v14  ;;  %8917 = vmatpush2.msra.mxu1 %v11482_v21  ;;  %v11555_v14 = vld [vmem:[%s19798_s16 + $0x19e0] sm:$0xff]  ;;  %v11481_v21 = vld [vmem:[%s19798_s16 + $0x1798] sm:$0xff] }
 0x7b2   :  { %8960 = vmatpush1.msra.mxu0 %v11412_v27  ;;  %8918 = vmatprep.subr.mxu1 %v11479_v9  ;;  %v11552_v27 = vld [vmem:[%s19798_s16 + $0x19c8] sm:$0xff]  ;;  %v11480_v9 = vld [vmem:[%s19798_s16 + $0x1790] sm:$0xff] }
 0x7b3   :  { %8961 = vmatprep.subr.mxu0 %v11409_v29  ;;  %8919 = vmatpush2.msra.mxu1 %v11478_v15  ;;  %v11551_v29 = vld [vmem:[%s19798_s16 + $0x19c0] sm:$0xff]  ;;  %v11477_v15 = vld [vmem:[%s19798_s16 + $0x1778] sm:$0xff] }
 0x7b4   :  { %8962 = vmatpush1.msra.mxu0 %v11408_v23  ;;  %8920 = vmatprep.subr.mxu1 %v11475_v25  ;;  %v11548_v23 = vld [vmem:[%s19798_s16 + $0x19a8] sm:$0xff]  ;;  %v11476_v25 = vld [vmem:[%s19798_s16 + $0x1770] sm:$0xff] }
 0x7b5   :  { %8963 = vmatprep.subr.mxu0 %v11405_v31  ;;  %8921 = vmatpush2.msra.mxu1 %v11474_v61  ;;  %v11547_v31 = vld [vmem:[%s19798_s16 + $0x19a0] sm:$0xff]  ;;  %v11473_v61 = vld [vmem:[%s19798_s16 + $0x1758] sm:$0xff] }
 0x7b6   :  { %8964 = vmatpush1.msra.mxu0 %v11404_v32  ;;  %8922 = vmatprep.subr.mxu1 %v11471_v45  ;;  %v11544_v32 = vld [vmem:[%s19798_s16 + $0x1988] sm:$0xff]  ;;  %v11472_v45 = vld [vmem:[%s19798_s16 + $0x1750] sm:$0xff] }
 0x7b7   :  { %8965 = vmatprep.subr.mxu0 %v11401_v2  ;;  %8923 = vmatpush2.msra.mxu1 %v11470_v8  ;;  %v11543_v2 = vld [vmem:[%s19798_s16 + $0x1980] sm:$0xff]  ;;  %v11469_v8 = vld [vmem:[%s19798_s16 + $0x1738] sm:$0xff] }
 0x7b8   :  { %8966 = vmatpush1.msra.mxu0 %v11400_v58  ;;  %8924 = vmatprep.subr.mxu1 %v11467_v49  ;;  %v11540_v58 = vld [vmem:[%s19798_s16 + $0x1968] sm:$0xff]  ;;  %v11468_v49 = vld [vmem:[%s19798_s16 + $0x1730] sm:$0xff] }
 0x7b9   :  { %8967 = vmatprep.subr.mxu0 %v11397_v1  ;;  %8925 = vmatpush2.msra.mxu1 %v11466_v33  ;;  %v11539_v1 = vld [vmem:[%s19798_s16 + $0x1960] sm:$0xff]  ;;  %v11465_v33 = vld [vmem:[%s19798_s16 + $0x1718] sm:$0xff] }
 0x7ba   :  { %8968 = vmatpush1.msra.mxu0 %v11396_v39  ;;  %8926 = vmatprep.subr.mxu1 %v11463_v37  ;;  %v11536_v39 = vld [vmem:[%s19798_s16 + $0x1948] sm:$0xff]  ;;  %v11464_v37 = vld [vmem:[%s19798_s16 + $0x1710] sm:$0xff] }
 0x7bb   :  { %8969 = vmatprep.subr.mxu0 %v11393_v4  ;;  %8927 = vmatpush2.msra.mxu1 %v11462_v11  ;;  %v11535_v4 = vld [vmem:[%s19798_s16 + $0x1940] sm:$0xff]  ;;  %v11461_v11 = vld [vmem:[%s19798_s16 + $0x16f8] sm:$0xff] }
 0x7bc   :  { %8970 = vmatpush1.msra.mxu0 %v11392_v35  ;;  %8928 = vmatprep.subr.mxu1 %v11459_v18  ;;  %v11532_v35 = vld [vmem:[%s19798_s16 + $0x1928] sm:$0xff]  ;;  %v11460_v18 = vld [vmem:[%s19798_s16 + $0x16f0] sm:$0xff] }
 0x7bd   :  { %8971 = vmatprep.subr.mxu0 %v11389_v36  ;;  %8929 = vmatpush2.msra.mxu1 %v11458_v63  ;;  %v11531_v36 = vld [vmem:[%s19798_s16 + $0x1920] sm:$0xff]  ;;  %v11457_v63 = vld [vmem:[%s19798_s16 + $0x16d8] sm:$0xff] }
 0x7be   :  { %8972 = vmatpush1.msra.mxu0 %v11388_v19  ;;  %8930 = vmatprep.subr.mxu1 %v11455_v57  ;;  %v11528_v19 = vld [vmem:[%s19798_s16 + $0x1908] sm:$0xff]  ;;  %v11456_v57 = vld [vmem:[%s19798_s16 + $0x16d0] sm:$0xff] }
 0x7bf   :  { %8973 = vmatprep.subr.mxu0 %v11385_v20  ;;  %8931 = vmatpush2.msra.mxu1 %v11454_v46  ;;  %v11527_v20 = vld [vmem:[%s19798_s16 + $0x1900] sm:$0xff]  ;;  %v11453_v46 = vld [vmem:[%s19798_s16 + $0x16b8] sm:$0xff] }
 0x7c0   :  { %8974 = vmatpush1.msra.mxu0 %v11384_v30  ;;  %8932 = vmatprep.subr.mxu1 %v11451_v28  ;;  %v11524_v30 = vld [vmem:[%s19798_s16 + $0x18e8] sm:$0xff]  ;;  %v11452_v28 = vld [vmem:[%s19798_s16 + $0x16b0] sm:$0xff] }
 0x7c1   :  { %8975 = vmatprep.subr.mxu0 %v11381_v50  ;;  %8933 = vmatpush2.msra.mxu1 %v11450_v22  ;;  %v11523_v50 = vld [vmem:[%s19798_s16 + $0x18e0] sm:$0xff]  ;;  %v11449_v22 = vld [vmem:[%s19798_s16 + $0x1698] sm:$0xff] }
 0x7c2   :  { %8976 = vmatpush1.msra.mxu0 %v11380_v6  ;;  %8934 = vmatprep.subr.mxu1 %v11447_v52  ;;  %v11520_v6 = vld [vmem:[%s19798_s16 + $0x18c8] sm:$0xff]  ;;  %v11448_v52 = vld [vmem:[%s19798_s16 + $0x1690] sm:$0xff] }
 0x7c3   :  { %8977 = vmatprep.subr.mxu0 %v11377_v60  ;;  %8935 = vmatpush2.msra.mxu1 %v11446_v17  ;;  %v11519_v60 = vld [vmem:[%s19798_s16 + $0x18c0] sm:$0xff]  ;;  %v11445_v17 = vld [vmem:[%s19798_s16 + $0x1678] sm:$0xff] }
 0x7c4   :  { %8978 = vmatpush1.msra.mxu0 %v11376_v5  ;;  %8936 = vmatprep.subr.mxu1 %v11443_v62  ;;  %v11516_v5 = vld [vmem:[%s19798_s16 + $0x18a8] sm:$0xff]  ;;  %v11444_v62 = vld [vmem:[%s19798_s16 + $0x1670] sm:$0xff] }
 0x7c5   :  { %8979 = vmatprep.subr.mxu0 %v11373_v0  ;;  %8937 = vmatpush2.msra.mxu1 %v11442_v7  ;;  %v11515_v0 = vld [vmem:[%s19798_s16 + $0x18a0] sm:$0xff]  ;;  %v11441_v7 = vld [vmem:[%s19798_s16 + $0x1658] sm:$0xff] }
 0x7c6   :  { %8980 = vmatpush1.msra.mxu0 %v11372_v42  ;;  %8938 = vmatprep.subr.mxu1 %v11439_v26  ;;  %v11512_v42 = vld [vmem:[%s19798_s16 + $0x1888] sm:$0xff]  ;;  %v11440_v26 = vld [vmem:[%s19798_s16 + $0x1650] sm:$0xff] }
 0x7c7   :  { %8981 = vmatprep.subr.mxu0 %v11369_v10  ;;  %8939 = vmatpush2.msra.mxu1 %v11438_v12  ;;  %v11511_v10 = vld [vmem:[%s19798_s16 + $0x1880] sm:$0xff]  ;;  %v11437_v12 = vld [vmem:[%s19798_s16 + $0x1638] sm:$0xff] }
 0x7c8   :  { %8982 = vmatpush1.msra.mxu0 %v11368_v40  ;;  %8940 = vmatprep.subr.mxu1 %v11435_v43  ;;  %v11508_v40 = vld [vmem:[%s19798_s16 + $0x1868] sm:$0xff]  ;;  %v11436_v43 = vld [vmem:[%s19798_s16 + $0x1630] sm:$0xff] }
 0x7c9   :  { %8983 = vmatprep.subr.mxu0 %v11493_v59  ;;  %8941 = vmatpush2.msra.mxu1 %v11434_v3  ;;  %v11507_v59 = vld [vmem:[%s19798_s16 + $0x1860] sm:$0xff]  ;;  %v11433_v3 = vld [vmem:[%s19798_s16 + $0x1618] sm:$0xff] }
 0x7ca   :  { %8984 = vmatpush2.msra.mxu0 %v11492_v16  ;;  %8942 = vmatprep.subr.mxu1 %v11431_v44  ;;  %v11504_v16 = vld [vmem:[%s19798_s16 + $0x1848] sm:$0xff]  ;;  %v11432_v44 = vld [vmem:[%s19798_s16 + $0x1610] sm:$0xff] }
 0x7cb   :  { %8985 = vmatprep.subr.mxu0 %v11489_v47  ;;  %8943 = vmatpush2.msra.mxu1 %v11430_v54  ;;  %v11503_v47 = vld [vmem:[%s19798_s16 + $0x1840] sm:$0xff]  ;;  %v11500_v54 = vld [vmem:[%s19798_s16 + $0x1828] sm:$0xff] }
 0x7cc   :  { %8944 = vmatprep.mubr.f32.mxu1 %v18223_v56  ;;  %8986 = vmatpush2.msra.mxu0 %v11488_v51  ;;  %v11558_v51 = vld [vmem:[%s19798_s16 + $0x19f8] sm:$0xff] }
 0x7cd   :  { %8945 = vmatmul.mubr.f32.vlgmr.msra.gmra.mxu1 %v18201_v41  ;;  %8987 = vmatprep.subr.mxu0 %v11485_v53  ;;  %v11499_v53 = vld [vmem:[%s19798_s16 + $0x1820] sm:$0xff] }
 0x7ce   :  { %9168 = vmatprep.subr.mxu1 %v11556_v55  ;;  %8988 = vmatpush2.msra.mxu0 %v11484_v13  ;;  %v11557_v55 = vld [vmem:[%s19798_s16 + $0x19f0] sm:$0xff]  ;;  %v11496_v13 = vld [vmem:[%s19798_s16 + $0x1808] sm:$0xff] }
 0x7cf   :  { %9169 = vmatpush1.msra.mxu1 %v11555_v14  ;;  %8989 = vmatprep.subr.mxu0 %v11481_v21  ;;  %v11554_v14 = vld [vmem:[%s19798_s16 + $0x19d8] sm:$0xff]  ;;  %v11553_v21 = vld [vmem:[%s19798_s16 + $0x19d0] sm:$0xff] }
 0x7d0   :  { %9170 = vmatprep.subr.mxu1 %v11552_v27  ;;  %8990 = vmatpush2.msra.mxu0 %v11480_v9  ;;  %v11550_v27 = vld [vmem:[%s19798_s16 + $0x19b8] sm:$0xff]  ;;  %v11619_v9 = vld [vmem:[%s19798_s16 + $0x1be0] sm:$0xff] }
 0x7d1   :  { %9171 = vmatpush1.msra.mxu1 %v11551_v29  ;;  %8991 = vmatprep.subr.mxu0 %v11477_v15  ;;  %v11549_v29 = vld [vmem:[%s19798_s16 + $0x19b0] sm:$0xff]  ;;  %v11616_v15 = vld [vmem:[%s19798_s16 + $0x1bc8] sm:$0xff] }
 0x7d2   :  { %9172 = vmatprep.subr.mxu1 %v11548_v23  ;;  %8992 = vmatpush2.msra.mxu0 %v11476_v25  ;;  %v11546_v23 = vld [vmem:[%s19798_s16 + $0x1998] sm:$0xff]  ;;  %v11615_v25 = vld [vmem:[%s19798_s16 + $0x1bc0] sm:$0xff] }
 0x7d3   :  { %9173 = vmatpush1.msra.mxu1 %v11547_v31  ;;  %8993 = vmatprep.subr.mxu0 %v11473_v61  ;;  %v11545_v31 = vld [vmem:[%s19798_s16 + $0x1990] sm:$0xff]  ;;  %v11612_v61 = vld [vmem:[%s19798_s16 + $0x1ba8] sm:$0xff] }
 0x7d4   :  { %9174 = vmatprep.subr.mxu1 %v11544_v32  ;;  %8994 = vmatpush2.msra.mxu0 %v11472_v45  ;;  %v11542_v32 = vld [vmem:[%s19798_s16 + $0x1978] sm:$0xff]  ;;  %v11611_v45 = vld [vmem:[%s19798_s16 + $0x1ba0] sm:$0xff] }
 0x7d5   :  { %9175 = vmatpush1.msra.mxu1 %v11543_v2  ;;  %8995 = vmatprep.subr.mxu0 %v11469_v8  ;;  %v11541_v2 = vld [vmem:[%s19798_s16 + $0x1970] sm:$0xff]  ;;  %v11608_v8 = vld [vmem:[%s19798_s16 + $0x1b88] sm:$0xff] }
 0x7d6   :  { %9176 = vmatprep.subr.mxu1 %v11540_v58  ;;  %8996 = vmatpush2.msra.mxu0 %v11468_v49  ;;  %v11538_v58 = vld [vmem:[%s19798_s16 + $0x1958] sm:$0xff]  ;;  %v11607_v49 = vld [vmem:[%s19798_s16 + $0x1b80] sm:$0xff] }
 0x7d7   :  { %9177 = vmatpush1.msra.mxu1 %v11539_v1  ;;  %8997 = vmatprep.subr.mxu0 %v11465_v33  ;;  %v11537_v1 = vld [vmem:[%s19798_s16 + $0x1950] sm:$0xff]  ;;  %v11604_v33 = vld [vmem:[%s19798_s16 + $0x1b68] sm:$0xff] }
 0x7d8   :  { %9178 = vmatprep.subr.mxu1 %v11536_v39  ;;  %8998 = vmatpush2.msra.mxu0 %v11464_v37  ;;  %v11534_v39 = vld [vmem:[%s19798_s16 + $0x1938] sm:$0xff]  ;;  %v11603_v37 = vld [vmem:[%s19798_s16 + $0x1b60] sm:$0xff] }
 0x7d9   :  { %9179 = vmatpush1.msra.mxu1 %v11535_v4  ;;  %8999 = vmatprep.subr.mxu0 %v11461_v11  ;;  %v11533_v4 = vld [vmem:[%s19798_s16 + $0x1930] sm:$0xff]  ;;  %v11600_v11 = vld [vmem:[%s19798_s16 + $0x1b48] sm:$0xff] }
 0x7da   :  { %9180 = vmatprep.subr.mxu1 %v11532_v35  ;;  %9000 = vmatpush2.msra.mxu0 %v11460_v18  ;;  %v11530_v35 = vld [vmem:[%s19798_s16 + $0x1918] sm:$0xff]  ;;  %v11599_v18 = vld [vmem:[%s19798_s16 + $0x1b40] sm:$0xff] }
 0x7db   :  { %9181 = vmatpush1.msra.mxu1 %v11531_v36  ;;  %9001 = vmatprep.subr.mxu0 %v11457_v63  ;;  %v11529_v36 = vld [vmem:[%s19798_s16 + $0x1910] sm:$0xff]  ;;  %v11596_v63 = vld [vmem:[%s19798_s16 + $0x1b28] sm:$0xff] }
 0x7dc   :  { %9182 = vmatprep.subr.mxu1 %v11528_v19  ;;  %9002 = vmatpush2.msra.mxu0 %v11456_v57  ;;  %v11526_v19 = vld [vmem:[%s19798_s16 + $0x18f8] sm:$0xff]  ;;  %v11595_v57 = vld [vmem:[%s19798_s16 + $0x1b20] sm:$0xff] }
 0x7dd   :  { %9183 = vmatpush1.msra.mxu1 %v11527_v20  ;;  %9003 = vmatprep.subr.mxu0 %v11453_v46  ;;  %v11525_v20 = vld [vmem:[%s19798_s16 + $0x18f0] sm:$0xff]  ;;  %v11592_v46 = vld [vmem:[%s19798_s16 + $0x1b08] sm:$0xff] }
 0x7de   :  { %9184 = vmatprep.subr.mxu1 %v11524_v30  ;;  %9004 = vmatpush2.msra.mxu0 %v11452_v28  ;;  %v11522_v30 = vld [vmem:[%s19798_s16 + $0x18d8] sm:$0xff]  ;;  %v11591_v28 = vld [vmem:[%s19798_s16 + $0x1b00] sm:$0xff] }
 0x7df   :  { %9185 = vmatpush1.msra.mxu1 %v11523_v50  ;;  %9005 = vmatprep.subr.mxu0 %v11449_v22  ;;  %v11521_v50 = vld [vmem:[%s19798_s16 + $0x18d0] sm:$0xff]  ;;  %v11588_v22 = vld [vmem:[%s19798_s16 + $0x1ae8] sm:$0xff] }
 0x7e0   :  { %9186 = vmatprep.subr.mxu1 %v11520_v6  ;;  %9006 = vmatpush2.msra.mxu0 %v11448_v52  ;;  %v11518_v6 = vld [vmem:[%s19798_s16 + $0x18b8] sm:$0xff]  ;;  %v11587_v52 = vld [vmem:[%s19798_s16 + $0x1ae0] sm:$0xff] }
 0x7e1   :  { %9187 = vmatpush1.msra.mxu1 %v11519_v60  ;;  %9007 = vmatprep.subr.mxu0 %v11445_v17  ;;  %v11517_v60 = vld [vmem:[%s19798_s16 + $0x18b0] sm:$0xff]  ;;  %v11584_v17 = vld [vmem:[%s19798_s16 + $0x1ac8] sm:$0xff] }
 0x7e2   :  { %9188 = vmatprep.subr.mxu1 %v11516_v5  ;;  %9008 = vmatpush2.msra.mxu0 %v11444_v62  ;;  %v11514_v5 = vld [vmem:[%s19798_s16 + $0x1898] sm:$0xff]  ;;  %v11583_v62 = vld [vmem:[%s19798_s16 + $0x1ac0] sm:$0xff] }
 0x7e3   :  { %9189 = vmatpush1.msra.mxu1 %v11515_v0  ;;  %9009 = vmatprep.subr.mxu0 %v11441_v7  ;;  %v11513_v0 = vld [vmem:[%s19798_s16 + $0x1890] sm:$0xff]  ;;  %v11580_v7 = vld [vmem:[%s19798_s16 + $0x1aa8] sm:$0xff] }
 0x7e4   :  { %9190 = vmatprep.subr.mxu1 %v11512_v42  ;;  %9010 = vmatpush2.msra.mxu0 %v11440_v26  ;;  %v11510_v42 = vld [vmem:[%s19798_s16 + $0x1878] sm:$0xff]  ;;  %v11579_v26 = vld [vmem:[%s19798_s16 + $0x1aa0] sm:$0xff] }
 0x7e5   :  { %9191 = vmatpush1.msra.mxu1 %v11511_v10  ;;  %9011 = vmatprep.subr.mxu0 %v11437_v12  ;;  %v11509_v10 = vld [vmem:[%s19798_s16 + $0x1870] sm:$0xff]  ;;  %v11576_v12 = vld [vmem:[%s19798_s16 + $0x1a88] sm:$0xff] }
 0x7e6   :  { %9192 = vmatprep.subr.mxu1 %v11508_v40  ;;  %9012 = vmatpush2.msra.mxu0 %v11436_v43  ;;  %v11506_v40 = vld [vmem:[%s19798_s16 + $0x1858] sm:$0xff]  ;;  %v11575_v43 = vld [vmem:[%s19798_s16 + $0x1a80] sm:$0xff] }
 0x7e7   :  { %9193 = vmatpush1.msra.mxu1 %v11507_v59  ;;  %9013 = vmatprep.subr.mxu0 %v11433_v3  ;;  %v11505_v59 = vld [vmem:[%s19798_s16 + $0x1850] sm:$0xff]  ;;  %v11572_v3 = vld [vmem:[%s19798_s16 + $0x1a68] sm:$0xff] }
 0x7e8   :  { %9194 = vmatprep.subr.mxu1 %v11504_v16  ;;  %9014 = vmatpush2.msra.mxu0 %v11432_v44  ;;  %v11502_v16 = vld [vmem:[%s19798_s16 + $0x1838] sm:$0xff]  ;;  %v11571_v44 = vld [vmem:[%s19798_s16 + $0x1a60] sm:$0xff] }
 0x7e9   :  { %9015 = vmatprep.mubr.f32.mxu0 %v18223_v56  ;;  %9195 = vmatpush1.msra.mxu1 %v11503_v47  ;;  %v11495_v56 = vld [vmem:[%s19798_s16 + $0x1800] sm:$0xff]  ;;  %v11501_v47 = vld [vmem:[%s19798_s16 + $0x1830] sm:$0xff] }
 0x7ea   :  { %9016 = vmatmul.mubr.f32.vlgmr.msra.gmra.mxu0 %v18201_v41  ;;  %9196 = vmatprep.subr.mxu1 %v11500_v54  ;;  %v11620_v41 = vld [vmem:[%s19798_s16 + $0x1be8] sm:$0xff] }
 0x7eb   :  { %9239 = vmatprep.subr.mxu0 %v11558_v51  ;;  %9197 = vmatpush1.msra.mxu1 %v11499_v53  ;;  %v11568_v54 = vld [vmem:[%s19798_s16 + $0x1a48] sm:$0xff]  ;;  %v11498_v51 = vld [vmem:[%s19798_s16 + $0x1818] sm:$0xff]  ;;  %v11567_v53 = vld [vmem:[%s19798_s16 + $0x1a40] sm:$0xff] }
 0x7ec   :  { %9240 = vmatpush1.msra.mxu0 %v11557_v55  ;;  %9198 = vmatprep.subr.mxu1 %v11496_v13  ;;  %v11497_v55 = vld [vmem:[%s19798_s16 + $0x1810] sm:$0xff] }
 0x7ed   :  { %9241 = vmatprep.subr.mxu0 %v11554_v14  ;;  %9199 = vmatpush1.msra.mxu1 %v11495_v56  ;;  %v18595_v13 = vld.sshfl [vmem:[#allocation7 + $0x18] sm:$0x33 pattern:$0x76325410]  ;;  %v11564_v14 = vld [vmem:[%s19798_s16 + $0x1a28] sm:$0xff]  ;;  %v11622_v56 = vld [vmem:[%s19798_s16 + $0x1bf8] sm:$0xff] }
 0x7ee   :  { %9242 = vmatpush1.msra.mxu0 %v11553_v21  ;;  %9200 = vmatprep.subr.mxu1 %v11620_v41  ;;  %v11563_v21 = vld [vmem:[%s19798_s16 + $0x1a20] sm:$0xff]  ;;  %v11621_v41 = vld [vmem:[%s19798_s16 + $0x1bf0] sm:$0xff] }
 0x7ef   :  { %9243 = vmatprep.subr.mxu0 %v11550_v27  ;;  %9201 = vmatpush2.msra.mxu1 %v11619_v9  ;;  %v11560_v27 = vld [vmem:[%s19798_s16 + $0x1a08] sm:$0xff]  ;;  %v11618_v9 = vld [vmem:[%s19798_s16 + $0x1bd8] sm:$0xff] }
 0x7f0   :  { %9244 = vmatpush1.msra.mxu0 %v11549_v29  ;;  %9202 = vmatprep.subr.mxu1 %v11616_v15  ;;  %v18617_v29 = vcombine.high %v18595_v13, %v18595_v13  ;;  %v11559_v15 = vld [vmem:[%s19798_s16 + $0x1a00] sm:$0xff] }
 0x7f1   :  { %9245 = vmatprep.subr.mxu0 %v11546_v23  ;;  %9203 = vmatpush2.msra.mxu1 %v11615_v25  ;;  %v11617_v23 = vld [vmem:[%s19798_s16 + $0x1bd0] sm:$0xff]  ;;  %v11614_v25 = vld [vmem:[%s19798_s16 + $0x1bb8] sm:$0xff] }
 0x7f2   :  { %9246 = vmatpush1.msra.mxu0 %v11545_v31  ;;  %9204 = vmatprep.subr.mxu1 %v11612_v61  ;;  %v11685_v31 = vld [vmem:[%s19798_s16 + $0x1de8] sm:$0xff]  ;;  %v11613_v61 = vld [vmem:[%s19798_s16 + $0x1bb0] sm:$0xff] }
 0x7f3   :  { %9247 = vmatprep.subr.mxu0 %v11542_v32  ;;  %9205 = vmatpush2.msra.mxu1 %v11611_v45  ;;  %v11684_v32 = vld [vmem:[%s19798_s16 + $0x1de0] sm:$0xff]  ;;  %v11610_v45 = vld [vmem:[%s19798_s16 + $0x1b98] sm:$0xff] }
 0x7f4   :  { %9248 = vmatpush1.msra.mxu0 %v11541_v2  ;;  %9206 = vmatprep.subr.mxu1 %v11608_v8  ;;  %v11681_v2 = vld [vmem:[%s19798_s16 + $0x1dc8] sm:$0xff]  ;;  %v11609_v8 = vld [vmem:[%s19798_s16 + $0x1b90] sm:$0xff] }
 0x7f5   :  { %9249 = vmatprep.subr.mxu0 %v11538_v58  ;;  %9207 = vmatpush2.msra.mxu1 %v11607_v49  ;;  %v11680_v58 = vld [vmem:[%s19798_s16 + $0x1dc0] sm:$0xff]  ;;  %v11606_v49 = vld [vmem:[%s19798_s16 + $0x1b78] sm:$0xff] }
 0x7f6   :  { %9250 = vmatpush1.msra.mxu0 %v11537_v1  ;;  %9208 = vmatprep.subr.mxu1 %v11604_v33  ;;  %v11677_v1 = vld [vmem:[%s19798_s16 + $0x1da8] sm:$0xff]  ;;  %v11605_v33 = vld [vmem:[%s19798_s16 + $0x1b70] sm:$0xff] }
 0x7f7   :  { %9251 = vmatprep.subr.mxu0 %v11534_v39  ;;  %9209 = vmatpush2.msra.mxu1 %v11603_v37  ;;  %v11676_v39 = vld [vmem:[%s19798_s16 + $0x1da0] sm:$0xff]  ;;  %v11602_v37 = vld [vmem:[%s19798_s16 + $0x1b58] sm:$0xff] }
 0x7f8   :  { %9252 = vmatpush1.msra.mxu0 %v11533_v4  ;;  %9210 = vmatprep.subr.mxu1 %v11600_v11  ;;  %v11673_v4 = vld [vmem:[%s19798_s16 + $0x1d88] sm:$0xff]  ;;  %v11601_v11 = vld [vmem:[%s19798_s16 + $0x1b50] sm:$0xff] }
 0x7f9   :  { %9253 = vmatprep.subr.mxu0 %v11530_v35  ;;  %9211 = vmatpush2.msra.mxu1 %v11599_v18  ;;  %v11672_v35 = vld [vmem:[%s19798_s16 + $0x1d80] sm:$0xff]  ;;  %v11598_v18 = vld [vmem:[%s19798_s16 + $0x1b38] sm:$0xff] }
 0x7fa   :  { %9254 = vmatpush1.msra.mxu0 %v11529_v36  ;;  %9212 = vmatprep.subr.mxu1 %v11596_v63  ;;  %v11669_v36 = vld [vmem:[%s19798_s16 + $0x1d68] sm:$0xff]  ;;  %v11597_v63 = vld [vmem:[%s19798_s16 + $0x1b30] sm:$0xff] }
 0x7fb   :  { %9255 = vmatprep.subr.mxu0 %v11526_v19  ;;  %9213 = vmatpush2.msra.mxu1 %v11595_v57  ;;  %v11668_v19 = vld [vmem:[%s19798_s16 + $0x1d60] sm:$0xff]  ;;  %v11594_v57 = vld [vmem:[%s19798_s16 + $0x1b18] sm:$0xff] }
 0x7fc   :  { %9256 = vmatpush1.msra.mxu0 %v11525_v20  ;;  %9214 = vmatprep.subr.mxu1 %v11592_v46  ;;  %v11665_v20 = vld [vmem:[%s19798_s16 + $0x1d48] sm:$0xff]  ;;  %v11593_v46 = vld [vmem:[%s19798_s16 + $0x1b10] sm:$0xff] }
 0x7fd   :  { %9257 = vmatprep.subr.mxu0 %v11522_v30  ;;  %9215 = vmatpush2.msra.mxu1 %v11591_v28  ;;  %v11664_v30 = vld [vmem:[%s19798_s16 + $0x1d40] sm:$0xff]  ;;  %v11590_v28 = vld [vmem:[%s19798_s16 + $0x1af8] sm:$0xff] }
 0x7fe   :  { %9258 = vmatpush1.msra.mxu0 %v11521_v50  ;;  %9216 = vmatprep.subr.mxu1 %v11588_v22  ;;  %v11661_v50 = vld [vmem:[%s19798_s16 + $0x1d28] sm:$0xff]  ;;  %v11589_v22 = vld [vmem:[%s19798_s16 + $0x1af0] sm:$0xff] }
 0x7ff   :  { %9259 = vmatprep.subr.mxu0 %v11518_v6  ;;  %9217 = vmatpush2.msra.mxu1 %v11587_v52  ;;  %v11660_v6 = vld [vmem:[%s19798_s16 + $0x1d20] sm:$0xff]  ;;  %v11586_v52 = vld [vmem:[%s19798_s16 + $0x1ad8] sm:$0xff] }
 0x800   :  { %9260 = vmatpush1.msra.mxu0 %v11517_v60  ;;  %9218 = vmatprep.subr.mxu1 %v11584_v17  ;;  %v11657_v60 = vld [vmem:[%s19798_s16 + $0x1d08] sm:$0xff]  ;;  %v11585_v17 = vld [vmem:[%s19798_s16 + $0x1ad0] sm:$0xff] }
 0x801   :  { %9261 = vmatprep.subr.mxu0 %v11514_v5  ;;  %9219 = vmatpush2.msra.mxu1 %v11583_v62  ;;  %v11656_v5 = vld [vmem:[%s19798_s16 + $0x1d00] sm:$0xff]  ;;  %v11582_v62 = vld [vmem:[%s19798_s16 + $0x1ab8] sm:$0xff] }
 0x802   :  { %9262 = vmatpush1.msra.mxu0 %v11513_v0  ;;  %9220 = vmatprep.subr.mxu1 %v11580_v7  ;;  %v11653_v0 = vld [vmem:[%s19798_s16 + $0x1ce8] sm:$0xff]  ;;  %v11581_v7 = vld [vmem:[%s19798_s16 + $0x1ab0] sm:$0xff] }
 0x803   :  { %9263 = vmatprep.subr.mxu0 %v11510_v42  ;;  %9221 = vmatpush2.msra.mxu1 %v11579_v26  ;;  %v11652_v42 = vld [vmem:[%s19798_s16 + $0x1ce0] sm:$0xff]  ;;  %v11578_v26 = vld [vmem:[%s19798_s16 + $0x1a98] sm:$0xff] }
 0x804   :  { %9264 = vmatpush1.msra.mxu0 %v11509_v10  ;;  %9222 = vmatprep.subr.mxu1 %v11576_v12  ;;  %v11649_v10 = vld [vmem:[%s19798_s16 + $0x1cc8] sm:$0xff]  ;;  %v11577_v12 = vld [vmem:[%s19798_s16 + $0x1a90] sm:$0xff] }
 0x805   :  { %9265 = vmatprep.subr.mxu0 %v11506_v40  ;;  %9223 = vmatpush2.msra.mxu1 %v11575_v43  ;;  %v11648_v40 = vld [vmem:[%s19798_s16 + $0x1cc0] sm:$0xff]  ;;  %v11574_v43 = vld [vmem:[%s19798_s16 + $0x1a78] sm:$0xff] }
 0x806   :  { %9266 = vmatpush1.msra.mxu0 %v11505_v59  ;;  %9224 = vmatprep.subr.mxu1 %v11572_v3  ;;  %v11645_v59 = vld [vmem:[%s19798_s16 + $0x1ca8] sm:$0xff]  ;;  %v11573_v3 = vld [vmem:[%s19798_s16 + $0x1a70] sm:$0xff] }
 0x807   :  { %9267 = vmatprep.subr.mxu0 %v11502_v16  ;;  %9225 = vmatpush2.msra.mxu1 %v11571_v44  ;;  %v11644_v16 = vld [vmem:[%s19798_s16 + $0x1ca0] sm:$0xff]  ;;  %v11570_v44 = vld [vmem:[%s19798_s16 + $0x1a58] sm:$0xff] }
 0x808   :  { %9268 = vmatpush1.msra.mxu0 %v11501_v47  ;;  %9226 = vmatprep.subr.mxu1 %v11568_v54  ;;  %v11641_v47 = vld [vmem:[%s19798_s16 + $0x1c88] sm:$0xff]  ;;  %v11569_v54 = vld [vmem:[%s19798_s16 + $0x1a50] sm:$0xff] }
 0x809   :  { %9269 = vmatprep.subr.mxu0 %v11498_v51  ;;  %9227 = vmatpush2.msra.mxu1 %v11567_v53  ;;  %v11640_v51 = vld [vmem:[%s19798_s16 + $0x1c80] sm:$0xff]  ;;  %v11566_v53 = vld [vmem:[%s19798_s16 + $0x1a38] sm:$0xff] }
 0x80a   :  { %9270 = vmatpush1.msra.mxu0 %v11497_v55  ;;  %9228 = vmatprep.subr.mxu1 %v11564_v14  ;;  %v11637_v55 = vld [vmem:[%s19798_s16 + $0x1c68] sm:$0xff]  ;;  %v11565_v14 = vld [vmem:[%s19798_s16 + $0x1a30] sm:$0xff] }
 0x80b   :  { %9271 = vmatprep.subr.mxu0 %v11622_v56  ;;  %9229 = vmatpush2.msra.mxu1 %v11563_v21  ;;  %v11636_v56 = vld [vmem:[%s19798_s16 + $0x1c60] sm:$0xff]  ;;  %v11562_v21 = vld [vmem:[%s19798_s16 + $0x1a18] sm:$0xff] }
 0x80c   :  { %9272 = vmatpush2.msra.mxu0 %v11621_v41  ;;  %9230 = vmatprep.subr.mxu1 %v11560_v27  ;;  %v11633_v41 = vld [vmem:[%s19798_s16 + $0x1c48] sm:$0xff]  ;;  %v11561_v27 = vld [vmem:[%s19798_s16 + $0x1a10] sm:$0xff] }
 0x80d   :  { %9273 = vmatprep.subr.mxu0 %v11618_v9  ;;  %9231 = vmatpush2.msra.mxu1 %v11559_v15  ;;  %v11632_v9 = vld [vmem:[%s19798_s16 + $0x1c40] sm:$0xff]  ;;  %v11629_v15 = vld [vmem:[%s19798_s16 + $0x1c28] sm:$0xff] }
 0x80e   :  { %9232 = vmatprep.mubr.f32.mxu1 %v18617_v29  ;;  %9274 = vmatpush2.msra.mxu0 %v11617_v23  ;;  %v11687_v23 = vld [vmem:[%s19798_s16 + $0x1df8] sm:$0xff] }
 0x80f   :  { %9233 = vmatmul.mubr.f32.vlgmr.msra.gmra.mxu1 %v18595_v13  ;;  %9275 = vmatprep.subr.mxu0 %v11614_v25  ;;  %v11628_v25 = vld [vmem:[%s19798_s16 + $0x1c20] sm:$0xff] }
 0x810   :  { %9456 = vmatprep.subr.mxu1 %v11685_v31  ;;  %9276 = vmatpush2.msra.mxu0 %v11613_v61  ;;  %v11686_v31 = vld [vmem:[%s19798_s16 + $0x1df0] sm:$0xff]  ;;  %v11625_v61 = vld [vmem:[%s19798_s16 + $0x1c08] sm:$0xff] }
 0x811   :  { %9457 = vmatpush1.msra.mxu1 %v11684_v32  ;;  %9277 = vmatprep.subr.mxu0 %v11610_v45  ;;  %v11683_v32 = vld [vmem:[%s19798_s16 + $0x1dd8] sm:$0xff]  ;;  %v11682_v45 = vld [vmem:[%s19798_s16 + $0x1dd0] sm:$0xff] }
 0x812   :  { %9458 = vmatprep.subr.mxu1 %v11681_v2  ;;  %9278 = vmatpush2.msra.mxu0 %v11609_v8  ;;  %v11679_v2 = vld [vmem:[%s19798_s16 + $0x1db8] sm:$0xff]  ;;  %v11748_v8 = vld [vmem:[%s19798_s16 + $0x1fe0] sm:$0xff] }
 0x813   :  { %9459 = vmatpush1.msra.mxu1 %v11680_v58  ;;  %9279 = vmatprep.subr.mxu0 %v11606_v49  ;;  %v11678_v58 = vld [vmem:[%s19798_s16 + $0x1db0] sm:$0xff]  ;;  %v11745_v49 = vld [vmem:[%s19798_s16 + $0x1fc8] sm:$0xff] }
 0x814   :  { %9460 = vmatprep.subr.mxu1 %v11677_v1  ;;  %9280 = vmatpush2.msra.mxu0 %v11605_v33  ;;  %v11675_v1 = vld [vmem:[%s19798_s16 + $0x1d98] sm:$0xff]  ;;  %v11744_v33 = vld [vmem:[%s19798_s16 + $0x1fc0] sm:$0xff] }
 0x815   :  { %9461 = vmatpush1.msra.mxu1 %v11676_v39  ;;  %9281 = vmatprep.subr.mxu0 %v11602_v37  ;;  %v11674_v39 = vld [vmem:[%s19798_s16 + $0x1d90] sm:$0xff]  ;;  %v11741_v37 = vld [vmem:[%s19798_s16 + $0x1fa8] sm:$0xff] }
 0x816   :  { %9462 = vmatprep.subr.mxu1 %v11673_v4  ;;  %9282 = vmatpush2.msra.mxu0 %v11601_v11  ;;  %v11671_v4 = vld [vmem:[%s19798_s16 + $0x1d78] sm:$0xff]  ;;  %v11740_v11 = vld [vmem:[%s19798_s16 + $0x1fa0] sm:$0xff] }
 0x817   :  { %9463 = vmatpush1.msra.mxu1 %v11672_v35  ;;  %9283 = vmatprep.subr.mxu0 %v11598_v18  ;;  %v11670_v35 = vld [vmem:[%s19798_s16 + $0x1d70] sm:$0xff]  ;;  %v11737_v18 = vld [vmem:[%s19798_s16 + $0x1f88] sm:$0xff] }
 0x818   :  { %9464 = vmatprep.subr.mxu1 %v11669_v36  ;;  %9284 = vmatpush2.msra.mxu0 %v11597_v63  ;;  %v11667_v36 = vld [vmem:[%s19798_s16 + $0x1d58] sm:$0xff]  ;;  %v11736_v63 = vld [vmem:[%s19798_s16 + $0x1f80] sm:$0xff] }
 0x819   :  { %9465 = vmatpush1.msra.mxu1 %v11668_v19  ;;  %9285 = vmatprep.subr.mxu0 %v11594_v57  ;;  %v11666_v19 = vld [vmem:[%s19798_s16 + $0x1d50] sm:$0xff]  ;;  %v11733_v57 = vld [vmem:[%s19798_s16 + $0x1f68] sm:$0xff] }
 0x81a   :  { %9466 = vmatprep.subr.mxu1 %v11665_v20  ;;  %9286 = vmatpush2.msra.mxu0 %v11593_v46  ;;  %v11663_v20 = vld [vmem:[%s19798_s16 + $0x1d38] sm:$0xff]  ;;  %v11732_v46 = vld [vmem:[%s19798_s16 + $0x1f60] sm:$0xff] }
 0x81b   :  { %9467 = vmatpush1.msra.mxu1 %v11664_v30  ;;  %9287 = vmatprep.subr.mxu0 %v11590_v28  ;;  %v11662_v30 = vld [vmem:[%s19798_s16 + $0x1d30] sm:$0xff]  ;;  %v11729_v28 = vld [vmem:[%s19798_s16 + $0x1f48] sm:$0xff] }
 0x81c   :  { %9468 = vmatprep.subr.mxu1 %v11661_v50  ;;  %9288 = vmatpush2.msra.mxu0 %v11589_v22  ;;  %v11659_v50 = vld [vmem:[%s19798_s16 + $0x1d18] sm:$0xff]  ;;  %v11728_v22 = vld [vmem:[%s19798_s16 + $0x1f40] sm:$0xff] }
 0x81d   :  { %9469 = vmatpush1.msra.mxu1 %v11660_v6  ;;  %9289 = vmatprep.subr.mxu0 %v11586_v52  ;;  %v11658_v6 = vld [vmem:[%s19798_s16 + $0x1d10] sm:$0xff]  ;;  %v11725_v52 = vld [vmem:[%s19798_s16 + $0x1f28] sm:$0xff] }
 0x81e   :  { %9470 = vmatprep.subr.mxu1 %v11657_v60  ;;  %9290 = vmatpush2.msra.mxu0 %v11585_v17  ;;  %v11655_v60 = vld [vmem:[%s19798_s16 + $0x1cf8] sm:$0xff]  ;;  %v11724_v17 = vld [vmem:[%s19798_s16 + $0x1f20] sm:$0xff] }
 0x81f   :  { %9471 = vmatpush1.msra.mxu1 %v11656_v5  ;;  %9291 = vmatprep.subr.mxu0 %v11582_v62  ;;  %v11654_v5 = vld [vmem:[%s19798_s16 + $0x1cf0] sm:$0xff]  ;;  %v11721_v62 = vld [vmem:[%s19798_s16 + $0x1f08] sm:$0xff] }
 0x820   :  { %9472 = vmatprep.subr.mxu1 %v11653_v0  ;;  %9292 = vmatpush2.msra.mxu0 %v11581_v7  ;;  %v11651_v0 = vld [vmem:[%s19798_s16 + $0x1cd8] sm:$0xff]  ;;  %v11720_v7 = vld [vmem:[%s19798_s16 + $0x1f00] sm:$0xff] }
 0x821   :  { %9473 = vmatpush1.msra.mxu1 %v11652_v42  ;;  %9293 = vmatprep.subr.mxu0 %v11578_v26  ;;  %v11650_v42 = vld [vmem:[%s19798_s16 + $0x1cd0] sm:$0xff]  ;;  %v11717_v26 = vld [vmem:[%s19798_s16 + $0x1ee8] sm:$0xff] }
 0x822   :  { %9474 = vmatprep.subr.mxu1 %v11649_v10  ;;  %9294 = vmatpush2.msra.mxu0 %v11577_v12  ;;  %v11647_v10 = vld [vmem:[%s19798_s16 + $0x1cb8] sm:$0xff]  ;;  %v11716_v12 = vld [vmem:[%s19798_s16 + $0x1ee0] sm:$0xff] }
 0x823   :  { %9475 = vmatpush1.msra.mxu1 %v11648_v40  ;;  %9295 = vmatprep.subr.mxu0 %v11574_v43  ;;  %v11646_v40 = vld [vmem:[%s19798_s16 + $0x1cb0] sm:$0xff]  ;;  %v11713_v43 = vld [vmem:[%s19798_s16 + $0x1ec8] sm:$0xff] }
 0x824   :  { %9476 = vmatprep.subr.mxu1 %v11645_v59  ;;  %9296 = vmatpush2.msra.mxu0 %v11573_v3  ;;  %v11643_v59 = vld [vmem:[%s19798_s16 + $0x1c98] sm:$0xff]  ;;  %v11712_v3 = vld [vmem:[%s19798_s16 + $0x1ec0] sm:$0xff] }
 0x825   :  { %9477 = vmatpush1.msra.mxu1 %v11644_v16  ;;  %9297 = vmatprep.subr.mxu0 %v11570_v44  ;;  %v11642_v16 = vld [vmem:[%s19798_s16 + $0x1c90] sm:$0xff]  ;;  %v11709_v44 = vld [vmem:[%s19798_s16 + $0x1ea8] sm:$0xff] }
 0x826   :  { %9478 = vmatprep.subr.mxu1 %v11641_v47  ;;  %9298 = vmatpush2.msra.mxu0 %v11569_v54  ;;  %v11639_v47 = vld [vmem:[%s19798_s16 + $0x1c78] sm:$0xff]  ;;  %v11708_v54 = vld [vmem:[%s19798_s16 + $0x1ea0] sm:$0xff] }
 0x827   :  { %9479 = vmatpush1.msra.mxu1 %v11640_v51  ;;  %9299 = vmatprep.subr.mxu0 %v11566_v53  ;;  %v11638_v51 = vld [vmem:[%s19798_s16 + $0x1c70] sm:$0xff]  ;;  %v11705_v53 = vld [vmem:[%s19798_s16 + $0x1e88] sm:$0xff] }
 0x828   :  { %9480 = vmatprep.subr.mxu1 %v11637_v55  ;;  %9300 = vmatpush2.msra.mxu0 %v11565_v14  ;;  %v11635_v55 = vld [vmem:[%s19798_s16 + $0x1c58] sm:$0xff]  ;;  %v11704_v14 = vld [vmem:[%s19798_s16 + $0x1e80] sm:$0xff] }
 0x829   :  { %9481 = vmatpush1.msra.mxu1 %v11636_v56  ;;  %9301 = vmatprep.subr.mxu0 %v11562_v21  ;;  %v11634_v56 = vld [vmem:[%s19798_s16 + $0x1c50] sm:$0xff]  ;;  %v11701_v21 = vld [vmem:[%s19798_s16 + $0x1e68] sm:$0xff] }
 0x82a   :  { %9482 = vmatprep.subr.mxu1 %v11633_v41  ;;  %9302 = vmatpush2.msra.mxu0 %v11561_v27  ;;  %v11631_v41 = vld [vmem:[%s19798_s16 + $0x1c38] sm:$0xff]  ;;  %v11700_v27 = vld [vmem:[%s19798_s16 + $0x1e60] sm:$0xff] }
 0x82b   :  { %9303 = vmatprep.mubr.f32.mxu0 %v18617_v29  ;;  %9483 = vmatpush1.msra.mxu1 %v11632_v9  ;;  %v11624_v29 = vld [vmem:[%s19798_s16 + $0x1c00] sm:$0xff]  ;;  %v11630_v9 = vld [vmem:[%s19798_s16 + $0x1c30] sm:$0xff] }
 0x82c   :  { %9304 = vmatmul.mubr.f32.vlgmr.msra.gmra.mxu0 %v18595_v13  ;;  %9484 = vmatprep.subr.mxu1 %v11629_v15  ;;  %v11749_v13 = vld [vmem:[%s19798_s16 + $0x1fe8] sm:$0xff] }
 0x82d   :  { %9527 = vmatprep.subr.mxu0 %v11687_v23  ;;  %9485 = vmatpush1.msra.mxu1 %v11628_v25  ;;  %v11697_v15 = vld [vmem:[%s19798_s16 + $0x1e48] sm:$0xff]  ;;  %v11627_v23 = vld [vmem:[%s19798_s16 + $0x1c18] sm:$0xff]  ;;  %v11696_v25 = vld [vmem:[%s19798_s16 + $0x1e40] sm:$0xff] }
 0x82e   :  { %9528 = vmatpush1.msra.mxu0 %v11686_v31  ;;  %9486 = vmatprep.subr.mxu1 %v11625_v61  ;;  %v11626_v31 = vld [vmem:[%s19798_s16 + $0x1c10] sm:$0xff] }
 0x82f   :  { %9529 = vmatprep.subr.mxu0 %v11683_v32  ;;  %9487 = vmatpush1.msra.mxu1 %v11624_v29  ;;  %v18989_v61 = vld.sshfl [vmem:[#allocation7 + $0x1c] sm:$0x33 pattern:$0x76325410]  ;;  %v11693_v32 = vld [vmem:[%s19798_s16 + $0x1e28] sm:$0xff]  ;;  %v11751_v29 = vld [vmem:[%s19798_s16 + $0x1ff8] sm:$0xff] }
 0x830   :  { %9530 = vmatpush1.msra.mxu0 %v11682_v45  ;;  %9488 = vmatprep.subr.mxu1 %v11749_v13  ;;  %v11692_v45 = vld [vmem:[%s19798_s16 + $0x1e20] sm:$0xff]  ;;  %v11750_v13 = vld [vmem:[%s19798_s16 + $0x1ff0] sm:$0xff] }
 0x831   :  { %9531 = vmatprep.subr.mxu0 %v11679_v2  ;;  %9489 = vmatpush2.msra.mxu1 %v11748_v8  ;;  %v11689_v2 = vld [vmem:[%s19798_s16 + $0x1e08] sm:$0xff]  ;;  %v11747_v8 = vld [vmem:[%s19798_s16 + $0x1fd8] sm:$0xff] }
 0x832   :  { %9532 = vmatpush1.msra.mxu0 %v11678_v58  ;;  %9490 = vmatprep.subr.mxu1 %v11745_v49  ;;  %v19011_v58 = vcombine.high %v18989_v61, %v18989_v61  ;;  %v11688_v49 = vld [vmem:[%s19798_s16 + $0x1e00] sm:$0xff] }
 0x833   :  { %9533 = vmatprep.subr.mxu0 %v11675_v1  ;;  %9491 = vmatpush2.msra.mxu1 %v11744_v33  ;;  %v11746_v1 = vld [vmem:[%s19798_s16 + $0x1fd0] sm:$0xff]  ;;  %v11743_v33 = vld [vmem:[%s19798_s16 + $0x1fb8] sm:$0xff] }
 0x834   :  { %9534 = vmatpush1.msra.mxu0 %v11674_v39  ;;  %9492 = vmatprep.subr.mxu1 %v11741_v37  ;;  %v11814_v39 = vld [vmem:[%s19798_s16 + $0x21e8] sm:$0xff]  ;;  %v11742_v37 = vld [vmem:[%s19798_s16 + $0x1fb0] sm:$0xff] }
 0x835   :  { %9535 = vmatprep.subr.mxu0 %v11671_v4  ;;  %9493 = vmatpush2.msra.mxu1 %v11740_v11  ;;  %v11813_v4 = vld [vmem:[%s19798_s16 + $0x21e0] sm:$0xff]  ;;  %v11739_v11 = vld [vmem:[%s19798_s16 + $0x1f98] sm:$0xff] }
 0x836   :  { %9536 = vmatpush1.msra.mxu0 %v11670_v35  ;;  %9494 = vmatprep.subr.mxu1 %v11737_v18  ;;  %v11810_v35 = vld [vmem:[%s19798_s16 + $0x21c8] sm:$0xff]  ;;  %v11738_v18 = vld [vmem:[%s19798_s16 + $0x1f90] sm:$0xff] }
 0x837   :  { %9537 = vmatprep.subr.mxu0 %v11667_v36  ;;  %9495 = vmatpush2.msra.mxu1 %v11736_v63  ;;  %v11809_v36 = vld [vmem:[%s19798_s16 + $0x21c0] sm:$0xff]  ;;  %v11735_v63 = vld [vmem:[%s19798_s16 + $0x1f78] sm:$0xff] }
 0x838   :  { %9538 = vmatpush1.msra.mxu0 %v11666_v19  ;;  %9496 = vmatprep.subr.mxu1 %v11733_v57  ;;  %v11806_v19 = vld [vmem:[%s19798_s16 + $0x21a8] sm:$0xff]  ;;  %v11734_v57 = vld [vmem:[%s19798_s16 + $0x1f70] sm:$0xff] }
 0x839   :  { %9539 = vmatprep.subr.mxu0 %v11663_v20  ;;  %9497 = vmatpush2.msra.mxu1 %v11732_v46  ;;  %v11805_v20 = vld [vmem:[%s19798_s16 + $0x21a0] sm:$0xff]  ;;  %v11731_v46 = vld [vmem:[%s19798_s16 + $0x1f58] sm:$0xff] }
 0x83a   :  { %9540 = vmatpush1.msra.mxu0 %v11662_v30  ;;  %9498 = vmatprep.subr.mxu1 %v11729_v28  ;;  %v11802_v30 = vld [vmem:[%s19798_s16 + $0x2188] sm:$0xff]  ;;  %v11730_v28 = vld [vmem:[%s19798_s16 + $0x1f50] sm:$0xff] }
 0x83b   :  { %9541 = vmatprep.subr.mxu0 %v11659_v50  ;;  %9499 = vmatpush2.msra.mxu1 %v11728_v22  ;;  %v11801_v50 = vld [vmem:[%s19798_s16 + $0x2180] sm:$0xff]  ;;  %v11727_v22 = vld [vmem:[%s19798_s16 + $0x1f38] sm:$0xff] }
 0x83c   :  { %9542 = vmatpush1.msra.mxu0 %v11658_v6  ;;  %9500 = vmatprep.subr.mxu1 %v11725_v52  ;;  %v11798_v6 = vld [vmem:[%s19798_s16 + $0x2168] sm:$0xff]  ;;  %v11726_v52 = vld [vmem:[%s19798_s16 + $0x1f30] sm:$0xff] }
 0x83d   :  { %9543 = vmatprep.subr.mxu0 %v11655_v60  ;;  %9501 = vmatpush2.msra.mxu1 %v11724_v17  ;;  %v11797_v60 = vld [vmem:[%s19798_s16 + $0x2160] sm:$0xff]  ;;  %v11723_v17 = vld [vmem:[%s19798_s16 + $0x1f18] sm:$0xff] }
 0x83e   :  { %9544 = vmatpush1.msra.mxu0 %v11654_v5  ;;  %9502 = vmatprep.subr.mxu1 %v11721_v62  ;;  %v11794_v5 = vld [vmem:[%s19798_s16 + $0x2148] sm:$0xff]  ;;  %v11722_v62 = vld [vmem:[%s19798_s16 + $0x1f10] sm:$0xff] }
 0x83f   :  { %9545 = vmatprep.subr.mxu0 %v11651_v0  ;;  %9503 = vmatpush2.msra.mxu1 %v11720_v7  ;;  %v11793_v0 = vld [vmem:[%s19798_s16 + $0x2140] sm:$0xff]  ;;  %v11719_v7 = vld [vmem:[%s19798_s16 + $0x1ef8] sm:$0xff] }
 0x840   :  { %9546 = vmatpush1.msra.mxu0 %v11650_v42  ;;  %9504 = vmatprep.subr.mxu1 %v11717_v26  ;;  %v11790_v42 = vld [vmem:[%s19798_s16 + $0x2128] sm:$0xff]  ;;  %v11718_v26 = vld [vmem:[%s19798_s16 + $0x1ef0] sm:$0xff] }
 0x841   :  { %9547 = vmatprep.subr.mxu0 %v11647_v10  ;;  %9505 = vmatpush2.msra.mxu1 %v11716_v12  ;;  %v11789_v10 = vld [vmem:[%s19798_s16 + $0x2120] sm:$0xff]  ;;  %v11715_v12 = vld [vmem:[%s19798_s16 + $0x1ed8] sm:$0xff] }
 0x842   :  { %9548 = vmatpush1.msra.mxu0 %v11646_v40  ;;  %9506 = vmatprep.subr.mxu1 %v11713_v43  ;;  %v11786_v40 = vld [vmem:[%s19798_s16 + $0x2108] sm:$0xff]  ;;  %v11714_v43 = vld [vmem:[%s19798_s16 + $0x1ed0] sm:$0xff] }
 0x843   :  { %9549 = vmatprep.subr.mxu0 %v11643_v59  ;;  %9507 = vmatpush2.msra.mxu1 %v11712_v3  ;;  %v11785_v59 = vld [vmem:[%s19798_s16 + $0x2100] sm:$0xff]  ;;  %v11711_v3 = vld [vmem:[%s19798_s16 + $0x1eb8] sm:$0xff] }
 0x844   :  { %9550 = vmatpush1.msra.mxu0 %v11642_v16  ;;  %9508 = vmatprep.subr.mxu1 %v11709_v44  ;;  %v11782_v16 = vld [vmem:[%s19798_s16 + $0x20e8] sm:$0xff]  ;;  %v11710_v44 = vld [vmem:[%s19798_s16 + $0x1eb0] sm:$0xff] }
 0x845   :  { %9551 = vmatprep.subr.mxu0 %v11639_v47  ;;  %9509 = vmatpush2.msra.mxu1 %v11708_v54  ;;  %v11781_v47 = vld [vmem:[%s19798_s16 + $0x20e0] sm:$0xff]  ;;  %v11707_v54 = vld [vmem:[%s19798_s16 + $0x1e98] sm:$0xff] }
 0x846   :  { %9552 = vmatpush1.msra.mxu0 %v11638_v51  ;;  %9510 = vmatprep.subr.mxu1 %v11705_v53  ;;  %v11778_v51 = vld [vmem:[%s19798_s16 + $0x20c8] sm:$0xff]  ;;  %v11706_v53 = vld [vmem:[%s19798_s16 + $0x1e90] sm:$0xff] }
 0x847   :  { %9553 = vmatprep.subr.mxu0 %v11635_v55  ;;  %9511 = vmatpush2.msra.mxu1 %v11704_v14  ;;  %v11777_v55 = vld [vmem:[%s19798_s16 + $0x20c0] sm:$0xff]  ;;  %v11703_v14 = vld [vmem:[%s19798_s16 + $0x1e78] sm:$0xff] }
 0x848   :  { %9554 = vmatpush1.msra.mxu0 %v11634_v56  ;;  %9512 = vmatprep.subr.mxu1 %v11701_v21  ;;  %v11774_v56 = vld [vmem:[%s19798_s16 + $0x20a8] sm:$0xff]  ;;  %v11702_v21 = vld [vmem:[%s19798_s16 + $0x1e70] sm:$0xff] }
 0x849   :  { %9555 = vmatprep.subr.mxu0 %v11631_v41  ;;  %9513 = vmatpush2.msra.mxu1 %v11700_v27  ;;  %v11773_v41 = vld [vmem:[%s19798_s16 + $0x20a0] sm:$0xff]  ;;  %v11699_v27 = vld [vmem:[%s19798_s16 + $0x1e58] sm:$0xff] }
 0x84a   :  { %9556 = vmatpush1.msra.mxu0 %v11630_v9  ;;  %9514 = vmatprep.subr.mxu1 %v11697_v15  ;;  %v11770_v9 = vld [vmem:[%s19798_s16 + $0x2088] sm:$0xff]  ;;  %v11698_v15 = vld [vmem:[%s19798_s16 + $0x1e50] sm:$0xff] }
 0x84b   :  { %9557 = vmatprep.subr.mxu0 %v11627_v23  ;;  %9515 = vmatpush2.msra.mxu1 %v11696_v25  ;;  %v11769_v23 = vld [vmem:[%s19798_s16 + $0x2080] sm:$0xff]  ;;  %v11695_v25 = vld [vmem:[%s19798_s16 + $0x1e38] sm:$0xff] }
 0x84c   :  { %9558 = vmatpush1.msra.mxu0 %v11626_v31  ;;  %9516 = vmatprep.subr.mxu1 %v11693_v32  ;;  %v11766_v31 = vld [vmem:[%s19798_s16 + $0x2068] sm:$0xff]  ;;  %v11694_v32 = vld [vmem:[%s19798_s16 + $0x1e30] sm:$0xff] }
 0x84d   :  { %9559 = vmatprep.subr.mxu0 %v11751_v29  ;;  %9517 = vmatpush2.msra.mxu1 %v11692_v45  ;;  %v11765_v29 = vld [vmem:[%s19798_s16 + $0x2060] sm:$0xff]  ;;  %v11691_v45 = vld [vmem:[%s19798_s16 + $0x1e18] sm:$0xff] }
 0x84e   :  { %9560 = vmatpush2.msra.mxu0 %v11750_v13  ;;  %9518 = vmatprep.subr.mxu1 %v11689_v2  ;;  %v11762_v13 = vld [vmem:[%s19798_s16 + $0x2048] sm:$0xff]  ;;  %v11690_v2 = vld [vmem:[%s19798_s16 + $0x1e10] sm:$0xff] }
 0x84f   :  { %9561 = vmatprep.subr.mxu0 %v11747_v8  ;;  %9519 = vmatpush2.msra.mxu1 %v11688_v49  ;;  %v11761_v8 = vld [vmem:[%s19798_s16 + $0x2040] sm:$0xff]  ;;  %v11758_v49 = vld [vmem:[%s19798_s16 + $0x2028] sm:$0xff] }
 0x850   :  { %9520 = vmatprep.mubr.f32.mxu1 %v19011_v58  ;;  %9562 = vmatpush2.msra.mxu0 %v11746_v1  ;;  %v11816_v1 = vld [vmem:[%s19798_s16 + $0x21f8] sm:$0xff] }
 0x851   :  { %9521 = vmatmul.mubr.f32.vlgmr.msra.gmra.mxu1 %v18989_v61  ;;  %9563 = vmatprep.subr.mxu0 %v11743_v33  ;;  %v11757_v33 = vld [vmem:[%s19798_s16 + $0x2020] sm:$0xff] }
 0x852   :  { %9744 = vmatprep.subr.mxu1 %v11814_v39  ;;  %9564 = vmatpush2.msra.mxu0 %v11742_v37  ;;  %v11815_v39 = vld [vmem:[%s19798_s16 + $0x21f0] sm:$0xff]  ;;  %v11754_v37 = vld [vmem:[%s19798_s16 + $0x2008] sm:$0xff] }
 0x853   :  { %9745 = vmatpush1.msra.mxu1 %v11813_v4  ;;  %9565 = vmatprep.subr.mxu0 %v11739_v11  ;;  %v11812_v4 = vld [vmem:[%s19798_s16 + $0x21d8] sm:$0xff]  ;;  %v11811_v11 = vld [vmem:[%s19798_s16 + $0x21d0] sm:$0xff] }
 0x854   :  { %9746 = vmatprep.subr.mxu1 %v11810_v35  ;;  %9566 = vmatpush2.msra.mxu0 %v11738_v18  ;;  %v11808_v35 = vld [vmem:[%s19798_s16 + $0x21b8] sm:$0xff]  ;;  %v11877_v18 = vld [vmem:[%s19798_s16 + $0x23e0] sm:$0xff] }
 0x855   :  { %9747 = vmatpush1.msra.mxu1 %v11809_v36  ;;  %9567 = vmatprep.subr.mxu0 %v11735_v63  ;;  %v11807_v36 = vld [vmem:[%s19798_s16 + $0x21b0] sm:$0xff]  ;;  %v11874_v63 = vld [vmem:[%s19798_s16 + $0x23c8] sm:$0xff] }
 0x856   :  { %9748 = vmatprep.subr.mxu1 %v11806_v19  ;;  %9568 = vmatpush2.msra.mxu0 %v11734_v57  ;;  %v11804_v19 = vld [vmem:[%s19798_s16 + $0x2198] sm:$0xff]  ;;  %v11873_v57 = vld [vmem:[%s19798_s16 + $0x23c0] sm:$0xff] }
 0x857   :  { %9749 = vmatpush1.msra.mxu1 %v11805_v20  ;;  %9569 = vmatprep.subr.mxu0 %v11731_v46  ;;  %v11803_v20 = vld [vmem:[%s19798_s16 + $0x2190] sm:$0xff]  ;;  %v11870_v46 = vld [vmem:[%s19798_s16 + $0x23a8] sm:$0xff] }
 0x858   :  { %9750 = vmatprep.subr.mxu1 %v11802_v30  ;;  %9570 = vmatpush2.msra.mxu0 %v11730_v28  ;;  %v11800_v30 = vld [vmem:[%s19798_s16 + $0x2178] sm:$0xff]  ;;  %v11869_v28 = vld [vmem:[%s19798_s16 + $0x23a0] sm:$0xff] }
 0x859   :  { %9751 = vmatpush1.msra.mxu1 %v11801_v50  ;;  %9571 = vmatprep.subr.mxu0 %v11727_v22  ;;  %v11799_v50 = vld [vmem:[%s19798_s16 + $0x2170] sm:$0xff]  ;;  %v11866_v22 = vld [vmem:[%s19798_s16 + $0x2388] sm:$0xff] }
 0x85a   :  { %9752 = vmatprep.subr.mxu1 %v11798_v6  ;;  %9572 = vmatpush2.msra.mxu0 %v11726_v52  ;;  %v11796_v6 = vld [vmem:[%s19798_s16 + $0x2158] sm:$0xff]  ;;  %v11865_v52 = vld [vmem:[%s19798_s16 + $0x2380] sm:$0xff] }
 0x85b   :  { %9753 = vmatpush1.msra.mxu1 %v11797_v60  ;;  %9573 = vmatprep.subr.mxu0 %v11723_v17  ;;  %v11795_v60 = vld [vmem:[%s19798_s16 + $0x2150] sm:$0xff]  ;;  %v11862_v17 = vld [vmem:[%s19798_s16 + $0x2368] sm:$0xff] }
 0x85c   :  { %9754 = vmatprep.subr.mxu1 %v11794_v5  ;;  %9574 = vmatpush2.msra.mxu0 %v11722_v62  ;;  %v11792_v5 = vld [vmem:[%s19798_s16 + $0x2138] sm:$0xff]  ;;  %v11861_v62 = vld [vmem:[%s19798_s16 + $0x2360] sm:$0xff] }
 0x85d   :  { %9755 = vmatpush1.msra.mxu1 %v11793_v0  ;;  %9575 = vmatprep.subr.mxu0 %v11719_v7  ;;  %v11791_v0 = vld [vmem:[%s19798_s16 + $0x2130] sm:$0xff]  ;;  %v11858_v7 = vld [vmem:[%s19798_s16 + $0x2348] sm:$0xff] }
 0x85e   :  { %9756 = vmatprep.subr.mxu1 %v11790_v42  ;;  %9576 = vmatpush2.msra.mxu0 %v11718_v26  ;;  %v11788_v42 = vld [vmem:[%s19798_s16 + $0x2118] sm:$0xff]  ;;  %v11857_v26 = vld [vmem:[%s19798_s16 + $0x2340] sm:$0xff] }
 0x85f   :  { %9757 = vmatpush1.msra.mxu1 %v11789_v10  ;;  %9577 = vmatprep.subr.mxu0 %v11715_v12  ;;  %v11787_v10 = vld [vmem:[%s19798_s16 + $0x2110] sm:$0xff]  ;;  %v11854_v12 = vld [vmem:[%s19798_s16 + $0x2328] sm:$0xff] }
 0x860   :  { %9758 = vmatprep.subr.mxu1 %v11786_v40  ;;  %9578 = vmatpush2.msra.mxu0 %v11714_v43  ;;  %v11784_v40 = vld [vmem:[%s19798_s16 + $0x20f8] sm:$0xff]  ;;  %v11853_v43 = vld [vmem:[%s19798_s16 + $0x2320] sm:$0xff] }
 0x861   :  { %9759 = vmatpush1.msra.mxu1 %v11785_v59  ;;  %9579 = vmatprep.subr.mxu0 %v11711_v3  ;;  %v11783_v59 = vld [vmem:[%s19798_s16 + $0x20f0] sm:$0xff]  ;;  %v11850_v3 = vld [vmem:[%s19798_s16 + $0x2308] sm:$0xff] }
 0x862   :  { %9760 = vmatprep.subr.mxu1 %v11782_v16  ;;  %9580 = vmatpush2.msra.mxu0 %v11710_v44  ;;  %v11780_v16 = vld [vmem:[%s19798_s16 + $0x20d8] sm:$0xff]  ;;  %v11849_v44 = vld [vmem:[%s19798_s16 + $0x2300] sm:$0xff] }
 0x863   :  { %9761 = vmatpush1.msra.mxu1 %v11781_v47  ;;  %9581 = vmatprep.subr.mxu0 %v11707_v54  ;;  %v11779_v47 = vld [vmem:[%s19798_s16 + $0x20d0] sm:$0xff]  ;;  %v11846_v54 = vld [vmem:[%s19798_s16 + $0x22e8] sm:$0xff] }
 0x864   :  { %9762 = vmatprep.subr.mxu1 %v11778_v51  ;;  %9582 = vmatpush2.msra.mxu0 %v11706_v53  ;;  %v11776_v51 = vld [vmem:[%s19798_s16 + $0x20b8] sm:$0xff]  ;;  %v11845_v53 = vld [vmem:[%s19798_s16 + $0x22e0] sm:$0xff] }
 0x865   :  { %9763 = vmatpush1.msra.mxu1 %v11777_v55  ;;  %9583 = vmatprep.subr.mxu0 %v11703_v14  ;;  %v11775_v55 = vld [vmem:[%s19798_s16 + $0x20b0] sm:$0xff]  ;;  %v11842_v14 = vld [vmem:[%s19798_s16 + $0x22c8] sm:$0xff] }
 0x866   :  { %9764 = vmatprep.subr.mxu1 %v11774_v56  ;;  %9584 = vmatpush2.msra.mxu0 %v11702_v21  ;;  %v11772_v56 = vld [vmem:[%s19798_s16 + $0x2098] sm:$0xff]  ;;  %v11841_v21 = vld [vmem:[%s19798_s16 + $0x22c0] sm:$0xff] }
 0x867   :  { %9765 = vmatpush1.msra.mxu1 %v11773_v41  ;;  %9585 = vmatprep.subr.mxu0 %v11699_v27  ;;  %v11771_v41 = vld [vmem:[%s19798_s16 + $0x2090] sm:$0xff]  ;;  %v11838_v27 = vld [vmem:[%s19798_s16 + $0x22a8] sm:$0xff] }
 0x868   :  { %9766 = vmatprep.subr.mxu1 %v11770_v9  ;;  %9586 = vmatpush2.msra.mxu0 %v11698_v15  ;;  %v11768_v9 = vld [vmem:[%s19798_s16 + $0x2078] sm:$0xff]  ;;  %v11837_v15 = vld [vmem:[%s19798_s16 + $0x22a0] sm:$0xff] }
 0x869   :  { %9767 = vmatpush1.msra.mxu1 %v11769_v23  ;;  %9587 = vmatprep.subr.mxu0 %v11695_v25  ;;  %v11767_v23 = vld [vmem:[%s19798_s16 + $0x2070] sm:$0xff]  ;;  %v11834_v25 = vld [vmem:[%s19798_s16 + $0x2288] sm:$0xff] }
 0x86a   :  { %9768 = vmatprep.subr.mxu1 %v11766_v31  ;;  %9588 = vmatpush2.msra.mxu0 %v11694_v32  ;;  %v11764_v31 = vld [vmem:[%s19798_s16 + $0x2058] sm:$0xff]  ;;  %v11833_v32 = vld [vmem:[%s19798_s16 + $0x2280] sm:$0xff] }
 0x86b   :  { %9769 = vmatpush1.msra.mxu1 %v11765_v29  ;;  %9589 = vmatprep.subr.mxu0 %v11691_v45  ;;  %v11763_v29 = vld [vmem:[%s19798_s16 + $0x2050] sm:$0xff]  ;;  %v11830_v45 = vld [vmem:[%s19798_s16 + $0x2268] sm:$0xff] }
 0x86c   :  { %9770 = vmatprep.subr.mxu1 %v11762_v13  ;;  %9590 = vmatpush2.msra.mxu0 %v11690_v2  ;;  %v11760_v13 = vld [vmem:[%s19798_s16 + $0x2038] sm:$0xff]  ;;  %v11829_v2 = vld [vmem:[%s19798_s16 + $0x2260] sm:$0xff] }
 0x86d   :  { %9591 = vmatprep.mubr.f32.mxu0 %v19011_v58  ;;  %9771 = vmatpush1.msra.mxu1 %v11761_v8  ;;  %v11753_v58 = vld [vmem:[%s19798_s16 + $0x2000] sm:$0xff]  ;;  %v11759_v8 = vld [vmem:[%s19798_s16 + $0x2030] sm:$0xff] }
 0x86e   :  { %9592 = vmatmul.mubr.f32.vlgmr.msra.gmra.mxu0 %v18989_v61  ;;  %9772 = vmatprep.subr.mxu1 %v11758_v49  ;;  %v11878_v61 = vld [vmem:[%s19798_s16 + $0x23e8] sm:$0xff] }
 0x86f   :  { %9815 = vmatprep.subr.mxu0 %v11816_v1  ;;  %9773 = vmatpush1.msra.mxu1 %v11757_v33  ;;  %v11826_v49 = vld [vmem:[%s19798_s16 + $0x2248] sm:$0xff]  ;;  %v11756_v1 = vld [vmem:[%s19798_s16 + $0x2018] sm:$0xff]  ;;  %v11825_v33 = vld [vmem:[%s19798_s16 + $0x2240] sm:$0xff] }
 0x870   :  { %9816 = vmatpush1.msra.mxu0 %v11815_v39  ;;  %9774 = vmatprep.subr.mxu1 %v11754_v37  ;;  %v11755_v39 = vld [vmem:[%s19798_s16 + $0x2010] sm:$0xff]  ;;  %v19383_v37 = vld.sshfl [vmem:[#allocation7 + $0x20] sm:$0x33 pattern:$0x76325410] }
 0x871   :  { %9817 = vmatprep.subr.mxu0 %v11812_v4  ;;  %9775 = vmatpush1.msra.mxu1 %v11753_v58  ;;  %v11822_v4 = vld [vmem:[%s19798_s16 + $0x2228] sm:$0xff]  ;;  %v11880_v58 = vld [vmem:[%s19798_s16 + $0x23f8] sm:$0xff] }
 0x872   :  { %9818 = vmatpush1.msra.mxu0 %v11811_v11  ;;  %9776 = vmatprep.subr.mxu1 %v11878_v61  ;;  %v11821_v11 = vld [vmem:[%s19798_s16 + $0x2220] sm:$0xff]  ;;  %v11879_v61 = vld [vmem:[%s19798_s16 + $0x23f0] sm:$0xff] }
 0x873   :  { %9819 = vmatprep.subr.mxu0 %v11808_v35  ;;  %9777 = vmatpush2.msra.mxu1 %v11877_v18  ;;  %v11818_v35 = vld [vmem:[%s19798_s16 + $0x2208] sm:$0xff]  ;;  %v11876_v18 = vld [vmem:[%s19798_s16 + $0x23d8] sm:$0xff] }
 0x874   :  { %9820 = vmatpush1.msra.mxu0 %v11807_v36  ;;  %9778 = vmatprep.subr.mxu1 %v11874_v63  ;;  %v9741_v36 = vcombine.high %v19383_v37, %v19383_v37  ;;  %v11817_v63 = vld [vmem:[%s19798_s16 + $0x2200] sm:$0xff] }
 0x875   :  { %9821 = vmatprep.subr.mxu0 %v11804_v19  ;;  %9779 = vmatpush2.msra.mxu1 %v11873_v57  ;;  %v11875_v19 = vld [vmem:[%s19798_s16 + $0x23d0] sm:$0xff]  ;;  %v11872_v57 = vld [vmem:[%s19798_s16 + $0x23b8] sm:$0xff] }
 0x876   :  { %9822 = vmatpush1.msra.mxu0 %v11803_v20  ;;  %9780 = vmatprep.subr.mxu1 %v11870_v46  ;;  %v11871_v20 = vld [vmem:[%s19798_s16 + $0x23b0] sm:$0xff]  ;;  %v11868_v46 = vld [vmem:[%s19798_s16 + $0x2398] sm:$0xff] }
 0x877   :  { %9823 = vmatprep.subr.mxu0 %v11800_v30  ;;  %9781 = vmatpush2.msra.mxu1 %v11869_v28  ;;  %v11867_v30 = vld [vmem:[%s19798_s16 + $0x2390] sm:$0xff]  ;;  %v11864_v28 = vld [vmem:[%s19798_s16 + $0x2378] sm:$0xff] }
 0x878   :  { %9824 = vmatpush1.msra.mxu0 %v11799_v50  ;;  %9782 = vmatprep.subr.mxu1 %v11866_v22  ;;  %v11863_v50 = vld [vmem:[%s19798_s16 + $0x2370] sm:$0xff]  ;;  %v11860_v22 = vld [vmem:[%s19798_s16 + $0x2358] sm:$0xff] }
 0x879   :  { %9825 = vmatprep.subr.mxu0 %v11796_v6  ;;  %9783 = vmatpush2.msra.mxu1 %v11865_v52  ;;  %v11859_v6 = vld [vmem:[%s19798_s16 + $0x2350] sm:$0xff]  ;;  %v11856_v52 = vld [vmem:[%s19798_s16 + $0x2338] sm:$0xff] }
 0x87a   :  { %9826 = vmatpush1.msra.mxu0 %v11795_v60  ;;  %9784 = vmatprep.subr.mxu1 %v11862_v17  ;;  %v11855_v60 = vld [vmem:[%s19798_s16 + $0x2330] sm:$0xff]  ;;  %v11852_v17 = vld [vmem:[%s19798_s16 + $0x2318] sm:$0xff] }
 0x87b   :  { %9827 = vmatprep.subr.mxu0 %v11792_v5  ;;  %9785 = vmatpush2.msra.mxu1 %v11861_v62  ;;  %v11851_v5 = vld [vmem:[%s19798_s16 + $0x2310] sm:$0xff]  ;;  %v11848_v62 = vld [vmem:[%s19798_s16 + $0x22f8] sm:$0xff] }
 0x87c   :  { %9828 = vmatpush1.msra.mxu0 %v11791_v0  ;;  %9786 = vmatprep.subr.mxu1 %v11858_v7  ;;  %v11847_v0 = vld [vmem:[%s19798_s16 + $0x22f0] sm:$0xff]  ;;  %v11844_v7 = vld [vmem:[%s19798_s16 + $0x22d8] sm:$0xff] }
 0x87d   :  { %9829 = vmatprep.subr.mxu0 %v11788_v42  ;;  %9787 = vmatpush2.msra.mxu1 %v11857_v26  ;;  %v11843_v42 = vld [vmem:[%s19798_s16 + $0x22d0] sm:$0xff]  ;;  %v11840_v26 = vld [vmem:[%s19798_s16 + $0x22b8] sm:$0xff] }
 0x87e   :  { %9830 = vmatpush1.msra.mxu0 %v11787_v10  ;;  %9788 = vmatprep.subr.mxu1 %v11854_v12  ;;  %v11839_v10 = vld [vmem:[%s19798_s16 + $0x22b0] sm:$0xff]  ;;  %v11836_v12 = vld [vmem:[%s19798_s16 + $0x2298] sm:$0xff] }
 0x87f   :  { %9831 = vmatprep.subr.mxu0 %v11784_v40  ;;  %9789 = vmatpush2.msra.mxu1 %v11853_v43  ;;  %v11835_v40 = vld [vmem:[%s19798_s16 + $0x2290] sm:$0xff]  ;;  %v11832_v43 = vld [vmem:[%s19798_s16 + $0x2278] sm:$0xff] }
 0x880   :  { %9832 = vmatpush1.msra.mxu0 %v11783_v59  ;;  %9790 = vmatprep.subr.mxu1 %v11850_v3  ;;  %v11831_v59 = vld [vmem:[%s19798_s16 + $0x2270] sm:$0xff]  ;;  %v11828_v3 = vld [vmem:[%s19798_s16 + $0x2258] sm:$0xff] }
 0x881   :  { %9833 = vmatprep.subr.mxu0 %v11780_v16  ;;  %9791 = vmatpush2.msra.mxu1 %v11849_v44  ;;  %v11827_v16 = vld [vmem:[%s19798_s16 + $0x2250] sm:$0xff]  ;;  %v11824_v44 = vld [vmem:[%s19798_s16 + $0x2238] sm:$0xff] }
 0x882   :  { %9834 = vmatpush1.msra.mxu0 %v11779_v47  ;;  %9792 = vmatprep.subr.mxu1 %v11846_v54  ;;  %v11823_v47 = vld [vmem:[%s19798_s16 + $0x2230] sm:$0xff]  ;;  %v11820_v54 = vld [vmem:[%s19798_s16 + $0x2218] sm:$0xff] }
 0x883   :  { %9835 = vmatprep.subr.mxu0 %v11776_v51  ;;  %9793 = vmatpush2.msra.mxu1 %v11845_v53  ;;  %v11819_v51 = vld [vmem:[%s19798_s16 + $0x2210] sm:$0xff]  ;;  %v19497_v53 = vpop.f32.mrf.mxu1 }
 0x884   :  { %9836 = vmatpush1.msra.mxu0 %v11775_v55  ;;  %9794 = vmatprep.subr.mxu1 %v11842_v14 }
 0x885   :  { %9837 = vmatprep.subr.mxu0 %v11772_v56  ;;  %9795 = vmatpush2.msra.mxu1 %v11841_v21  ;;  %v19499_v55 = vpop.f32.mrf.mxu1  ;;  %v10121_v56 = vld [vmem:[%s19801_s19 + $0xf8] sm:$0xff] }
 0x886   :  { %9838 = vmatpush1.msra.mxu0 %v11771_v41  ;;  %9796 = vmatprep.subr.mxu1 %v11838_v27  ;;  %v10153_v21 = vld [vmem:[%s19801_s19 + $0x1f8] sm:$0xff] }
 0x887   :  { %9839 = vmatprep.subr.mxu0 %v11768_v9  ;;  %9797 = vmatpush2.msra.mxu1 %v11837_v15  ;;  %v19501_v14 = vpop.f32.mrf.mxu1  ;;  %v10105_v41 = vld [vmem:[%s19801_s19 + $0x78] sm:$0xff]  ;;  %v10120_v9 = vld [vmem:[%s19801_s19 + $0xf0] sm:$0xff] }
 0x888   :  { %9840 = vmatpush1.msra.mxu0 %v11767_v23  ;;  %9798 = vmatprep.subr.mxu1 %v11834_v25  ;;  %v10137_v27 = vld [vmem:[%s19801_s19 + $0x178] sm:$0xff]  ;;  %v10152_v15 = vld [vmem:[%s19801_s19 + $0x1f0] sm:$0xff] }
 0x889   :  { %9841 = vmatprep.subr.mxu0 %v11764_v31  ;;  %9799 = vmatpush2.msra.mxu1 %v11833_v32  ;;  %v10104_v23 = vld [vmem:[%s19801_s19 + $0x70] sm:$0xff]  ;;  %v19527_v31 = vpop.f32.mrf.mxu1  ;;  %v10119_v32 = vld [vmem:[%s19801_s19 + $0xe8] sm:$0xff] }
 0x88a   :  { %9842 = vmatpush1.msra.mxu0 %v11763_v29  ;;  %9800 = vmatprep.subr.mxu1 %v11830_v45  ;;  %v10136_v25 = vld [vmem:[%s19801_s19 + $0x170] sm:$0xff]  ;;  %v10151_v29 = vld [vmem:[%s19801_s19 + $0x1e8] sm:$0xff] }
 0x88b   :  { %9843 = vmatprep.subr.mxu0 %v11760_v13  ;;  %9801 = vmatpush2.msra.mxu1 %v11829_v2  ;;  %v10103_v45 = vld [vmem:[%s19801_s19 + $0x68] sm:$0xff]  ;;  %v19541_v2 = vpop.f32.mrf.mxu1 }
 0x88c   :  { %9844 = vmatpush1.msra.mxu0 %v11759_v8  ;;  %9802 = vmatprep.subr.mxu1 %v11826_v49  ;;  %v10135_v13 = vld [vmem:[%s19801_s19 + $0x168] sm:$0xff]  ;;  %v10118_v8 = vld [vmem:[%s19801_s19 + $0xe0] sm:$0xff] }
 0x88d   :  { %9845 = vmatprep.subr.mxu0 %v11756_v1  ;;  %9803 = vmatpush2.msra.mxu1 %v11825_v33  ;;  %v10150_v49 = vld [vmem:[%s19801_s19 + $0x1e0] sm:$0xff] }
 0x88e   :  { %9846 = vmatpush1.msra.mxu0 %v11755_v39  ;;  %9804 = vmatprep.subr.mxu1 %v11822_v4  ;;  %v10102_v1 = vld [vmem:[%s19801_s19 + $0x60] sm:$0xff]  ;;  %v10117_v39 = vld [vmem:[%s19801_s19 + $0xd8] sm:$0xff] }
 0x88f   :  { %9847 = vmatprep.subr.mxu0 %v11880_v58  ;;  %9805 = vmatpush2.msra.mxu1 %v11821_v11  ;;  %v10134_v33 = vld [vmem:[%s19801_s19 + $0x160] sm:$0xff]  ;;  %v10101_v4 = vld [vmem:[%s19801_s19 + $0x58] sm:$0xff]  ;;  %v19567_v11 = vpop.f32.mrf.mxu1 }
 0x890   :  { %9848 = vmatpush2.msra.mxu0 %v11879_v61  ;;  %9806 = vmatprep.subr.mxu1 %v11818_v35  ;;  %v10133_v58 = vld [vmem:[%s19801_s19 + $0x158] sm:$0xff]  ;;  %v10116_v61 = vld [vmem:[%s19801_s19 + $0xd0] sm:$0xff] }
 0x891   :  { %9849 = vmatprep.subr.mxu0 %v11876_v18  ;;  %9807 = vmatpush2.msra.mxu1 %v11817_v63  ;;  %v10148_v35 = vld [vmem:[%s19801_s19 + $0x1d0] sm:$0xff]  ;;  %v19581_v63 = vpop.f32.mrf.mxu1 }
 0x892   :  { %9808 = vmatprep.mubr.f32.mxu1 %v9741_v36  ;;  %9850 = vmatpush2.msra.mxu0 %v11875_v19  ;;  %v10100_v18 = vld [vmem:[%s19801_s19 + $0x50] sm:$0xff]  ;;  %v10115_v19 = vld [vmem:[%s19801_s19 + $0xc8] sm:$0xff] }
 0x893   :  { %9809 = vmatmul.mubr.f32.vlgmr.msra.gmra.mxu1 %v19383_v37  ;;  %9851 = vmatprep.subr.mxu0 %v11872_v57  ;;  %v10147_v57 = vld [vmem:[%s19801_s19 + $0x1c8] sm:$0xff] }
 0x894   :  { %9879 = vmatprep.mubr.f32.mxu0 %v9741_v36  ;;  %9852 = vmatpush2.msra.mxu0 %v11871_v20  ;;  %v10132_v36 = vld [vmem:[%s19801_s19 + $0x150] sm:$0xff]  ;;  %v10099_v20 = vld [vmem:[%s19801_s19 + $0x48] sm:$0xff] }
 0x895   :  { %9853 = vmatprep.subr.mxu0 %v11868_v46  ;;  %12260 = vmatprep.subr.mxu1 %v10121_v56  ;;  %v10131_v46 = vld [vmem:[%s19801_s19 + $0x148] sm:$0xff]  ;;  %v19665_v56 = vpop.f32.mrf.mxu0 }
 0x896   :  { %9854 = vmatpush2.msra.mxu0 %v11867_v30  ;;  %12261 = vmatpush3.msra.mxu1 %v10105_v41  ;;  %v10114_v30 = vld [vmem:[%s19801_s19 + $0xc0] sm:$0xff]  ;;  %v10125_v41 = vld [vmem:[%s19801_s19 + $0x118] sm:$0xff] }
 0x897   :  { %9855 = vmatprep.subr.mxu0 %v11864_v28  ;;  %12262 = vmatprep.subr.mxu1 %v10120_v9  ;;  %v10146_v28 = vld [vmem:[%s19801_s19 + $0x1c0] sm:$0xff]  ;;  %v10108_v9 = vld [vmem:[%s19801_s19 + $0x90] sm:$0xff] }
 0x898   :  { %9856 = vmatpush2.msra.mxu0 %v11863_v50  ;;  %12263 = vmatpush3.msra.mxu1 %v10104_v23  ;;  %v10098_v50 = vld [vmem:[%s19801_s19 + $0x40] sm:$0xff]  ;;  %v10092_v23 = vld [vmem:[%s19801_s19 + $0x10] sm:$0xff] }
 0x899   :  { %9857 = vmatprep.subr.mxu0 %v11860_v22  ;;  %12264 = vmatprep.subr.mxu1 %v10119_v32  ;;  %v10130_v22 = vld [vmem:[%s19801_s19 + $0x140] sm:$0xff]  ;;  %v10107_v32 = vld [vmem:[%s19801_s19 + $0x88] sm:$0xff] }
 0x89a   :  { %9858 = vmatpush2.msra.mxu0 %v11859_v6  ;;  %12265 = vmatpush3.msra.mxu1 %v10103_v45  ;;  %v10113_v6 = vld [vmem:[%s19801_s19 + $0xb8] sm:$0xff]  ;;  %v19691_v45 = vpop.f32.mrf.mxu0 }
 0x89b   :  { %9859 = vmatprep.subr.mxu0 %v11856_v52  ;;  %12266 = vmatprep.subr.mxu1 %v10118_v8  ;;  %v10145_v52 = vld [vmem:[%s19801_s19 + $0x1b8] sm:$0xff]  ;;  %v10123_v8 = vld [vmem:[%s19801_s19 + $0x108] sm:$0xff] }
 0x89c   :  { %9860 = vmatpush2.msra.mxu0 %v11855_v60  ;;  %12267 = vmatpush3.msra.mxu1 %v10102_v1  ;;  %v19613_v60 = vpop.f32.mrf.mxu1  ;;  %v10106_v1 = vld [vmem:[%s19801_s19 + $0x80] sm:$0xff] }
 0x89d   :  { %9861 = vmatprep.subr.mxu0 %v11852_v17  ;;  %12268 = vmatprep.subr.mxu1 %v10117_v39  ;;  %v10097_v17 = vld [vmem:[%s19801_s19 + $0x38] sm:$0xff]  ;;  %v7800_v39 = vadd.f32 %v19501_v14, %v19497_v53 }
 0x89e   :  { %9862 = vmatpush2.msra.mxu0 %v11851_v5  ;;  %12269 = vmatpush3.msra.mxu1 %v10101_v4  ;;  %v10129_v5 = vld [vmem:[%s19801_s19 + $0x138] sm:$0xff]  ;;  %v10090_v4 = vld [vmem:[%s19801_s19] sm:$0xff] }
 0x89f   :  { %9863 = vmatprep.subr.mxu0 %v11848_v62  ;;  %12270 = vmatprep.subr.mxu1 %v10116_v61  ;;  %v10112_v62 = vld [vmem:[%s19801_s19 + $0xb0] sm:$0xff] }
 0x8a0   :  { %9864 = vmatpush2.msra.mxu0 %v11847_v0  ;;  %12271 = vmatpush3.msra.mxu1 %v10100_v18  ;;  %v10144_v0 = vld [vmem:[%s19801_s19 + $0x1b0] sm:$0xff]  ;;  %v8159_v18 = vadd.f32 %v19541_v2, %v7800_v39 }
 0x8a1   :  { %9865 = vmatprep.subr.mxu0 %v11844_v7  ;;  %12272 = vmatprep.subr.mxu1 %v10115_v19  ;;  %v10096_v7 = vld [vmem:[%s19801_s19 + $0x30] sm:$0xff] }
 0x8a2   :  { %9866 = vmatpush2.msra.mxu0 %v11843_v42  ;;  %12273 = vmatpush3.msra.mxu1 %v10099_v20  ;;  %v10128_v42 = vld [vmem:[%s19801_s19 + $0x130] sm:$0xff] }
 0x8a3   :  { %9867 = vmatprep.subr.mxu0 %v11840_v26  ;;  %12274 = vmatprep.subr.mxu1 %v10114_v30  ;;  %v19633_v26 = vpop.f32.mrf.mxu1 }
 0x8a4   :  { %9868 = vmatpush2.msra.mxu0 %v11839_v10  ;;  %12275 = vmatpush3.msra.mxu1 %v10098_v50  ;;  %v10111_v10 = vld [vmem:[%s19801_s19 + $0xa8] sm:$0xff] }
 0x8a5   :  { %9869 = vmatprep.subr.mxu0 %v11836_v12  ;;  %12276 = vmatprep.subr.mxu1 %v10113_v6  ;;  %v10143_v12 = vld [vmem:[%s19801_s19 + $0x1a8] sm:$0xff] }
 0x8a6   :  { %9870 = vmatpush2.msra.mxu0 %v11835_v40  ;;  %12277 = vmatpush3.msra.mxu1 %v10097_v17  ;;  %v10095_v40 = vld [vmem:[%s19801_s19 + $0x28] sm:$0xff] }
 0x8a7   :  { %9871 = vmatprep.subr.mxu0 %v11832_v43  ;;  %12278 = vmatprep.subr.mxu1 %v10112_v62  ;;  %v10127_v43 = vld [vmem:[%s19801_s19 + $0x128] sm:$0xff] }
 0x8a8   :  { %9872 = vmatpush2.msra.mxu0 %v11831_v59  ;;  %12279 = vmatpush3.msra.mxu1 %v10096_v7  ;;  %v10110_v59 = vld [vmem:[%s19801_s19 + $0xa0] sm:$0xff] }
 0x8a9   :  { %9873 = vmatprep.subr.mxu0 %v11828_v3  ;;  %v10142_v3 = vld [vmem:[%s19801_s19 + $0x1a0] sm:$0xff]  ;;  %12280 = vmatprep.subr.mxu1 %v10111_v10 }
 0x8aa   :  { %9874 = vmatpush2.msra.mxu0 %v11827_v16  ;;  %v10094_v16 = vld [vmem:[%s19801_s19 + $0x20] sm:$0xff]  ;;  %12281 = vmatpush3.msra.mxu1 %v10095_v40 }
 0x8ab   :  { %9875 = vmatprep.subr.mxu0 %v11824_v44  ;;  %v10126_v44 = vld [vmem:[%s19801_s19 + $0x120] sm:$0xff]  ;;  %12282 = vmatprep.subr.mxu1 %v10110_v59 }
 0x8ac   :  { %9876 = vmatpush2.msra.mxu0 %v11823_v47  ;;  %v8660_v47 = vpop.f32.mrf.mxu1  ;;  %12283 = vmatpush3.msra.mxu1 %v10094_v16 }
 0x8ad   :  { %9877 = vmatprep.subr.mxu0 %v11820_v54  ;;  %v10109_v54 = vld [vmem:[%s19801_s19 + $0x98] sm:$0xff] }
 0x8ae   :  { %9878 = vmatpush2.msra.mxu0 %v11819_v51  ;;  %v10141_v51 = vld [vmem:[%s19801_s19 + $0x198] sm:$0xff]  ;;  %12284 = vmatprep.subr.mxu1 %v10109_v54 }
 0x8af   :  { %9880 = vmatmul.mubr.f32.vlgmr.msra.gmra.mxu0 %v19383_v37  ;;  %12295 = vmatprep.subr.mxu0 %v10153_v21  ;;  %v10149_v37 = vld [vmem:[%s19801_s19 + $0x1d8] sm:$0xff] }
 0x8b0   :  { %12296 = vmatpush3.msra.mxu0 %v10137_v27  ;;  %v10093_v21 = vld [vmem:[%s19801_s19 + $0x18] sm:$0xff]  ;;  %v8946_v27 = vpop.f32.mrf.mxu1 }
 0x8b1   :  { %12297 = vmatprep.subr.mxu0 %v10152_v15  ;;  %v10140_v15 = vld [vmem:[%s19801_s19 + $0x190] sm:$0xff]  ;;  %12285 = vmatpush3.msra.mxu1 %v10093_v21 }
 0x8b2   :  { %12298 = vmatpush3.msra.mxu0 %v10136_v25  ;;  %v10124_v25 = vld [vmem:[%s19801_s19 + $0x110] sm:$0xff]  ;;  %12286 = vmatprep.subr.mxu1 %v10108_v9 }
 0x8b3   :  { %12299 = vmatprep.subr.mxu0 %v10151_v29  ;;  %v10139_v29 = vld [vmem:[%s19801_s19 + $0x188] sm:$0xff]  ;;  %12287 = vmatpush3.msra.mxu1 %v10092_v23 }
 0x8b4   :  { %12300 = vmatpush3.msra.mxu0 %v10135_v13  ;;  %v10091_v13 = vld [vmem:[%s19801_s19 + $0x8] sm:$0xff]  ;;  %12288 = vmatprep.subr.mxu1 %v10107_v32 }
 0x8b5   :  { %12301 = vmatprep.subr.mxu0 %v10150_v49  ;;  %v8948_v49 = vpop.f32.mrf.mxu1  ;;  %12289 = vmatpush3.msra.mxu1 %v10091_v13 }
 0x8b6   :  { %12302 = vmatpush3.msra.mxu0 %v10134_v33  ;;  %v10138_v33 = vld [vmem:[%s19801_s19 + $0x180] sm:$0xff]  ;;  %12290 = vmatprep.subr.mxu1 %v10106_v1 }
 0x8b7   :  { %12303 = vmatprep.subr.mxu0 %v10149_v37  ;;  %v7870_v37 = vpop.f32.mrf.mxu0  ;;  %12291 = vmatpush3.msra.mxu1 %v10090_v4 }
 0x8b8   :  { %12304 = vmatpush3.msra.mxu0 %v10133_v58  ;;  %v10122_v58 = vld [vmem:[%s19801_s19 + $0x100] sm:$0xff] }
 0x8b9   :  { %12305 = vmatprep.subr.mxu0 %v10148_v35  ;;  %v7802_v35 = vadd.f32 %v19527_v31, %v19499_v55  ;;  %v7872_v53 = vpop.f32.mrf.mxu0 }
 0x8ba   :  { %12306 = vmatpush3.msra.mxu0 %v10132_v36  ;;  %v8447_v36 = vadd.f32 %v19581_v63, %v8159_v18 }
 0x8bb   :  { %12307 = vmatprep.subr.mxu0 %v10147_v57  ;;  %v8160_v14 = vadd.f32 %v19567_v11, %v7802_v35  ;;  %v8154_v57 = vpop.f32.mrf.mxu0 }
 0x8bc   :  { %12308 = vmatpush3.msra.mxu0 %v10131_v46  ;;  %v8734_v46 = vadd.f32 %v19633_v26, %v8447_v36 }
 0x8bd   :  { %12309 = vmatprep.subr.mxu0 %v10146_v28  ;;  %v8448_v20 = vadd.f32 %v19613_v60, %v8160_v14  ;;  %v8156_v31 = vpop.f32.mrf.mxu0 }
 0x8be   :  { %12310 = vmatpush3.msra.mxu0 %v10130_v22  ;;  %v9022_v55 = vadd.f32 %v8946_v27, %v8734_v46  ;;  %v7871_v27 = vadd.f32 %v7870_v37, %v19665_v56 }
 0x8bf   :  { %12311 = vmatprep.subr.mxu0 %v10145_v52  ;;  %v8735_v28 = vadd.f32 %v8660_v47, %v8448_v20  ;;  %v8442_v6 = vpop.f32.mrf.mxu0 }
 0x8c0   :  { %12312 = vmatpush3.msra.mxu0 %v10129_v5  ;;  %v8161_v32 = vadd.f32 %v8154_v57, %v7871_v27 }
 0x8c1   :  { %12313 = vmatprep.subr.mxu0 %v10144_v0  ;;  %v9023_v2 = vadd.f32 %v8948_v49, %v8735_v28  ;;  %v8444_v0 = vpop.f32.mrf.mxu0 }
 0x8c2   :  { %12314 = vmatpush3.msra.mxu0 %v10128_v42 }
 0x8c3   :  { %12315 = vmatprep.subr.mxu0 %v10143_v12  ;;  %v8729_v26 = vpop.f32.mrf.mxu0 }
 0x8c4   :  { %12316 = vmatpush3.msra.mxu0 %v10127_v43 }
 0x8c5   :  { %12317 = vmatprep.subr.mxu0 %v10142_v3  ;;  %v8731_v3 = vpop.f32.mrf.mxu0 }
 0x8c6   :  { %12318 = vmatpush3.msra.mxu0 %v10126_v44 }
 0x8c7   :  { %12319 = vmatprep.subr.mxu0 %v10141_v51  ;;  %v9017_v47 = vpop.f32.mrf.mxu0 }
 0x8c8   :  { %12320 = vmatpush3.msra.mxu0 %v10125_v41 }
 0x8c9   :  { %12321 = vmatprep.subr.mxu0 %v10140_v15  ;;  %v9019_v41 = vpop.f32.mrf.mxu0 }
 0x8ca   :  { %12322 = vmatpush3.msra.mxu0 %v10124_v25  ;;  %v7873_v25 = vadd.f32 %v7872_v53, %v19691_v45 }
 0x8cb   :  { %12323 = vmatprep.subr.mxu0 %v10139_v29 }
 0x8cc   :  { %12324 = vmatpush3.msra.mxu0 %v10123_v8  ;;  %v8162_v13 = vadd.f32 %v8156_v31, %v7873_v25  ;;  %v8449_v8 = vadd.f32 %v8442_v6, %v8161_v32 }
 0x8cd   :  { %12325 = vmatprep.subr.mxu0 %v10138_v33 }
 0x8ce   :  { %12326 = vmatpush3.msra.mxu0 %v10122_v58  ;;  %v8450_v33 = vadd.f32 %v8444_v0, %v8162_v13  ;;  %v8736_v39 = vadd.f32 %v8729_v26, %v8449_v8 }
 0x8cf   :  { %v9234_v61 = vpop.f32.mrf.mxu1 }
 0x8d0   :  { %v9310_v50 = vadd.f32 %v9234_v61, %v9022_v55  ;;  %v8737_v56 = vadd.f32 %v8731_v3, %v8450_v33  ;;  %v9024_v37 = vadd.f32 %v9017_v47, %v8736_v39 }
 0x8d1   :  { %v9236_v19 = vpop.f32.mrf.mxu1 }
 0x8d2   :  { %v9311_v52 = vadd.f32 %v9236_v19, %v9023_v2  ;;  %v9025_v45 = vadd.f32 %v9019_v41, %v8737_v56 }
 0x8ec   :  { %v9305_v15 = vpop.f32.mrf.mxu0 }
 0x8ed   :  { %v9312_v35 = vadd.f32 %v9305_v15, %v9024_v37 }
 0x8ee   :  { %v9307_v49 = vpop.f32.mrf.mxu0 }
 0x8ef   :  { %v9313_v14 = vadd.f32 %v9307_v49, %v9025_v45 }
 0x911   :  { %v9522_v30 = vpop.f32.mrf.mxu1 }
 0x912   :  { %v9598_v17 = vadd.f32 %v9522_v30, %v9310_v50 }
 0x913   :  { %v9524_v22 = vpop.f32.mrf.mxu1 }
 0x914   :  { %v9599_v11 = vadd.f32 %v9524_v22, %v9311_v52 }
 0x92e   :  { %v9593_v4 = vpop.f32.mrf.mxu0 }
 0x92f   :  { %v9600_v36 = vadd.f32 %v9593_v4, %v9312_v35 }
 0x930   :  { %v9595_v18 = vpop.f32.mrf.mxu0 }
 0x931   :  { %v9601_v20 = vadd.f32 %v9595_v18, %v9313_v14 }
 0x953   :  { %v9810_v5 = vpop.f32.mrf.mxu1 }
 0x954   :  { %v19720_v62 = vadd.f32 %v9810_v5, %v9598_v17 }
 0x955   :  { %v9812_v63 = vpop.f32.mrf.mxu1 }
 0x956   :  { %v9890_v60 = vsel %vm7175_vm3, %v19720_v62, 0.0  ;;  %v19724_v7 = vadd.f32 %v9812_v63, %v9599_v11 }
 0x957   :  { %v9891_v42 = vrot.slane %v9890_v60, 4 }
 0x958   :  { %v9897_v10 = vsel %vm7175_vm3, %v19724_v7, 0.0 }
 0x959   :  { %v9892_v12 = vadd.f32 %v9891_v42, %v9890_v60  ;;  %v9898_v40 = vrot.slane %v9897_v10, 4 }
 0x95b   :  { %v9893_v43 = vrot.slane %v9892_v12, 2  ;;  %v9899_v59 = vadd.f32 %v9898_v40, %v9897_v10 }
 0x95d   :  { %v9894_v16 = vadd.f32 %v9893_v43, %v9892_v12  ;;  %v9900_v44 = vrot.slane %v9899_v59, 2 }
 0x95f   :  { %v9901_v54 = vadd.f32 %v9900_v44, %v9899_v59  ;;  %v9895_v51 = vrot.slane %v9894_v16, 1 }
 0x961   :  { %v9902_v21 = vrot.slane %v9901_v54, 1  ;;  %v9896_v23 = vadd.f32 %v9895_v51, %v9894_v16 }
 0x963   :  { %v9903_v9 = vadd.f32 %v9902_v21, %v9901_v54  ;;  %v19732_v1 = vmul.f32 0.5, %v9896_v23 }
 0x965   :  { %v19730_v29 = vmul.f32 0.5, %v9903_v9  ;;  %v9922_v61 = vsub.f32 %v19720_v62, %v19732_v1 }
 0x967   :  { %v9923_v58 = vsub.f32 %v19724_v7, %v19730_v29  ;;  %v9926_v19 = vmul.f32 %v9922_v61, %v9922_v61 }
 0x969   :  { %v9927_v53 = vmul.f32 %v9923_v58, %v9923_v58  ;;  %v9930_v2 = vsel %vm7175_vm3, %v9926_v19, 0.0 }
 0x96a   :  { %v9931_v5 = vrot.slane %v9930_v2, 4 }
 0x96b   :  { %v9937_v30 = vsel %vm7175_vm3, %v9927_v53, 0.0 }
 0x96c   :  { %v9938_v22 = vrot.slane %v9937_v30, 4  ;;  %v9932_v26 = vadd.f32 %v9931_v5, %v9930_v2 }
 0x96e   :  { %v9939_v0 = vadd.f32 %v9938_v22, %v9937_v30  ;;  %v9933_v3 = vrot.slane %v9932_v26, 2 }
 0x96f   :  { %v9881_v57 = vpop.f32.mrf.mxu0 }
 0x970   :  { %v19738_v46 = vadd.f32 %v9881_v57, %v9600_v36  ;;  %v9940_v40 = vrot.slane %v9939_v0, 2  ;;  %v9934_v21 = vadd.f32 %v9933_v3, %v9932_v26  ;;  %v10017_v26 = vsub.s32 3, %v13619_v24 }
 0x971   :  { %v9883_v28 = vpop.f32.mrf.mxu0 }
 0x972   :  { %v9904_v55 = vsel %vm7175_vm3, %v19738_v46, 0.0  ;;  %v19743_v31 = vadd.f32 %v9883_v28, %v9601_v20  ;;  %v9941_v47 = vadd.f32 %v9940_v40, %v9939_v0  ;;  %v9935_v25 = vrot.slane %v9934_v21, 1  ;;  %v9962_v0 = vld [vmem:[%s19799_s17] sm:$0xf] }
 0x973   :  { %v9905_v50 = vrot.slane %v9904_v55, 4 }
 0x974   :  { %v9911_v6 = vsel %vm7175_vm3, %v19743_v31, 0.0  ;;  %v9942_v9 = vrot.slane %v9941_v47, 1  ;;  %v9936_v39 = vadd.f32 %v9935_v25, %v9934_v21 }
 0x975   :  { %v9906_v52 = vadd.f32 %v9905_v50, %v9904_v55  ;;  %v9912_v17 = vrot.slane %v9911_v6, 4 }
 0x976   :  { %v9943_v8 = vadd.f32 %v9942_v9, %v9941_v47  ;;  %v9958_v45 = vmul.f32 0.5, %v9936_v39 }
 0x977   :  { %v9907_v11 = vrot.slane %v9906_v52, 2  ;;  %v9913_v63 = vadd.f32 %v9912_v17, %v9911_v6 }
 0x978   :  { %v9959_v56 = vmul.f32 0.5, %v9943_v8  ;;  %v9963_v19 = vadd.f32 1e-05, %v9958_v45 }
 0x979   :  { %v9908_v60 = vadd.f32 %v9907_v11, %v9906_v52  ;;  %v9914_v42 = vrot.slane %v9913_v63, 2 }
 0x97a   :  { %v9964_v53 = vadd.f32 1e-05, %v9959_v56 }
 0x97b   :  { %v9909_v10 = vrot.slane %v9908_v60, 1  ;;  %v9915_v12 = vadd.f32 %v9914_v42, %v9913_v63  ;;  %v10013_v42 = vsub.s32 2, %v13619_v24 }
 0x97c   :  { %12932 = vrsqrt.f32 %v9964_v53 }
 0x97d   :  { %v9910_v43 = vadd.f32 %v9909_v10, %v9908_v60  ;;  %v9916_v59 = vrot.slane %v9915_v12, 1  ;;  %12934 = vrsqrt.f32 %v9963_v19 }
 0x97f   :  { %v9920_v16 = vmul.f32 0.5, %v9910_v43  ;;  %v9917_v44 = vadd.f32 %v9916_v59, %v9915_v12 }
 0x981   :  { %v9924_v54 = vsub.f32 %v19738_v46, %v9920_v16  ;;  %v9921_v51 = vmul.f32 0.5, %v9917_v44 }
 0x983   :  { %v9928_v41 = vmul.f32 %v9924_v54, %v9924_v54  ;;  %v9925_v27 = vsub.f32 %v19743_v31, %v9921_v51 }
 0x985   :  { %v9944_v15 = vsel %vm7175_vm3, %v9928_v41, 0.0  ;;  %v9929_v23 = vmul.f32 %v9925_v27, %v9925_v27 }
 0x986   :  { %v9945_v32 = vrot.slane %v9944_v15, 4 }
 0x987   :  { %v9951_v13 = vsel %vm7175_vm3, %v9929_v23, 0.0 }
 0x988   :  { %v9946_v49 = vadd.f32 %v9945_v32, %v9944_v15  ;;  %v9952_v33 = vrot.slane %v9951_v13, 4  ;;  %v10001_v15 = vld [vmem:[%s19800_s18] sm:$0xf] }
 0x989   :  { %v12933_v2 = vpop.eup %12932 }
 0x98a   :  { %v9947_v4 = vrot.slane %v9946_v49, 2  ;;  %v9953_v58 = vadd.f32 %v9952_v33, %v9951_v13  ;;  %v12935_v50 = vpop.eup %12934 }
 0x98b   :  { %v9975_v6 = vcombine.low %v12935_v50, %v12933_v2 }
 0x98c   :  { %v9948_v37 = vadd.f32 %v9947_v4, %v9946_v49  ;;  %v9954_v61 = vrot.slane %v9953_v58, 2 }
 0x98d   :  { %v9983_v5 = vrot.slane %v9975_v6, %v17501_v34 }
 0x98e   :  { %v9949_v35 = vrot.slane %v9948_v37, 1  ;;  %v9955_v18 = vadd.f32 %v9954_v61, %v9953_v58 }
 0x990   :  { %v9950_v14 = vadd.f32 %v9949_v35, %v9948_v37  ;;  %v9956_v36 = vrot.slane %v9955_v18, 1 }
 0x992   :  { %v9960_v57 = vmul.f32 0.5, %v9950_v14  ;;  %v9957_v20 = vadd.f32 %v9956_v36, %v9955_v18 }
 0x994   :  { %v9965_v30 = vadd.f32 1e-05, %v9960_v57  ;;  %v9961_v28 = vmul.f32 0.5, %v9957_v20 }
 0x996   :  { %v9966_v55 = vadd.f32 1e-05, %v9961_v28  ;;  %12936 = vrsqrt.f32 %v9965_v30 }
 0x998   :  { %12938 = vrsqrt.f32 %v9966_v55 }
 0x9a3   :  { %v12937_v22 = vpop.eup %12936 }
 0x9a5   :  { %v12939_v52 = vpop.eup %12938 }
 0x9a6   :  { %v9976_v17 = vcombine.low %v12937_v22, %v12939_v52 }
 0x9a8   :  { %v9990_v11 = vrot.slane %v9976_v17, %v17501_v34 }
 0x9aa   :  { %v9991_v63 = vcombine.low %v9983_v5, %v9990_v11 }
 0x9ac   :  { %v9998_v60 = vrot.slane %v9991_v63, %v17501_v34 }
 0x9ae   :  { %v10000_v10 = vmul.f32 %v9998_v60, %v9962_v0 }
 0x9b0   :  { %v10014_v12 = vrot.slane %v10000_v10, %v10013_v42  ;;  %v10018_v40 = vrot.slane %v10000_v10, %v10017_v26  ;;  %v10006_v43 = vrot.slane %v10000_v10, %v13713_v48  ;;  %v10010_v59 = vrot.slane %v10000_v10, %v17545_v38 }
 0x9b2   :  { %v10025_v3 = vmul.f32 %v10014_v12, %v9920_v16  ;;  %v10026_v44 = vmul.f32 %v10018_v40, %v9921_v51  ;;  %v10023_v47 = vmul.f32 %v10006_v43, %v19732_v1  ;;  %v10024_v54 = vmul.f32 %v10010_v59, %v19730_v29 }
 0x9b3   :  { %v10060_v16 = vmul.f32 %v10018_v40, %v19743_v31  ;;  %v10058_v1 = vmul.f32 %v10010_v59, %v19724_v7  ;;  %v10057_v29 = vmul.f32 %v10006_v43, %v19720_v62  ;;  %v10059_v51 = vmul.f32 %v10014_v12, %v19738_v46 }
 0x9b4   :  { %v10032_v21 = vcombine.low %v10025_v3, %v10026_v44  ;;  %v10031_v41 = vcombine.low %v10023_v47, %v10024_v54 }
 0x9b6   :  { %v10046_v27 = vrot.slane %v10032_v21, %v17501_v34  ;;  %v10039_v9 = vrot.slane %v10031_v41, %v17501_v34 }
 0x9b8   :  { %v10047_v24 = vcombine.low %v10039_v9, %v10046_v27 }
 0x9ba   :  { %v10054_v23 = vrot.slane %v10047_v24, %v17501_v34 }
 0x9bc   :  { %v10056_v25 = vsub.f32 %v10001_v15, %v10054_v23 }
 0x9be   :  { %v10069_v32 = vrot.slane %v10056_v25, %v17545_v38  ;;  %v10077_v13 = vrot.slane %v10056_v25, %v10017_v26  ;;  %v10065_v8 = vrot.slane %v10056_v25, %v13713_v48  ;;  %v10073_v49 = vrot.slane %v10056_v25, %v10013_v42  ;;  %v11882_v38 = vld [vmem:[%s19802_s20] ss:$0 sm:$0xff] }
 0x9c0   :  { %v10083_v33 = vadd.f32 %v10069_v32, %v10058_v1  ;;  %v10085_v39 = vadd.f32 %v10077_v13, %v10060_v16  ;;  %v10082_v4 = vadd.f32 %v10065_v8, %v10057_v29  ;;  %v10084_v58 = vadd.f32 %v10073_v49, %v10059_v51 }
 0x9c2   :  { %v10087_v34 = vmax.f32 %v10083_v33, 0.0  ;;  %v10089_v56 = vmax.f32 %v10085_v39, 0.0  ;;  %v10086_v37 = vmax.f32 %v10082_v4, 0.0  ;;  %v10088_v31 = vmax.f32 %v10084_v58, 0.0 }
 0x9c4   :  { %10225 = vmatprep.mubr.f32.mxu1 %v10087_v34  ;;  %10295 = vmatprep.mubr.f32.mxu0 %v10089_v56 }
 0x9c5   :  { %10226 = vmatmul.mubr.f32.vlgmr.msra.gmra.mxu1 %v10086_v37  ;;  %10296 = vmatmul.mubr.f32.vlgmr.msra.gmra.mxu0 %v10088_v31 }
 0xa85   :  { %v12292_v62 = vpop.f32.mrf.mxu1  ;;  %v12327_v7 = vpop.f32.mrf.mxu0 }
 0xa87   :  { %v12293_v48 = vpop.f32.mrf.mxu1  ;;  %v12328_v46 = vpop.f32.mrf.mxu0 }
 0xa88   :  { %v12294_v61 = vadd.f32 %v12293_v48, %v12292_v62  ;;  %v12329_v35 = vadd.f32 %v12328_v46, %v12327_v7 }
 0xa8a   :  { %v10228_v45 = vadd.f32 %v12294_v61, %v11882_v38 }
 0xa8c   :  { %v10298_v18 = vadd.f32 %v12329_v35, %v10228_v45 }
 0xa8e   :  { %10302 = vst.msk [vmem:[#allocation8] sm:$0x3] %vm10301_vm4, %v10298_v18 }
 0xa8f   :  { %12969 = shalt.err (!%p12966_p4)
}
 0xa90   :  { %10312 = dma.vmem_to_hbm [thread:$0]  %s10310_s22, 32, %s19803_s21, [#allocation9]  }
 0xa91   :  { %12978 = dma.done.wait [#allocation9], 32  }
 0xa92   :  { %12979 = vsyncadd [#allocation9], 4294967264 }
 0xa93   :  { %10316 = vsyncpa [#allocation9], 1 }

</bundles_post_ra>
